<compile_context>
chip_gen: v6e
topology: v6e:2x2x1
jax: 0.10.0
libtpu: 0.0.40
codegen_flags: <defaults>
</compile_context>

<pallas_src>
import functools

import jax
import jax.numpy as jnp
from jax.experimental import pallas as pl
from jax.experimental.pallas import tpu as pltpu

_LEAKY_SLOPE = 0.2
_IN_EPS = 1e-5          # nn.InstanceNorm2d default (affine=False, biased variance)
_LANE = 128
_ROW_TILE = 512         # grid-level output-row tile for the pure-GEMM (row-tiled) layers
_ACC_ELEMS = 32768      # per-chunk f32 accumulator budget (~128 KiB ~ half the vreg file)


def _round_up(x, m):
    return (x + m - 1) // m * m


@functools.lru_cache(maxsize=None)
def _vmem_limit():
    """Generation-aware limit: ~75% of physical VMEM (≈48 MiB v7x, ≈96 MiB v5e/v6e)."""
    try:
        cap = int(pltpu.get_tpu_info().vmem_capacity_bytes)
    except Exception:
        cap = 64 * 1024 * 1024
    return min(cap * 3 // 4, 112 * 1024 * 1024)


def _resident_spec(shape, index_map):
    """Constant-index-map operand (weights / bias): single-buffered to save VMEM."""
    try:
        return pl.BlockSpec(shape, index_map, pipeline_mode=pl.Buffered(1))
    except TypeError:   # older BlockSpec signature without pipeline_mode
        return pl.BlockSpec(shape, index_map)


# ----------------------------- Pallas kernel -----------------------------

def _fused_conv_kernel(x_ref, w_ref, b_ref, o_ref, *scratch,
                       kk, ws, wo, l, n_valid, mode, chunk_rows):
    """Implicit-GEMM stride-1 conv (kk x kk taps) + bias + epilogue for one block.

    x_ref: (1, Lin, kc)       bf16 flat-shifted input window (Lin >= l + max tap shift)
    w_ref: (kk*kk, kc, cpad)  bf16 weights; tap index g = dy*kk + dx
    b_ref: (1, cpad)          f32 bias (zero in padded lanes)
    o_ref: (1, l,  cpad)      bf16 output rows (full-width rows incl. junk cols), or
           (1, 1,  cpad)      f32 pooled output when mode == "pool"
    scratch: for mode == "norm_leaky": one (l, cpad) f32 VMEM buffer for pre-norm values.
    """
    cpad = w_ref.shape[-1]
    need_mask = (ws != wo)          # junk columns only exist for the flat full-width layout
    inv_n = 1.0 / float(n_valid)
    bias = b_ref[...]               # (1, cpad) f32, hoisted out of the chunk loop

    psum = jnp.zeros((1, cpad), jnp.float32)    # pool running sum
    ssum = jnp.zeros((1, cpad), jnp.float32)    # instance-norm running sum
    ssq = jnp.zeros((1, cpad), jnp.float32)     # instance-norm running sum of squares

    n_chunks = pl.cdiv(l, chunk_rows)
    for c in range(n_chunks):
        r0 = c * chunk_rows
        cl = min(chunk_rows, l - r0)
        # K-reduction over the kernel taps: each step is a lane-dense MXU matmul on a
        # contiguous flat-shifted bf16 window (implicit GEMM, no im2col, no per-tap casts).
        # The (cl, cpad) f32 accumulator is sized to stay in vregs.
        acc = jnp.zeros((cl, cpad), jnp.float32)
        for dy in range(kk):
            for dx in range(kk):
                s = r0 + dy * ws + dx                       # static offset
                xs = x_ref[0, s:s + cl, :]                  # (cl, kc) bf16
                acc = acc + jnp.dot(xs, w_ref[dy * kk + dx],
                                    preferred_element_type=jnp.float32)
        y = acc + bias                                      # f32 epilogue

        if mode == "leaky":
            y = jnp.where(y >= 0, y, _LEAKY_SLOPE * y)
            o_ref[0, r0:r0 + cl, :] = y.astype(o_ref.dtype)
            continue

        if need_mask:
            # Rows r with (r % ws) >= wo are junk columns from full-width flat accumulation.
            r = jax.lax.broadcasted_iota(jnp.int32, (cl, 1), 0) + r0
            ym = jnp.where((r % ws) < wo, y, 0.0)
        else:
            ym = y

        if mode == "pool":
            # Final Conv(Cout=1) fused with the global average pool:
            # mean over valid positions of (conv + bias).
            psum = psum + jnp.sum(ym, axis=0, keepdims=True)
        else:  # "norm_leaky": accumulate stats, stash pre-norm f32 values for pass 2.
            ssum = ssum + jnp.sum(ym, axis=0, keepdims=True)
            ssq = ssq + jnp.sum(ym * ym, axis=0, keepdims=True)
            scratch[0][r0:r0 + cl, :] = y

    if mode == "leaky":
        return

    if mode == "pool":
        o_ref[...] = (psum * inv_n)[None].astype(o_ref.dtype)
        return

    # InstanceNorm2d finalize (biased variance, eps, no affine), stats over valid positions
    # only, all in f32, per (batch, channel) — channel is the lane axis, no transposes.
    mean = ssum * inv_n
    var = jnp.maximum(ssq * inv_n - mean * mean, 0.0)
    inv_std = jax.lax.rsqrt(var + _IN_EPS)
    buf = scratch[0]
    for c in range(n_chunks):
        r0 = c * chunk_rows
        cl = min(chunk_rows, l - r0)
        y = (buf[r0:r0 + cl, :] - mean) * inv_std
        y = jnp.where(y >= 0, y, _LEAKY_SLOPE * y)          # LeakyReLU(0.2)
        o_ref[0, r0:r0 + cl, :] = y.astype(o_ref.dtype)


# ----------------------------- wrapper-side layer prep -----------------------------

def _prep_stride1(x):
    """k=4, s=1, p=1: pad (extra bottom margin keeps flat-shifted reads in bounds) + flatten."""
    bsz, h, w, c = x.shape
    ho, wo = h - 1, w - 1
    ws = w + 2
    xp = jnp.pad(x, ((0, 0), (1, 2), (1, 1), (0, 0)))
    return xp.reshape(bsz, (h + 3) * ws, c), 4, ws, ho, wo, c


def _prep_stride2_s2d(x):
    """k=4, s=2, p=1 (wide cin): space-to-depth(2) of padded input -> equivalent k=2 s=1 conv."""
    bsz, h, w, c = x.shape
    ho, wo = (h - 2) // 2 + 1, (w - 2) // 2 + 1
    pb = 2 * (ho + 2) - h - 1            # bottom pad: even height + one spare s2d row
    pw = 2 * (wo + 1) - w - 1            # right pad: even width
    xp = jnp.pad(x, ((0, 0), (1, pb), (1, pw), (0, 0)))
    hs, ws = ho + 2, wo + 1
    xs = xp.reshape(bsz, hs, 2, ws, 2, c)
    xs = xs.transpose(0, 1, 3, 2, 4, 5).reshape(bsz, hs * ws, 4 * c)
    return xs, 2, ws, ho, wo, 4 * c


def _prep_stride2_im2col(x):
    """k=4, s=2, p=1 (narrow cin): full im2col -> single dot with K = 16*cin, no junk cols."""
    bsz, h, w, c = x.shape
    ho, wo = h // 2, w // 2
    xp = jnp.pad(x, ((0, 0), (1, 1), (1, 1), (0, 0)))
    cols = [xp[:, dy:dy + 2 * ho:2, dx:dx + 2 * wo:2, :]
            for dy in range(4) for dx in range(4)]
    xi = jnp.concatenate(cols, axis=-1).reshape(bsz, ho * wo, 16 * c)
    return xi, 1, wo, ho, wo, 16 * c


def _weight_taps(wgt):
    kh, kw, cin, cout = wgt.shape
    return wgt.reshape(kh * kw * cin, cout)          # row = (kh*4 + kw)*cin + c


def _weight_s2d(wgt):
    _, _, cin, cout = wgt.shape
    w2 = wgt.reshape(2, 2, 2, 2, cin, cout)          # (a, p, b, q, c, n); kh=2a+p, kw=2b+q
    w2 = w2.transpose(0, 2, 1, 3, 4, 5)              # (a, b, p, q, c, n) matches s2d channels
    return w2.reshape(2 * 2 * 4 * cin, cout)


# ----------------------------- fused conv layer -----------------------------

def conv_layer(x, wgt, bias, *, stride, mode):
    """Fused Conv2d(4x4, pad=1) [+ InstanceNorm] [+ LeakyReLU] [+ global avg pool].

    x: (B, H, W, Cin) NHWC bf16.  Returns (B, Ho, Wo, Cout) bf16, or (B, 1) f32 for "pool".
    """
    bsz, h, w, cin = x.shape
    cout = wgt.shape[-1]

    if stride == 2:
        assert h % 2 == 0 and w % 2 == 0, "stride-2 layers expect even H/W (CycleGAN shapes)"
        if 16 * cin <= _LANE:
            x_flat, kk, ws, ho, wo, kc = _prep_stride2_im2col(x)   # fix kc-as-small-as-12
            w_flat = _weight_taps(wgt)
        else:
            x_flat, kk, ws, ho, wo, kc = _prep_stride2_s2d(x)
            w_flat = _weight_s2d(wgt)
    else:
        x_flat, kk, ws, ho, wo, kc = _prep_stride1(x)
        w_flat = _weight_taps(wgt)

    cpad = _round_up(cout, _LANE)                    # lane-dense MXU N / unmasked stores
    w_pad = jnp.pad(w_flat, ((0, 0), (0, cpad - cout)))
    w_pad = w_pad.reshape(kk * kk, kc, cpad).astype(jnp.bfloat16)
    b_pad = jnp.pad(bias, (0, cpad - cout)).reshape(1, cpad).astype(jnp.float32)
    x_flat = x_flat.astype(jnp.bfloat16)             # bf16 activations end-to-end
    chunk_rows = max(8, (_ACC_ELEMS // cpad) // 8 * 8)

    # Row tiling over the grid only for the pure-GEMM (kk==1) activation-only layers; the
    # norm/pool layers keep the whole (small, deep) map per grid step.
    row_tiled = (mode == "leaky" and kk == 1)

    if row_tiled:
        l = ho * wo
        tile = min(_ROW_TILE, _round_up(l, 8))
        l_pad = _round_up(l, tile)
        if l_pad != x_flat.shape[1]:
            x_flat = jnp.pad(x_flat, ((0, 0), (0, l_pad - x_flat.shape[1]), (0, 0)))
        grid = (bsz, l_pad // tile)
        in_specs = [
            pl.BlockSpec((1, tile, kc), lambda b, t: (b, t, 0)),
            _resident_spec((kk * kk, kc, cpad), lambda b, t: (0, 0, 0)),
            _resident_spec((1, cpad), lambda b, t: (0, 0)),
        ]
        out_shape = jax.ShapeDtypeStruct((bsz, l_pad, cpad), jnp.bfloat16)
        out_specs = pl.BlockSpec((1, tile, cpad), lambda b, t: (b, t, 0))
        scratch_shapes = []
        dims = ("parallel", "parallel")               # B=1 still keeps both v7x TCs busy
        kern_l, kern_ws = tile, wo
        total_rows = bsz * l_pad
    else:
        lout = ho * ws
        grid = (bsz,)
        in_specs = [
            pl.BlockSpec((1, x_flat.shape[1], kc), lambda i: (i, 0, 0)),
            _resident_spec((kk * kk, kc, cpad), lambda i: (0, 0, 0)),
            _resident_spec((1, cpad), lambda i: (0, 0)),
        ]
        if mode == "pool":
            out_shape = jax.ShapeDtypeStruct((bsz, 1, cpad), jnp.float32)
            out_specs = pl.BlockSpec((1, 1, cpad), lambda i: (i, 0, 0))
        else:
            out_shape = jax.ShapeDtypeStruct((bsz, lout, cpad), jnp.bfloat16)
            out_specs = pl.BlockSpec((1, lout, cpad), lambda i: (i, 0, 0))
        scratch_shapes = ([pltpu.VMEM((lout, cpad), jnp.float32)]
                          if mode == "norm_leaky" else [])
        dims = ("parallel",)
        kern_l, kern_ws = lout, ws
        total_rows = bsz * lout

    out_bytes = bsz * (cpad * 4 if mode == "pool" else out_shape.shape[1] * cpad * 2)
    cost = pl.CostEstimate(
        flops=2 * total_rows * kc * cpad * kk * kk,
        transcendentals=bsz * cpad if mode == "norm_leaky" else 0,
        bytes_accessed=x_flat.size * 2 + w_pad.size * 2 + b_pad.size * 4 + out_bytes,
    )

    kern = functools.partial(_fused_conv_kernel, kk=kk, ws=kern_ws, wo=wo,
                             l=kern_l, n_valid=ho * wo, mode=mode,
                             chunk_rows=chunk_rows)
    out = pl.pallas_call(
        kern,
        out_shape=out_shape,
        grid=grid,
        in_specs=in_specs,
        out_specs=out_specs,
        scratch_shapes=scratch_shapes,
        compiler_params=pltpu.CompilerParams(
            dimension_semantics=dims,
            vmem_limit_bytes=_vmem_limit(),
        ),
        cost_estimate=cost,
    )(x_flat, w_pad, b_pad)

    if mode == "pool":
        return out[:, 0, :1].astype(jnp.float32)                  # (B, 1) f32
    if row_tiled:
        return out[:, :ho * wo, :cout].reshape(bsz, ho, wo, cout)
    # Strip lane padding + junk columns (bf16 repack; fuses into the next layer's prep copy).
    return out.reshape(bsz, ho, ws, cpad)[:, :, :wo, :cout]


# ----------------------------- model definition -----------------------------

def make_discriminator_params(key, input_nc=3, output_nc=64, layer_n=3, mul_nc=2):
    """Deterministic init. layer specs: (cin, cout, stride, mode)."""
    specs = [(input_nc, output_nc, 2, "leaky")]
    cin = output_nc
    for i in range(layer_n):
        stride = 1 if i == layer_n - 1 else 2
        cout = cin * mul_nc
        specs.append((cin, cout, stride, "norm_leaky"))
        cin = cout
    specs.append((cin, 1, 1, "pool"))     # final conv, fused with the global average pool

    params = []
    for ci, co, _, _ in specs:
        key, k_w, k_b = jax.random.split(key, 3)
        w = jax.random.normal(k_w, (4, 4, ci, co), jnp.float32) * 0.05   # (kh, kw, cin, cout)
        b = jax.random.normal(k_b, (co,), jnp.float32) * 0.05
        params.append((w, b))
    return params, specs


def discriminator_forward(x_nchw, params, specs):
    # NCHW -> NHWC once; bf16 activations from here on (MXU-friendly, half the HBM traffic).
    x = jnp.transpose(x_nchw, (0, 2, 3, 1)).astype(jnp.bfloat16)
    for (w, b), (_, _, stride, mode) in zip(params, specs):
        x = conv_layer(x, w, b, stride=stride, mode=mode)
    return x                                                        # (B, 1) f32


# ----------------------------- main -----------------------------

if __name__ == "__main__":
    key = jax.random.PRNGKey(0)
    key_x, key_p = jax.random.split(key)

    # Small-but-consistent config: channels 3 -> 8 -> 16 -> 32 -> 64 -> 1,
    # spatial 64 -> 32 -> 16 -> 8 -> 7 -> 6 -> global avg pool -> (B, 1).
    # 64x64 input exercises the row-tiled grid path (layer 1: 2 row tiles of 512).
    B, C_in, H, W = 2, 3, 64, 64
    x = jax.random.normal(key_x, (B, C_in, H, W), jnp.float32)

    params, specs = make_discriminator_params(
        key_p, input_nc=C_in, output_nc=8, layer_n=3, mul_nc=2
    )

    fwd = jax.jit(functools.partial(discriminator_forward, specs=specs))
    out = jax.block_until_ready(fwd(x, params))

    assert out.shape == (B, 1), out.shape
    assert out.dtype == jnp.float32
    assert bool(jnp.all(jnp.isfinite(out)))
    print("KERNEL_OK")
</pallas_src>

<mosaic_0001>
module attributes {stable_mosaic.version = 11 : i64} {
  func.func @_fused_conv_kernel(%arg0: i32, %arg1: i32, %arg2: memref<1x512x48xbf16, #tpu.memory_space<vmem>>, %arg3: memref<1x48x128xbf16, #tpu.memory_space<vmem>>, %arg4: memref<1x128xf32, #tpu.memory_space<vmem>>, %arg5: memref<1x512x128xbf16, #tpu.memory_space<vmem>>) attributes {dimension_semantics = [#tpu.dimension_semantics<parallel>, #tpu.dimension_semantics<parallel>], iteration_bounds = array<i64: 2, 2>, scalar_prefetch = 0 : i64, scratch_operands = 0 : i64, tpu.core_type = #tpu.core_type<tc>, window_params = [{transform_indices = @transform_0, window_bounds = array<i64: 1, 512, 48>}, {pipeline_mode = #tpu.pipeline_mode<synchronous>, transform_indices = @transform_1, window_bounds = array<i64: 1, 48, 128>}, {pipeline_mode = #tpu.pipeline_mode<synchronous>, transform_indices = @transform_2, window_bounds = array<i64: 1, 128>}, {transform_indices = @transform_3, window_bounds = array<i64: 1, 512, 128>}]} {
    %c0 = arith.constant 0 : index
    %c0_0 = arith.constant 0 : index
    %0 = vector.load %arg4[%c0, %c0_0] : memref<1x128xf32, #tpu.memory_space<vmem>>, vector<1x128xf32>
    %cst = arith.constant 0.000000e+00 : f32
    %1 = vector.broadcast %cst : f32 to vector<256x128xf32>
    %c0_1 = arith.constant 0 : index
    %c0_2 = arith.constant 0 : index
    %c0_3 = arith.constant 0 : index
    %2 = vector.load %arg2[%c0_1, %c0_2, %c0_3] : memref<1x512x48xbf16, #tpu.memory_space<vmem>>, vector<1x256x48xbf16>
    %3 = vector.shape_cast %2 : vector<1x256x48xbf16> to vector<256x48xbf16>
    %c0_4 = arith.constant 0 : index
    %c0_5 = arith.constant 0 : index
    %c0_6 = arith.constant 0 : index
    %4 = vector.load %arg3[%c0_4, %c0_5, %c0_6] : memref<1x48x128xbf16, #tpu.memory_space<vmem>>, vector<1x48x128xbf16>
    %5 = vector.shape_cast %4 : vector<1x48x128xbf16> to vector<48x128xbf16>
    %cst_7 = arith.constant dense<0.000000e+00> : vector<256x128xf32>
    %6 = tpu.matmul %3, %5, %cst_7 {dimension_numbers = #tpu.dot_dimension_numbers<[1], [0], [0], [1], [0, 0, 1, 1], [], []>} : vector<256x48xbf16>, vector<48x128xbf16>, vector<256x128xf32> -> vector<256x128xf32>
    %7 = arith.addf %1, %6 : vector<256x128xf32>
    %8 = vector.broadcast %0 : vector<1x128xf32> to vector<256x128xf32>
    %9 = arith.addf %7, %8 : vector<256x128xf32>
    %cst_8 = arith.constant 0.000000e+00 : f32
    %10 = vector.broadcast %cst_8 : f32 to vector<256x128xf32>
    %11 = arith.cmpf oge, %9, %10 : vector<256x128xf32>
    %cst_9 = arith.constant 2.000000e-01 : f32
    %12 = vector.broadcast %cst_9 : f32 to vector<256x128xf32>
    %13 = arith.mulf %12, %9 : vector<256x128xf32>
    %14 = arith.select %11, %9, %13 : vector<256x128xi1>, vector<256x128xf32>
    %15 = arith.truncf %14 : vector<256x128xf32> to vector<256x128xbf16>
    %c0_10 = arith.constant 0 : index
    %c0_11 = arith.constant 0 : index
    %c0_12 = arith.constant 0 : index
    %16 = vector.load %arg5[%c0_10, %c0_11, %c0_12] : memref<1x512x128xbf16, #tpu.memory_space<vmem>>, vector<1x256x128xbf16>
    %17 = vector.shape_cast %16 : vector<1x256x128xbf16> to vector<256x128xbf16>
    %18 = vector.shape_cast %15 : vector<256x128xbf16> to vector<1x256x128xbf16>
    tpu.vector_store %arg5[%c0_10, %c0_11, %c0_12], %18 {strides = array<i32>} : memref<1x512x128xbf16, #tpu.memory_space<vmem>>, vector<1x256x128xbf16>,
    %cst_13 = arith.constant 0.000000e+00 : f32
    %19 = vector.broadcast %cst_13 : f32 to vector<256x128xf32>
    %c0_14 = arith.constant 0 : index
    %c256 = arith.constant 256 : index
    %c0_15 = arith.constant 0 : index
    %20 = vector.load %arg2[%c0_14, %c256, %c0_15] : memref<1x512x48xbf16, #tpu.memory_space<vmem>>, vector<1x256x48xbf16>
    %21 = vector.shape_cast %20 : vector<1x256x48xbf16> to vector<256x48xbf16>
    %c0_16 = arith.constant 0 : index
    %c0_17 = arith.constant 0 : index
    %c0_18 = arith.constant 0 : index
    %22 = vector.load %arg3[%c0_16, %c0_17, %c0_18] : memref<1x48x128xbf16, #tpu.memory_space<vmem>>, vector<1x48x128xbf16>
    %23 = vector.shape_cast %22 : vector<1x48x128xbf16> to vector<48x128xbf16>
    %cst_19 = arith.constant dense<0.000000e+00> : vector<256x128xf32>
    %24 = tpu.matmul %21, %23, %cst_19 {dimension_numbers = #tpu.dot_dimension_numbers<[1], [0], [0], [1], [0, 0, 1, 1], [], []>} : vector<256x48xbf16>, vector<48x128xbf16>, vector<256x128xf32> -> vector<256x128xf32>
    %25 = arith.addf %19, %24 : vector<256x128xf32>
    %26 = vector.broadcast %0 : vector<1x128xf32> to vector<256x128xf32>
    %27 = arith.addf %25, %26 : vector<256x128xf32>
    %cst_20 = arith.constant 0.000000e+00 : f32
    %28 = vector.broadcast %cst_20 : f32 to vector<256x128xf32>
    %29 = arith.cmpf oge, %27, %28 : vector<256x128xf32>
    %cst_21 = arith.constant 2.000000e-01 : f32
    %30 = vector.broadcast %cst_21 : f32 to vector<256x128xf32>
    %31 = arith.mulf %30, %27 : vector<256x128xf32>
    %32 = arith.select %29, %27, %31 : vector<256x128xi1>, vector<256x128xf32>
    %33 = arith.truncf %32 : vector<256x128xf32> to vector<256x128xbf16>
    %c0_22 = arith.constant 0 : index
    %c256_23 = arith.constant 256 : index
    %c0_24 = arith.constant 0 : index
    %34 = vector.load %arg5[%c0_22, %c256_23, %c0_24] : memref<1x512x128xbf16, #tpu.memory_space<vmem>>, vector<1x256x128xbf16>
    %35 = vector.shape_cast %34 : vector<1x256x128xbf16> to vector<256x128xbf16>
    %36 = vector.shape_cast %33 : vector<256x128xbf16> to vector<1x256x128xbf16>
    tpu.vector_store %arg5[%c0_22, %c256_23, %c0_24], %36 {strides = array<i32>} : memref<1x512x128xbf16, #tpu.memory_space<vmem>>, vector<1x256x128xbf16>,
    return
  }
  func.func @transform_0(%arg0: i32, %arg1: i32) -> (i32, i32, i32) {
    %c0_i32 = arith.constant 0 : i32
    %c0_i32_0 = arith.constant 0 : i32
    return %arg0, %arg1, %c0_i32 : i32, i32, i32
  }
  func.func @transform_1(%arg0: i32, %arg1: i32) -> (i32, i32, i32) {
    %c0_i32 = arith.constant 0 : i32
    %c0_i32_0 = arith.constant 0 : i32
    %c0_i32_1 = arith.constant 0 : i32
    %c0_i32_2 = arith.constant 0 : i32
    return %c0_i32, %c0_i32_0, %c0_i32_1 : i32, i32, i32
  }
  func.func @transform_2(%arg0: i32, %arg1: i32) -> (i32, i32) {
    %c0_i32 = arith.constant 0 : i32
    %c0_i32_0 = arith.constant 0 : i32
    %c0_i32_1 = arith.constant 0 : i32
    return %c0_i32, %c0_i32_0 : i32, i32
  }
  func.func @transform_3(%arg0: i32, %arg1: i32) -> (i32, i32, i32) {
    %c0_i32 = arith.constant 0 : i32
    %c0_i32_0 = arith.constant 0 : i32
    return %arg0, %arg1, %c0_i32 : i32, i32, i32
  }
}

module attributes {stable_mosaic.version = 11 : i64} {
  func.func @_fused_conv_kernel(%arg0: i32, %arg1: memref<1x256x128xbf16, #tpu.memory_space<vmem>>, %arg2: memref<1x128x128xbf16, #tpu.memory_space<vmem>>, %arg3: memref<1x128xf32, #tpu.memory_space<vmem>>, %arg4: memref<1x256x128xbf16, #tpu.memory_space<vmem>>, %arg5: memref<256x128xf32, #tpu.memory_space<vmem>>) attributes {dimension_semantics = [#tpu.dimension_semantics<parallel>], iteration_bounds = array<i64: 2>, scalar_prefetch = 0 : i64, scratch_operands = 1 : i64, tpu.core_type = #tpu.core_type<tc>, window_params = [{transform_indices = @transform_0, window_bounds = array<i64: 1, 256, 128>}, {pipeline_mode = #tpu.pipeline_mode<synchronous>, transform_indices = @transform_1, window_bounds = array<i64: 1, 128, 128>}, {pipeline_mode = #tpu.pipeline_mode<synchronous>, transform_indices = @transform_2, window_bounds = array<i64: 1, 128>}, {transform_indices = @transform_3, window_bounds = array<i64: 1, 256, 128>}]} {
    %c0 = arith.constant 0 : index
    %c0_0 = arith.constant 0 : index
    %0 = vector.load %arg3[%c0, %c0_0] : memref<1x128xf32, #tpu.memory_space<vmem>>, vector<1x128xf32>
    %cst = arith.constant 0.000000e+00 : f32
    %1 = vector.broadcast %cst : f32 to vector<1x128xf32>
    %cst_1 = arith.constant 0.000000e+00 : f32
    %2 = vector.broadcast %cst_1 : f32 to vector<1x128xf32>
    %cst_2 = arith.constant 0.000000e+00 : f32
    %3 = vector.broadcast %cst_2 : f32 to vector<256x128xf32>
    %c0_3 = arith.constant 0 : index
    %c0_4 = arith.constant 0 : index
    %c0_5 = arith.constant 0 : index
    %4 = vector.load %arg1[%c0_3, %c0_4, %c0_5] : memref<1x256x128xbf16, #tpu.memory_space<vmem>>, vector<1x256x128xbf16>
    %5 = vector.shape_cast %4 : vector<1x256x128xbf16> to vector<256x128xbf16>
    %c0_6 = arith.constant 0 : index
    %c0_7 = arith.constant 0 : index
    %c0_8 = arith.constant 0 : index
    %6 = vector.load %arg2[%c0_6, %c0_7, %c0_8] : memref<1x128x128xbf16, #tpu.memory_space<vmem>>, vector<1x128x128xbf16>
    %7 = vector.shape_cast %6 : vector<1x128x128xbf16> to vector<128x128xbf16>
    %cst_9 = arith.constant dense<0.000000e+00> : vector<256x128xf32>
    %8 = tpu.matmul %5, %7, %cst_9 {dimension_numbers = #tpu.dot_dimension_numbers<[1], [0], [0], [1], [0, 0, 1, 1], [], []>} : vector<256x128xbf16>, vector<128x128xbf16>, vector<256x128xf32> -> vector<256x128xf32>
    %9 = arith.addf %3, %8 : vector<256x128xf32>
    %10 = vector.broadcast %0 : vector<1x128xf32> to vector<256x128xf32>
    %11 = arith.addf %9, %10 : vector<256x128xf32>
    %cst_10 = arith.constant dense<0.000000e+00> : vector<128xf32>
    %12 = vector.multi_reduction <add>, %11, %cst_10 [0] : vector<256x128xf32> to vector<128xf32>
    %13 = vector.shape_cast %12 : vector<128xf32> to vector<1x128xf32>
    %14 = arith.addf %1, %13 : vector<1x128xf32>
    %15 = arith.mulf %11, %11 : vector<256x128xf32>
    %cst_11 = arith.constant dense<0.000000e+00> : vector<128xf32>
    %16 = vector.multi_reduction <add>, %15, %cst_11 [0] : vector<256x128xf32> to vector<128xf32>
    %17 = vector.shape_cast %16 : vector<128xf32> to vector<1x128xf32>
    %18 = arith.addf %2, %17 : vector<1x128xf32>
    %c0_12 = arith.constant 0 : index
    %c0_13 = arith.constant 0 : index
    %19 = vector.load %arg5[%c0_12, %c0_13] : memref<256x128xf32, #tpu.memory_space<vmem>>, vector<256x128xf32>
    tpu.vector_store %arg5[%c0_12, %c0_13], %11 {strides = array<i32>} : memref<256x128xf32, #tpu.memory_space<vmem>>, vector<256x128xf32>,
    %cst_14 = arith.constant 3.906250e-03 : f32
    %20 = vector.broadcast %cst_14 : f32 to vector<1x128xf32>
    %21 = arith.mulf %14, %20 : vector<1x128xf32>
    %cst_15 = arith.constant 3.906250e-03 : f32
    %22 = vector.broadcast %cst_15 : f32 to vector<1x128xf32>
    %23 = arith.mulf %18, %22 : vector<1x128xf32>
    %24 = arith.mulf %21, %21 : vector<1x128xf32>
    %25 = arith.subf %23, %24 : vector<1x128xf32>
    %cst_16 = arith.constant 0.000000e+00 : f32
    %26 = vector.broadcast %cst_16 : f32 to vector<1x128xf32>
    %27 = arith.maximumf %25, %26 : vector<1x128xf32>
    %cst_17 = arith.constant 9.99999974E-6 : f32
    %28 = vector.broadcast %cst_17 : f32 to vector<1x128xf32>
    %29 = arith.addf %27, %28 : vector<1x128xf32>
    %30 = math.rsqrt %29 : vector<1x128xf32>
    %c0_18 = arith.constant 0 : index
    %c0_19 = arith.constant 0 : index
    %31 = vector.load %arg5[%c0_18, %c0_19] : memref<256x128xf32, #tpu.memory_space<vmem>>, vector<256x128xf32>
    %32 = vector.broadcast %21 : vector<1x128xf32> to vector<256x128xf32>
    %33 = arith.subf %31, %32 : vector<256x128xf32>
    %34 = vector.broadcast %30 : vector<1x128xf32> to vector<256x128xf32>
    %35 = arith.mulf %33, %34 : vector<256x128xf32>
    %cst_20 = arith.constant 0.000000e+00 : f32
    %36 = vector.broadcast %cst_20 : f32 to vector<256x128xf32>
    %37 = arith.cmpf oge, %35, %36 : vector<256x128xf32>
    %cst_21 = arith.constant 2.000000e-01 : f32
    %38 = vector.broadcast %cst_21 : f32 to vector<256x128xf32>
    %39 = arith.mulf %38, %35 : vector<256x128xf32>
    %40 = arith.select %37, %35, %39 : vector<256x128xi1>, vector<256x128xf32>
    %41 = arith.truncf %40 : vector<256x128xf32> to vector<256x128xbf16>
    %c0_22 = arith.constant 0 : index
    %c0_23 = arith.constant 0 : index
    %c0_24 = arith.constant 0 : index
    %42 = vector.load %arg4[%c0_22, %c0_23, %c0_24] : memref<1x256x128xbf16, #tpu.memory_space<vmem>>, vector<1x256x128xbf16>
    %43 = vector.shape_cast %42 : vector<1x256x128xbf16> to vector<256x128xbf16>
    %44 = vector.shape_cast %41 : vector<256x128xbf16> to vector<1x256x128xbf16>
    tpu.vector_store %arg4[%c0_22, %c0_23, %c0_24], %44 {strides = array<i32>} : memref<1x256x128xbf16, #tpu.memory_space<vmem>>, vector<1x256x128xbf16>,
    return
  }
  func.func @transform_0(%arg0: i32) -> (i32, i32, i32) {
    %c0_i32 = arith.constant 0 : i32
    %c0_i32_0 = arith.constant 0 : i32
    %c0_i32_1 = arith.constant 0 : i32
    return %arg0, %c0_i32, %c0_i32_0 : i32, i32, i32
  }
  func.func @transform_1(%arg0: i32) -> (i32, i32, i32) {
    %c0_i32 = arith.constant 0 : i32
    %c0_i32_0 = arith.constant 0 : i32
    %c0_i32_1 = arith.constant 0 : i32
    %c0_i32_2 = arith.constant 0 : i32
    return %c0_i32, %c0_i32_0, %c0_i32_1 : i32, i32, i32
  }
  func.func @transform_2(%arg0: i32) -> (i32, i32) {
    %c0_i32 = arith.constant 0 : i32
    %c0_i32_0 = arith.constant 0 : i32
    %c0_i32_1 = arith.constant 0 : i32
    return %c0_i32, %c0_i32_0 : i32, i32
  }
  func.func @transform_3(%arg0: i32) -> (i32, i32, i32) {
    %c0_i32 = arith.constant 0 : i32
    %c0_i32_0 = arith.constant 0 : i32
    %c0_i32_1 = arith.constant 0 : i32
    return %arg0, %c0_i32, %c0_i32_0 : i32, i32, i32
  }
}

module attributes {stable_mosaic.version = 11 : i64} {
  func.func @_fused_conv_kernel(%arg0: i32, %arg1: memref<1x90x64xbf16, #tpu.memory_space<vmem>>, %arg2: memref<4x64x128xbf16, #tpu.memory_space<vmem>>, %arg3: memref<1x128xf32, #tpu.memory_space<vmem>>, %arg4: memref<1x72x128xbf16, #tpu.memory_space<vmem>>, %arg5: memref<72x128xf32, #tpu.memory_space<vmem>>) attributes {dimension_semantics = [#tpu.dimension_semantics<parallel>], iteration_bounds = array<i64: 2>, scalar_prefetch = 0 : i64, scratch_operands = 1 : i64, tpu.core_type = #tpu.core_type<tc>, window_params = [{transform_indices = @transform_0, window_bounds = array<i64: 1, 90, 64>}, {pipeline_mode = #tpu.pipeline_mode<synchronous>, transform_indices = @transform_1, window_bounds = array<i64: 4, 64, 128>}, {pipeline_mode = #tpu.pipeline_mode<synchronous>, transform_indices = @transform_2, window_bounds = array<i64: 1, 128>}, {transform_indices = @transform_3, window_bounds = array<i64: 1, 72, 128>}]} {
    %c0 = arith.constant 0 : index
    %c0_0 = arith.constant 0 : index
    %0 = vector.load %arg3[%c0, %c0_0] : memref<1x128xf32, #tpu.memory_space<vmem>>, vector<1x128xf32>
    %cst = arith.constant 0.000000e+00 : f32
    %1 = vector.broadcast %cst : f32 to vector<1x128xf32>
    %cst_1 = arith.constant 0.000000e+00 : f32
    %2 = vector.broadcast %cst_1 : f32 to vector<1x128xf32>
    %cst_2 = arith.constant 0.000000e+00 : f32
    %3 = vector.broadcast %cst_2 : f32 to vector<72x128xf32>
    %c0_3 = arith.constant 0 : index
    %c0_4 = arith.constant 0 : index
    %c0_5 = arith.constant 0 : index
    %4 = vector.load %arg1[%c0_3, %c0_4, %c0_5] : memref<1x90x64xbf16, #tpu.memory_space<vmem>>, vector<1x72x64xbf16>
    %5 = vector.shape_cast %4 : vector<1x72x64xbf16> to vector<72x64xbf16>
    %c0_6 = arith.constant 0 : index
    %c0_7 = arith.constant 0 : index
    %c0_8 = arith.constant 0 : index
    %6 = vector.load %arg2[%c0_6, %c0_7, %c0_8] : memref<4x64x128xbf16, #tpu.memory_space<vmem>>, vector<1x64x128xbf16>
    %7 = vector.shape_cast %6 : vector<1x64x128xbf16> to vector<64x128xbf16>
    %cst_9 = arith.constant dense<0.000000e+00> : vector<72x128xf32>
    %8 = tpu.matmul %5, %7, %cst_9 {dimension_numbers = #tpu.dot_dimension_numbers<[1], [0], [0], [1], [0, 0, 1, 1], [], []>} : vector<72x64xbf16>, vector<64x128xbf16>, vector<72x128xf32> -> vector<72x128xf32>
    %9 = arith.addf %3, %8 : vector<72x128xf32>
    %c0_10 = arith.constant 0 : index
    %c1 = arith.constant 1 : index
    %c0_11 = arith.constant 0 : index
    %10 = vector.load %arg1[%c0_10, %c1, %c0_11] : memref<1x90x64xbf16, #tpu.memory_space<vmem>>, vector<1x72x64xbf16>
    %11 = vector.shape_cast %10 : vector<1x72x64xbf16> to vector<72x64xbf16>
    %c1_12 = arith.constant 1 : index
    %c0_13 = arith.constant 0 : index
    %c0_14 = arith.constant 0 : index
    %12 = vector.load %arg2[%c1_12, %c0_13, %c0_14] : memref<4x64x128xbf16, #tpu.memory_space<vmem>>, vector<1x64x128xbf16>
    %13 = vector.shape_cast %12 : vector<1x64x128xbf16> to vector<64x128xbf16>
    %cst_15 = arith.constant dense<0.000000e+00> : vector<72x128xf32>
    %14 = tpu.matmul %11, %13, %cst_15 {dimension_numbers = #tpu.dot_dimension_numbers<[1], [0], [0], [1], [0, 0, 1, 1], [], []>} : vector<72x64xbf16>, vector<64x128xbf16>, vector<72x128xf32> -> vector<72x128xf32>
    %15 = arith.addf %9, %14 : vector<72x128xf32>
    %c0_16 = arith.constant 0 : index
    %c9 = arith.constant 9 : index
    %c0_17 = arith.constant 0 : index
    %16 = vector.load %arg1[%c0_16, %c9, %c0_17] : memref<1x90x64xbf16, #tpu.memory_space<vmem>>, vector<1x72x64xbf16>
    %17 = vector.shape_cast %16 : vector<1x72x64xbf16> to vector<72x64xbf16>
    %c2 = arith.constant 2 : index
    %c0_18 = arith.constant 0 : index
    %c0_19 = arith.constant 0 : index
    %18 = vector.load %arg2[%c2, %c0_18, %c0_19] : memref<4x64x128xbf16, #tpu.memory_space<vmem>>, vector<1x64x128xbf16>
    %19 = vector.shape_cast %18 : vector<1x64x128xbf16> to vector<64x128xbf16>
    %cst_20 = arith.constant dense<0.000000e+00> : vector<72x128xf32>
    %20 = tpu.matmul %17, %19, %cst_20 {dimension_numbers = #tpu.dot_dimension_numbers<[1], [0], [0], [1], [0, 0, 1, 1], [], []>} : vector<72x64xbf16>, vector<64x128xbf16>, vector<72x128xf32> -> vector<72x128xf32>
    %21 = arith.addf %15, %20 : vector<72x128xf32>
    %c0_21 = arith.constant 0 : index
    %c10 = arith.constant 10 : index
    %c0_22 = arith.constant 0 : index
    %22 = vector.load %arg1[%c0_21, %c10, %c0_22] : memref<1x90x64xbf16, #tpu.memory_space<vmem>>, vector<1x72x64xbf16>
    %23 = vector.shape_cast %22 : vector<1x72x64xbf16> to vector<72x64xbf16>
    %c3 = arith.constant 3 : index
    %c0_23 = arith.constant 0 : index
    %c0_24 = arith.constant 0 : index
    %24 = vector.load %arg2[%c3, %c0_23, %c0_24] : memref<4x64x128xbf16, #tpu.memory_space<vmem>>, vector<1x64x128xbf16>
    %25 = vector.shape_cast %24 : vector<1x64x128xbf16> to vector<64x128xbf16>
    %cst_25 = arith.constant dense<0.000000e+00> : vector<72x128xf32>
    %26 = tpu.matmul %23, %25, %cst_25 {dimension_numbers = #tpu.dot_dimension_numbers<[1], [0], [0], [1], [0, 0, 1, 1], [], []>} : vector<72x64xbf16>, vector<64x128xbf16>, vector<72x128xf32> -> vector<72x128xf32>
    %27 = arith.addf %21, %26 : vector<72x128xf32>
    %28 = vector.broadcast %0 : vector<1x128xf32> to vector<72x128xf32>
    %29 = arith.addf %27, %28 : vector<72x128xf32>
    %30 = tpu.iota {dimensions = array<i32: 0>} : vector<72x1xi32>
    %c0_i32 = arith.constant 0 : i32
    %31 = vector.broadcast %c0_i32 : i32 to vector<72x1xi32>
    %32 = arith.addi %30, %31 : vector<72x1xi32>
    %c9_i32 = arith.constant 9 : i32
    %c0_i32_26 = arith.constant 0 : i32
    %33 = arith.cmpi eq, %c9_i32, %c0_i32_26 : i32
    %c1_i32 = arith.constant 1 : i32
    %34 = arith.select %33, %c1_i32, %c9_i32 : i32
    %35 = vector.broadcast %34 : i32 to vector<72x1xi32>
    %36 = arith.remsi %32, %35 : vector<72x1xi32>
    %c0_i32_27 = arith.constant 0 : i32
    %37 = vector.broadcast %c0_i32_27 : i32 to vector<72x1xi32>
    %38 = arith.cmpi ne, %36, %37 : vector<72x1xi32>
    %c0_i32_28 = arith.constant 0 : i32
    %39 = vector.broadcast %c0_i32_28 : i32 to vector<72x1xi32>
    %40 = arith.cmpi slt, %36, %39 : vector<72x1xi32>
    %c0_i32_29 = arith.constant 0 : i32
    %41 = arith.cmpi slt, %34, %c0_i32_29 : i32
    %42 = vector.broadcast %41 : i1 to vector<72x1xi1>
    %43 = vector.broadcast %42 : vector<72x1xi1> to vector<72x1xi1>
    %44 = arith.xori %40, %43 : vector<72x1xi1>
    %45 = arith.andi %44, %38 : vector<72x1xi1>
    %46 = vector.broadcast %34 : i32 to vector<72x1xi32>
    %47 = arith.addi %36, %46 : vector<72x1xi32>
    %48 = arith.select %45, %47, %36 : vector<72x1xi1>, vector<72x1xi32>
    %c8_i32 = arith.constant 8 : i32
    %49 = vector.broadcast %c8_i32 : i32 to vector<72x1xi32>
    %50 = arith.cmpi slt, %48, %49 : vector<72x1xi32>
    %cst_30 = arith.constant 0.000000e+00 : f32
    %51 = vector.shape_cast %50 : vector<72x1xi1> to vector<72x1xi1>
    %52 = vector.broadcast %51 : vector<72x1xi1> to vector<72x128xi1>
    %53 = vector.broadcast %cst_30 : f32 to vector<72x128xf32>
    %54 = arith.select %52, %29, %53 : vector<72x128xi1>, vector<72x128xf32>
    %cst_31 = arith.constant dense<0.000000e+00> : vector<128xf32>
    %55 = vector.multi_reduction <add>, %54, %cst_31 [0] : vector<72x128xf32> to vector<128xf32>
    %56 = vector.shape_cast %55 : vector<128xf32> to vector<1x128xf32>
    %57 = arith.addf %1, %56 : vector<1x128xf32>
    %58 = arith.mulf %54, %54 : vector<72x128xf32>
    %cst_32 = arith.constant dense<0.000000e+00> : vector<128xf32>
    %59 = vector.multi_reduction <add>, %58, %cst_32 [0] : vector<72x128xf32> to vector<128xf32>
    %60 = vector.shape_cast %59 : vector<128xf32> to vector<1x128xf32>
    %61 = arith.addf %2, %60 : vector<1x128xf32>
    %c0_33 = arith.constant 0 : index
    %c0_34 = arith.constant 0 : index
    %62 = vector.load %arg5[%c0_33, %c0_34] : memref<72x128xf32, #tpu.memory_space<vmem>>, vector<72x128xf32>
    tpu.vector_store %arg5[%c0_33, %c0_34], %29 {strides = array<i32>} : memref<72x128xf32, #tpu.memory_space<vmem>>, vector<72x128xf32>,
    %cst_35 = arith.constant 1.562500e-02 : f32
    %63 = vector.broadcast %cst_35 : f32 to vector<1x128xf32>
    %64 = arith.mulf %57, %63 : vector<1x128xf32>
    %cst_36 = arith.constant 1.562500e-02 : f32
    %65 = vector.broadcast %cst_36 : f32 to vector<1x128xf32>
    %66 = arith.mulf %61, %65 : vector<1x128xf32>
    %67 = arith.mulf %64, %64 : vector<1x128xf32>
    %68 = arith.subf %66, %67 : vector<1x128xf32>
    %cst_37 = arith.constant 0.000000e+00 : f32
    %69 = vector.broadcast %cst_37 : f32 to vector<1x128xf32>
    %70 = arith.maximumf %68, %69 : vector<1x128xf32>
    %cst_38 = arith.constant 9.99999974E-6 : f32
    %71 = vector.broadcast %cst_38 : f32 to vector<1x128xf32>
    %72 = arith.addf %70, %71 : vector<1x128xf32>
    %73 = math.rsqrt %72 : vector<1x128xf32>
    %c0_39 = arith.constant 0 : index
    %c0_40 = arith.constant 0 : index
    %74 = vector.load %arg5[%c0_39, %c0_40] : memref<72x128xf32, #tpu.memory_space<vmem>>, vector<72x128xf32>
    %75 = vector.broadcast %64 : vector<1x128xf32> to vector<72x128xf32>
    %76 = arith.subf %74, %75 : vector<72x128xf32>
    %77 = vector.broadcast %73 : vector<1x128xf32> to vector<72x128xf32>
    %78 = arith.mulf %76, %77 : vector<72x128xf32>
    %cst_41 = arith.constant 0.000000e+00 : f32
    %79 = vector.broadcast %cst_41 : f32 to vector<72x128xf32>
    %80 = arith.cmpf oge, %78, %79 : vector<72x128xf32>
    %cst_42 = arith.constant 2.000000e-01 : f32
    %81 = vector.broadcast %cst_42 : f32 to vector<72x128xf32>
    %82 = arith.mulf %81, %78 : vector<72x128xf32>
    %83 = arith.select %80, %78, %82 : vector<72x128xi1>, vector<72x128xf32>
    %84 = arith.truncf %83 : vector<72x128xf32> to vector<72x128xbf16>
    %c0_43 = arith.constant 0 : index
    %c0_44 = arith.constant 0 : index
    %c0_45 = arith.constant 0 : index
    %85 = vector.load %arg4[%c0_43, %c0_44, %c0_45] : memref<1x72x128xbf16, #tpu.memory_space<vmem>>, vector<1x72x128xbf16>
    %86 = vector.shape_cast %85 : vector<1x72x128xbf16> to vector<72x128xbf16>
    %87 = vector.shape_cast %84 : vector<72x128xbf16> to vector<1x72x128xbf16>
    tpu.vector_store %arg4[%c0_43, %c0_44, %c0_45], %87 {strides = array<i32>} : memref<1x72x128xbf16, #tpu.memory_space<vmem>>, vector<1x72x128xbf16>,
    return
  }
  func.func @transform_0(%arg0: i32) -> (i32, i32, i32) {
    %c0_i32 = arith.constant 0 : i32
    %c0_i32_0 = arith.constant 0 : i32
    %c0_i32_1 = arith.constant 0 : i32
    return %arg0, %c0_i32, %c0_i32_0 : i32, i32, i32
  }
  func.func @transform_1(%arg0: i32) -> (i32, i32, i32) {
    %c0_i32 = arith.constant 0 : i32
    %c0_i32_0 = arith.constant 0 : i32
    %c0_i32_1 = arith.constant 0 : i32
    %c0_i32_2 = arith.constant 0 : i32
    return %c0_i32, %c0_i32_0, %c0_i32_1 : i32, i32, i32
  }
  func.func @transform_2(%arg0: i32) -> (i32, i32) {
    %c0_i32 = arith.constant 0 : i32
    %c0_i32_0 = arith.constant 0 : i32
    %c0_i32_1 = arith.constant 0 : i32
    return %c0_i32, %c0_i32_0 : i32, i32
  }
  func.func @transform_3(%arg0: i32) -> (i32, i32, i32) {
    %c0_i32 = arith.constant 0 : i32
    %c0_i32_0 = arith.constant 0 : i32
    %c0_i32_1 = arith.constant 0 : i32
    return %arg0, %c0_i32, %c0_i32_0 : i32, i32, i32
  }
}

module attributes {stable_mosaic.version = 11 : i64} {
  func.func @_fused_conv_kernel(%arg0: i32, %arg1: memref<1x110x32xbf16, #tpu.memory_space<vmem>>, %arg2: memref<16x32x128xbf16, #tpu.memory_space<vmem>>, %arg3: memref<1x128xf32, #tpu.memory_space<vmem>>, %arg4: memref<1x70x128xbf16, #tpu.memory_space<vmem>>, %arg5: memref<70x128xf32, #tpu.memory_space<vmem>>) attributes {dimension_semantics = [#tpu.dimension_semantics<parallel>], iteration_bounds = array<i64: 2>, scalar_prefetch = 0 : i64, scratch_operands = 1 : i64, tpu.core_type = #tpu.core_type<tc>, window_params = [{transform_indices = @transform_0, window_bounds = array<i64: 1, 110, 32>}, {pipeline_mode = #tpu.pipeline_mode<synchronous>, transform_indices = @transform_1, window_bounds = array<i64: 16, 32, 128>}, {pipeline_mode = #tpu.pipeline_mode<synchronous>, transform_indices = @transform_2, window_bounds = array<i64: 1, 128>}, {transform_indices = @transform_3, window_bounds = array<i64: 1, 70, 128>}]} {
    %c0 = arith.constant 0 : index
    %c0_0 = arith.constant 0 : index
    %0 = vector.load %arg3[%c0, %c0_0] : memref<1x128xf32, #tpu.memory_space<vmem>>, vector<1x128xf32>
    %cst = arith.constant 0.000000e+00 : f32
    %1 = vector.broadcast %cst : f32 to vector<1x128xf32>
    %cst_1 = arith.constant 0.000000e+00 : f32
    %2 = vector.broadcast %cst_1 : f32 to vector<1x128xf32>
    %cst_2 = arith.constant 0.000000e+00 : f32
    %3 = vector.broadcast %cst_2 : f32 to vector<70x128xf32>
    %c0_3 = arith.constant 0 : index
    %c0_4 = arith.constant 0 : index
    %c0_5 = arith.constant 0 : index
    %4 = vector.load %arg1[%c0_3, %c0_4, %c0_5] : memref<1x110x32xbf16, #tpu.memory_space<vmem>>, vector<1x70x32xbf16>
    %5 = vector.shape_cast %4 : vector<1x70x32xbf16> to vector<70x32xbf16>
    %c0_6 = arith.constant 0 : index
    %c0_7 = arith.constant 0 : index
    %c0_8 = arith.constant 0 : index
    %6 = vector.load %arg2[%c0_6, %c0_7, %c0_8] : memref<16x32x128xbf16, #tpu.memory_space<vmem>>, vector<1x32x128xbf16>
    %7 = vector.shape_cast %6 : vector<1x32x128xbf16> to vector<32x128xbf16>
    %cst_9 = arith.constant dense<0.000000e+00> : vector<70x128xf32>
    %8 = tpu.matmul %5, %7, %cst_9 {dimension_numbers = #tpu.dot_dimension_numbers<[1], [0], [0], [1], [0, 0, 1, 1], [], []>} : vector<70x32xbf16>, vector<32x128xbf16>, vector<70x128xf32> -> vector<70x128xf32>
    %9 = arith.addf %3, %8 : vector<70x128xf32>
    %c0_10 = arith.constant 0 : index
    %c1 = arith.constant 1 : index
    %c0_11 = arith.constant 0 : index
    %10 = vector.load %arg1[%c0_10, %c1, %c0_11] : memref<1x110x32xbf16, #tpu.memory_space<vmem>>, vector<1x70x32xbf16>
    %11 = vector.shape_cast %10 : vector<1x70x32xbf16> to vector<70x32xbf16>
    %c1_12 = arith.constant 1 : index
    %c0_13 = arith.constant 0 : index
    %c0_14 = arith.constant 0 : index
    %12 = vector.load %arg2[%c1_12, %c0_13, %c0_14] : memref<16x32x128xbf16, #tpu.memory_space<vmem>>, vector<1x32x128xbf16>
    %13 = vector.shape_cast %12 : vector<1x32x128xbf16> to vector<32x128xbf16>
    %cst_15 = arith.constant dense<0.000000e+00> : vector<70x128xf32>
    %14 = tpu.matmul %11, %13, %cst_15 {dimension_numbers = #tpu.dot_dimension_numbers<[1], [0], [0], [1], [0, 0, 1, 1], [], []>} : vector<70x32xbf16>, vector<32x128xbf16>, vector<70x128xf32> -> vector<70x128xf32>
    %15 = arith.addf %9, %14 : vector<70x128xf32>
    %c0_16 = arith.constant 0 : index
    %c2 = arith.constant 2 : index
    %c0_17 = arith.constant 0 : index
    %16 = vector.load %arg1[%c0_16, %c2, %c0_17] : memref<1x110x32xbf16, #tpu.memory_space<vmem>>, vector<1x70x32xbf16>
    %17 = vector.shape_cast %16 : vector<1x70x32xbf16> to vector<70x32xbf16>
    %c2_18 = arith.constant 2 : index
    %c0_19 = arith.constant 0 : index
    %c0_20 = arith.constant 0 : index
    %18 = vector.load %arg2[%c2_18, %c0_19, %c0_20] : memref<16x32x128xbf16, #tpu.memory_space<vmem>>, vector<1x32x128xbf16>
    %19 = vector.shape_cast %18 : vector<1x32x128xbf16> to vector<32x128xbf16>
    %cst_21 = arith.constant dense<0.000000e+00> : vector<70x128xf32>
    %20 = tpu.matmul %17, %19, %cst_21 {dimension_numbers = #tpu.dot_dimension_numbers<[1], [0], [0], [1], [0, 0, 1, 1], [], []>} : vector<70x32xbf16>, vector<32x128xbf16>, vector<70x128xf32> -> vector<70x128xf32>
    %21 = arith.addf %15, %20 : vector<70x128xf32>
    %c0_22 = arith.constant 0 : index
    %c3 = arith.constant 3 : index
    %c0_23 = arith.constant 0 : index
    %22 = vector.load %arg1[%c0_22, %c3, %c0_23] : memref<1x110x32xbf16, #tpu.memory_space<vmem>>, vector<1x70x32xbf16>
    %23 = vector.shape_cast %22 : vector<1x70x32xbf16> to vector<70x32xbf16>
    %c3_24 = arith.constant 3 : index
    %c0_25 = arith.constant 0 : index
    %c0_26 = arith.constant 0 : index
    %24 = vector.load %arg2[%c3_24, %c0_25, %c0_26] : memref<16x32x128xbf16, #tpu.memory_space<vmem>>, vector<1x32x128xbf16>
    %25 = vector.shape_cast %24 : vector<1x32x128xbf16> to vector<32x128xbf16>
    %cst_27 = arith.constant dense<0.000000e+00> : vector<70x128xf32>
    %26 = tpu.matmul %23, %25, %cst_27 {dimension_numbers = #tpu.dot_dimension_numbers<[1], [0], [0], [1], [0, 0, 1, 1], [], []>} : vector<70x32xbf16>, vector<32x128xbf16>, vector<70x128xf32> -> vector<70x128xf32>
    %27 = arith.addf %21, %26 : vector<70x128xf32>
    %c0_28 = arith.constant 0 : index
    %c10 = arith.constant 10 : index
    %c0_29 = arith.constant 0 : index
    %28 = vector.load %arg1[%c0_28, %c10, %c0_29] : memref<1x110x32xbf16, #tpu.memory_space<vmem>>, vector<1x70x32xbf16>
    %29 = vector.shape_cast %28 : vector<1x70x32xbf16> to vector<70x32xbf16>
    %c4 = arith.constant 4 : index
    %c0_30 = arith.constant 0 : index
    %c0_31 = arith.constant 0 : index
    %30 = vector.load %arg2[%c4, %c0_30, %c0_31] : memref<16x32x128xbf16, #tpu.memory_space<vmem>>, vector<1x32x128xbf16>
    %31 = vector.shape_cast %30 : vector<1x32x128xbf16> to vector<32x128xbf16>
    %cst_32 = arith.constant dense<0.000000e+00> : vector<70x128xf32>
    %32 = tpu.matmul %29, %31, %cst_32 {dimension_numbers = #tpu.dot_dimension_numbers<[1], [0], [0], [1], [0, 0, 1, 1], [], []>} : vector<70x32xbf16>, vector<32x128xbf16>, vector<70x128xf32> -> vector<70x128xf32>
    %33 = arith.addf %27, %32 : vector<70x128xf32>
    %c0_33 = arith.constant 0 : index
    %c11 = arith.constant 11 : index
    %c0_34 = arith.constant 0 : index
    %34 = vector.load %arg1[%c0_33, %c11, %c0_34] : memref<1x110x32xbf16, #tpu.memory_space<vmem>>, vector<1x70x32xbf16>
    %35 = vector.shape_cast %34 : vector<1x70x32xbf16> to vector<70x32xbf16>
    %c5 = arith.constant 5 : index
    %c0_35 = arith.constant 0 : index
    %c0_36 = arith.constant 0 : index
    %36 = vector.load %arg2[%c5, %c0_35, %c0_36] : memref<16x32x128xbf16, #tpu.memory_space<vmem>>, vector<1x32x128xbf16>
    %37 = vector.shape_cast %36 : vector<1x32x128xbf16> to vector<32x128xbf16>
    %cst_37 = arith.constant dense<0.000000e+00> : vector<70x128xf32>
    %38 = tpu.matmul %35, %37, %cst_37 {dimension_numbers = #tpu.dot_dimension_numbers<[1], [0], [0], [1], [0, 0, 1, 1], [], []>} : vector<70x32xbf16>, vector<32x128xbf16>, vector<70x128xf32> -> vector<70x128xf32>
    %39 = arith.addf %33, %38 : vector<70x128xf32>
    %c0_38 = arith.constant 0 : index
    %c12 = arith.constant 12 : index
    %c0_39 = arith.constant 0 : index
    %40 = vector.load %arg1[%c0_38, %c12, %c0_39] : memref<1x110x32xbf16, #tpu.memory_space<vmem>>, vector<1x70x32xbf16>
    %41 = vector.shape_cast %40 : vector<1x70x32xbf16> to vector<70x32xbf16>
    %c6 = arith.constant 6 : index
    %c0_40 = arith.constant 0 : index
    %c0_41 = arith.constant 0 : index
    %42 = vector.load %arg2[%c6, %c0_40, %c0_41] : memref<16x32x128xbf16, #tpu.memory_space<vmem>>, vector<1x32x128xbf16>
    %43 = vector.shape_cast %42 : vector<1x32x128xbf16> to vector<32x128xbf16>
    %cst_42 = arith.constant dense<0.000000e+00> : vector<70x128xf32>
    %44 = tpu.matmul %41, %43, %cst_42 {dimension_numbers = #tpu.dot_dimension_numbers<[1], [0], [0], [1], [0, 0, 1, 1], [], []>} : vector<70x32xbf16>, vector<32x128xbf16>, vector<70x128xf32> -> vector<70x128xf32>
    %45 = arith.addf %39, %44 : vector<70x128xf32>
    %c0_43 = arith.constant 0 : index
    %c13 = arith.constant 13 : index
    %c0_44 = arith.constant 0 : index
    %46 = vector.load %arg1[%c0_43, %c13, %c0_44] : memref<1x110x32xbf16, #tpu.memory_space<vmem>>, vector<1x70x32xbf16>
    %47 = vector.shape_cast %46 : vector<1x70x32xbf16> to vector<70x32xbf16>
    %c7 = arith.constant 7 : index
    %c0_45 = arith.constant 0 : index
    %c0_46 = arith.constant 0 : index
    %48 = vector.load %arg2[%c7, %c0_45, %c0_46] : memref<16x32x128xbf16, #tpu.memory_space<vmem>>, vector<1x32x128xbf16>
    %49 = vector.shape_cast %48 : vector<1x32x128xbf16> to vector<32x128xbf16>
    %cst_47 = arith.constant dense<0.000000e+00> : vector<70x128xf32>
    %50 = tpu.matmul %47, %49, %cst_47 {dimension_numbers = #tpu.dot_dimension_numbers<[1], [0], [0], [1], [0, 0, 1, 1], [], []>} : vector<70x32xbf16>, vector<32x128xbf16>, vector<70x128xf32> -> vector<70x128xf32>
    %51 = arith.addf %45, %50 : vector<70x128xf32>
    %c0_48 = arith.constant 0 : index
    %c20 = arith.constant 20 : index
    %c0_49 = arith.constant 0 : index
    %52 = vector.load %arg1[%c0_48, %c20, %c0_49] : memref<1x110x32xbf16, #tpu.memory_space<vmem>>, vector<1x70x32xbf16>
    %53 = vector.shape_cast %52 : vector<1x70x32xbf16> to vector<70x32xbf16>
    %c8 = arith.constant 8 : index
    %c0_50 = arith.constant 0 : index
    %c0_51 = arith.constant 0 : index
    %54 = vector.load %arg2[%c8, %c0_50, %c0_51] : memref<16x32x128xbf16, #tpu.memory_space<vmem>>, vector<1x32x128xbf16>
    %55 = vector.shape_cast %54 : vector<1x32x128xbf16> to vector<32x128xbf16>
    %cst_52 = arith.constant dense<0.000000e+00> : vector<70x128xf32>
    %56 = tpu.matmul %53, %55, %cst_52 {dimension_numbers = #tpu.dot_dimension_numbers<[1], [0], [0], [1], [0, 0, 1, 1], [], []>} : vector<70x32xbf16>, vector<32x128xbf16>, vector<70x128xf32> -> vector<70x128xf32>
    %57 = arith.addf %51, %56 : vector<70x128xf32>
    %c0_53 = arith.constant 0 : index
    %c21 = arith.constant 21 : index
    %c0_54 = arith.constant 0 : index
    %58 = vector.load %arg1[%c0_53, %c21, %c0_54] : memref<1x110x32xbf16, #tpu.memory_space<vmem>>, vector<1x70x32xbf16>
    %59 = vector.shape_cast %58 : vector<1x70x32xbf16> to vector<70x32xbf16>
    %c9 = arith.constant 9 : index
    %c0_55 = arith.constant 0 : index
    %c0_56 = arith.constant 0 : index
    %60 = vector.load %arg2[%c9, %c0_55, %c0_56] : memref<16x32x128xbf16, #tpu.memory_space<vmem>>, vector<1x32x128xbf16>
    %61 = vector.shape_cast %60 : vector<1x32x128xbf16> to vector<32x128xbf16>
    %cst_57 = arith.constant dense<0.000000e+00> : vector<70x128xf32>
    %62 = tpu.matmul %59, %61, %cst_57 {dimension_numbers = #tpu.dot_dimension_numbers<[1], [0], [0], [1], [0, 0, 1, 1], [], []>} : vector<70x32xbf16>, vector<32x128xbf16>, vector<70x128xf32> -> vector<70x128xf32>
    %63 = arith.addf %57, %62 : vector<70x128xf32>
    %c0_58 = arith.constant 0 : index
    %c22 = arith.constant 22 : index
    %c0_59 = arith.constant 0 : index
    %64 = vector.load %arg1[%c0_58, %c22, %c0_59] : memref<1x110x32xbf16, #tpu.memory_space<vmem>>, vector<1x70x32xbf16>
    %65 = vector.shape_cast %64 : vector<1x70x32xbf16> to vector<70x32xbf16>
    %c10_60 = arith.constant 10 : index
    %c0_61 = arith.constant 0 : index
    %c0_62 = arith.constant 0 : index
    %66 = vector.load %arg2[%c10_60, %c0_61, %c0_62] : memref<16x32x128xbf16, #tpu.memory_space<vmem>>, vector<1x32x128xbf16>
    %67 = vector.shape_cast %66 : vector<1x32x128xbf16> to vector<32x128xbf16>
    %cst_63 = arith.constant dense<0.000000e+00> : vector<70x128xf32>
    %68 = tpu.matmul %65, %67, %cst_63 {dimension_numbers = #tpu.dot_dimension_numbers<[1], [0], [0], [1], [0, 0, 1, 1], [], []>} : vector<70x32xbf16>, vector<32x128xbf16>, vector<70x128xf32> -> vector<70x128xf32>
    %69 = arith.addf %63, %68 : vector<70x128xf32>
    %c0_64 = arith.constant 0 : index
    %c23 = arith.constant 23 : index
    %c0_65 = arith.constant 0 : index
    %70 = vector.load %arg1[%c0_64, %c23, %c0_65] : memref<1x110x32xbf16, #tpu.memory_space<vmem>>, vector<1x70x32xbf16>
    %71 = vector.shape_cast %70 : vector<1x70x32xbf16> to vector<70x32xbf16>
    %c11_66 = arith.constant 11 : index
    %c0_67 = arith.constant 0 : index
    %c0_68 = arith.constant 0 : index
    %72 = vector.load %arg2[%c11_66, %c0_67, %c0_68] : memref<16x32x128xbf16, #tpu.memory_space<vmem>>, vector<1x32x128xbf16>
    %73 = vector.shape_cast %72 : vector<1x32x128xbf16> to vector<32x128xbf16>
    %cst_69 = arith.constant dense<0.000000e+00> : vector<70x128xf32>
    %74 = tpu.matmul %71, %73, %cst_69 {dimension_numbers = #tpu.dot_dimension_numbers<[1], [0], [0], [1], [0, 0, 1, 1], [], []>} : vector<70x32xbf16>, vector<32x128xbf16>, vector<70x128xf32> -> vector<70x128xf32>
    %75 = arith.addf %69, %74 : vector<70x128xf32>
    %c0_70 = arith.constant 0 : index
    %c30 = arith.constant 30 : index
    %c0_71 = arith.constant 0 : index
    %76 = vector.load %arg1[%c0_70, %c30, %c0_71] : memref<1x110x32xbf16, #tpu.memory_space<vmem>>, vector<1x70x32xbf16>
    %77 = vector.shape_cast %76 : vector<1x70x32xbf16> to vector<70x32xbf16>
    %c12_72 = arith.constant 12 : index
    %c0_73 = arith.constant 0 : index
    %c0_74 = arith.constant 0 : index
    %78 = vector.load %arg2[%c12_72, %c0_73, %c0_74] : memref<16x32x128xbf16, #tpu.memory_space<vmem>>, vector<1x32x128xbf16>
    %79 = vector.shape_cast %78 : vector<1x32x128xbf16> to vector<32x128xbf16>
    %cst_75 = arith.constant dense<0.000000e+00> : vector<70x128xf32>
    %80 = tpu.matmul %77, %79, %cst_75 {dimension_numbers = #tpu.dot_dimension_numbers<[1], [0], [0], [1], [0, 0, 1, 1], [], []>} : vector<70x32xbf16>, vector<32x128xbf16>, vector<70x128xf32> -> vector<70x128xf32>
    %81 = arith.addf %75, %80 : vector<70x128xf32>
    %c0_76 = arith.constant 0 : index
    %c31 = arith.constant 31 : index
    %c0_77 = arith.constant 0 : index
    %82 = vector.load %arg1[%c0_76, %c31, %c0_77] : memref<1x110x32xbf16, #tpu.memory_space<vmem>>, vector<1x70x32xbf16>
    %83 = vector.shape_cast %82 : vector<1x70x32xbf16> to vector<70x32xbf16>
    %c13_78 = arith.constant 13 : index
    %c0_79 = arith.constant 0 : index
    %c0_80 = arith.constant 0 : index
    %84 = vector.load %arg2[%c13_78, %c0_79, %c0_80] : memref<16x32x128xbf16, #tpu.memory_space<vmem>>, vector<1x32x128xbf16>
    %85 = vector.shape_cast %84 : vector<1x32x128xbf16> to vector<32x128xbf16>
    %cst_81 = arith.constant dense<0.000000e+00> : vector<70x128xf32>
    %86 = tpu.matmul %83, %85, %cst_81 {dimension_numbers = #tpu.dot_dimension_numbers<[1], [0], [0], [1], [0, 0, 1, 1], [], []>} : vector<70x32xbf16>, vector<32x128xbf16>, vector<70x128xf32> -> vector<70x128xf32>
    %87 = arith.addf %81, %86 : vector<70x128xf32>
    %c0_82 = arith.constant 0 : index
    %c32 = arith.constant 32 : index
    %c0_83 = arith.constant 0 : index
    %88 = vector.load %arg1[%c0_82, %c32, %c0_83] : memref<1x110x32xbf16, #tpu.memory_space<vmem>>, vector<1x70x32xbf16>
    %89 = vector.shape_cast %88 : vector<1x70x32xbf16> to vector<70x32xbf16>
    %c14 = arith.constant 14 : index
    %c0_84 = arith.constant 0 : index
    %c0_85 = arith.constant 0 : index
    %90 = vector.load %arg2[%c14, %c0_84, %c0_85] : memref<16x32x128xbf16, #tpu.memory_space<vmem>>, vector<1x32x128xbf16>
    %91 = vector.shape_cast %90 : vector<1x32x128xbf16> to vector<32x128xbf16>
    %cst_86 = arith.constant dense<0.000000e+00> : vector<70x128xf32>
    %92 = tpu.matmul %89, %91, %cst_86 {dimension_numbers = #tpu.dot_dimension_numbers<[1], [0], [0], [1], [0, 0, 1, 1], [], []>} : vector<70x32xbf16>, vector<32x128xbf16>, vector<70x128xf32> -> vector<70x128xf32>
    %93 = arith.addf %87, %92 : vector<70x128xf32>
    %c0_87 = arith.constant 0 : index
    %c33 = arith.constant 33 : index
    %c0_88 = arith.constant 0 : index
    %94 = vector.load %arg1[%c0_87, %c33, %c0_88] : memref<1x110x32xbf16, #tpu.memory_space<vmem>>, vector<1x70x32xbf16>
    %95 = vector.shape_cast %94 : vector<1x70x32xbf16> to vector<70x32xbf16>
    %c15 = arith.constant 15 : index
    %c0_89 = arith.constant 0 : index
    %c0_90 = arith.constant 0 : index
    %96 = vector.load %arg2[%c15, %c0_89, %c0_90] : memref<16x32x128xbf16, #tpu.memory_space<vmem>>, vector<1x32x128xbf16>
    %97 = vector.shape_cast %96 : vector<1x32x128xbf16> to vector<32x128xbf16>
    %cst_91 = arith.constant dense<0.000000e+00> : vector<70x128xf32>
    %98 = tpu.matmul %95, %97, %cst_91 {dimension_numbers = #tpu.dot_dimension_numbers<[1], [0], [0], [1], [0, 0, 1, 1], [], []>} : vector<70x32xbf16>, vector<32x128xbf16>, vector<70x128xf32> -> vector<70x128xf32>
    %99 = arith.addf %93, %98 : vector<70x128xf32>
    %100 = vector.broadcast %0 : vector<1x128xf32> to vector<70x128xf32>
    %101 = arith.addf %99, %100 : vector<70x128xf32>
    %102 = tpu.iota {dimensions = array<i32: 0>} : vector<70x1xi32>
    %c0_i32 = arith.constant 0 : i32
    %103 = vector.broadcast %c0_i32 : i32 to vector<70x1xi32>
    %104 = arith.addi %102, %103 : vector<70x1xi32>
    %c10_i32 = arith.constant 10 : i32
    %c0_i32_92 = arith.constant 0 : i32
    %105 = arith.cmpi eq, %c10_i32, %c0_i32_92 : i32
    %c1_i32 = arith.constant 1 : i32
    %106 = arith.select %105, %c1_i32, %c10_i32 : i32
    %107 = vector.broadcast %106 : i32 to vector<70x1xi32>
    %108 = arith.remsi %104, %107 : vector<70x1xi32>
    %c0_i32_93 = arith.constant 0 : i32
    %109 = vector.broadcast %c0_i32_93 : i32 to vector<70x1xi32>
    %110 = arith.cmpi ne, %108, %109 : vector<70x1xi32>
    %c0_i32_94 = arith.constant 0 : i32
    %111 = vector.broadcast %c0_i32_94 : i32 to vector<70x1xi32>
    %112 = arith.cmpi slt, %108, %111 : vector<70x1xi32>
    %c0_i32_95 = arith.constant 0 : i32
    %113 = arith.cmpi slt, %106, %c0_i32_95 : i32
    %114 = vector.broadcast %113 : i1 to vector<70x1xi1>
    %115 = vector.broadcast %114 : vector<70x1xi1> to vector<70x1xi1>
    %116 = arith.xori %112, %115 : vector<70x1xi1>
    %117 = arith.andi %116, %110 : vector<70x1xi1>
    %118 = vector.broadcast %106 : i32 to vector<70x1xi32>
    %119 = arith.addi %108, %118 : vector<70x1xi32>
    %120 = arith.select %117, %119, %108 : vector<70x1xi1>, vector<70x1xi32>
    %c7_i32 = arith.constant 7 : i32
    %121 = vector.broadcast %c7_i32 : i32 to vector<70x1xi32>
    %122 = arith.cmpi slt, %120, %121 : vector<70x1xi32>
    %cst_96 = arith.constant 0.000000e+00 : f32
    %123 = vector.shape_cast %122 : vector<70x1xi1> to vector<70x1xi1>
    %124 = vector.broadcast %123 : vector<70x1xi1> to vector<70x128xi1>
    %125 = vector.broadcast %cst_96 : f32 to vector<70x128xf32>
    %126 = arith.select %124, %101, %125 : vector<70x128xi1>, vector<70x128xf32>
    %cst_97 = arith.constant dense<0.000000e+00> : vector<128xf32>
    %127 = vector.multi_reduction <add>, %126, %cst_97 [0] : vector<70x128xf32> to vector<128xf32>
    %128 = vector.shape_cast %127 : vector<128xf32> to vector<1x128xf32>
    %129 = arith.addf %1, %128 : vector<1x128xf32>
    %130 = arith.mulf %126, %126 : vector<70x128xf32>
    %cst_98 = arith.constant dense<0.000000e+00> : vector<128xf32>
    %131 = vector.multi_reduction <add>, %130, %cst_98 [0] : vector<70x128xf32> to vector<128xf32>
    %132 = vector.shape_cast %131 : vector<128xf32> to vector<1x128xf32>
    %133 = arith.addf %2, %132 : vector<1x128xf32>
    %c0_99 = arith.constant 0 : index
    %c0_100 = arith.constant 0 : index
    %134 = vector.load %arg5[%c0_99, %c0_100] : memref<70x128xf32, #tpu.memory_space<vmem>>, vector<70x128xf32>
    tpu.vector_store %arg5[%c0_99, %c0_100], %101 {strides = array<i32>} : memref<70x128xf32, #tpu.memory_space<vmem>>, vector<70x128xf32>,
    %cst_101 = arith.constant 0.0204081628 : f32
    %135 = vector.broadcast %cst_101 : f32 to vector<1x128xf32>
    %136 = arith.mulf %129, %135 : vector<1x128xf32>
    %cst_102 = arith.constant 0.0204081628 : f32
    %137 = vector.broadcast %cst_102 : f32 to vector<1x128xf32>
    %138 = arith.mulf %133, %137 : vector<1x128xf32>
    %139 = arith.mulf %136, %136 : vector<1x128xf32>
    %140 = arith.subf %138, %139 : vector<1x128xf32>
    %cst_103 = arith.constant 0.000000e+00 : f32
    %141 = vector.broadcast %cst_103 : f32 to vector<1x128xf32>
    %142 = arith.maximumf %140, %141 : vector<1x128xf32>
    %cst_104 = arith.constant 9.99999974E-6 : f32
    %143 = vector.broadcast %cst_104 : f32 to vector<1x128xf32>
    %144 = arith.addf %142, %143 : vector<1x128xf32>
    %145 = math.rsqrt %144 : vector<1x128xf32>
    %c0_105 = arith.constant 0 : index
    %c0_106 = arith.constant 0 : index
    %146 = vector.load %arg5[%c0_105, %c0_106] : memref<70x128xf32, #tpu.memory_space<vmem>>, vector<70x128xf32>
    %147 = vector.broadcast %136 : vector<1x128xf32> to vector<70x128xf32>
    %148 = arith.subf %146, %147 : vector<70x128xf32>
    %149 = vector.broadcast %145 : vector<1x128xf32> to vector<70x128xf32>
    %150 = arith.mulf %148, %149 : vector<70x128xf32>
    %cst_107 = arith.constant 0.000000e+00 : f32
    %151 = vector.broadcast %cst_107 : f32 to vector<70x128xf32>
    %152 = arith.cmpf oge, %150, %151 : vector<70x128xf32>
    %cst_108 = arith.constant 2.000000e-01 : f32
    %153 = vector.broadcast %cst_108 : f32 to vector<70x128xf32>
    %154 = arith.mulf %153, %150 : vector<70x128xf32>
    %155 = arith.select %152, %150, %154 : vector<70x128xi1>, vector<70x128xf32>
    %156 = arith.truncf %155 : vector<70x128xf32> to vector<70x128xbf16>
    %c0_109 = arith.constant 0 : index
    %c0_110 = arith.constant 0 : index
    %c0_111 = arith.constant 0 : index
    %157 = vector.load %arg4[%c0_109, %c0_110, %c0_111] : memref<1x70x128xbf16, #tpu.memory_space<vmem>>, vector<1x70x128xbf16>
    %158 = vector.shape_cast %157 : vector<1x70x128xbf16> to vector<70x128xbf16>
    %159 = vector.shape_cast %156 : vector<70x128xbf16> to vector<1x70x128xbf16>
    tpu.vector_store %arg4[%c0_109, %c0_110, %c0_111], %159 {strides = array<i32>} : memref<1x70x128xbf16, #tpu.memory_space<vmem>>, vector<1x70x128xbf16>,
    return
  }
  func.func @transform_0(%arg0: i32) -> (i32, i32, i32) {
    %c0_i32 = arith.constant 0 : i32
    %c0_i32_0 = arith.constant 0 : i32
    %c0_i32_1 = arith.constant 0 : i32
    return %arg0, %c0_i32, %c0_i32_0 : i32, i32, i32
  }
  func.func @transform_1(%arg0: i32) -> (i32, i32, i32) {
    %c0_i32 = arith.constant 0 : i32
    %c0_i32_0 = arith.constant 0 : i32
    %c0_i32_1 = arith.constant 0 : i32
    %c0_i32_2 = arith.constant 0 : i32
    return %c0_i32, %c0_i32_0, %c0_i32_1 : i32, i32, i32
  }
  func.func @transform_2(%arg0: i32) -> (i32, i32) {
    %c0_i32 = arith.constant 0 : i32
    %c0_i32_0 = arith.constant 0 : i32
    %c0_i32_1 = arith.constant 0 : i32
    return %c0_i32, %c0_i32_0 : i32, i32
  }
  func.func @transform_3(%arg0: i32) -> (i32, i32, i32) {
    %c0_i32 = arith.constant 0 : i32
    %c0_i32_0 = arith.constant 0 : i32
    %c0_i32_1 = arith.constant 0 : i32
    return %arg0, %c0_i32, %c0_i32_0 : i32, i32, i32
  }
}

module attributes {stable_mosaic.version = 11 : i64} {
  func.func @_fused_conv_kernel(%arg0: i32, %arg1: memref<1x90x64xbf16, #tpu.memory_space<vmem>>, %arg2: memref<16x64x128xbf16, #tpu.memory_space<vmem>>, %arg3: memref<1x128xf32, #tpu.memory_space<vmem>>, %arg4: memref<1x1x128xf32, #tpu.memory_space<vmem>>) attributes {dimension_semantics = [#tpu.dimension_semantics<parallel>], iteration_bounds = array<i64: 2>, scalar_prefetch = 0 : i64, scratch_operands = 0 : i64, tpu.core_type = #tpu.core_type<tc>, window_params = [{transform_indices = @transform_0, window_bounds = array<i64: 1, 90, 64>}, {pipeline_mode = #tpu.pipeline_mode<synchronous>, transform_indices = @transform_1, window_bounds = array<i64: 16, 64, 128>}, {pipeline_mode = #tpu.pipeline_mode<synchronous>, transform_indices = @transform_2, window_bounds = array<i64: 1, 128>}, {transform_indices = @transform_3, window_bounds = array<i64: 1, 1, 128>}]} {
    %c0 = arith.constant 0 : index
    %c0_0 = arith.constant 0 : index
    %0 = vector.load %arg3[%c0, %c0_0] : memref<1x128xf32, #tpu.memory_space<vmem>>, vector<1x128xf32>
    %cst = arith.constant 0.000000e+00 : f32
    %1 = vector.broadcast %cst : f32 to vector<1x128xf32>
    %cst_1 = arith.constant 0.000000e+00 : f32
    %2 = vector.broadcast %cst_1 : f32 to vector<54x128xf32>
    %c0_2 = arith.constant 0 : index
    %c0_3 = arith.constant 0 : index
    %c0_4 = arith.constant 0 : index
    %3 = vector.load %arg1[%c0_2, %c0_3, %c0_4] : memref<1x90x64xbf16, #tpu.memory_space<vmem>>, vector<1x54x64xbf16>
    %4 = vector.shape_cast %3 : vector<1x54x64xbf16> to vector<54x64xbf16>
    %c0_5 = arith.constant 0 : index
    %c0_6 = arith.constant 0 : index
    %c0_7 = arith.constant 0 : index
    %5 = vector.load %arg2[%c0_5, %c0_6, %c0_7] : memref<16x64x128xbf16, #tpu.memory_space<vmem>>, vector<1x64x128xbf16>
    %6 = vector.shape_cast %5 : vector<1x64x128xbf16> to vector<64x128xbf16>
    %cst_8 = arith.constant dense<0.000000e+00> : vector<54x128xf32>
    %7 = tpu.matmul %4, %6, %cst_8 {dimension_numbers = #tpu.dot_dimension_numbers<[1], [0], [0], [1], [0, 0, 1, 1], [], []>} : vector<54x64xbf16>, vector<64x128xbf16>, vector<54x128xf32> -> vector<54x128xf32>
    %8 = arith.addf %2, %7 : vector<54x128xf32>
    %c0_9 = arith.constant 0 : index
    %c1 = arith.constant 1 : index
    %c0_10 = arith.constant 0 : index
    %9 = vector.load %arg1[%c0_9, %c1, %c0_10] : memref<1x90x64xbf16, #tpu.memory_space<vmem>>, vector<1x54x64xbf16>
    %10 = vector.shape_cast %9 : vector<1x54x64xbf16> to vector<54x64xbf16>
    %c1_11 = arith.constant 1 : index
    %c0_12 = arith.constant 0 : index
    %c0_13 = arith.constant 0 : index
    %11 = vector.load %arg2[%c1_11, %c0_12, %c0_13] : memref<16x64x128xbf16, #tpu.memory_space<vmem>>, vector<1x64x128xbf16>
    %12 = vector.shape_cast %11 : vector<1x64x128xbf16> to vector<64x128xbf16>
    %cst_14 = arith.constant dense<0.000000e+00> : vector<54x128xf32>
    %13 = tpu.matmul %10, %12, %cst_14 {dimension_numbers = #tpu.dot_dimension_numbers<[1], [0], [0], [1], [0, 0, 1, 1], [], []>} : vector<54x64xbf16>, vector<64x128xbf16>, vector<54x128xf32> -> vector<54x128xf32>
    %14 = arith.addf %8, %13 : vector<54x128xf32>
    %c0_15 = arith.constant 0 : index
    %c2 = arith.constant 2 : index
    %c0_16 = arith.constant 0 : index
    %15 = vector.load %arg1[%c0_15, %c2, %c0_16] : memref<1x90x64xbf16, #tpu.memory_space<vmem>>, vector<1x54x64xbf16>
    %16 = vector.shape_cast %15 : vector<1x54x64xbf16> to vector<54x64xbf16>
    %c2_17 = arith.constant 2 : index
    %c0_18 = arith.constant 0 : index
    %c0_19 = arith.constant 0 : index
    %17 = vector.load %arg2[%c2_17, %c0_18, %c0_19] : memref<16x64x128xbf16, #tpu.memory_space<vmem>>, vector<1x64x128xbf16>
    %18 = vector.shape_cast %17 : vector<1x64x128xbf16> to vector<64x128xbf16>
    %cst_20 = arith.constant dense<0.000000e+00> : vector<54x128xf32>
    %19 = tpu.matmul %16, %18, %cst_20 {dimension_numbers = #tpu.dot_dimension_numbers<[1], [0], [0], [1], [0, 0, 1, 1], [], []>} : vector<54x64xbf16>, vector<64x128xbf16>, vector<54x128xf32> -> vector<54x128xf32>
    %20 = arith.addf %14, %19 : vector<54x128xf32>
    %c0_21 = arith.constant 0 : index
    %c3 = arith.constant 3 : index
    %c0_22 = arith.constant 0 : index
    %21 = vector.load %arg1[%c0_21, %c3, %c0_22] : memref<1x90x64xbf16, #tpu.memory_space<vmem>>, vector<1x54x64xbf16>
    %22 = vector.shape_cast %21 : vector<1x54x64xbf16> to vector<54x64xbf16>
    %c3_23 = arith.constant 3 : index
    %c0_24 = arith.constant 0 : index
    %c0_25 = arith.constant 0 : index
    %23 = vector.load %arg2[%c3_23, %c0_24, %c0_25] : memref<16x64x128xbf16, #tpu.memory_space<vmem>>, vector<1x64x128xbf16>
    %24 = vector.shape_cast %23 : vector<1x64x128xbf16> to vector<64x128xbf16>
    %cst_26 = arith.constant dense<0.000000e+00> : vector<54x128xf32>
    %25 = tpu.matmul %22, %24, %cst_26 {dimension_numbers = #tpu.dot_dimension_numbers<[1], [0], [0], [1], [0, 0, 1, 1], [], []>} : vector<54x64xbf16>, vector<64x128xbf16>, vector<54x128xf32> -> vector<54x128xf32>
    %26 = arith.addf %20, %25 : vector<54x128xf32>
    %c0_27 = arith.constant 0 : index
    %c9 = arith.constant 9 : index
    %c0_28 = arith.constant 0 : index
    %27 = vector.load %arg1[%c0_27, %c9, %c0_28] : memref<1x90x64xbf16, #tpu.memory_space<vmem>>, vector<1x54x64xbf16>
    %28 = vector.shape_cast %27 : vector<1x54x64xbf16> to vector<54x64xbf16>
    %c4 = arith.constant 4 : index
    %c0_29 = arith.constant 0 : index
    %c0_30 = arith.constant 0 : index
    %29 = vector.load %arg2[%c4, %c0_29, %c0_30] : memref<16x64x128xbf16, #tpu.memory_space<vmem>>, vector<1x64x128xbf16>
    %30 = vector.shape_cast %29 : vector<1x64x128xbf16> to vector<64x128xbf16>
    %cst_31 = arith.constant dense<0.000000e+00> : vector<54x128xf32>
    %31 = tpu.matmul %28, %30, %cst_31 {dimension_numbers = #tpu.dot_dimension_numbers<[1], [0], [0], [1], [0, 0, 1, 1], [], []>} : vector<54x64xbf16>, vector<64x128xbf16>, vector<54x128xf32> -> vector<54x128xf32>
    %32 = arith.addf %26, %31 : vector<54x128xf32>
    %c0_32 = arith.constant 0 : index
    %c10 = arith.constant 10 : index
    %c0_33 = arith.constant 0 : index
    %33 = vector.load %arg1[%c0_32, %c10, %c0_33] : memref<1x90x64xbf16, #tpu.memory_space<vmem>>, vector<1x54x64xbf16>
    %34 = vector.shape_cast %33 : vector<1x54x64xbf16> to vector<54x64xbf16>
    %c5 = arith.constant 5 : index
    %c0_34 = arith.constant 0 : index
    %c0_35 = arith.constant 0 : index
    %35 = vector.load %arg2[%c5, %c0_34, %c0_35] : memref<16x64x128xbf16, #tpu.memory_space<vmem>>, vector<1x64x128xbf16>
    %36 = vector.shape_cast %35 : vector<1x64x128xbf16> to vector<64x128xbf16>
    %cst_36 = arith.constant dense<0.000000e+00> : vector<54x128xf32>
    %37 = tpu.matmul %34, %36, %cst_36 {dimension_numbers = #tpu.dot_dimension_numbers<[1], [0], [0], [1], [0, 0, 1, 1], [], []>} : vector<54x64xbf16>, vector<64x128xbf16>, vector<54x128xf32> -> vector<54x128xf32>
    %38 = arith.addf %32, %37 : vector<54x128xf32>
    %c0_37 = arith.constant 0 : index
    %c11 = arith.constant 11 : index
    %c0_38 = arith.constant 0 : index
    %39 = vector.load %arg1[%c0_37, %c11, %c0_38] : memref<1x90x64xbf16, #tpu.memory_space<vmem>>, vector<1x54x64xbf16>
    %40 = vector.shape_cast %39 : vector<1x54x64xbf16> to vector<54x64xbf16>
    %c6 = arith.constant 6 : index
    %c0_39 = arith.constant 0 : index
    %c0_40 = arith.constant 0 : index
    %41 = vector.load %arg2[%c6, %c0_39, %c0_40] : memref<16x64x128xbf16, #tpu.memory_space<vmem>>, vector<1x64x128xbf16>
    %42 = vector.shape_cast %41 : vector<1x64x128xbf16> to vector<64x128xbf16>
    %cst_41 = arith.constant dense<0.000000e+00> : vector<54x128xf32>
    %43 = tpu.matmul %40, %42, %cst_41 {dimension_numbers = #tpu.dot_dimension_numbers<[1], [0], [0], [1], [0, 0, 1, 1], [], []>} : vector<54x64xbf16>, vector<64x128xbf16>, vector<54x128xf32> -> vector<54x128xf32>
    %44 = arith.addf %38, %43 : vector<54x128xf32>
    %c0_42 = arith.constant 0 : index
    %c12 = arith.constant 12 : index
    %c0_43 = arith.constant 0 : index
    %45 = vector.load %arg1[%c0_42, %c12, %c0_43] : memref<1x90x64xbf16, #tpu.memory_space<vmem>>, vector<1x54x64xbf16>
    %46 = vector.shape_cast %45 : vector<1x54x64xbf16> to vector<54x64xbf16>
    %c7 = arith.constant 7 : index
    %c0_44 = arith.constant 0 : index
    %c0_45 = arith.constant 0 : index
    %47 = vector.load %arg2[%c7, %c0_44, %c0_45] : memref<16x64x128xbf16, #tpu.memory_space<vmem>>, vector<1x64x128xbf16>
    %48 = vector.shape_cast %47 : vector<1x64x128xbf16> to vector<64x128xbf16>
    %cst_46 = arith.constant dense<0.000000e+00> : vector<54x128xf32>
    %49 = tpu.matmul %46, %48, %cst_46 {dimension_numbers = #tpu.dot_dimension_numbers<[1], [0], [0], [1], [0, 0, 1, 1], [], []>} : vector<54x64xbf16>, vector<64x128xbf16>, vector<54x128xf32> -> vector<54x128xf32>
    %50 = arith.addf %44, %49 : vector<54x128xf32>
    %c0_47 = arith.constant 0 : index
    %c18 = arith.constant 18 : index
    %c0_48 = arith.constant 0 : index
    %51 = vector.load %arg1[%c0_47, %c18, %c0_48] : memref<1x90x64xbf16, #tpu.memory_space<vmem>>, vector<1x54x64xbf16>
    %52 = vector.shape_cast %51 : vector<1x54x64xbf16> to vector<54x64xbf16>
    %c8 = arith.constant 8 : index
    %c0_49 = arith.constant 0 : index
    %c0_50 = arith.constant 0 : index
    %53 = vector.load %arg2[%c8, %c0_49, %c0_50] : memref<16x64x128xbf16, #tpu.memory_space<vmem>>, vector<1x64x128xbf16>
    %54 = vector.shape_cast %53 : vector<1x64x128xbf16> to vector<64x128xbf16>
    %cst_51 = arith.constant dense<0.000000e+00> : vector<54x128xf32>
    %55 = tpu.matmul %52, %54, %cst_51 {dimension_numbers = #tpu.dot_dimension_numbers<[1], [0], [0], [1], [0, 0, 1, 1], [], []>} : vector<54x64xbf16>, vector<64x128xbf16>, vector<54x128xf32> -> vector<54x128xf32>
    %56 = arith.addf %50, %55 : vector<54x128xf32>
    %c0_52 = arith.constant 0 : index
    %c19 = arith.constant 19 : index
    %c0_53 = arith.constant 0 : index
    %57 = vector.load %arg1[%c0_52, %c19, %c0_53] : memref<1x90x64xbf16, #tpu.memory_space<vmem>>, vector<1x54x64xbf16>
    %58 = vector.shape_cast %57 : vector<1x54x64xbf16> to vector<54x64xbf16>
    %c9_54 = arith.constant 9 : index
    %c0_55 = arith.constant 0 : index
    %c0_56 = arith.constant 0 : index
    %59 = vector.load %arg2[%c9_54, %c0_55, %c0_56] : memref<16x64x128xbf16, #tpu.memory_space<vmem>>, vector<1x64x128xbf16>
    %60 = vector.shape_cast %59 : vector<1x64x128xbf16> to vector<64x128xbf16>
    %cst_57 = arith.constant dense<0.000000e+00> : vector<54x128xf32>
    %61 = tpu.matmul %58, %60, %cst_57 {dimension_numbers = #tpu.dot_dimension_numbers<[1], [0], [0], [1], [0, 0, 1, 1], [], []>} : vector<54x64xbf16>, vector<64x128xbf16>, vector<54x128xf32> -> vector<54x128xf32>
    %62 = arith.addf %56, %61 : vector<54x128xf32>
    %c0_58 = arith.constant 0 : index
    %c20 = arith.constant 20 : index
    %c0_59 = arith.constant 0 : index
    %63 = vector.load %arg1[%c0_58, %c20, %c0_59] : memref<1x90x64xbf16, #tpu.memory_space<vmem>>, vector<1x54x64xbf16>
    %64 = vector.shape_cast %63 : vector<1x54x64xbf16> to vector<54x64xbf16>
    %c10_60 = arith.constant 10 : index
    %c0_61 = arith.constant 0 : index
    %c0_62 = arith.constant 0 : index
    %65 = vector.load %arg2[%c10_60, %c0_61, %c0_62] : memref<16x64x128xbf16, #tpu.memory_space<vmem>>, vector<1x64x128xbf16>
    %66 = vector.shape_cast %65 : vector<1x64x128xbf16> to vector<64x128xbf16>
    %cst_63 = arith.constant dense<0.000000e+00> : vector<54x128xf32>
    %67 = tpu.matmul %64, %66, %cst_63 {dimension_numbers = #tpu.dot_dimension_numbers<[1], [0], [0], [1], [0, 0, 1, 1], [], []>} : vector<54x64xbf16>, vector<64x128xbf16>, vector<54x128xf32> -> vector<54x128xf32>
    %68 = arith.addf %62, %67 : vector<54x128xf32>
    %c0_64 = arith.constant 0 : index
    %c21 = arith.constant 21 : index
    %c0_65 = arith.constant 0 : index
    %69 = vector.load %arg1[%c0_64, %c21, %c0_65] : memref<1x90x64xbf16, #tpu.memory_space<vmem>>, vector<1x54x64xbf16>
    %70 = vector.shape_cast %69 : vector<1x54x64xbf16> to vector<54x64xbf16>
    %c11_66 = arith.constant 11 : index
    %c0_67 = arith.constant 0 : index
    %c0_68 = arith.constant 0 : index
    %71 = vector.load %arg2[%c11_66, %c0_67, %c0_68] : memref<16x64x128xbf16, #tpu.memory_space<vmem>>, vector<1x64x128xbf16>
    %72 = vector.shape_cast %71 : vector<1x64x128xbf16> to vector<64x128xbf16>
    %cst_69 = arith.constant dense<0.000000e+00> : vector<54x128xf32>
    %73 = tpu.matmul %70, %72, %cst_69 {dimension_numbers = #tpu.dot_dimension_numbers<[1], [0], [0], [1], [0, 0, 1, 1], [], []>} : vector<54x64xbf16>, vector<64x128xbf16>, vector<54x128xf32> -> vector<54x128xf32>
    %74 = arith.addf %68, %73 : vector<54x128xf32>
    %c0_70 = arith.constant 0 : index
    %c27 = arith.constant 27 : index
    %c0_71 = arith.constant 0 : index
    %75 = vector.load %arg1[%c0_70, %c27, %c0_71] : memref<1x90x64xbf16, #tpu.memory_space<vmem>>, vector<1x54x64xbf16>
    %76 = vector.shape_cast %75 : vector<1x54x64xbf16> to vector<54x64xbf16>
    %c12_72 = arith.constant 12 : index
    %c0_73 = arith.constant 0 : index
    %c0_74 = arith.constant 0 : index
    %77 = vector.load %arg2[%c12_72, %c0_73, %c0_74] : memref<16x64x128xbf16, #tpu.memory_space<vmem>>, vector<1x64x128xbf16>
    %78 = vector.shape_cast %77 : vector<1x64x128xbf16> to vector<64x128xbf16>
    %cst_75 = arith.constant dense<0.000000e+00> : vector<54x128xf32>
    %79 = tpu.matmul %76, %78, %cst_75 {dimension_numbers = #tpu.dot_dimension_numbers<[1], [0], [0], [1], [0, 0, 1, 1], [], []>} : vector<54x64xbf16>, vector<64x128xbf16>, vector<54x128xf32> -> vector<54x128xf32>
    %80 = arith.addf %74, %79 : vector<54x128xf32>
    %c0_76 = arith.constant 0 : index
    %c28 = arith.constant 28 : index
    %c0_77 = arith.constant 0 : index
    %81 = vector.load %arg1[%c0_76, %c28, %c0_77] : memref<1x90x64xbf16, #tpu.memory_space<vmem>>, vector<1x54x64xbf16>
    %82 = vector.shape_cast %81 : vector<1x54x64xbf16> to vector<54x64xbf16>
    %c13 = arith.constant 13 : index
    %c0_78 = arith.constant 0 : index
    %c0_79 = arith.constant 0 : index
    %83 = vector.load %arg2[%c13, %c0_78, %c0_79] : memref<16x64x128xbf16, #tpu.memory_space<vmem>>, vector<1x64x128xbf16>
    %84 = vector.shape_cast %83 : vector<1x64x128xbf16> to vector<64x128xbf16>
    %cst_80 = arith.constant dense<0.000000e+00> : vector<54x128xf32>
    %85 = tpu.matmul %82, %84, %cst_80 {dimension_numbers = #tpu.dot_dimension_numbers<[1], [0], [0], [1], [0, 0, 1, 1], [], []>} : vector<54x64xbf16>, vector<64x128xbf16>, vector<54x128xf32> -> vector<54x128xf32>
    %86 = arith.addf %80, %85 : vector<54x128xf32>
    %c0_81 = arith.constant 0 : index
    %c29 = arith.constant 29 : index
    %c0_82 = arith.constant 0 : index
    %87 = vector.load %arg1[%c0_81, %c29, %c0_82] : memref<1x90x64xbf16, #tpu.memory_space<vmem>>, vector<1x54x64xbf16>
    %88 = vector.shape_cast %87 : vector<1x54x64xbf16> to vector<54x64xbf16>
    %c14 = arith.constant 14 : index
    %c0_83 = arith.constant 0 : index
    %c0_84 = arith.constant 0 : index
    %89 = vector.load %arg2[%c14, %c0_83, %c0_84] : memref<16x64x128xbf16, #tpu.memory_space<vmem>>, vector<1x64x128xbf16>
    %90 = vector.shape_cast %89 : vector<1x64x128xbf16> to vector<64x128xbf16>
    %cst_85 = arith.constant dense<0.000000e+00> : vector<54x128xf32>
    %91 = tpu.matmul %88, %90, %cst_85 {dimension_numbers = #tpu.dot_dimension_numbers<[1], [0], [0], [1], [0, 0, 1, 1], [], []>} : vector<54x64xbf16>, vector<64x128xbf16>, vector<54x128xf32> -> vector<54x128xf32>
    %92 = arith.addf %86, %91 : vector<54x128xf32>
    %c0_86 = arith.constant 0 : index
    %c30 = arith.constant 30 : index
    %c0_87 = arith.constant 0 : index
    %93 = vector.load %arg1[%c0_86, %c30, %c0_87] : memref<1x90x64xbf16, #tpu.memory_space<vmem>>, vector<1x54x64xbf16>
    %94 = vector.shape_cast %93 : vector<1x54x64xbf16> to vector<54x64xbf16>
    %c15 = arith.constant 15 : index
    %c0_88 = arith.constant 0 : index
    %c0_89 = arith.constant 0 : index
    %95 = vector.load %arg2[%c15, %c0_88, %c0_89] : memref<16x64x128xbf16, #tpu.memory_space<vmem>>, vector<1x64x128xbf16>
    %96 = vector.shape_cast %95 : vector<1x64x128xbf16> to vector<64x128xbf16>
    %cst_90 = arith.constant dense<0.000000e+00> : vector<54x128xf32>
    %97 = tpu.matmul %94, %96, %cst_90 {dimension_numbers = #tpu.dot_dimension_numbers<[1], [0], [0], [1], [0, 0, 1, 1], [], []>} : vector<54x64xbf16>, vector<64x128xbf16>, vector<54x128xf32> -> vector<54x128xf32>
    %98 = arith.addf %92, %97 : vector<54x128xf32>
    %99 = vector.broadcast %0 : vector<1x128xf32> to vector<54x128xf32>
    %100 = arith.addf %98, %99 : vector<54x128xf32>
    %101 = tpu.iota {dimensions = array<i32: 0>} : vector<54x1xi32>
    %c0_i32 = arith.constant 0 : i32
    %102 = vector.broadcast %c0_i32 : i32 to vector<54x1xi32>
    %103 = arith.addi %101, %102 : vector<54x1xi32>
    %c9_i32 = arith.constant 9 : i32
    %c0_i32_91 = arith.constant 0 : i32
    %104 = arith.cmpi eq, %c9_i32, %c0_i32_91 : i32
    %c1_i32 = arith.constant 1 : i32
    %105 = arith.select %104, %c1_i32, %c9_i32 : i32
    %106 = vector.broadcast %105 : i32 to vector<54x1xi32>
    %107 = arith.remsi %103, %106 : vector<54x1xi32>
    %c0_i32_92 = arith.constant 0 : i32
    %108 = vector.broadcast %c0_i32_92 : i32 to vector<54x1xi32>
    %109 = arith.cmpi ne, %107, %108 : vector<54x1xi32>
    %c0_i32_93 = arith.constant 0 : i32
    %110 = vector.broadcast %c0_i32_93 : i32 to vector<54x1xi32>
    %111 = arith.cmpi slt, %107, %110 : vector<54x1xi32>
    %c0_i32_94 = arith.constant 0 : i32
    %112 = arith.cmpi slt, %105, %c0_i32_94 : i32
    %113 = vector.broadcast %112 : i1 to vector<54x1xi1>
    %114 = vector.broadcast %113 : vector<54x1xi1> to vector<54x1xi1>
    %115 = arith.xori %111, %114 : vector<54x1xi1>
    %116 = arith.andi %115, %109 : vector<54x1xi1>
    %117 = vector.broadcast %105 : i32 to vector<54x1xi32>
    %118 = arith.addi %107, %117 : vector<54x1xi32>
    %119 = arith.select %116, %118, %107 : vector<54x1xi1>, vector<54x1xi32>
    %c6_i32 = arith.constant 6 : i32
    %120 = vector.broadcast %c6_i32 : i32 to vector<54x1xi32>
    %121 = arith.cmpi slt, %119, %120 : vector<54x1xi32>
    %cst_95 = arith.constant 0.000000e+00 : f32
    %122 = vector.shape_cast %121 : vector<54x1xi1> to vector<54x1xi1>
    %123 = vector.broadcast %122 : vector<54x1xi1> to vector<54x128xi1>
    %124 = vector.broadcast %cst_95 : f32 to vector<54x128xf32>
    %125 = arith.select %123, %100, %124 : vector<54x128xi1>, vector<54x128xf32>
    %cst_96 = arith.constant dense<0.000000e+00> : vector<128xf32>
    %126 = vector.multi_reduction <add>, %125, %cst_96 [0] : vector<54x128xf32> to vector<128xf32>
    %127 = vector.shape_cast %126 : vector<128xf32> to vector<1x128xf32>
    %128 = arith.addf %1, %127 : vector<1x128xf32>
    %cst_97 = arith.constant 0.027777778 : f32
    %129 = vector.broadcast %cst_97 : f32 to vector<1x128xf32>
    %130 = arith.mulf %128, %129 : vector<1x128xf32>
    %131 = vector.shape_cast %130 : vector<1x128xf32> to vector<1x1x128xf32>
    %c0_98 = arith.constant 0 : index
    %c0_99 = arith.constant 0 : index
    %c0_100 = arith.constant 0 : index
    %132 = vector.load %arg4[%c0_98, %c0_99, %c0_100] : memref<1x1x128xf32, #tpu.memory_space<vmem>>, vector<1x1x128xf32>
    tpu.vector_store %arg4[%c0_98, %c0_99, %c0_100], %131 {strides = array<i32>} : memref<1x1x128xf32, #tpu.memory_space<vmem>>, vector<1x1x128xf32>,
    return
  }
  func.func @transform_0(%arg0: i32) -> (i32, i32, i32) {
    %c0_i32 = arith.constant 0 : i32
    %c0_i32_0 = arith.constant 0 : i32
    %c0_i32_1 = arith.constant 0 : i32
    return %arg0, %c0_i32, %c0_i32_0 : i32, i32, i32
  }
  func.func @transform_1(%arg0: i32) -> (i32, i32, i32) {
    %c0_i32 = arith.constant 0 : i32
    %c0_i32_0 = arith.constant 0 : i32
    %c0_i32_1 = arith.constant 0 : i32
    %c0_i32_2 = arith.constant 0 : i32
    return %c0_i32, %c0_i32_0, %c0_i32_1 : i32, i32, i32
  }
  func.func @transform_2(%arg0: i32) -> (i32, i32) {
    %c0_i32 = arith.constant 0 : i32
    %c0_i32_0 = arith.constant 0 : i32
    %c0_i32_1 = arith.constant 0 : i32
    return %c0_i32, %c0_i32_0 : i32, i32
  }
  func.func @transform_3(%arg0: i32) -> (i32, i32, i32) {
    %c0_i32 = arith.constant 0 : i32
    %c0_i32_0 = arith.constant 0 : i32
    %c0_i32_1 = arith.constant 0 : i32
    return %arg0, %c0_i32, %c0_i32_0 : i32, i32, i32
  }
}

</mosaic_0001>

<bundles_post_ra>
// kernel: discriminator_forward.5
= control target key start
LH: loop header
LB: loop body
LE: loop exit
PB: predicated region body
PF: predicated region fallthrough
CT: control target
= control target key end

     0   :  { %s2166_s12 = smov 0   ;;  %s2168_s13 = smov 0   ;;  %s2420_s0 = inlined_call_operand.vmem [shape: bf16[2,1024,48], index: 0, kind: input, shape index: {}]   ;;  %s2421_s1 = inlined_call_operand.vmem [shape: bf16[1,48,128], index: 1, kind: input, shape index: {}]   ;;  %s2422_s2 = inlined_call_operand.vmem [shape: f32[1,128], index: 2, kind: input, shape index: {}]   ;;  %s2423_s3 = inlined_call_operand.vmem [shape: bf16[2,1024,128], index: 3, kind: output, shape index: {}]  }
   0x1   :  { %s2170_s14 = smov 0   ;;  %s2172_s15 = smov 0  }
   0x2   :  { %s2174_s16 = smov 0  }
   0x3 LB: > { %s22_s17 = sadd.s32 1, %s2136_s14  ;;  %s25_s18 = sadd.s32 1, %s2140_s15  ;;  %s2144_s16 = sphi %s2174_s16, %s13_s16   ;;  %s2140_s15 = sphi %s2172_s15, %s2427_s15   ;;  %s2136_s14 = sphi %s2170_s14, %s2426_s14   ;;  %s2132_s13 = sphi %s2168_s13, %s2425_s13   ;;  %s2128_s12 = sphi %s2166_s12, %s2424_s12  }
   0x4   : > { %p23_p0 = scmp.ge.s32.totalorder %s22_s17, 2  ;;  %p1515_p1 = scmp.ge.s32.totalorder %s2144_s16, 1 }
   0x5   : > { %p158_p2 = scmp.lt.s32.totalorder %s2144_s16, 5 }
   0x6   : > { %s2429_s17 = smov (%p23_p0, %s22_s17), 0  ;;  %s2431_s18 = smov (!%p23_p0, %s25_s18), %s2140_s15 }
   0x7   : > { %p159_p3 = pnand %p1515_p1, %p158_p2  ;;  %p27_p4 = scmp.ge.s32.totalorder %s2431_s18, 2 }
   0x8   : > { %s1516_s21 = sshll.u32 (!%p159_p3), %s2128_s12, 6  ;;  %p191_p5 = scmp.lt.s32.totalorder (!%p159_p3), %s2132_s13, 1 }
   0x9   : > { %s2433_s18 = smov (%p27_p4, %s2431_s18), 0  ;;  %162 = sbr.rel (%p159_p3) target bundleno = 297 (0x129), region = 32 }
   0xa   : > { %p193_p6 = scmp.lt.s32.totalorder (!%p159_p3), %s1516_s21, 127 }
   0xe   : > { %v2068_v0 = vld [vmem:[%s2421_s1 + $0x10] sm:$0xff]   ;;  %v2070_v2 = vld [vmem:[%s2421_s1 + $0x8] sm:$0xff]   ;;  %s2435_s13 = smov (!%p191_p5, %s2132_s13), 1  ;;  %v2072_v4 = vld [vmem:[%s2421_s1] sm:$0xff]   ;;  %s2437_s21 = smov (!%p193_p6, %s1516_s21), 127  ;;  %vm354_vm0 = vcmask 392192  }
   0xf   : > { %v2069_v1 = vld [vmem:[%s2421_s1 + $0x10] sm:$0xff]   ;;  %1952 = vmatprep.subr.bf16.mxu0 %v2068_v0  ;;  %v2071_v3 = vld [vmem:[%s2421_s1 + $0x8] sm:$0xff]   ;;  %v2073_v5 = vld [vmem:[%s2421_s1] sm:$0xff]   ;;  %s1517_s5 = sshll.u32 %s2435_s13, 7 }
  0x10   : > { %1990 = vmatprep.subr.bf16.mxu1 %v2069_v1  ;;  %1953 = vmatpush3.bf16.msra.mxu0 %v2068_v0  ;;  %s2217_s6 = sadd.s32 %s1517_s5, %s2437_s21  ;;  %v2294_v38 = vld [vmem:[%s2422_s2] ss:$0 sm:$0xff] }
  0x11   : > { %1991 = vmatpush3.bf16.msra.mxu1 %v2069_v1  ;;  %1954 = vmatprep.subr.bf16.mxu0 %v2070_v2  ;;  %s1518_s7 = sshll.u32 %s2217_s6, 2 }
  0x12   : > { %1992 = vmatprep.subr.bf16.mxu1 %v2071_v3  ;;  %s2225_s10 = scalar_lea.vmem %s2420_s0, %s1518_s7  ;;  %s2309_s20 = scalar_lea.vmem %s2423_s3, %s1518_s7 }
  0x13   : > { %v2074_v6 = vld [vmem:[%s2225_s10] sm:$0xff]   ;;  %v2076_v8 = vld [vmem:[%s2225_s10 + $0x8] sm:$0xff]   ;;  %v2078_v10 = vld [vmem:[%s2225_s10 + $0x10] sm:$0xff]  }
  0x14   : > { %1955 = vmatpush3.bf16.msra.mxu0 %v2070_v2  ;;  %v2075_v7 = vld [vmem:[%s2225_s10 + $0x80] sm:$0xff]   ;;  %1958 = vmatprep.mubr.msk.bf16.mxu0 %vm354_vm0, %v2074_v6  ;;  %v2077_v9 = vld [vmem:[%s2225_s10 + $0x88] sm:$0xff]   ;;  %v2079_v11 = vld [vmem:[%s2225_s10 + $0x90] sm:$0xff]  }
  0x15   : > { %1993 = vmatpush3.bf16.msra.mxu1 %v2071_v3  ;;  %1956 = vmatprep.subr.bf16.mxu0 %v2072_v4  ;;  %v2080_v12 = vld [vmem:[%s2225_s10 + $0x18] sm:$0xff]   ;;  %v2082_v14 = vld [vmem:[%s2225_s10 + $0x20] sm:$0xff]   ;;  %v2084_v16 = vld [vmem:[%s2225_s10 + $0x28] sm:$0xff]  }
  0x16   : > { %1994 = vmatprep.subr.bf16.mxu1 %v2073_v5  ;;  %1996 = vmatprep.mubr.msk.bf16.mxu1 %vm354_vm0, %v2075_v7  ;;  %v2081_v13 = vld [vmem:[%s2225_s10 + $0x98] sm:$0xff]   ;;  %v2083_v15 = vld [vmem:[%s2225_s10 + $0xa0] sm:$0xff]   ;;  %v2085_v17 = vld [vmem:[%s2225_s10 + $0xa8] sm:$0xff]  }
  0x17   : > { %v2086_v18 = vld [vmem:[%s2225_s10 + $0x30] sm:$0xff]   ;;  %v2088_v20 = vld [vmem:[%s2225_s10 + $0x38] sm:$0xff]   ;;  %v2090_v22 = vld [vmem:[%s2225_s10 + $0x40] sm:$0xff]  }
  0x18   : > { %1957 = vmatpush3.bf16.msra.mxu0 %v2072_v4  ;;  %v2087_v19 = vld [vmem:[%s2225_s10 + $0xb0] sm:$0xff]   ;;  %v2089_v21 = vld [vmem:[%s2225_s10 + $0xb8] sm:$0xff]   ;;  %v2091_v23 = vld [vmem:[%s2225_s10 + $0xc0] sm:$0xff]  }
  0x19   : > { %1995 = vmatpush3.bf16.msra.mxu1 %v2073_v5  ;;  %v2092_v24 = vld [vmem:[%s2225_s10 + $0x48] sm:$0xff]   ;;  %v2094_v26 = vld [vmem:[%s2225_s10 + $0x50] sm:$0xff]   ;;  %v2096_v28 = vld [vmem:[%s2225_s10 + $0x58] sm:$0xff]  }
  0x1a   : > { %v2093_v25 = vld [vmem:[%s2225_s10 + $0xc8] sm:$0xff]   ;;  %v2095_v27 = vld [vmem:[%s2225_s10 + $0xd0] sm:$0xff]   ;;  %v2097_v29 = vld [vmem:[%s2225_s10 + $0xd8] sm:$0xff]  }
  0x1b   : > { %1959 = vmatmul.mubr.msk.bf16.vlgmr.msra.gmra.mxu0 %vm354_vm0, %v2076_v8  ;;  %v2098_v30 = vld [vmem:[%s2225_s10 + $0x60] sm:$0xff]   ;;  %v2100_v32 = vld [vmem:[%s2225_s10 + $0x68] sm:$0xff]   ;;  %v2102_v34 = vld [vmem:[%s2225_s10 + $0x70] sm:$0xff]  }
  0x1c   : > { %1997 = vmatmul.mubr.msk.bf16.vlgmr.msra.gmra.mxu1 %vm354_vm0, %v2077_v9  ;;  %1962 = vmatprep.mubr.msk.bf16.mxu0 %vm354_vm0, %v2078_v10  ;;  %v2099_v31 = vld [vmem:[%s2225_s10 + $0xe0] sm:$0xff]   ;;  %v2101_v33 = vld [vmem:[%s2225_s10 + $0xe8] sm:$0xff]   ;;  %v2103_v35 = vld [vmem:[%s2225_s10 + $0xf0] sm:$0xff]  }
  0x1d   : > { %2000 = vmatprep.mubr.msk.bf16.mxu1 %vm354_vm0, %v2079_v11  ;;  %v2104_v36 = vld [vmem:[%s2225_s10 + $0x78] sm:$0xff]  }
  0x1e   : > { %v2105_v37 = vld [vmem:[%s2225_s10 + $0xf8] sm:$0xff]  }
  0x23   : > { %1963 = vmatmul.mubr.msk.bf16.gmra.mxu0 %vm354_vm0, %v2080_v12 }
  0x24   : > { %2001 = vmatmul.mubr.msk.bf16.gmra.mxu1 %vm354_vm0, %v2081_v13  ;;  %1966 = vmatprep.mubr.msk.bf16.mxu0 %vm354_vm0, %v2082_v14 }
  0x25   : > { %2004 = vmatprep.mubr.msk.bf16.mxu1 %vm354_vm0, %v2083_v15 }
  0x2b   : > { %1967 = vmatmul.mubr.msk.bf16.gmra.mxu0 %vm354_vm0, %v2084_v16 }
  0x2c   : > { %2005 = vmatmul.mubr.msk.bf16.gmra.mxu1 %vm354_vm0, %v2085_v17  ;;  %1970 = vmatprep.mubr.msk.bf16.mxu0 %vm354_vm0, %v2086_v18 }
  0x2d   : > { %2008 = vmatprep.mubr.msk.bf16.mxu1 %vm354_vm0, %v2087_v19 }
  0x33   : > { %1971 = vmatmul.mubr.msk.bf16.gmra.mxu0 %vm354_vm0, %v2088_v20 }
  0x34   : > { %2009 = vmatmul.mubr.msk.bf16.gmra.mxu1 %vm354_vm0, %v2089_v21  ;;  %1974 = vmatprep.mubr.msk.bf16.mxu0 %vm354_vm0, %v2090_v22 }
  0x35   : > { %2012 = vmatprep.mubr.msk.bf16.mxu1 %vm354_vm0, %v2091_v23 }
  0x3b   : > { %1975 = vmatmul.mubr.msk.bf16.gmra.mxu0 %vm354_vm0, %v2092_v24 }
  0x3c   : > { %2013 = vmatmul.mubr.msk.bf16.gmra.mxu1 %vm354_vm0, %v2093_v25  ;;  %1978 = vmatprep.mubr.msk.bf16.mxu0 %vm354_vm0, %v2094_v26 }
  0x3d   : > { %2016 = vmatprep.mubr.msk.bf16.mxu1 %vm354_vm0, %v2095_v27 }
  0x43   : > { %1979 = vmatmul.mubr.msk.bf16.gmra.mxu0 %vm354_vm0, %v2096_v28 }
  0x44   : > { %2017 = vmatmul.mubr.msk.bf16.gmra.mxu1 %vm354_vm0, %v2097_v29  ;;  %1982 = vmatprep.mubr.msk.bf16.mxu0 %vm354_vm0, %v2098_v30 }
  0x45   : > { %2020 = vmatprep.mubr.msk.bf16.mxu1 %vm354_vm0, %v2099_v31 }
  0x4b   : > { %1983 = vmatmul.mubr.msk.bf16.gmra.mxu0 %vm354_vm0, %v2100_v32 }
  0x4c   : > { %2021 = vmatmul.mubr.msk.bf16.gmra.mxu1 %vm354_vm0, %v2101_v33  ;;  %1986 = vmatprep.mubr.msk.bf16.mxu0 %vm354_vm0, %v2102_v34 }
  0x4d   : > { %2024 = vmatprep.mubr.msk.bf16.mxu1 %vm354_vm0, %v2103_v35 }
  0x53   : > { %1987 = vmatmul.mubr.msk.bf16.gmra.mxu0 %vm354_vm0, %v2104_v36 }
  0x54   : > { %2025 = vmatmul.mubr.msk.bf16.gmra.mxu1 %vm354_vm0, %v2105_v37 }
  0xdb   : > { %v1960_v39 = vpop.f32.mrf.mxu0 }
  0xdc   : > { %v446_v40 = vadd.f32 %v1960_v39, %v2294_v38  ;;  %v1998_v41 = vpop.f32.mrf.mxu1 }
  0xdd   : > { %v1047_v42 = vadd.f32 %v1998_v41, %v2294_v38  ;;  %v437_v43 = vpop.f32.mrf.mxu0 }
  0xde   : > { %vm566_vm1 = vcmp.ge.f32.partialorder %v446_v40, 0.0  ;;  %v598_v44 = vmul.f32 0.2, %v446_v40  ;;  %v438_v45 = vadd.f32 %v2294_v38, %v437_v43  ;;  %v1038_v46 = vpop.f32.mrf.mxu1 }
  0xdf   : > { %vm1167_vm2 = vcmp.ge.f32.partialorder %v1047_v42, 0.0  ;;  %v1199_v47 = vmul.f32 0.2, %v1047_v42  ;;  %v1039_v48 = vadd.f32 %v2294_v38, %v1038_v46  ;;  %v1961_v49 = vpop.f32.mrf.mxu0 }
  0xe0   : > { %v630_v50 = vsel %vm566_vm1, %v446_v40, %v598_v44  ;;  %vm564_vm3 = vcmp.ge.f32.partialorder %v438_v45, 0.0  ;;  %v596_v51 = vmul.f32 0.2, %v438_v45  ;;  %v449_v52 = vadd.f32 %v1961_v49, %v2294_v38  ;;  %v1999_v53 = vpop.f32.mrf.mxu1 }
  0xe1   : > { %v1231_v54 = vsel %vm1167_vm2, %v1047_v42, %v1199_v47  ;;  %vm1165_vm4 = vcmp.ge.f32.partialorder %v1039_v48, 0.0  ;;  %v1197_v55 = vmul.f32 0.2, %v1039_v48  ;;  %v1050_v56 = vadd.f32 %v1999_v53, %v2294_v38  ;;  %v440_v57 = vpop.f32.mrf.mxu0 }
  0xe2   : > { %v628_v58 = vsel %vm564_vm3, %v438_v45, %v596_v51  ;;  %vm567_vm5 = vcmp.ge.f32.partialorder %v449_v52, 0.0  ;;  %v599_v59 = vmul.f32 0.2, %v449_v52  ;;  %v441_v60 = vadd.f32 %v2294_v38, %v440_v57  ;;  %v1041_v61 = vpop.f32.mrf.mxu1 }
  0xe3   : > { %v1229_v62 = vsel %vm1165_vm4, %v1039_v48, %v1197_v55  ;;  %vm1168_vm6 = vcmp.ge.f32.partialorder %v1050_v56, 0.0  ;;  %v1200_v63 = vmul.f32 0.2, %v1050_v56  ;;  %v1042_v0 = vadd.f32 %v2294_v38, %v1041_v61  ;;  %v1964_v1 = vpop.f32.mrf.mxu0 }
  0xe4   : > { %v631_v2 = vsel %vm567_vm5, %v449_v52, %v599_v59  ;;  %vm565_vm7 = vcmp.ge.f32.partialorder %v441_v60, 0.0  ;;  %v597_v3 = vmul.f32 0.2, %v441_v60  ;;  %v462_v4 = vadd.f32 %v1964_v1, %v2294_v38  ;;  %v2002_v5 = vpop.f32.mrf.mxu1 }
  0xe5   : > { %v1731_v6 = vpack.c.bf16 %v631_v2, %v630_v50  ;;  %v1232_v7 = vsel %vm1168_vm6, %v1050_v56, %v1200_v63  ;;  %vm1166_vm8 = vcmp.ge.f32.partialorder %v1042_v0, 0.0  ;;  %v1198_v8 = vmul.f32 0.2, %v1042_v0  ;;  %v453_v9 = vpop.f32.mrf.mxu0 }
  0xe6   : > { %v1811_v10 = vpack.c.bf16 %v1232_v7, %v1231_v54  ;;  %v629_v11 = vsel %vm565_vm7, %v441_v60, %v597_v3  ;;  %vm570_vm9 = vcmp.ge.f32.partialorder %v462_v4, 0.0  ;;  %v602_v12 = vmul.f32 0.2, %v462_v4  ;;  %v1054_v13 = vpop.f32.mrf.mxu1 }
  0xe7   : > { %1883 = vst [vmem:[%s2309_s20 + $0x8] sm:$0xff] %v1731_v6   ;;  %v1726_v14 = vpack.c.bf16 %v629_v11, %v628_v58  ;;  %v1230_v15 = vsel %vm1166_vm8, %v1042_v0, %v1198_v8  ;;  %v1063_v16 = vadd.f32 %v2002_v5, %v2294_v38  ;;  %v454_v17 = vadd.f32 %v2294_v38, %v453_v9  ;;  %v1965_v18 = vpop.f32.mrf.mxu0 }
  0xe8   : > { %1899 = vst [vmem:[%s2309_s20 + $0x88] sm:$0xff] %v1811_v10   ;;  %v1806_v19 = vpack.c.bf16 %v1230_v15, %v1229_v62  ;;  %v634_v20 = vsel %vm570_vm9, %v462_v4, %v602_v12  ;;  %v1055_v21 = vadd.f32 %v2294_v38, %v1054_v13  ;;  %v465_v22 = vadd.f32 %v1965_v18, %v2294_v38  ;;  %v2003_v23 = vpop.f32.mrf.mxu1 }
  0xe9   : > { %1727 = vst [vmem:[%s2309_s20] sm:$0xff] %v1726_v14   ;;  %vm1171_vm10 = vcmp.ge.f32.partialorder %v1063_v16, 0.0  ;;  %v1203_v24 = vmul.f32 0.2, %v1063_v16  ;;  %vm568_vm11 = vcmp.ge.f32.partialorder %v454_v17, 0.0  ;;  %v600_v25 = vmul.f32 0.2, %v454_v17  ;;  %v456_v26 = vpop.f32.mrf.mxu0 }
  0xea   : > { %1898 = vst [vmem:[%s2309_s20 + $0x80] sm:$0xff] %v1806_v19   ;;  %vm1169_vm12 = vcmp.ge.f32.partialorder %v1055_v21, 0.0  ;;  %v1201_v27 = vmul.f32 0.2, %v1055_v21  ;;  %vm571_vm13 = vcmp.ge.f32.partialorder %v465_v22, 0.0  ;;  %v1057_v29 = vpop.f32.mrf.mxu1  ;;  %v1066_v32 = vadd.f32 %v2003_v23, %v2294_v38 }
  0xeb   : > { %v603_v28 = vmul.f32 0.2, %v465_v22  ;;  %v1235_v30 = vsel %vm1171_vm10, %v1063_v16, %v1203_v24  ;;  %v632_v31 = vsel %vm568_vm11, %v454_v17, %v600_v25  ;;  %v457_v33 = vadd.f32 %v2294_v38, %v456_v26  ;;  %v1968_v34 = vpop.f32.mrf.mxu0 }
  0xec   : > { %v1233_v35 = vsel %vm1169_vm12, %v1055_v21, %v1201_v27  ;;  %v1058_v37 = vadd.f32 %v2294_v38, %v1057_v29  ;;  %v478_v39 = vadd.f32 %v1968_v34, %v2294_v38  ;;  %v2006_v40 = vpop.f32.mrf.mxu1  ;;  %vm1172_vm14 = vcmp.ge.f32.partialorder %v1066_v32, 0.0 }
  0xed   : > { %v635_v36 = vsel %vm571_vm13, %v465_v22, %v603_v28  ;;  %v1204_v42 = vmul.f32 0.2, %v1066_v32  ;;  %vm569_vm15 = vcmp.ge.f32.partialorder %v457_v33, 0.0  ;;  %v469_v43 = vpop.f32.mrf.mxu0  ;;  %v601_v44 = vmul.f32 0.2, %v457_v33 }
  0xee   : > { %v1741_v41 = vpack.c.bf16 %v635_v36, %v634_v20  ;;  %vm1170_vm0 = vcmp.ge.f32.partialorder %v1058_v37, 0.0  ;;  %v1202_v45 = vmul.f32 0.2, %v1058_v37  ;;  %vm574_vm1 = vcmp.ge.f32.partialorder %v478_v39, 0.0  ;;  %v1070_v46 = vpop.f32.mrf.mxu1 }
  0xef   : > { %v1236_v47 = vsel %vm1172_vm14, %v1066_v32, %v1204_v42  ;;  %v606_v48 = vmul.f32 0.2, %v478_v39  ;;  %v1079_v49 = vadd.f32 %v2006_v40, %v2294_v38  ;;  %v470_v50 = vadd.f32 %v2294_v38, %v469_v43  ;;  %v1969_v51 = vpop.f32.mrf.mxu0 }
  0xf0   : > { %1885 = vst [vmem:[%s2309_s20 + $0x18] sm:$0xff] %v1741_v41   ;;  %v1821_v52 = vpack.c.bf16 %v1236_v47, %v1235_v30  ;;  %v633_v53 = vsel %vm569_vm15, %v457_v33, %v601_v44  ;;  %v1234_v54 = vsel %vm1170_vm0, %v1058_v37, %v1202_v45  ;;  %v1071_v55 = vadd.f32 %v2294_v38, %v1070_v46  ;;  %v2007_v56 = vpop.f32.mrf.mxu1 }
  0xf1   : > { %v1736_v57 = vpack.c.bf16 %v633_v53, %v632_v31  ;;  %v1816_v58 = vpack.c.bf16 %v1234_v54, %v1233_v35  ;;  %v638_v59 = vsel %vm574_vm1, %v478_v39, %v606_v48  ;;  %vm1175_vm2 = vcmp.ge.f32.partialorder %v1079_v49, 0.0  ;;  %v472_v60 = vpop.f32.mrf.mxu0 }
  0xf2   : > { %1901 = vst [vmem:[%s2309_s20 + $0x98] sm:$0xff] %v1821_v52   ;;  %v1207_v61 = vmul.f32 0.2, %v1079_v49  ;;  %vm572_vm3 = vcmp.ge.f32.partialorder %v470_v50, 0.0  ;;  %v604_v62 = vmul.f32 0.2, %v470_v50  ;;  %v1073_v63 = vpop.f32.mrf.mxu1  ;;  %v481_v1 = vadd.f32 %v1969_v51, %v2294_v38 }
  0xf3   : > { %vm1173_vm4 = vcmp.ge.f32.partialorder %v1071_v55, 0.0  ;;  %1884 = vst [vmem:[%s2309_s20 + $0x10] sm:$0xff] %v1736_v57   ;;  %1900 = vst [vmem:[%s2309_s20 + $0x90] sm:$0xff] %v1816_v58   ;;  %v1205_v0 = vmul.f32 0.2, %v1071_v55  ;;  %v1082_v2 = vadd.f32 %v2007_v56, %v2294_v38  ;;  %v473_v3 = vadd.f32 %v2294_v38, %v472_v60  ;;  %v1972_v4 = vpop.f32.mrf.mxu0 }
  0xf4   : > { %v1239_v5 = vsel %vm1175_vm2, %v1079_v49, %v1207_v61  ;;  %v636_v6 = vsel %vm572_vm3, %v470_v50, %v604_v62  ;;  %v1074_v7 = vadd.f32 %v2294_v38, %v1073_v63  ;;  %v494_v8 = vadd.f32 %v1972_v4, %v2294_v38  ;;  %v2010_v9 = vpop.f32.mrf.mxu1 }
  0xf5   : > { %v1237_v10 = vsel %vm1173_vm4, %v1071_v55, %v1205_v0  ;;  %vm575_vm5 = vcmp.ge.f32.partialorder %v481_v1, 0.0  ;;  %v607_v11 = vmul.f32 0.2, %v481_v1  ;;  %vm1176_vm6 = vcmp.ge.f32.partialorder %v1082_v2, 0.0  ;;  %v485_v12 = vpop.f32.mrf.mxu0 }
  0xf6   : > { %v1208_v13 = vmul.f32 0.2, %v1082_v2  ;;  %vm573_vm7 = vcmp.ge.f32.partialorder %v473_v3, 0.0  ;;  %v605_v14 = vmul.f32 0.2, %v473_v3  ;;  %vm1174_vm8 = vcmp.ge.f32.partialorder %v1074_v7, 0.0  ;;  %v1086_v15 = vpop.f32.mrf.mxu1 }
  0xf7   : > { %v639_v16 = vsel %vm575_vm5, %v481_v1, %v607_v11  ;;  %v1206_v17 = vmul.f32 0.2, %v1074_v7  ;;  %vm578_vm9 = vcmp.ge.f32.partialorder %v494_v8, 0.0  ;;  %v610_v18 = vmul.f32 0.2, %v494_v8  ;;  %v1973_v19 = vpop.f32.mrf.mxu0 }
  0xf8   : > { %v1751_v20 = vpack.c.bf16 %v639_v16, %v638_v59  ;;  %v1240_v21 = vsel %vm1176_vm6, %v1082_v2, %v1208_v13  ;;  %v637_v22 = vsel %vm573_vm7, %v473_v3, %v605_v14  ;;  %v1095_v23 = vadd.f32 %v2010_v9, %v2294_v38  ;;  %v2011_v24 = vpop.f32.mrf.mxu1 }
  0xf9   : > { %v1831_v25 = vpack.c.bf16 %v1240_v21, %v1239_v5  ;;  %v1746_v26 = vpack.c.bf16 %v637_v22, %v636_v6  ;;  %v1238_v27 = vsel %vm1174_vm8, %v1074_v7, %v1206_v17  ;;  %v642_v28 = vsel %vm578_vm9, %v494_v8, %v610_v18  ;;  %v488_v29 = vpop.f32.mrf.mxu0 }
  0xfa   : > { %1887 = vst [vmem:[%s2309_s20 + $0x28] sm:$0xff] %v1751_v20   ;;  %v1826_v30 = vpack.c.bf16 %v1238_v27, %v1237_v10  ;;  %vm1179_vm10 = vcmp.ge.f32.partialorder %v1095_v23, 0.0  ;;  %v1211_v31 = vmul.f32 0.2, %v1095_v23  ;;  %v486_v32 = vadd.f32 %v2294_v38, %v485_v12  ;;  %v1089_v33 = vpop.f32.mrf.mxu1 }
  0xfb   : > { %1903 = vst [vmem:[%s2309_s20 + $0xa8] sm:$0xff] %v1831_v25   ;;  %1886 = vst [vmem:[%s2309_s20 + $0x20] sm:$0xff] %v1746_v26   ;;  %v1087_v34 = vadd.f32 %v2294_v38, %v1086_v15  ;;  %v497_v35 = vadd.f32 %v1973_v19, %v2294_v38  ;;  %v1098_v36 = vadd.f32 %v2011_v24, %v2294_v38  ;;  %v1976_v39 = vpop.f32.mrf.mxu0 }
  0xfc   : > { %v489_v37 = vadd.f32 %v2294_v38, %v488_v29  ;;  %1902 = vst [vmem:[%s2309_s20 + $0xa0] sm:$0xff] %v1826_v30   ;;  %v1243_v40 = vsel %vm1179_vm10, %v1095_v23, %v1211_v31  ;;  %vm576_vm11 = vcmp.ge.f32.partialorder %v486_v32, 0.0  ;;  %v608_v41 = vmul.f32 0.2, %v486_v32  ;;  %v2014_v43 = vpop.f32.mrf.mxu1 }
  0xfd   : > { %v1090_v42 = vadd.f32 %v2294_v38, %v1089_v33  ;;  %vm1177_vm12 = vcmp.ge.f32.partialorder %v1087_v34, 0.0  ;;  %v1209_v44 = vmul.f32 0.2, %v1087_v34  ;;  %vm579_vm13 = vcmp.ge.f32.partialorder %v497_v35, 0.0  ;;  %v501_v46 = vpop.f32.mrf.mxu0 }
  0xfe   : > { %v611_v45 = vmul.f32 0.2, %v497_v35  ;;  %v640_v47 = vsel %vm576_vm11, %v486_v32, %v608_v41  ;;  %vm1180_vm14 = vcmp.ge.f32.partialorder %v1098_v36, 0.0  ;;  %v1212_v48 = vmul.f32 0.2, %v1098_v36  ;;  %v1102_v49 = vpop.f32.mrf.mxu1 }
  0xff   : > { %vm577_vm15 = vcmp.ge.f32.partialorder %v489_v37, 0.0  ;;  %v1241_v50 = vsel %vm1177_vm12, %v1087_v34, %v1209_v44  ;;  %v609_v52 = vmul.f32 0.2, %v489_v37  ;;  %vm1178_vm0 = vcmp.ge.f32.partialorder %v1090_v42, 0.0  ;;  %v1977_v53 = vpop.f32.mrf.mxu0 }
 0x100   : > { %v643_v51 = vsel %vm579_vm13, %v497_v35, %v611_v45  ;;  %v1244_v55 = vsel %vm1180_vm14, %v1098_v36, %v1212_v48  ;;  %v1210_v56 = vmul.f32 0.2, %v1090_v42  ;;  %v510_v57 = vadd.f32 %v1976_v39, %v2294_v38  ;;  %v2015_v58 = vpop.f32.mrf.mxu1 }
 0x101   : > { %v1761_v54 = vpack.c.bf16 %v643_v51, %v642_v28  ;;  %v1841_v59 = vpack.c.bf16 %v1244_v55, %v1243_v40  ;;  %v641_v60 = vsel %vm577_vm15, %v489_v37, %v609_v52  ;;  %v1111_v61 = vadd.f32 %v2014_v43, %v2294_v38  ;;  %v504_v63 = vpop.f32.mrf.mxu0 }
 0x102   : > { %v502_v62 = vadd.f32 %v2294_v38, %v501_v46  ;;  %v1756_v0 = vpack.c.bf16 %v641_v60, %v640_v47  ;;  %v1242_v1 = vsel %vm1178_vm0, %v1090_v42, %v1210_v56  ;;  %vm582_vm1 = vcmp.ge.f32.partialorder %v510_v57, 0.0  ;;  %v1105_v3 = vpop.f32.mrf.mxu1 }
 0x103   : > { %1889 = vst [vmem:[%s2309_s20 + $0x38] sm:$0xff] %v1761_v54   ;;  %v614_v2 = vmul.f32 0.2, %v510_v57  ;;  %1905 = vst [vmem:[%s2309_s20 + $0xb8] sm:$0xff] %v1841_v59   ;;  %v1836_v4 = vpack.c.bf16 %v1242_v1, %v1241_v50  ;;  %vm1183_vm2 = vcmp.ge.f32.partialorder %v1111_v61, 0.0  ;;  %v1980_v6 = vpop.f32.mrf.mxu0  ;;  %v1103_v9 = vadd.f32 %v2294_v38, %v1102_v49 }
 0x104   : > { %v1215_v5 = vmul.f32 0.2, %v1111_v61  ;;  %vm580_vm3 = vcmp.ge.f32.partialorder %v502_v62, 0.0  ;;  %1888 = vst [vmem:[%s2309_s20 + $0x30] sm:$0xff] %v1756_v0   ;;  %v612_v8 = vmul.f32 0.2, %v502_v62  ;;  %v513_v10 = vadd.f32 %v1977_v53, %v2294_v38  ;;  %v2018_v11 = vpop.f32.mrf.mxu1 }
 0x105   : > { %v646_v7 = vsel %vm582_vm1, %v510_v57, %v614_v2  ;;  %1904 = vst [vmem:[%s2309_s20 + $0xb0] sm:$0xff] %v1836_v4   ;;  %v1114_v13 = vadd.f32 %v2015_v58, %v2294_v38  ;;  %v505_v14 = vadd.f32 %v2294_v38, %v504_v63  ;;  %v1106_v15 = vadd.f32 %v2294_v38, %v1105_v3  ;;  %v517_v16 = vpop.f32.mrf.mxu0 }
 0x106   : > { %v1247_v12 = vsel %vm1183_vm2, %v1111_v61, %v1215_v5  ;;  %v644_v17 = vsel %vm580_vm3, %v502_v62, %v612_v8  ;;  %vm1181_vm4 = vcmp.ge.f32.partialorder %v1103_v9, 0.0  ;;  %v1213_v18 = vmul.f32 0.2, %v1103_v9  ;;  %v1118_v19 = vpop.f32.mrf.mxu1 }
 0x107   : > { %vm583_vm5 = vcmp.ge.f32.partialorder %v513_v10, 0.0  ;;  %v615_v20 = vmul.f32 0.2, %v513_v10  ;;  %vm1184_vm6 = vcmp.ge.f32.partialorder %v1114_v13, 0.0  ;;  %v1216_v21 = vmul.f32 0.2, %v1114_v13  ;;  %v1981_v22 = vpop.f32.mrf.mxu0 }
 0x108   : > { %vm581_vm7 = vcmp.ge.f32.partialorder %v505_v14, 0.0  ;;  %v1245_v23 = vsel %vm1181_vm4, %v1103_v9, %v1213_v18  ;;  %v613_v24 = vmul.f32 0.2, %v505_v14  ;;  %vm1182_vm8 = vcmp.ge.f32.partialorder %v1106_v15, 0.0  ;;  %v2019_v26 = vpop.f32.mrf.mxu1 }
 0x109   : > { %v1214_v25 = vmul.f32 0.2, %v1106_v15  ;;  %v647_v27 = vsel %vm583_vm5, %v513_v10, %v615_v20  ;;  %v1248_v28 = vsel %vm1184_vm6, %v1114_v13, %v1216_v21  ;;  %v526_v29 = vadd.f32 %v1980_v6, %v2294_v38  ;;  %v520_v31 = vpop.f32.mrf.mxu0 }
 0x10a   : > { %v1127_v30 = vadd.f32 %v2018_v11, %v2294_v38  ;;  %v1771_v32 = vpack.c.bf16 %v647_v27, %v646_v7  ;;  %v1851_v33 = vpack.c.bf16 %v1248_v28, %v1247_v12  ;;  %v645_v34 = vsel %vm581_vm7, %v505_v14, %v613_v24  ;;  %v1121_v36 = vpop.f32.mrf.mxu1 }
 0x10b   : > { %v1246_v35 = vsel %vm1182_vm8, %v1106_v15, %v1214_v25  ;;  %v1766_v37 = vpack.c.bf16 %v645_v34, %v644_v17  ;;  %vm586_vm9 = vcmp.ge.f32.partialorder %v526_v29, 0.0  ;;  %v618_v40 = vmul.f32 0.2, %v526_v29  ;;  %v1984_v41 = vpop.f32.mrf.mxu0 }
 0x10c   : > { %v1846_v39 = vpack.c.bf16 %v1246_v35, %v1245_v23  ;;  %1891 = vst [vmem:[%s2309_s20 + $0x48] sm:$0xff] %v1771_v32   ;;  %1907 = vst [vmem:[%s2309_s20 + $0xc8] sm:$0xff] %v1851_v33   ;;  %vm1187_vm10 = vcmp.ge.f32.partialorder %v1127_v30, 0.0  ;;  %v1219_v42 = vmul.f32 0.2, %v1127_v30  ;;  %v518_v43 = vadd.f32 %v2294_v38, %v517_v16  ;;  %v2022_v45 = vpop.f32.mrf.mxu1 }
 0x10d   : > { %v1119_v44 = vadd.f32 %v2294_v38, %v1118_v19  ;;  %1890 = vst [vmem:[%s2309_s20 + $0x40] sm:$0xff] %v1766_v37   ;;  %v650_v46 = vsel %vm586_vm9, %v526_v29, %v618_v40  ;;  %v529_v47 = vadd.f32 %v1981_v22, %v2294_v38  ;;  %v1130_v48 = vadd.f32 %v2019_v26, %v2294_v38  ;;  %v533_v50 = vpop.f32.mrf.mxu0 }
 0x10e   : > { %1906 = vst [vmem:[%s2309_s20 + $0xc0] sm:$0xff] %v1846_v39   ;;  %v521_v49 = vadd.f32 %v2294_v38, %v520_v31  ;;  %v1251_v51 = vsel %vm1187_vm10, %v1127_v30, %v1219_v42  ;;  %vm584_vm11 = vcmp.ge.f32.partialorder %v518_v43, 0.0  ;;  %v616_v52 = vmul.f32 0.2, %v518_v43  ;;  %v1134_v53 = vpop.f32.mrf.mxu1 }
 0x10f   : > { %vm1185_vm12 = vcmp.ge.f32.partialorder %v1119_v44, 0.0  ;;  %v1217_v54 = vmul.f32 0.2, %v1119_v44  ;;  %vm587_vm13 = vcmp.ge.f32.partialorder %v529_v47, 0.0  ;;  %v619_v55 = vmul.f32 0.2, %v529_v47  ;;  %v1985_v56 = vpop.f32.mrf.mxu0 }
 0x110   : > { %vm1188_vm14 = vcmp.ge.f32.partialorder %v1130_v48, 0.0  ;;  %v648_v57 = vsel %vm584_vm11, %v518_v43, %v616_v52  ;;  %v1220_v58 = vmul.f32 0.2, %v1130_v48  ;;  %vm585_vm15 = vcmp.ge.f32.partialorder %v521_v49, 0.0  ;;  %v2023_v60 = vpop.f32.mrf.mxu1 }
 0x111   : > { %v617_v59 = vmul.f32 0.2, %v521_v49  ;;  %v1249_v61 = vsel %vm1185_vm12, %v1119_v44, %v1217_v54  ;;  %v651_v62 = vsel %vm587_vm13, %v529_v47, %v619_v55  ;;  %v1122_v63 = vadd.f32 %v2294_v38, %v1121_v36  ;;  %v536_v1 = vpop.f32.mrf.mxu0 }
 0x112   : > { %v542_v0 = vadd.f32 %v1984_v41, %v2294_v38  ;;  %v1781_v2 = vpack.c.bf16 %v651_v62, %v650_v46  ;;  %v1252_v3 = vsel %vm1188_vm14, %v1130_v48, %v1220_v58  ;;  %v1143_v5 = vadd.f32 %v2022_v45, %v2294_v38  ;;  %v1137_v6 = vpop.f32.mrf.mxu1 }
 0x113   : > { %v649_v4 = vsel %vm585_vm15, %v521_v49, %v617_v59  ;;  %v1861_v7 = vpack.c.bf16 %v1252_v3, %v1251_v51  ;;  %vm1186_vm0 = vcmp.ge.f32.partialorder %v1122_v63, 0.0  ;;  %v1218_v9 = vmul.f32 0.2, %v1122_v63  ;;  %v1988_v10 = vpop.f32.mrf.mxu0 }
 0x114   : > { %v1776_v8 = vpack.c.bf16 %v649_v4, %v648_v57  ;;  %1893 = vst [vmem:[%s2309_s20 + $0x58] sm:$0xff] %v1781_v2   ;;  %vm590_vm1 = vcmp.ge.f32.partialorder %v542_v0, 0.0  ;;  %v622_v11 = vmul.f32 0.2, %v542_v0  ;;  %vm1191_vm2 = vcmp.ge.f32.partialorder %v1143_v5, 0.0  ;;  %v2026_v13 = vpop.f32.mrf.mxu1 }
 0x115   : > { %v1223_v12 = vmul.f32 0.2, %v1143_v5  ;;  %1909 = vst [vmem:[%s2309_s20 + $0xd8] sm:$0xff] %v1861_v7   ;;  %v1250_v14 = vsel %vm1186_vm0, %v1122_v63, %v1218_v9  ;;  %v534_v15 = vadd.f32 %v2294_v38, %v533_v50  ;;  %v1135_v16 = vadd.f32 %v2294_v38, %v1134_v53  ;;  %v549_v20 = vpop.f32.mrf.mxu0 }
 0x116   : > { %1892 = vst [vmem:[%s2309_s20 + $0x50] sm:$0xff] %v1776_v8   ;;  %v545_v17 = vadd.f32 %v1985_v56, %v2294_v38  ;;  %v1856_v18 = vpack.c.bf16 %v1250_v14, %v1249_v61  ;;  %v1146_v19 = vadd.f32 %v2023_v60, %v2294_v38  ;;  %v1150_v21 = vpop.f32.mrf.mxu1  ;;  %v654_v22 = vsel %vm590_vm1, %v542_v0, %v622_v11 }
 0x117   : > { %v1255_v23 = vsel %vm1191_vm2, %v1143_v5, %v1223_v12  ;;  %vm588_vm3 = vcmp.ge.f32.partialorder %v534_v15, 0.0  ;;  %v620_v24 = vmul.f32 0.2, %v534_v15  ;;  %vm1189_vm6 = vcmp.ge.f32.partialorder %v1135_v16, 0.0  ;;  %v1989_v34 = vpop.f32.mrf.mxu0 }
 0x118   : > { %1908 = vst [vmem:[%s2309_s20 + $0xd0] sm:$0xff] %v1856_v18   ;;  %vm591_vm4 = vcmp.ge.f32.partialorder %v545_v17, 0.0  ;;  %v623_v25 = vmul.f32 0.2, %v545_v17  ;;  %vm1192_vm5 = vcmp.ge.f32.partialorder %v1146_v19, 0.0  ;;  %v537_v28 = vadd.f32 %v2294_v38, %v536_v1  ;;  %v2027_v35 = vpop.f32.mrf.mxu1 }
 0x119   : > { %v1224_v26 = vmul.f32 0.2, %v1146_v19  ;;  %v1221_v27 = vmul.f32 0.2, %v1135_v16  ;;  %v1138_v29 = vadd.f32 %v2294_v38, %v1137_v6  ;;  %v558_v32 = vadd.f32 %v1988_v10, %v2294_v38  ;;  %v552_v48 = vpop.f32.mrf.mxu0 }
 0x11a   : > { %v655_v30 = vsel %vm591_vm4, %v545_v17, %v623_v25  ;;  %v1159_v33 = vadd.f32 %v2026_v13, %v2294_v38  ;;  %vm589_vm7 = vcmp.ge.f32.partialorder %v537_v28, 0.0  ;;  %v621_v39 = vmul.f32 0.2, %v537_v28  ;;  %v1153_v49 = vpop.f32.mrf.mxu1 }
 0x11b   : > { %v1256_v31 = vsel %vm1192_vm5, %v1146_v19, %v1224_v26  ;;  %v1791_v36 = vpack.c.bf16 %v655_v30, %v654_v22  ;;  %vm1190_vm8 = vcmp.ge.f32.partialorder %v1138_v29, 0.0  ;;  %v1222_v40 = vmul.f32 0.2, %v1138_v29 }
 0x11c   : > { %v1871_v37 = vpack.c.bf16 %v1256_v31, %v1255_v23  ;;  %v652_v41 = vsel %vm588_vm3, %v534_v15, %v620_v24  ;;  %v653_v42 = vsel %vm589_vm7, %v537_v28, %v621_v39  ;;  %v550_v43 = vadd.f32 %v2294_v38, %v549_v20 }
 0x11d   : > { %1895 = vst [vmem:[%s2309_s20 + $0x68] sm:$0xff] %v1791_v36   ;;  %v1253_v44 = vsel %vm1189_vm6, %v1135_v16, %v1221_v27  ;;  %v1786_v45 = vpack.c.bf16 %v653_v42, %v652_v41  ;;  %v1254_v46 = vsel %vm1190_vm8, %v1138_v29, %v1222_v40  ;;  %v1151_v47 = vadd.f32 %v2294_v38, %v1150_v21 }
 0x11e   : > { %1911 = vst [vmem:[%s2309_s20 + $0xe8] sm:$0xff] %v1871_v37   ;;  %v1866_v50 = vpack.c.bf16 %v1254_v46, %v1253_v44  ;;  %vm594_vm9 = vcmp.ge.f32.partialorder %v558_v32, 0.0  ;;  %v626_v51 = vmul.f32 0.2, %v558_v32  ;;  %vm1195_vm10 = vcmp.ge.f32.partialorder %v1159_v33, 0.0 }
 0x11f   : > { %1894 = vst [vmem:[%s2309_s20 + $0x60] sm:$0xff] %v1786_v45   ;;  %v1227_v52 = vmul.f32 0.2, %v1159_v33  ;;  %vm592_vm11 = vcmp.ge.f32.partialorder %v550_v43, 0.0  ;;  %v561_v53 = vadd.f32 %v1989_v34, %v2294_v38  ;;  %v1162_v54 = vadd.f32 %v2027_v35, %v2294_v38 }
 0x120   : > { %1910 = vst [vmem:[%s2309_s20 + $0xe0] sm:$0xff] %v1866_v50   ;;  %v624_v55 = vmul.f32 0.2, %v550_v43  ;;  %vm1193_vm12 = vcmp.ge.f32.partialorder %v1151_v47, 0.0  ;;  %v553_v56 = vadd.f32 %v2294_v38, %v552_v48  ;;  %v1154_v57 = vadd.f32 %v2294_v38, %v1153_v49 }
 0x121   : > { %v1225_v58 = vmul.f32 0.2, %v1151_v47  ;;  %vm595_vm13 = vcmp.ge.f32.partialorder %v561_v53, 0.0  ;;  %v627_v59 = vmul.f32 0.2, %v561_v53  ;;  %vm1196_vm14 = vcmp.ge.f32.partialorder %v1162_v54, 0.0 }
 0x122   : > { %v1228_v60 = vmul.f32 0.2, %v1162_v54  ;;  %vm593_vm15 = vcmp.ge.f32.partialorder %v553_v56, 0.0  ;;  %v625_v61 = vmul.f32 0.2, %v553_v56  ;;  %vm1194_vm0 = vcmp.ge.f32.partialorder %v1154_v57, 0.0 }
 0x123   : > { %v658_v62 = vsel %vm594_vm9, %v558_v32, %v626_v51  ;;  %v1259_v63 = vsel %vm1195_vm10, %v1159_v33, %v1227_v52  ;;  %v659_v0 = vsel %vm595_vm13, %v561_v53, %v627_v59  ;;  %v1226_v1 = vmul.f32 0.2, %v1154_v57 }
 0x124   : > { %v656_v38 = vsel %vm592_vm11, %v550_v43, %v624_v55  ;;  %v1801_v2 = vpack.c.bf16 %v659_v0, %v658_v62  ;;  %v1260_v3 = vsel %vm1196_vm14, %v1162_v54, %v1228_v60  ;;  %v657_v4 = vsel %vm593_vm15, %v553_v56, %v625_v61 }
 0x125   : > { %v1257_v5 = vsel %vm1193_vm12, %v1151_v47, %v1225_v58  ;;  %v1881_v6 = vpack.c.bf16 %v1260_v3, %v1259_v63  ;;  %v1796_v7 = vpack.c.bf16 %v657_v4, %v656_v38  ;;  %v1258_v8 = vsel %vm1194_vm0, %v1154_v57, %v1226_v1 }
 0x126   : > { %1897 = vst [vmem:[%s2309_s20 + $0x78] sm:$0xff] %v1801_v2   ;;  %v1876_v9 = vpack.c.bf16 %v1258_v8, %v1257_v5 }
 0x127   : > { %1913 = vst [vmem:[%s2309_s20 + $0xf8] sm:$0xff] %v1881_v6   ;;  %1896 = vst [vmem:[%s2309_s20 + $0x70] sm:$0xff] %v1796_v7  }
 0x128   : > { %1912 = vst [vmem:[%s2309_s20 + $0xf0] sm:$0xff] %v1876_v9  }
 0x129 PF: > { %s13_s16 = sadd.s32 1, %s2144_s16   ;;  %s2424_s12 = smov %s2136_s14 }
 0x12a   : > { %p10_p7 = scmp.ge.s32.totalorder %s13_s16, 6   ;;  %s2425_s13 = smov %s2140_s15 }
 0x12b   : > { %s2426_s14 = smov %s2429_s17  ;;  %s2427_s15 = smov %s2433_s18 }
 0x12c   :  { %12 = sbr.rel (!%p10_p7) target bundleno = 3 (0x3), region = 62 }

// kernel: discriminator_forward.6
= control target key start
LH: loop header
LB: loop body
LE: loop exit
PB: predicated region body
PF: predicated region fallthrough
CT: control target
= control target key end

     0   :  { %s1433_s12 = smov 0   ;;  %s2033_s0 = inlined_call_operand.vmem [shape: bf16[2,256,128], index: 0, kind: input, shape index: {}]   ;;  %s2034_s1 = inlined_call_operand.vmem [shape: bf16[1,128,128], index: 1, kind: input, shape index: {}]   ;;  %s2035_s2 = inlined_call_operand.vmem [shape: f32[1,128], index: 2, kind: input, shape index: {}]   ;;  %s2036_s3 = inlined_call_operand.vmem [shape: bf16[2,256,128], index: 3, kind: output, shape index: {}]  }
   0x1 LB: > { %s1086_s13 = sadd.s32 4294967295, %s1411_s12   ;;  %p1090_p0 = scmp.ge.s32.totalorder %s1411_s12, 1  ;;  %s1411_s12 = sphi %s1433_s12, %s13_s12  }
   0x2   : > { %p137_p1 = scmp.lt.s32.totalorder %s1411_s12, 3 }
   0x4   : > { %p138_p2 = pnand %p1090_p0, %p137_p1 }
   0x5   : > { %p161_p3 = scmp.lt.s32.totalorder (!%p138_p2), %s1086_s13, 1 }
   0x6   : > { %141 = sbr.rel (%p138_p2) target bundleno = 385 (0x181), region = 32 }
   0xb   : > { %v1379_v0 = vld [vmem:[%s2034_s1 + $0x38] sm:$0xff]   ;;  %v1380_v1 = vld [vmem:[%s2034_s1 + $0x30] sm:$0xff]   ;;  %s2052_s13 = smov (!%p161_p3, %s1086_s13), 1  ;;  %v1381_v2 = vld [vmem:[%s2034_s1 + $0x28] sm:$0xff]  }
   0xc   : > { %1307 = vmatprep.subr.bf16.mxu0 %v1379_v0  ;;  %1355 = vmatprep.subr.bf16.mxu1 %v1379_v0  ;;  %s1154_s20 = sshll.u32 %s2052_s13, 7  ;;  %v1382_v3 = vld [vmem:[%s2034_s1 + $0x20] sm:$0xff]   ;;  %v1383_v5 = vld [vmem:[%s2034_s1 + $0x18] sm:$0xff]   ;;  %v1384_v6 = vld [vmem:[%s2034_s1 + $0x10] sm:$0xff]  }
   0xd   : > { %1308 = vmatpush3.bf16.msra.mxu0 %v1379_v0  ;;  %1363 = vmatpush3.bf16.msra.mxu1 %v1379_v0  ;;  %s1458_s23 = scalar_lea.vmem %s2033_s0, %s1154_s20  ;;  %v1385_v8 = vld [vmem:[%s2034_s1 + $0x8] sm:$0xff]   ;;  %v1386_v9 = vld [vmem:[%s2034_s1] sm:$0xff]   ;;  %s1992_s11 = scalar_lea.vmem %s2036_s3, %s1154_s20 }
   0xe   : > { %1309 = vmatprep.subr.bf16.mxu0 %v1380_v1  ;;  %1356 = vmatprep.subr.bf16.mxu1 %v1380_v1  ;;  %v1387_v4 = vld [vmem:[%s1458_s23] sm:$0xff]   ;;  %v1388_v10 = vld [vmem:[%s1458_s23 + $0x8] sm:$0xff]   ;;  %v1389_v12 = vld [vmem:[%s1458_s23 + $0x10] sm:$0xff]  }
   0xf   : > { %1323 = vmatprep.mubr.bf16.mxu0 %v1387_v4  ;;  %v1395_v7 = vld [vmem:[%s1458_s23 + $0x40] sm:$0xff]   ;;  %v1396_v11 = vld [vmem:[%s1458_s23 + $0x48] sm:$0xff]   ;;  %v1397_v13 = vld [vmem:[%s1458_s23 + $0x50] sm:$0xff]  }
  0x10   : > { %1339 = vmatprep.mubr.bf16.mxu1 %v1395_v7  ;;  %v1390_v14 = vld [vmem:[%s1458_s23 + $0x18] sm:$0xff]   ;;  %v1391_v16 = vld [vmem:[%s1458_s23 + $0x20] sm:$0xff]   ;;  %v1392_v18 = vld [vmem:[%s1458_s23 + $0x28] sm:$0xff]  }
  0x11   : > { %1310 = vmatpush3.bf16.msra.mxu0 %v1380_v1  ;;  %1364 = vmatpush3.bf16.msra.mxu1 %v1380_v1  ;;  %v1398_v15 = vld [vmem:[%s1458_s23 + $0x58] sm:$0xff]   ;;  %v1399_v17 = vld [vmem:[%s1458_s23 + $0x60] sm:$0xff]   ;;  %v1400_v19 = vld [vmem:[%s1458_s23 + $0x68] sm:$0xff]  }
  0x12   : > { %1311 = vmatprep.subr.bf16.mxu0 %v1381_v2  ;;  %1357 = vmatprep.subr.bf16.mxu1 %v1381_v2  ;;  %v1393_v20 = vld [vmem:[%s1458_s23 + $0x30] sm:$0xff]   ;;  %v1394_v22 = vld [vmem:[%s1458_s23 + $0x38] sm:$0xff]   ;;  %v1498_v28 = vld [vmem:[%s2035_s2] ss:$0 sm:$0xff] }
  0x13   : > { %v1401_v21 = vld [vmem:[%s1458_s23 + $0x70] sm:$0xff]   ;;  %v1402_v23 = vld [vmem:[%s1458_s23 + $0x78] sm:$0xff]  }
  0x15   : > { %1312 = vmatpush3.bf16.msra.mxu0 %v1381_v2  ;;  %1365 = vmatpush3.bf16.msra.mxu1 %v1381_v2 }
  0x16   : > { %1313 = vmatprep.subr.bf16.mxu0 %v1382_v3  ;;  %1358 = vmatprep.subr.bf16.mxu1 %v1382_v3 }
  0x19   : > { %1314 = vmatpush3.bf16.msra.mxu0 %v1382_v3  ;;  %1366 = vmatpush3.bf16.msra.mxu1 %v1382_v3 }
  0x1a   : > { %1315 = vmatprep.subr.bf16.mxu0 %v1383_v5  ;;  %1359 = vmatprep.subr.bf16.mxu1 %v1383_v5 }
  0x1d   : > { %1316 = vmatpush3.bf16.msra.mxu0 %v1383_v5  ;;  %1367 = vmatpush3.bf16.msra.mxu1 %v1383_v5 }
  0x1e   : > { %1317 = vmatprep.subr.bf16.mxu0 %v1384_v6  ;;  %1360 = vmatprep.subr.bf16.mxu1 %v1384_v6 }
  0x21   : > { %1318 = vmatpush3.bf16.msra.mxu0 %v1384_v6  ;;  %1368 = vmatpush3.bf16.msra.mxu1 %v1384_v6 }
  0x22   : > { %1319 = vmatprep.subr.bf16.mxu0 %v1385_v8  ;;  %1361 = vmatprep.subr.bf16.mxu1 %v1385_v8 }
  0x25   : > { %1320 = vmatpush3.bf16.msra.mxu0 %v1385_v8  ;;  %1369 = vmatpush3.bf16.msra.mxu1 %v1385_v8 }
  0x26   : > { %1321 = vmatprep.subr.bf16.mxu0 %v1386_v9  ;;  %1362 = vmatprep.subr.bf16.mxu1 %v1386_v9 }
  0x29   : > { %1322 = vmatpush3.bf16.msra.mxu0 %v1386_v9  ;;  %1370 = vmatpush3.bf16.msra.mxu1 %v1386_v9 }
  0x2c   : > { %1324 = vmatmul.mubr.bf16.vlgmr.msra.gmra.mxu0 %v1388_v10  ;;  %1340 = vmatmul.mubr.bf16.vlgmr.msra.gmra.mxu1 %v1396_v11 }
  0x2d   : > { %1327 = vmatprep.mubr.bf16.mxu0 %v1389_v12  ;;  %1343 = vmatprep.mubr.bf16.mxu1 %v1397_v13 }
  0x34   : > { %1328 = vmatmul.mubr.bf16.gmra.mxu0 %v1390_v14  ;;  %1344 = vmatmul.mubr.bf16.gmra.mxu1 %v1398_v15 }
  0x35   : > { %1331 = vmatprep.mubr.bf16.mxu0 %v1391_v16  ;;  %1347 = vmatprep.mubr.bf16.mxu1 %v1399_v17 }
  0x3c   : > { %1332 = vmatmul.mubr.bf16.gmra.mxu0 %v1392_v18  ;;  %1348 = vmatmul.mubr.bf16.gmra.mxu1 %v1400_v19 }
  0x3d   : > { %1335 = vmatprep.mubr.bf16.mxu0 %v1393_v20  ;;  %1351 = vmatprep.mubr.bf16.mxu1 %v1401_v21 }
  0x44   : > { %1336 = vmatmul.mubr.bf16.gmra.mxu0 %v1394_v22  ;;  %1352 = vmatmul.mubr.bf16.gmra.mxu1 %v1402_v23 }
  0xec   : > { %v1325_v24 = vpop.f32.mrf.mxu0  ;;  %v1491_v25 = vpop.f32.mrf.mxu1 }
  0xed   : > { %v1506_v33 = vadd.f32 %v1325_v24, %v1498_v28 }
  0xee   : > { %v405_v26 = vpop.f32.mrf.mxu0  ;;  %v1493_v27 = vpop.f32.mrf.mxu1 }
  0xef   : > { %v1501_v30 = vadd.f32 %v1498_v28, %v405_v26  ;;  %v572_v42 = vmul.f32 %v1506_v33, %v1506_v33 }
  0xf0   : > { %v1326_v29 = vpop.f32.mrf.mxu0  ;;  %v1503_v32 = vpop.f32.mrf.mxu1 }
  0xf1   : > { %v570_v36 = vmul.f32 %v1501_v30, %v1501_v30  ;;  %v1514_v37 = vadd.f32 %v1326_v29, %v1498_v28 }
  0xf2   : > { %v408_v31 = vpop.f32.mrf.mxu0  ;;  %v1520_v41 = vpop.f32.mrf.mxu1 }
  0xf3   : > { %v1509_v34 = vadd.f32 %v1498_v28, %v408_v31  ;;  %v573_v47 = vmul.f32 %v1514_v37, %v1514_v37 }
  0xf4   : > { %v1329_v35 = vpop.f32.mrf.mxu0  ;;  %v1534_v52 = vpop.f32.mrf.mxu1 }
  0xf5   : > { %v532_v38 = vadd.f32 %v1509_v34, %v1501_v30  ;;  %v571_v39 = vmul.f32 %v1509_v34, %v1509_v34  ;;  %v1532_v50 = vadd.f32 %v1329_v35, %v1498_v28 }
  0xf6   : > { %v421_v40 = vpop.f32.mrf.mxu0  ;;  %v1548_v63 = vpop.f32.mrf.mxu1 }
  0xf7   : > { %v533_v43 = vadd.f32 %v532_v38, %v1506_v33  ;;  %v602_v44 = vadd.f32 %v571_v39, %v570_v36  ;;  %v1526_v45 = vadd.f32 %v1498_v28, %v421_v40  ;;  %v576_v0 = vmul.f32 %v1532_v50, %v1532_v50 }
  0xf8   : > { %v1330_v46 = vpop.f32.mrf.mxu0  ;;  %v1562_v10 = vpop.f32.mrf.mxu1 }
  0xf9   : > { %v603_v48 = vadd.f32 %v602_v44, %v572_v42  ;;  %v534_v49 = vadd.f32 %v533_v43, %v1514_v37  ;;  %v574_v54 = vmul.f32 %v1526_v45, %v1526_v45  ;;  %v1543_v59 = vadd.f32 %v1330_v46, %v1498_v28 }
  0xfa   : > { %v424_v51 = vpop.f32.mrf.mxu0  ;;  %v488_v21 = vpop.f32.mrf.mxu1 }
  0xfb   : > { %v535_v53 = vadd.f32 %v534_v49, %v1526_v45  ;;  %v604_v55 = vadd.f32 %v603_v48, %v573_v47  ;;  %v1540_v56 = vadd.f32 %v1498_v28, %v424_v51  ;;  %v577_v5 = vmul.f32 %v1543_v59, %v1543_v59 }
  0xfc   : > { %v1333_v57 = vpop.f32.mrf.mxu0  ;;  %v1349_v40 = vpop.f32.mrf.mxu1 }
  0xfd   : > { %v605_v58 = vadd.f32 %v604_v55, %v574_v54  ;;  %v536_v60 = vadd.f32 %v535_v53, %v1540_v56  ;;  %v575_v61 = vmul.f32 %v1540_v56, %v1540_v56  ;;  %v1560_v8 = vadd.f32 %v1333_v57, %v1498_v28 }
  0xfe   : > { %v437_v62 = vpop.f32.mrf.mxu0  ;;  %v501_v53 = vpop.f32.mrf.mxu1  ;;  %v1604_v55 = vadd.f32 %v1498_v28, %v1493_v27 }
  0xff   : > { %v537_v1 = vadd.f32 %v536_v60, %v1532_v50  ;;  %v606_v2 = vadd.f32 %v605_v58, %v575_v61  ;;  %v1554_v3 = vadd.f32 %v1498_v28, %v437_v62  ;;  %v580_v22 = vmul.f32 %v1560_v8, %v1560_v8 }
 0x100   : > { %v1334_v4 = vpop.f32.mrf.mxu0  ;;  %v1611_v62 = vadd.f32 %v1498_v28, %v1520_v41  ;;  %v586_v27 = vmul.f32 %v1604_v55, %v1604_v55 }
 0x101   : > { %v607_v6 = vadd.f32 %v606_v2, %v576_v0  ;;  %v538_v7 = vadd.f32 %v537_v1, %v1543_v59  ;;  %v578_v12 = vmul.f32 %v1554_v3, %v1554_v3  ;;  %v1571_v17 = vadd.f32 %v1334_v4, %v1498_v28  ;;  %v1350_v1 = vpop.f32.mrf.mxu1 }
 0x102   : > { %v440_v9 = vpop.f32.mrf.mxu0  ;;  %v1616_v2 = vadd.f32 %v1491_v25, %v1498_v28 }
 0x103   : > { %v539_v11 = vadd.f32 %v538_v7, %v1554_v3  ;;  %v608_v13 = vadd.f32 %v607_v6, %v577_v5  ;;  %v1568_v14 = vadd.f32 %v1498_v28, %v440_v9  ;;  %v581_v31 = vmul.f32 %v1571_v17, %v1571_v17 }
 0x104   : > { %v1337_v15 = vpop.f32.mrf.mxu0  ;;  %v1623_v6 = vadd.f32 %v1503_v32, %v1498_v28  ;;  %v587_v7 = vmul.f32 %v1611_v62, %v1611_v62  ;;  %v588_v25 = vmul.f32 %v1616_v2, %v1616_v2 }
 0x105   : > { %v609_v16 = vadd.f32 %v608_v13, %v578_v12  ;;  %v540_v18 = vadd.f32 %v539_v11, %v1568_v14  ;;  %v579_v19 = vmul.f32 %v1568_v14, %v1568_v14  ;;  %v1586_v38 = vadd.f32 %v1337_v15, %v1498_v28  ;;  %v504_v11 = vpop.f32.mrf.mxu1 }
 0x106   : > { %v453_v20 = vpop.f32.mrf.mxu0  ;;  %v1633_v15 = vadd.f32 %v1498_v28, %v1548_v63  ;;  %v589_v32 = vmul.f32 %v1623_v6, %v1623_v6 }
 0x107   : > { %v541_v23 = vadd.f32 %v540_v18, %v1560_v8  ;;  %v610_v24 = vadd.f32 %v609_v16, %v579_v19  ;;  %v1580_v26 = vadd.f32 %v1498_v28, %v453_v20  ;;  %v584_v54 = vmul.f32 %v1586_v38, %v1586_v38  ;;  %v1353_v20 = vpop.f32.mrf.mxu1 }
 0x108   : > { %v1338_v29 = vpop.f32.mrf.mxu0  ;;  %v1639_v19 = vadd.f32 %v1498_v28, %v488_v21  ;;  %v590_v63 = vmul.f32 %v1633_v15, %v1633_v15 }
 0x109   : > { %v611_v35 = vadd.f32 %v610_v24, %v580_v22  ;;  %v542_v36 = vadd.f32 %v541_v23, %v1571_v17  ;;  %v582_v43 = vmul.f32 %v1580_v26, %v1580_v26  ;;  %v1595_v48 = vadd.f32 %v1338_v29, %v1498_v28 }
 0x10a   : > { %v456_v39 = vpop.f32.mrf.mxu0  ;;  %v1643_v22 = vadd.f32 %v1534_v52, %v1498_v28  ;;  %v591_v21 = vmul.f32 %v1639_v19, %v1639_v19 }
 0x10b   : > { %v543_v42 = vadd.f32 %v542_v36, %v1580_v26  ;;  %v612_v44 = vadd.f32 %v611_v35, %v581_v31  ;;  %v1592_v46 = vadd.f32 %v1498_v28, %v456_v39  ;;  %v585_v60 = vmul.f32 %v1595_v48, %v1595_v48  ;;  %v517_v36 = vpop.f32.mrf.mxu1 }
 0x10c   : > { %v1650_v31 = vadd.f32 %v1562_v10, %v1498_v28  ;;  %v592_v52 = vmul.f32 %v1643_v22, %v1643_v22 }
 0x10d   : > { %v613_v47 = vadd.f32 %v612_v44, %v582_v43  ;;  %v544_v49 = vadd.f32 %v543_v42, %v1592_v46  ;;  %v583_v51 = vmul.f32 %v1592_v46, %v1592_v46  ;;  %v1659_v43 = vadd.f32 %v1498_v28, %v501_v53 }
 0x10e   : > { %v593_v44 = vmul.f32 %v1650_v31, %v1650_v31 }
 0x10f   : > { %v545_v57 = vadd.f32 %v544_v49, %v1586_v38  ;;  %v614_v58 = vadd.f32 %v613_v47, %v583_v51  ;;  %v1665_v49 = vadd.f32 %v1498_v28, %v504_v11  ;;  %v1354_v51 = vpop.f32.mrf.mxu1 }
 0x111   : > { %v615_v61 = vadd.f32 %v614_v58, %v584_v54  ;;  %v546_v0 = vadd.f32 %v545_v57, %v1595_v48  ;;  %v1668_v54 = vadd.f32 %v1349_v40, %v1498_v28  ;;  %v594_v58 = vmul.f32 %v1659_v43, %v1659_v43 }
 0x113   : > { %v547_v4 = vadd.f32 %v546_v0, %v1604_v55  ;;  %v616_v5 = vadd.f32 %v615_v61, %v585_v60  ;;  %v1674_v61 = vadd.f32 %v1350_v1, %v1498_v28  ;;  %v596_v40 = vmul.f32 %v1668_v54, %v1668_v54 }
 0x115   : > { %v548_v41 = vadd.f32 %v547_v4, %v1611_v62  ;;  %v617_v9 = vadd.f32 %v616_v5, %v586_v27  ;;  %v595_v27 = vmul.f32 %v1665_v49, %v1665_v49  ;;  %v520_v4 = vpop.f32.mrf.mxu1 }
 0x117   : > { %v549_v12 = vadd.f32 %v548_v41, %v1616_v2  ;;  %v618_v13 = vadd.f32 %v617_v9, %v587_v7  ;;  %v1683_v7 = vadd.f32 %v1498_v28, %v517_v36  ;;  %v597_v9 = vmul.f32 %v1674_v61, %v1674_v61 }
 0x119   : > { %v619_v16 = vadd.f32 %v618_v13, %v588_v25  ;;  %v550_v18 = vadd.f32 %v549_v12, %v1623_v6  ;;  %v1689_v25 = vadd.f32 %v1498_v28, %v520_v4  ;;  %v1692_v12 = vadd.f32 %v1353_v20, %v1498_v28 }
 0x11b   : > { %v551_v23 = vadd.f32 %v550_v18, %v1633_v15  ;;  %v620_v24 = vadd.f32 %v619_v16, %v589_v32  ;;  %v598_v32 = vmul.f32 %v1683_v7, %v1683_v7 }
 0x11d   : > { %v621_v29 = vadd.f32 %v620_v24, %v590_v63  ;;  %v552_v35 = vadd.f32 %v551_v23, %v1639_v19  ;;  %v1698_v23 = vadd.f32 %v1354_v51, %v1498_v28  ;;  %v599_v24 = vmul.f32 %v1689_v25, %v1689_v25 }
 0x11f   : > { %v553_v39 = vadd.f32 %v552_v35, %v1643_v22  ;;  %v622_v42 = vadd.f32 %v621_v29, %v591_v21  ;;  %v600_v29 = vmul.f32 %v1692_v12, %v1692_v12  ;;  %v601_v21 = vmul.f32 %v1698_v23, %v1698_v23 }
 0x121   : > { %v623_v10 = vadd.f32 %v622_v42, %v592_v52  ;;  %v554_v47 = vadd.f32 %v553_v39, %v1650_v31 }
 0x123   : > { %v555_v57 = vadd.f32 %v554_v47, %v1659_v43  ;;  %v624_v53 = vadd.f32 %v623_v10, %v593_v44 }
 0x125   : > { %v625_v60 = vadd.f32 %v624_v53, %v594_v58  ;;  %v556_v0 = vadd.f32 %v555_v57, %v1665_v49 }
 0x127   : > { %v557_v5 = vadd.f32 %v556_v0, %v1668_v54  ;;  %v626_v41 = vadd.f32 %v625_v60, %v595_v27 }
 0x129   : > { %v627_v1 = vadd.f32 %v626_v41, %v596_v40  ;;  %v558_v11 = vadd.f32 %v557_v5, %v1674_v61 }
 0x12b   : > { %v559_v13 = vadd.f32 %v558_v11, %v1683_v7  ;;  %v628_v16 = vadd.f32 %v627_v1, %v597_v9 }
 0x12d   : > { %v629_v18 = vadd.f32 %v628_v16, %v598_v32  ;;  %v560_v63 = vadd.f32 %v559_v13, %v1689_v25 }
 0x12f   : > { %v561_v20 = vadd.f32 %v560_v63, %v1692_v12  ;;  %v630_v35 = vadd.f32 %v629_v18, %v599_v24 }
 0x131   : > { %v562_v36 = vadd.f32 %v561_v20, %v1698_v23  ;;  %v631_v52 = vadd.f32 %v630_v35, %v600_v29 }
 0x133   : > { %v563_v39 = vrot.slane %v562_v36, 4  ;;  %v632_v28 = vadd.f32 %v631_v52, %v601_v21 }
 0x135   : > { %v564_v42 = vadd.f32 %v563_v39, %v562_v36  ;;  %v633_v44 = vrot.slane %v632_v28, 4 }
 0x137   : > { %v565_v10 = vrot.slane %v564_v42, 2  ;;  %v634_v47 = vadd.f32 %v633_v44, %v632_v28 }
 0x139   : > { %v566_v51 = vadd.f32 %v565_v10, %v564_v42  ;;  %v635_v57 = vrot.slane %v634_v47, 2 }
 0x13b   : > { %v567_v58 = vrot.slane %v566_v51, 1  ;;  %v636_v53 = vadd.f32 %v635_v57, %v634_v47 }
 0x13d   : > { %v568_v60 = vadd.f32 %v567_v58, %v566_v51  ;;  %v637_v0 = vrot.slane %v636_v53, 1 }
 0x13f   : > { %v638_v27 = vadd.f32 %v637_v0, %v636_v53  ;;  %v1709_v4 = vmul.f32 0.00390625, %v568_v60 }
 0x141   : > { %v673_v40 = vmul.f32 0.00390625, %v638_v27  ;;  %v674_v5 = vmul.f32 %v1709_v4, %v1709_v4  ;;  %v711_v11 = vsub.f32 %v1501_v30, %v1709_v4  ;;  %v712_v13 = vsub.f32 %v1509_v34, %v1709_v4 }
 0x142   : > { %v713_v32 = vsub.f32 %v1506_v33, %v1709_v4  ;;  %v714_v16 = vsub.f32 %v1514_v37, %v1709_v4  ;;  %v715_v18 = vsub.f32 %v1526_v45, %v1709_v4  ;;  %v716_v63 = vsub.f32 %v1540_v56, %v1709_v4 }
 0x143   : > { %v675_v41 = vsub.f32 %v673_v40, %v674_v5  ;;  %v717_v24 = vsub.f32 %v1532_v50, %v1709_v4  ;;  %v718_v30 = vsub.f32 %v1543_v59, %v1709_v4  ;;  %v719_v34 = vsub.f32 %v1554_v3, %v1709_v4 }
 0x144   : > { %v720_v33 = vsub.f32 %v1568_v14, %v1709_v4  ;;  %v721_v37 = vsub.f32 %v1560_v8, %v1709_v4  ;;  %v722_v45 = vsub.f32 %v1571_v17, %v1709_v4  ;;  %v723_v56 = vsub.f32 %v1580_v26, %v1709_v4 }
 0x145   : > { %v676_v9 = vmax.f32 %v675_v41, 0.0  ;;  %v724_v50 = vsub.f32 %v1592_v46, %v1709_v4  ;;  %v725_v59 = vsub.f32 %v1586_v38, %v1709_v4  ;;  %v726_v3 = vsub.f32 %v1595_v48, %v1709_v4 }
 0x146   : > { %v727_v14 = vsub.f32 %v1604_v55, %v1709_v4  ;;  %v728_v8 = vsub.f32 %v1611_v62, %v1709_v4  ;;  %v729_v17 = vsub.f32 %v1616_v2, %v1709_v4  ;;  %v730_v26 = vsub.f32 %v1623_v6, %v1709_v4 }
 0x147   : > { %v677_v1 = vadd.f32 1e-05, %v676_v9  ;;  %v731_v46 = vsub.f32 %v1633_v15, %v1709_v4  ;;  %v732_v38 = vsub.f32 %v1639_v19, %v1709_v4  ;;  %v733_v48 = vsub.f32 %v1643_v22, %v1709_v4 }
 0x148   : > { %v734_v55 = vsub.f32 %v1650_v31, %v1709_v4  ;;  %v735_v62 = vsub.f32 %v1659_v43, %v1709_v4  ;;  %v736_v2 = vsub.f32 %v1665_v49, %v1709_v4  ;;  %v737_v6 = vsub.f32 %v1668_v54, %v1709_v4 }
 0x149   : > { %1403 = vrsqrt.f32 %v677_v1  ;;  %v738_v15 = vsub.f32 %v1674_v61, %v1709_v4  ;;  %v739_v19 = vsub.f32 %v1683_v7, %v1709_v4  ;;  %v740_v22 = vsub.f32 %v1689_v25, %v1709_v4 }
 0x14a   : > { %v741_v31 = vsub.f32 %v1692_v12, %v1709_v4  ;;  %v742_v43 = vsub.f32 %v1698_v23, %v1709_v4 }
 0x156   : > { %v1404_v29 = vpop.eup %1403 }
 0x157   : > { %v1777_v20 = vmul.f32 %v1404_v29, %v711_v11  ;;  %v1779_v49 = vmul.f32 %v1404_v29, %v712_v13  ;;  %v1781_v54 = vmul.f32 %v1404_v29, %v713_v32  ;;  %v1783_v35 = vmul.f32 %v1404_v29, %v714_v16 }
 0x158   : > { %v1785_v61 = vmul.f32 %v1404_v29, %v715_v18  ;;  %v1787_v7 = vmul.f32 %v1404_v29, %v716_v63  ;;  %v1789_v21 = vmul.f32 %v1404_v29, %v717_v24  ;;  %v1791_v25 = vmul.f32 %v1404_v29, %v718_v30 }
 0x159   : > { %v1793_v12 = vmul.f32 %v1404_v29, %v719_v34  ;;  %v1795_v36 = vmul.f32 %v1404_v29, %v720_v33  ;;  %v1797_v23 = vmul.f32 %v1404_v29, %v721_v37  ;;  %v1799_v52 = vmul.f32 %v1404_v29, %v722_v45 }
 0x15a   : > { %v1801_v39 = vmul.f32 %v1404_v29, %v723_v56  ;;  %v1803_v28 = vmul.f32 %v1404_v29, %v724_v50  ;;  %v1805_v42 = vmul.f32 %v1404_v29, %v725_v59  ;;  %v1807_v44 = vmul.f32 %v1404_v29, %v726_v3 }
 0x15b   : > { %v1809_v10 = vmul.f32 %v1404_v29, %v727_v14  ;;  %v1811_v47 = vmul.f32 %v1404_v29, %v728_v8  ;;  %v1813_v51 = vmul.f32 %v1404_v29, %v729_v17  ;;  %v1815_v57 = vmul.f32 %v1404_v29, %v730_v26 }
 0x15c   : > { %v1817_v58 = vmul.f32 %v1404_v29, %v731_v46  ;;  %v1819_v53 = vmul.f32 %v1404_v29, %v732_v38  ;;  %v1821_v60 = vmul.f32 %v1404_v29, %v733_v48  ;;  %v1823_v0 = vmul.f32 %v1404_v29, %v734_v55 }
 0x15d   : > { %v1825_v27 = vmul.f32 %v1404_v29, %v735_v62  ;;  %v1827_v4 = vmul.f32 %v1404_v29, %v736_v2  ;;  %v1829_v40 = vmul.f32 %v1404_v29, %v737_v6  ;;  %v1831_v5 = vmul.f32 %v1404_v29, %v738_v15 }
 0x15e   : > { %v1833_v41 = vmul.f32 %v1404_v29, %v739_v19  ;;  %v1835_v9 = vmul.f32 %v1404_v29, %v740_v22  ;;  %vm775_vm0 = vcmp.ge.f32.partialorder %v1777_v20, 0.0  ;;  %vm776_vm1 = vcmp.ge.f32.partialorder %v1779_v49, 0.0 }
 0x15f   : > { %vm777_vm2 = vcmp.ge.f32.partialorder %v1781_v54, 0.0  ;;  %vm778_vm3 = vcmp.ge.f32.partialorder %v1783_v35, 0.0  ;;  %vm779_vm4 = vcmp.ge.f32.partialorder %v1785_v61, 0.0  ;;  %vm780_vm5 = vcmp.ge.f32.partialorder %v1787_v7, 0.0 }
 0x160   : > { %vm781_vm6 = vcmp.ge.f32.partialorder %v1789_v21, 0.0  ;;  %vm782_vm7 = vcmp.ge.f32.partialorder %v1791_v25, 0.0  ;;  %vm783_vm8 = vcmp.ge.f32.partialorder %v1793_v12, 0.0  ;;  %v1847_v1 = vmul.f32 %v1404_v29, %v741_v31 }
 0x161   : > { %v807_v11 = vmul.f32 0.2, %v1777_v20  ;;  %v808_v13 = vmul.f32 0.2, %v1779_v49  ;;  %v809_v32 = vmul.f32 0.2, %v1781_v54  ;;  %v1856_v16 = vmul.f32 %v1404_v29, %v742_v43 }
 0x162   : > { %vm790_vm15 = vcmp.ge.f32.partialorder %v1807_v44, 0.0  ;;  %vm791_vm10 = vcmp.ge.f32.partialorder %v1809_v10, 0.0  ;;  %v810_v18 = vmul.f32 0.2, %v1783_v35  ;;  %v811_v63 = vmul.f32 0.2, %v1785_v61 }
 0x163   : > { %v812_v24 = vmul.f32 0.2, %v1787_v7  ;;  %vm796_vm14 = vcmp.ge.f32.partialorder %v1819_v53, 0.0  ;;  %v813_v30 = vmul.f32 0.2, %v1789_v21  ;;  %v1875_v37 = vsel %vm775_vm0, %v1777_v20, %v807_v11 }
 0x164   : > { %v814_v34 = vmul.f32 0.2, %v1791_v25  ;;  %v815_v33 = vmul.f32 0.2, %v1793_v12  ;;  %vm800_vm9 = vcmp.ge.f32.partialorder %v1827_v4, 0.0  ;;  %v1887_v59 = vsel %vm776_vm1, %v1779_v49, %v808_v13 }
 0x165   : > { %v816_v45 = vmul.f32 0.2, %v1795_v36  ;;  %v817_v56 = vmul.f32 0.2, %v1797_v23  ;;  %v818_v50 = vmul.f32 0.2, %v1799_v52  ;;  %v841_v17 = vsel %vm777_vm2, %v1781_v54, %v809_v32 }
 0x166   : > { %vm802_vm11 = vcmp.ge.f32.partialorder %v1831_v5, 0.0  ;;  %vm803_vm13 = vcmp.ge.f32.partialorder %v1833_v41, 0.0  ;;  %vm804_vm12 = vcmp.ge.f32.partialorder %v1835_v9, 0.0  ;;  %v819_v3 = vmul.f32 0.2, %v1801_v39 }
 0x167   : > { %v820_v14 = vmul.f32 0.2, %v1803_v28  ;;  %v821_v8 = vmul.f32 0.2, %v1805_v42  ;;  %vm805_vm1 = vcmp.ge.f32.partialorder %v1847_v1, 0.0  ;;  %vm806_vm0 = vcmp.ge.f32.partialorder %v1856_v16, 0.0 }
 0x168   : > { %v822_v26 = vmul.f32 0.2, %v1807_v44  ;;  %v823_v29 = vmul.f32 0.2, %v1809_v10  ;;  %v824_v46 = vmul.f32 0.2, %v1811_v47  ;;  %v842_v38 = vsel %vm778_vm3, %v1783_v35, %v810_v18 }
 0x169   : > { %v825_v48 = vmul.f32 0.2, %v1813_v51  ;;  %v826_v55 = vmul.f32 0.2, %v1815_v57  ;;  %v827_v62 = vmul.f32 0.2, %v1817_v58  ;;  %v843_v2 = vsel %vm779_vm4, %v1785_v61, %v811_v63 }
 0x16a   : > { %v828_v6 = vmul.f32 0.2, %v1819_v53  ;;  %v829_v15 = vmul.f32 0.2, %v1821_v60  ;;  %v830_v19 = vmul.f32 0.2, %v1823_v0  ;;  %v844_v22 = vsel %vm780_vm5, %v1787_v7, %v812_v24 }
 0x16b   : > { %v831_v31 = vmul.f32 0.2, %v1825_v27  ;;  %v832_v43 = vmul.f32 0.2, %v1827_v4  ;;  %v833_v20 = vmul.f32 0.2, %v1829_v40  ;;  %v845_v49 = vsel %vm781_vm6, %v1789_v21, %v813_v30 }
 0x16c   : > { %v834_v54 = vmul.f32 0.2, %v1831_v5  ;;  %v835_v35 = vmul.f32 0.2, %v1833_v41  ;;  %v836_v61 = vmul.f32 0.2, %v1835_v9  ;;  %v846_v7 = vsel %vm782_vm7, %v1791_v25, %v814_v34 }
 0x16d   : > { %v837_v11 = vmul.f32 0.2, %v1847_v1  ;;  %v838_v13 = vmul.f32 0.2, %v1856_v16  ;;  %v847_v32 = vsel %vm783_vm8, %v1793_v12, %v815_v33  ;;  %vm2037_vm2 = vcmp.ge.f32.partialorder %v1795_v36, 0.0 }
 0x16e   : > { %v848_v21 = vsel %vm2037_vm2, %v1795_v36, %v816_v45  ;;  %vm2038_vm3 = vcmp.ge.f32.partialorder %v1797_v23, 0.0  ;;  %vm2039_vm4 = vcmp.ge.f32.partialorder %v1799_v52, 0.0  ;;  %vm2040_vm5 = vcmp.ge.f32.partialorder %v1801_v39, 0.0 }
 0x16f   : > { %v849_v18 = vsel %vm2038_vm3, %v1797_v23, %v817_v56  ;;  %v850_v25 = vsel %vm2039_vm4, %v1799_v52, %v818_v50  ;;  %v851_v63 = vsel %vm2040_vm5, %v1801_v39, %v819_v3  ;;  %vm2041_vm6 = vcmp.ge.f32.partialorder %v1803_v28, 0.0 }
 0x170   : > { %v852_v12 = vsel %vm2041_vm6, %v1803_v28, %v820_v14  ;;  %vm2042_vm7 = vcmp.ge.f32.partialorder %v1805_v42, 0.0  ;;  %v854_v23 = vsel %vm790_vm15, %v1807_v44, %v822_v26  ;;  %v855_v52 = vsel %vm791_vm10, %v1809_v10, %v823_v29 }
 0x171   : > { %v853_v36 = vsel %vm2042_vm7, %v1805_v42, %v821_v8  ;;  %vm2043_vm8 = vcmp.ge.f32.partialorder %v1811_v47, 0.0  ;;  %vm2044_vm2 = vcmp.ge.f32.partialorder %v1813_v51, 0.0  ;;  %vm2045_vm3 = vcmp.ge.f32.partialorder %v1815_v57, 0.0 }
 0x172   : > { %v856_v39 = vsel %vm2043_vm8, %v1811_v47, %v824_v46  ;;  %v857_v28 = vsel %vm2044_vm2, %v1813_v51, %v825_v48  ;;  %v858_v42 = vsel %vm2045_vm3, %v1815_v57, %v826_v55  ;;  %vm2046_vm4 = vcmp.ge.f32.partialorder %v1817_v58, 0.0 }
 0x173   : > { %v859_v44 = vsel %vm2046_vm4, %v1817_v58, %v827_v62  ;;  %v860_v10 = vsel %vm796_vm14, %v1819_v53, %v828_v6  ;;  %vm2047_vm10 = vcmp.ge.f32.partialorder %v1821_v60, 0.0  ;;  %vm2048_vm15 = vcmp.ge.f32.partialorder %v1823_v0, 0.0 }
 0x174   : > { %v861_v47 = vsel %vm2047_vm10, %v1821_v60, %v829_v15  ;;  %v862_v51 = vsel %vm2048_vm15, %v1823_v0, %v830_v19  ;;  %vm2049_vm5 = vcmp.ge.f32.partialorder %v1825_v27, 0.0  ;;  %v864_v58 = vsel %vm800_vm9, %v1827_v4, %v832_v43 }
 0x175   : > { %v863_v57 = vsel %vm2049_vm5, %v1825_v27, %v831_v31  ;;  %vm2050_vm14 = vcmp.ge.f32.partialorder %v1829_v40, 0.0  ;;  %v866_v60 = vsel %vm802_vm11, %v1831_v5, %v834_v54  ;;  %v867_v0 = vsel %vm803_vm13, %v1833_v41, %v835_v35 }
 0x176   : > { %v865_v53 = vsel %vm2050_vm14, %v1829_v40, %v833_v20  ;;  %v868_v27 = vsel %vm804_vm12, %v1835_v9, %v836_v61  ;;  %v869_v4 = vsel %vm805_vm1, %v1847_v1, %v837_v11  ;;  %v870_v40 = vsel %vm806_vm0, %v1856_v16, %v838_v13 }
 0x177   : > { %v1191_v5 = vpack.c.bf16 %v1887_v59, %v1875_v37  ;;  %v1196_v41 = vpack.c.bf16 %v842_v38, %v841_v17  ;;  %v1201_v24 = vpack.c.bf16 %v844_v22, %v843_v2  ;;  %v1206_v30 = vpack.c.bf16 %v846_v7, %v845_v49 }
 0x178   : > { %v1211_v34 = vpack.c.bf16 %v848_v21, %v847_v32  ;;  %v1216_v9 = vpack.c.bf16 %v850_v25, %v849_v18  ;;  %v1221_v1 = vpack.c.bf16 %v852_v12, %v851_v63  ;;  %v1226_v33 = vpack.c.bf16 %v854_v23, %v853_v36 }
 0x179   : > { %1192 = vst [vmem:[%s1992_s11] sm:$0xff] %v1191_v5   ;;  %1268 = vst [vmem:[%s1992_s11 + $0x8] sm:$0xff] %v1196_v41   ;;  %v1231_v45 = vpack.c.bf16 %v856_v39, %v855_v52  ;;  %v1236_v16 = vpack.c.bf16 %v858_v42, %v857_v28  ;;  %v1241_v37 = vpack.c.bf16 %v860_v10, %v859_v44 }
 0x17a   : > { %1269 = vst [vmem:[%s1992_s11 + $0x10] sm:$0xff] %v1201_v24   ;;  %1270 = vst [vmem:[%s1992_s11 + $0x18] sm:$0xff] %v1206_v30   ;;  %v1246_v56 = vpack.c.bf16 %v862_v51, %v861_v47  ;;  %v1251_v50 = vpack.c.bf16 %v864_v58, %v863_v57  ;;  %v1256_v59 = vpack.c.bf16 %v866_v60, %v865_v53 }
 0x17b   : > { %1271 = vst [vmem:[%s1992_s11 + $0x20] sm:$0xff] %v1211_v34   ;;  %1272 = vst [vmem:[%s1992_s11 + $0x28] sm:$0xff] %v1216_v9   ;;  %v1261_v3 = vpack.c.bf16 %v868_v27, %v867_v0  ;;  %v1266_v14 = vpack.c.bf16 %v870_v40, %v869_v4 }
 0x17c   : > { %1273 = vst [vmem:[%s1992_s11 + $0x30] sm:$0xff] %v1221_v1   ;;  %1274 = vst [vmem:[%s1992_s11 + $0x38] sm:$0xff] %v1226_v33  }
 0x17d   : > { %1275 = vst [vmem:[%s1992_s11 + $0x40] sm:$0xff] %v1231_v45   ;;  %1276 = vst [vmem:[%s1992_s11 + $0x48] sm:$0xff] %v1236_v16  }
 0x17e   : > { %1277 = vst [vmem:[%s1992_s11 + $0x50] sm:$0xff] %v1241_v37   ;;  %1278 = vst [vmem:[%s1992_s11 + $0x58] sm:$0xff] %v1246_v56  }
 0x17f   : > { %1279 = vst [vmem:[%s1992_s11 + $0x60] sm:$0xff] %v1251_v50   ;;  %1280 = vst [vmem:[%s1992_s11 + $0x68] sm:$0xff] %v1256_v59  }
 0x180   : > { %1281 = vst [vmem:[%s1992_s11 + $0x70] sm:$0xff] %v1261_v3   ;;  %1282 = vst [vmem:[%s1992_s11 + $0x78] sm:$0xff] %v1266_v14  }
 0x181 PF: > { %s13_s12 = sadd.s32 1, %s1411_s12  }
 0x182   : > { %p10_p4 = scmp.ge.s32.totalorder %s13_s12, 4  }
 0x184   :  { %12 = sbr.rel (!%p10_p4) target bundleno = 1 (0x1), region = 62 }

// kernel: discriminator_forward.7
= control target key start
LH: loop header
LB: loop body
LE: loop exit
PB: predicated region body
PF: predicated region fallthrough
CT: control target
= control target key end

     0   :  { %s1607_s12 = smov 0   ;;  %s2148_s0 = inlined_call_operand.vmem [shape: bf16[2,90,64], index: 0, kind: input, shape index: {}]   ;;  %s2149_s1 = inlined_call_operand.vmem [shape: bf16[4,64,128], index: 1, kind: input, shape index: {}]   ;;  %s2150_s2 = inlined_call_operand.vmem [shape: f32[1,128], index: 2, kind: input, shape index: {}]   ;;  %s2151_s3 = inlined_call_operand.vmem [shape: bf16[2,72,128], index: 3, kind: output, shape index: {}]  }
   0x1 LB: > { %s1246_s13 = sadd.s32 4294967295, %s1583_s12   ;;  %p1250_p0 = scmp.ge.s32.totalorder %s1583_s12, 1  ;;  %s1583_s12 = sphi %s1607_s12, %s13_s12  }
   0x2   : > { %p137_p1 = scmp.lt.s32.totalorder %s1583_s12, 3 }
   0x4   : > { %p138_p2 = pnand %p1250_p0, %p137_p1 }
   0x5   : > { %p161_p3 = scmp.lt.s32.totalorder (!%p138_p2), %s1246_s13, 1 }
   0x6   : > { %141 = sbr.rel (%p138_p2) target bundleno = 352 (0x160), region = 32 }
   0xb   : > { %v1547_v0 = vld [vmem:[%s2149_s1 + $0x38] sm:$0xff]   ;;  %v1585_v1 = vmov 0.0   ;;  %v1549_v3 = vld [vmem:[%s2149_s1 + $0x30] sm:$0xff]   ;;  %vm1586_vm0 = vmmov 0   ;;  %s2183_s13 = smov (!%p161_p3, %s1246_s13), 1  ;;  %v1551_v5 = vld [vmem:[%s2149_s1 + $0x28] sm:$0xff]  }
   0xc   : > { %1405 = vmatprep.subr.bf16.mxu0 %v1585_v1  ;;  %1433 = vmatprep.subr.bf16.mxu1 %v1585_v1  ;;  %v1548_v2 = vld [vmem:[%s2149_s1 + $0x18] sm:$0xff]   ;;  %v1550_v4 = vld [vmem:[%s2149_s1 + $0x10] sm:$0xff]   ;;  %s1517_s24 = smul.u32 48, %s2183_s13  ;;  %v1552_v6 = vld [vmem:[%s2149_s1 + $0x8] sm:$0xff]   ;;  %vm289_vm1 = vcmask 523264   ;;  %vm701_vm3 = vcmask 1046528  }
   0xd   : > { %1406 = vmatpush3.bf16.msra.mxu0 %v1547_v0  ;;  %1413 = vmatprep.mubr.msk.bf16.mxu0 %vm1586_vm0, %v1585_v1  ;;  %v1553_v7 = vld [vmem:[%s2149_s1 + $0x20] sm:$0xff]   ;;  %vm225_vm2 = vsmask.f32 7424  ;;  %v1558_v17 = vld [vmem:[%s2149_s1 + $0x78] sm:$0xff]   ;;  %v1560_v24 = vld [vmem:[%s2149_s1 + $0x50] sm:$0xff]   ;;  %s1518_s27 = smul.u32 36, %s2183_s13 }
   0xe   : > { %1434 = vmatpush3.bf16.msra.mxu1 %v1548_v2  ;;  %1407 = vmatprep.subr.bf16.mxu0 %v1585_v1  ;;  %s1652_s4 = scalar_lea.vmem %s2148_s0, %s1517_s24  ;;  %v1554_v10 = vld [vmem:[%s2149_s1] sm:$0xff]   ;;  %v1557_v20 = vld [vmem:[%s2149_s1 + $0x58] sm:$0xff]   ;;  %v1561_v25 = vld [vmem:[%s2149_s1 + $0x70] sm:$0xff]  }
   0xf   : > { %1435 = vmatprep.subr.bf16.mxu1 %v1585_v1  ;;  %1441 = vmatprep.mubr.msk.bf16.mxu1 %vm1586_vm0, %v1585_v1  ;;  %v1555_v8 = vld [vmem:[%s1652_s4] sm:$0xff]   ;;  %v1556_v9 = vld [vmem:[%s1652_s4 + $0x8] sm:$0xff]   ;;  %v1662_v14 = vld [vmem:[%s1652_s4 + $0x10] sm:$0xff]   ;;  %s170_s29 = scalar_lea.vmem %s2151_s3, %s1518_s27 }
  0x10   : > { %v227_v11 = vshrl.u32 %v1555_v8, 16  ;;  %v229_v12 = vshll.u32 %v1555_v8, 16  ;;  %v234_v13 = vshll.u32 %v1556_v9, 16  ;;  %v242_v18 = vshll.u32 %v1662_v14, 16  ;;  %v1562_v26 = vld [vmem:[%s1652_s4 + $0x18] sm:$0xff]   ;;  %v1563_v29 = vld [vmem:[%s2149_s1 + $0x48] sm:$0xff]  }
  0x11   : > { %1408 = vmatpush3.bf16.msra.mxu0 %v1549_v3  ;;  %v238_v21 = vshrl.u32 %v1556_v9, 16  ;;  %v246_v28 = vshrl.u32 %v1662_v14, 16  ;;  %v250_v31 = vshll.u32 %v1562_v26, 16  ;;  %v1564_v32 = vld [vmem:[%s2149_s1 + $0x68] sm:$0xff]   ;;  %v181_v33 = vld [vmem:[%s1652_s4 + $0x20] sm:$0xf] }
  0x12   : > { %1436 = vmatpush3.bf16.msra.mxu1 %v1550_v4  ;;  %1409 = vmatprep.subr.bf16.mxu0 %v1585_v1  ;;  %v231_v15 = vrot.slane %v229_v12, 1  ;;  %v236_v16 = vrot.slane %v234_v13, 1  ;;  %v244_v23 = vrot.slane %v242_v18, 1  ;;  %v190_v34 = vld [vmem:[%s1652_s4 + $0x24] sm:$0x1]  ;;  %v1703_v35 = vld [vmem:[%s1652_s4 + $0x1c] sm:$0xff]   ;;  %v1275_v62 = vcombine.low %v181_v33, %v181_v33 }
  0x13   : > { %1437 = vmatprep.subr.bf16.mxu1 %v1585_v1  ;;  %v252_v37 = vrot.slane %v250_v31, 1  ;;  %v1265_v38 = vcombine.low %v181_v33, %v190_v34  ;;  %v1566_v39 = vld [vmem:[%s2149_s1 + $0x40] sm:$0xff]   ;;  %v553_v40 = vshll.u32 %v1703_v35, 16  ;;  %v557_v44 = vshrl.u32 %v1703_v35, 16  ;;  %v486_v55 = vld [vmem:[%s1652_s4 + $0x8] sm:$0xf] }
  0x14   : > { %v232_v19 = vor.u32 %v231_v15, %v227_v11  ;;  %v240_v27 = vor.u32 %v238_v21, %v236_v16  ;;  %v248_v36 = vor.u32 %v246_v28, %v244_v23  ;;  %v1568_v41 = vld [vmem:[%s2149_s1 + $0x60] sm:$0xff]   ;;  %v254_v47 = vshrl.u32 %v1562_v26, 16  ;;  %v1570_v59 = vld [vmem:[%s1652_s4 + $0xc] sm:$0xff]  }
  0x15   : > { %1410 = vmatpush3.bf16.msra.mxu0 %v1551_v5  ;;  %v1719_v42 = vld [vmem:[%s1652_s4 + $0x24] sm:$0x1f]   ;;  %v1722_v43 = vrot.slane %v553_v40, 1  ;;  %v258_v48 = vshll.u32 %v1265_v38, 16  ;;  %v262_v58 = vshrl.u32 %v1265_v38, 16  ;;  %v537_v4 = vshll.u32 %v1570_v59, 16 }
  0x16   : > { %1438 = vmatpush3.bf16.msra.mxu1 %v1552_v6  ;;  %1411 = vmatprep.subr.bf16.mxu0 %v1585_v1  ;;  %v237_v22 = vsel %vm225_vm2, %v232_v19, %v236_v16  ;;  %v245_v30 = vsel %vm225_vm2, %v240_v27, %v244_v23  ;;  %v561_v45 = vshll.u32 %v1719_v42, 16  ;;  %v253_v46 = vsel %vm225_vm2, %v248_v36, %v252_v37  ;;  %v485_v54 = vld [vmem:[%s1652_s4 + $0x4] sm:$0xf] }
  0x17   : > { %1439 = vmatprep.subr.bf16.mxu1 %v1585_v1  ;;  %v559_v49 = vor.u32 %v557_v44, %v1722_v43  ;;  %v256_v52 = vor.u32 %v254_v47, %v252_v37  ;;  %v260_v53 = vrot.slane %v258_v48, 1  ;;  %v1293_v57 = vcombine.low %v485_v54, %v486_v55  ;;  %v688_v61 = vld [vmem:[%s1652_s4 + $0x4] sm:$0xe] }
  0x18   : > { %v1728_v50 = vrot.slane %v561_v45, 1  ;;  %v1315_v0 = vcombine.low %v688_v61, %v486_v55  ;;  %v703_v6 = vrot.slane %v1570_v59, 1  ;;  %v541_v12 = vshrl.u32 %v1570_v59, 16 }
  0x19   : > { %1412 = vmatpush3.bf16.msra.mxu0 %v1553_v7  ;;  %v261_v56 = vsel %vm225_vm2, %v256_v52, %v260_v53  ;;  %v532_v60 = vshll.u32 %v1293_v57, 16  ;;  %v264_v63 = vor.u32 %v262_v58, %v260_v53  ;;  %v530_v2 = vshrl.u32 %v1293_v57, 16 }
  0x1a   : > { %1440 = vmatpush3.bf16.msra.mxu1 %v1554_v10  ;;  %1461 = vmatprep.subr.bf16.mxu0 %v1585_v1  ;;  %v564_v51 = vsel %vm225_vm2, %v559_v49, %v1728_v50  ;;  %v702_v5 = vrot.slane %v1315_v0, 1  ;;  %v846_v44 = vlaneseq }
  0x1b   : > { %1489 = vmatprep.subr.bf16.mxu1 %v1585_v1  ;;  %v534_v3 = vrot.slane %v532_v60, 1 }
  0x1c   : > { %1414 = vmatmul.mubr.msk.bf16.vlgmr.msra.gmra.mxu0 %vm289_vm1, %v237_v22  ;;  %v704_v10 = vsel %vm701_vm3, %v702_v5, %v703_v6  ;;  %v847_v49 = vshrl.u32 %v846_v44, 7 }
  0x1d   : > { %1442 = vmatmul.mubr.msk.bf16.vlgmr.msra.gmra.mxu1 %vm289_vm1, %v1555_v8  ;;  %1462 = vmatpush3.bf16.msra.mxu0 %v1557_v20  ;;  %v535_v7 = vor.u32 %v534_v3, %v530_v2  ;;  %v539_v8 = vrot.slane %v537_v4, 1  ;;  %v707_v20 = vrot.slane %v1703_v35, 1 }
  0x1e   : > { %1490 = vmatpush3.bf16.msra.mxu1 %v1558_v17  ;;  %1417 = vmatprep.mubr.msk.bf16.mxu0 %vm1586_vm0, %v1585_v1  ;;  %v848_v52 = vadd.s32 8, %v847_v49  ;;  %v849_v58 = vadd.s32 16, %v847_v49  ;;  %v1836_v5 = vadd.s32 32, %v847_v49 }
  0x1f   : > { %1445 = vmatprep.mubr.msk.bf16.mxu1 %vm1586_vm0, %v1585_v1  ;;  %1463 = vmatprep.subr.bf16.mxu0 %v1585_v1  ;;  %v540_v11 = vsel %vm225_vm2, %v535_v7, %v539_v8  ;;  %v543_v15 = vor.u32 %v541_v12, %v539_v8 }
  0x20   : > { %1491 = vmatprep.subr.bf16.mxu1 %v1585_v1  ;;  %v1826_v60 = vmul.u32.u64.low 3817748708, %v848_v52  ;;  %v1827_v61 = vmul.u32.u64.high 3817748708, %v848_v52, %v1826_v60  ;;  %v1833_v3 = vmul.u32.u64.low 3817748708, %v849_v58  ;;  %v1834_v4 = vmul.u32.u64.high 3817748708, %v849_v58, %v1833_v3 }
  0x21   : > { %1464 = vmatpush3.bf16.msra.mxu0 %v1560_v24  ;;  %v709_v24 = vrot.slane %v1719_v42, 1 }
  0x22   : > { %1492 = vmatpush3.bf16.msra.mxu1 %v1561_v25  ;;  %1465 = vmatprep.subr.bf16.mxu0 %v1585_v1 }
  0x23   : > { %1493 = vmatprep.subr.bf16.mxu1 %v1585_v1  ;;  %v710_v25 = vsel %vm701_vm3, %v707_v20, %v709_v24 }
  0x24   : > { %1418 = vmatmul.mubr.msk.bf16.gmra.mxu0 %vm289_vm1, %v245_v30 }
  0x25   : > { %1446 = vmatmul.mubr.msk.bf16.gmra.mxu1 %vm289_vm1, %v1556_v9  ;;  %1421 = vmatprep.mubr.msk.bf16.mxu0 %vm1586_vm0, %v1585_v1  ;;  %v1572_v9 = vld [vmem:[%s1652_s4 + $0x14] sm:$0xff]  }
  0x26   : > { %1449 = vmatprep.mubr.msk.bf16.mxu1 %vm1586_vm0, %v1585_v1  ;;  %1466 = vmatpush3.bf16.msra.mxu0 %v1563_v29  ;;  %v545_v13 = vshll.u32 %v1572_v9, 16  ;;  %v549_v19 = vshrl.u32 %v1572_v9, 16 }
  0x27   : > { %1494 = vmatpush3.bf16.msra.mxu1 %v1564_v32  ;;  %1467 = vmatprep.subr.bf16.mxu0 %v1585_v1 }
  0x28   : > { %1495 = vmatprep.subr.bf16.mxu1 %v1585_v1  ;;  %v547_v16 = vrot.slane %v545_v13, 1 }
  0x2a   : > { %1468 = vmatpush3.bf16.msra.mxu0 %v1566_v39  ;;  %v548_v18 = vsel %vm225_vm2, %v543_v15, %v547_v16  ;;  %v551_v21 = vor.u32 %v549_v19, %v547_v16  ;;  %v1851_v15 = vmul.u32.u64.low 3817748708, %v1836_v5  ;;  %v1852_v16 = vmul.u32.u64.high 3817748708, %v1836_v5, %v1851_v15 }
  0x2b   : > { %1496 = vmatpush3.bf16.msra.mxu1 %v1568_v41 }
  0x2c   : > { %1422 = vmatmul.mubr.msk.bf16.gmra.mxu0 %vm289_vm1, %v253_v46  ;;  %v556_v23 = vsel %vm225_vm2, %v551_v21, %v1722_v43 }
  0x2d   : > { %1450 = vmatmul.mubr.msk.bf16.gmra.mxu1 %vm289_vm1, %v1662_v14  ;;  %1425 = vmatprep.mubr.msk.bf16.mxu0 %vm1586_vm0, %v1585_v1  ;;  %v705_v14 = vrot.slane %v1572_v9, 1  ;;  %v1841_v9 = vadd.s32 40, %v847_v49 }
  0x2e   : > { %1453 = vmatprep.mubr.msk.bf16.mxu1 %vm1586_vm0, %v1585_v1 }
  0x2f   : > { %v706_v17 = vsel %vm701_vm3, %v703_v6, %v705_v14  ;;  %v708_v22 = vsel %vm701_vm3, %v705_v14, %v707_v20  ;;  %v1856_v19 = vmul.u32.u64.low 3817748708, %v1841_v9  ;;  %v1857_v20 = vmul.u32.u64.high 3817748708, %v1841_v9, %v1856_v19 }
  0x34   : > { %1426 = vmatmul.mubr.msk.bf16.gmra.mxu0 %vm289_vm1, %v261_v56  ;;  %v1823_v56 = vmul.u32.u64.low 3817748708, %v847_v49  ;;  %v1824_v57 = vmul.u32.u64.high 3817748708, %v847_v49, %v1823_v56 }
  0x35   : > { %1454 = vmatmul.mubr.msk.bf16.gmra.mxu1 %vm289_vm1, %v1562_v26  ;;  %1429 = vmatprep.mubr.msk.bf16.mxu0 %vm1586_vm0, %v1585_v1  ;;  %v565_v26 = vshrl.u32 %v1719_v42, 16  ;;  %v917_v56 = vshrl.u32 %v1857_v20, 3 }
  0x36   : > { %1457 = vmatprep.mubr.msk.bf16.mxu1 %vm1586_vm0, %v1585_v1  ;;  %v862_v14 = vshrl.u32 %v1824_v57, 3 }
  0x37   : > { %v567_v27 = vor.u32 %v565_v26, %v1728_v50 }
  0x38   : > { %v863_v26 = vmul.u32 9, %v862_v14 }
  0x3c   : > { %1430 = vmatmul.mubr.msk.bf16.gmra.mxu0 %vm289_vm1, %v264_v63 }
  0x3d   : > { %1458 = vmatmul.mubr.msk.bf16.gmra.mxu1 %vm289_vm1, %v1275_v62  ;;  %1469 = vmatprep.mubr.msk.bf16.mxu0 %vm1586_vm0, %v1585_v1  ;;  %v850_v62 = vadd.s32 24, %v847_v49 }
  0x3e   : > { %1497 = vmatprep.mubr.msk.bf16.mxu1 %vm1586_vm0, %v1585_v1 }
  0x3f   : > { %v1838_v7 = vmul.u32.u64.low 3817748708, %v850_v62  ;;  %v1839_v8 = vmul.u32.u64.high 3817748708, %v850_v62, %v1838_v7 }
  0x44   : > { %1470 = vmatmul.mubr.msk.bf16.vlgmr.msra.gmra.mxu0 %vm289_vm1, %v540_v11  ;;  %v1843_v11 = vadd.s32 48, %v847_v49 }
  0x45   : > { %1498 = vmatmul.mubr.msk.bf16.vlgmr.msra.gmra.mxu1 %vm289_vm1, %v704_v10  ;;  %1473 = vmatprep.mubr.msk.bf16.mxu0 %vm1586_vm0, %v1585_v1 }
  0x46   : > { %1501 = vmatprep.mubr.msk.bf16.mxu1 %vm1586_vm0, %v1585_v1 }
  0x4c   : > { %1474 = vmatmul.mubr.msk.bf16.gmra.mxu0 %vm289_vm1, %v548_v18  ;;  %v873_v18 = vshrl.u32 %v1827_v61, 3 }
  0x4d   : > { %1502 = vmatmul.mubr.msk.bf16.gmra.mxu1 %vm289_vm1, %v706_v17  ;;  %1477 = vmatprep.mubr.msk.bf16.mxu0 %vm1586_vm0, %v1585_v1 }
  0x4e   : > { %1505 = vmatprep.mubr.msk.bf16.mxu1 %vm1586_vm0, %v1585_v1 }
  0x54   : > { %1478 = vmatmul.mubr.msk.bf16.gmra.mxu0 %vm289_vm1, %v556_v23 }
  0x55   : > { %1506 = vmatmul.mubr.msk.bf16.gmra.mxu1 %vm289_vm1, %v708_v22  ;;  %1481 = vmatprep.mubr.msk.bf16.mxu0 %vm1586_vm0, %v1585_v1  ;;  %v1860_v22 = vmul.u32.u64.low 3817748708, %v1843_v11  ;;  %v1861_v23 = vmul.u32.u64.high 3817748708, %v1843_v11, %v1860_v22 }
  0x56   : > { %1509 = vmatprep.mubr.msk.bf16.mxu1 %vm1586_vm0, %v1585_v1 }
  0x5c   : > { %1482 = vmatmul.mubr.msk.bf16.gmra.mxu0 %vm289_vm1, %v564_v51 }
  0x5d   : > { %1510 = vmatmul.mubr.msk.bf16.gmra.mxu1 %vm289_vm1, %v710_v25  ;;  %1485 = vmatprep.mubr.msk.bf16.mxu0 %vm1586_vm0, %v1585_v1 }
  0x5e   : > { %1513 = vmatprep.mubr.msk.bf16.mxu1 %vm1586_vm0, %v1585_v1 }
  0x64   : > { %1486 = vmatmul.mubr.msk.bf16.gmra.mxu0 %vm289_vm1, %v567_v27  ;;  %v884_v27 = vshrl.u32 %v1834_v4, 3 }
  0x65   : > { %1514 = vmatmul.mubr.msk.bf16.gmra.mxu1 %vm289_vm1, %v709_v24 }
  0x66   : > { %v885_v44 = vmul.u32 9, %v884_v27 }
  0xdc   : > { %v1797_v29 = vpop.f32.mrf.mxu0 }
  0xdd   : > { %v1795_v28 = vpop.f32.mrf.mxu1 }
  0xde   : > { %v1415_v31 = vpop.f32.mrf.mxu0 }
  0xdf   : > { %v1443_v30 = vpop.f32.mrf.mxu1  ;;  %v874_v31 = vmul.u32 9, %v873_v18 }
  0xe0   : > { %v1801_v33 = vpop.f32.mrf.mxu0 }
  0xe1   : > { %v1799_v32 = vpop.f32.mrf.mxu1 }
  0xe2   : > { %v1416_v35 = vpop.f32.mrf.mxu0 }
  0xe3   : > { %v1444_v34 = vpop.f32.mrf.mxu1 }
  0xe4   : > { %v1805_v1 = vpop.f32.mrf.mxu0  ;;  %v895_v34 = vshrl.u32 %v1839_v8, 3  ;;  %v918_v8 = vmul.u32 9, %v917_v56 }
  0xe5   : > { %v1803_v36 = vpop.f32.mrf.mxu1 }
  0xe6   : > { %v1419_v38 = vpop.f32.mrf.mxu0 }
  0xe7   : > { %v1447_v37 = vpop.f32.mrf.mxu1 }
  0xe8   : > { %v1809_v40 = vpop.f32.mrf.mxu0  ;;  %v1865_v37 = vadd.s32 56, %v847_v49 }
  0xe9   : > { %v1807_v39 = vpop.f32.mrf.mxu1 }
  0xea   : > { %v1420_v42 = vpop.f32.mrf.mxu0  ;;  %v1877_v60 = vmul.u32.u64.low 3817748708, %v1865_v37  ;;  %v1878_v61 = vmul.u32.u64.high 3817748708, %v1865_v37, %v1877_v60 }
  0xeb   : > { %v1448_v41 = vpop.f32.mrf.mxu1  ;;  %v1869_v42 = vsub.s32 %v847_v49, %v863_v26 }
  0xec   : > { %v1813_v45 = vpop.f32.mrf.mxu0 }
  0xed   : > { %v1811_v43 = vpop.f32.mrf.mxu1  ;;  %vm955_vm4 = vcmp.ne.s32.totalorder %v1869_v42, 0  ;;  %vm964_vm5 = vcmp.lt.s32.totalorder %v1869_v42, 0 }
  0xee   : > { %v1423_v47 = vpop.f32.mrf.mxu0  ;;  %vm1899_vm8 = vmand %vm964_vm5, %vm955_vm4 }
  0xef   : > { %v1451_v46 = vpop.f32.mrf.mxu1 }
  0xf0   : > { %v1817_v50 = vpop.f32.mrf.mxu0  ;;  %v906_v46 = vshrl.u32 %v1852_v16, 3 }
  0xf1   : > { %v1815_v48 = vpop.f32.mrf.mxu1 }
  0xf2   : > { %v1424_v53 = vpop.f32.mrf.mxu0 }
  0xf3   : > { %v1452_v51 = vpop.f32.mrf.mxu1  ;;  %v896_v53 = vmul.u32 9, %v895_v34 }
  0xf4   : > { %v1821_v55 = vpop.f32.mrf.mxu0  ;;  %v1872_v51 = vsub.s32 %v848_v52, %v874_v31  ;;  %v907_v52 = vmul.u32 9, %v906_v46 }
  0xf5   : > { %v1819_v54 = vpop.f32.mrf.mxu1  ;;  %v1888_v14 = vsub.s32 %v850_v62, %v896_v53 }
  0xf6   : > { %v1427_v63 = vpop.f32.mrf.mxu0  ;;  %vm956_vm6 = vcmp.ne.s32.totalorder %v1872_v51, 0  ;;  %vm965_vm7 = vcmp.lt.s32.totalorder %v1872_v51, 0  ;;  %v983_v62 = vadd.s32 9, %v1872_v51 }
  0xf7   : > { %v1455_v59 = vpop.f32.mrf.mxu1  ;;  %v1880_v63 = vadd.s32 64, %v847_v49  ;;  %vm1917_vm11 = vmand %vm965_vm7, %vm956_vm6  ;;  %vm958_vm12 = vcmp.ne.s32.totalorder %v1888_v14, 0  ;;  %vm967_vm13 = vcmp.lt.s32.totalorder %v1888_v14, 0  ;;  %v985_v31 = vadd.s32 9, %v1888_v14 }
  0xf8   : > { %v1831_v2 = vpop.f32.mrf.mxu0  ;;  %v928_v59 = vshrl.u32 %v1861_v23, 3  ;;  %vm1953_vm0 = vmand %vm967_vm13, %vm958_vm12 }
  0xf9   : > { %v1829_v0 = vpop.f32.mrf.mxu1  ;;  %v1891_v15 = vmul.u32.u64.low 3817748708, %v1880_v63  ;;  %v1892_v16 = vmul.u32.u64.high 3817748708, %v1880_v63, %v1891_v15 }
  0xfa   : > { %v1428_v10 = vpop.f32.mrf.mxu0  ;;  %v929_v49 = vmul.u32 9, %v928_v59  ;;  %v1969_v59 = vld [vmem:[%s2150_s2] ss:$0 sm:$0xff] }
  0xfb   : > { %v1456_v6 = vpop.f32.mrf.mxu1 }
  0xfc   : > { %v1847_v13 = vpop.f32.mrf.mxu0  ;;  %v1883_v6 = vsub.s32 %v849_v58, %v885_v44  ;;  %v451_v58 = vadd.f32 %v1799_v32, %v1801_v33  ;;  %v448_v32 = vadd.f32 %v1795_v28, %v1797_v29  ;;  %v456_v33 = vadd.f32 %v1803_v36, %v1805_v1 }
  0xfd   : > { %v1845_v12 = vpop.f32.mrf.mxu1  ;;  %v1927_v28 = vsub.s32 %v1843_v11, %v929_v49  ;;  %v939_v29 = vshrl.u32 %v1878_v61, 3  ;;  %v459_v36 = vadd.f32 %v1807_v39, %v1809_v40  ;;  %v994_v61 = vsel %vm1953_vm0, %v985_v31, %v1888_v14 }
  0xfe   : > { %v1431_v21 = vpop.f32.mrf.mxu0  ;;  %vm957_vm9 = vcmp.ne.s32.totalorder %v1883_v6, 0  ;;  %vm966_vm10 = vcmp.lt.s32.totalorder %v1883_v6, 0  ;;  %v984_v39 = vadd.s32 9, %v1883_v6  ;;  %vm2026_vm12 = vcmp.lt.s32.totalorder %v994_v61, 8 }
  0xff   : > { %v1459_v17 = vpop.f32.mrf.mxu1  ;;  %v1907_v21 = vsub.s32 %v1836_v5, %v907_v52  ;;  %vm1942_vm14 = vmand %vm966_vm10, %vm957_vm9  ;;  %vm961_vm4 = vcmp.ne.s32.totalorder %v1927_v28, 0  ;;  %v940_v46 = vmul.u32 9, %v939_v29  ;;  %vm970_vm5 = vcmp.lt.s32.totalorder %v1927_v28, 0 }
 0x100   : > { %v374_v25 = vpop.f32.mrf.mxu0  ;;  %v982_v17 = vadd.s32 9, %v1869_v42  ;;  %v993_v60 = vsel %vm1942_vm14, %v984_v39, %v1883_v6  ;;  %vm2007_vm10 = vmand %vm970_vm5, %vm961_vm4  ;;  %v480_v15 = vadd.f32 %v1845_v12, %v1847_v13 }
 0x101   : > { %v482_v24 = vpop.f32.mrf.mxu1  ;;  %v1922_v25 = vsub.s32 %v1841_v9, %v918_v8  ;;  %vm959_vm15 = vcmp.ne.s32.totalorder %v1907_v21, 0  ;;  %vm968_vm1 = vcmp.lt.s32.totalorder %v1907_v21, 0 }
 0x102   : > { %v1432_v35 = vpop.f32.mrf.mxu0  ;;  %v991_v26 = vsel %vm1899_vm8, %v982_v17, %v1869_v42  ;;  %vm1981_vm6 = vmand %vm968_vm1, %vm959_vm15  ;;  %v467_v17 = vadd.f32 %v1815_v48, %v1817_v50 }
 0x103   : > { %v1460_v30 = vpop.f32.mrf.mxu1  ;;  %vm960_vm2 = vcmp.ne.s32.totalorder %v1922_v25, 0  ;;  %vm969_vm3 = vcmp.lt.s32.totalorder %v1922_v25, 0  ;;  %vm1999_vm8 = vcmp.lt.s32.totalorder %v991_v26, 8 }
 0x104   : > { %v641_v41 = vpop.f32.mrf.mxu0  ;;  %v992_v30 = vsel %vm1917_vm11, %v983_v62, %v1872_v51  ;;  %v464_v51 = vadd.f32 %v1811_v43, %v1813_v45  ;;  %vm1994_vm7 = vmand %vm969_vm3, %vm960_vm2  ;;  %vm2022_vm11 = vcmp.lt.s32.totalorder %v993_v60, 8 }
 0x105   : > { %v1867_v38 = vpop.f32.mrf.mxu1  ;;  %v679_v1 = vadd.f32 %v641_v41, %v448_v32  ;;  %vm1001_vm9 = vcmp.lt.s32.totalorder %v992_v30, 8 }
 0x106   : > { %v1471_v57 = vpop.f32.mrf.mxu0 }
 0x107   : > { %v1499_v47 = vpop.f32.mrf.mxu1  ;;  %v822_v53 = vadd.f32 %v1867_v38, %v679_v1  ;;  %v986_v38 = vadd.s32 9, %v1907_v21 }
 0x108   : > { %v644_v4 = vpop.f32.mrf.mxu0  ;;  %v950_v47 = vshrl.u32 %v1892_v16, 3  ;;  %v2012_v16 = vsub.s32 %v1865_v37, %v940_v46 }
 0x109   : > { %v787_v3 = vpop.f32.mrf.mxu1  ;;  %v680_v22 = vadd.f32 %v644_v4, %v451_v58  ;;  %v995_v48 = vsel %vm1981_vm6, %v986_v38, %v1907_v21 }
 0x10a   : > { %v1472_v10 = vpop.f32.mrf.mxu0  ;;  %v951_v58 = vmul.u32 9, %v950_v47  ;;  %vm962_vm13 = vcmp.ne.s32.totalorder %v2012_v16, 0  ;;  %vm971_vm14 = vcmp.lt.s32.totalorder %v2012_v16, 0  ;;  %vm2059_vm15 = vcmp.lt.s32.totalorder %v995_v48, 8 }
 0x10b   : > { %v1500_v7 = vpop.f32.mrf.mxu1  ;;  %v823_v34 = vadd.f32 %v787_v3, %v680_v22  ;;  %v987_v3 = vadd.s32 9, %v1922_v25  ;;  %v988_v10 = vadd.s32 9, %v1927_v28  ;;  %v989_v11 = vadd.s32 9, %v2012_v16  ;;  %vm2082_vm2 = vmand %vm971_vm14, %vm962_vm13 }
 0x10c   : > { %v649_v20 = vpop.f32.mrf.mxu0 }
 0x10d   : > { %v792_v18 = vpop.f32.mrf.mxu1  ;;  %v681_v9 = vadd.f32 %v649_v20, %v456_v33  ;;  %v1988_v4 = vadd.f32 %v1969_v59, %v823_v34  ;;  %v996_v37 = vsel %vm1994_vm7, %v987_v3, %v1922_v25  ;;  %v997_v29 = vsel %vm2007_vm10, %v988_v10, %v1927_v28 }
 0x10e   : > { %v1475_v5 = vpop.f32.mrf.mxu0  ;;  %v2048_v25 = vsub.s32 %v1880_v63, %v951_v58  ;;  %vm2063_vm0 = vcmp.lt.s32.totalorder %v996_v37, 8  ;;  %vm2074_vm1 = vcmp.lt.s32.totalorder %v997_v29, 8  ;;  %v998_v38 = vsel %vm2082_vm2, %v989_v11, %v2012_v16 }
 0x10f   : > { %v1503_v24 = vpop.f32.mrf.mxu1  ;;  %v824_v56 = vadd.f32 %v792_v18, %v681_v9  ;;  %v2017_v18 = vadd.f32 %v1969_v59, %v822_v53  ;;  %v1028_v22 = vsel %vm1001_vm9, %v1988_v4, 0.0  ;;  %vm1007_vm6 = vcmp.lt.s32.totalorder %v998_v38, 8 }
 0x110   : > { %v652_v40 = vpop.f32.mrf.mxu0  ;;  %v1052_v9 = vmul.f32 %v1028_v22, %v1028_v22  ;;  %vm963_vm3 = vcmp.ne.s32.totalorder %v2048_v25, 0  ;;  %vm972_vm4 = vcmp.lt.s32.totalorder %v2048_v25, 0 }
 0x111   : > { %v795_v27 = vpop.f32.mrf.mxu1  ;;  %v682_v35 = vadd.f32 %v652_v40, %v459_v36  ;;  %v2020_v19 = vadd.f32 %v1969_v59, %v824_v56  ;;  %v472_v36 = vadd.f32 %v1819_v54, %v1821_v55  ;;  %v1027_v1 = vsel %vm1999_vm8, %v2017_v18, 0.0  ;;  %vm2107_vm5 = vmand %vm972_vm4, %vm963_vm3 }
 0x112   : > { %v1476_v44 = vpop.f32.mrf.mxu0 }
 0x113   : > { %v1504_v42 = vpop.f32.mrf.mxu1  ;;  %v825_v6 = vadd.f32 %v795_v27, %v682_v35  ;;  %v1029_v26 = vsel %vm2022_vm11, %v2020_v19, 0.0  ;;  %v1036_v44 = vadd.f32 %v1028_v22, %v1027_v1 }
 0x114   : > { %v657_v43 = vpop.f32.mrf.mxu0  ;;  %v1051_v42 = vmul.f32 %v1027_v1, %v1027_v1  ;;  %v1053_v46 = vmul.f32 %v1029_v26, %v1029_v26 }
 0x115   : > { %v800_v57 = vpop.f32.mrf.mxu1  ;;  %v683_v52 = vadd.f32 %v657_v43, %v464_v51  ;;  %v2038_v23 = vadd.f32 %v1969_v59, %v825_v6  ;;  %v475_v51 = vadd.f32 %v1829_v0, %v1831_v2  ;;  %v1037_v61 = vadd.f32 %v1036_v44, %v1029_v26 }
 0x116   : > { %v1479_v49 = vpop.f32.mrf.mxu0  ;;  %v1060_v60 = vadd.f32 %v1052_v9, %v1051_v42 }
 0x117   : > { %v1507_v7 = vpop.f32.mrf.mxu1  ;;  %v826_v62 = vadd.f32 %v800_v57, %v683_v52  ;;  %v1030_v39 = vsel %vm2026_vm12, %v2038_v23, 0.0  ;;  %v990_v52 = vadd.s32 9, %v2048_v25 }
 0x118   : > { %v660_v50 = vpop.f32.mrf.mxu0  ;;  %v1054_v43 = vmul.f32 %v1030_v39, %v1030_v39  ;;  %v1061_v7 = vadd.f32 %v1060_v60, %v1053_v46  ;;  %v1038_v8 = vadd.f32 %v1037_v61, %v1030_v39 }
 0x119   : > { %v803_v20 = vpop.f32.mrf.mxu1  ;;  %v684_v24 = vadd.f32 %v660_v50, %v467_v17  ;;  %v2057_v28 = vadd.f32 %v1969_v59, %v826_v62  ;;  %v999_v37 = vsel %vm2107_vm5, %v990_v52, %v2048_v25 }
 0x11a   : > { %v1480_v21 = vpop.f32.mrf.mxu0  ;;  %v1062_v62 = vadd.f32 %v1061_v7, %v1054_v43  ;;  %vm1008_vm7 = vcmp.lt.s32.totalorder %v999_v37, 8 }
 0x11b   : > { %v1508_v5 = vpop.f32.mrf.mxu1  ;;  %v827_v54 = vadd.f32 %v803_v20, %v684_v24  ;;  %v1031_v53 = vsel %vm2059_vm15, %v2057_v28, 0.0 }
 0x11c   : > { %v665_v30 = vpop.f32.mrf.mxu0  ;;  %v1055_v10 = vmul.f32 %v1031_v53, %v1031_v53  ;;  %v1039_v20 = vadd.f32 %v1038_v8, %v1031_v53 }
 0x11d   : > { %v808_v55 = vpop.f32.mrf.mxu1  ;;  %v2072_v40 = vadd.f32 %v1969_v59, %v827_v54  ;;  %v685_v31 = vadd.f32 %v665_v30, %v472_v36 }
 0x11e   : > { %v1483_v47 = vpop.f32.mrf.mxu0  ;;  %v1063_v13 = vadd.f32 %v1062_v62, %v1055_v10 }
 0x11f   : > { %v1511_v35 = vpop.f32.mrf.mxu1  ;;  %v828_v56 = vadd.f32 %v808_v55, %v685_v31  ;;  %v1032_v0 = vsel %vm2063_vm0, %v2072_v40, 0.0 }
 0x120   : > { %v668_v45 = vpop.f32.mrf.mxu0  ;;  %v1056_v32 = vmul.f32 %v1032_v0, %v1032_v0  ;;  %v1040_v22 = vadd.f32 %v1039_v20, %v1032_v0 }
 0x121   : > { %v811_v57 = vpop.f32.mrf.mxu1  ;;  %v2100_v2 = vadd.f32 %v1969_v59, %v828_v56  ;;  %v686_v3 = vadd.f32 %v668_v45, %v475_v51 }
 0x122   : > { %v1484_v14 = vpop.f32.mrf.mxu0  ;;  %v1064_v1 = vadd.f32 %v1063_v13, %v1056_v32 }
 0x123   : > { %v1512_v6 = vpop.f32.mrf.mxu1  ;;  %v1033_v16 = vsel %vm2074_vm1, %v2100_v2, 0.0  ;;  %v829_v58 = vadd.f32 %v811_v57, %v686_v3 }
 0x124   : > { %v673_v33 = vpop.f32.mrf.mxu0  ;;  %v1057_v24 = vmul.f32 %v1033_v16, %v1033_v16  ;;  %v1041_v26 = vadd.f32 %v1040_v22, %v1033_v16 }
 0x125   : > { %v816_v17 = vpop.f32.mrf.mxu1  ;;  %v2117_v48 = vadd.f32 %v1969_v59, %v829_v58  ;;  %v687_v50 = vadd.f32 %v673_v33, %v480_v15 }
 0x126   : > { %v1487_v5 = vpop.f32.mrf.mxu0  ;;  %v1065_v63 = vadd.f32 %v1064_v1, %v1057_v24 }
 0x127   : > { %v1515_v12 = vpop.f32.mrf.mxu1  ;;  %v1034_v29 = vsel %vm1007_vm6, %v2117_v48, 0.0  ;;  %v830_v36 = vadd.f32 %v816_v17, %v687_v50 }
 0x128   : > { %v1058_v54 = vmul.f32 %v1034_v29, %v1034_v29  ;;  %v676_v55 = vpop.f32.mrf.mxu0  ;;  %v1042_v30 = vadd.f32 %v1041_v26, %v1034_v29 }
 0x129   : > { %v819_v21 = vpop.f32.mrf.mxu1  ;;  %v845_v9 = vadd.f32 %v1969_v59, %v830_v36 }
 0x12a   : > { %v1488_v25 = vpop.f32.mrf.mxu0  ;;  %v1066_v39 = vadd.f32 %v1065_v63, %v1058_v54 }
 0x12b   : > { %v1516_v27 = vpop.f32.mrf.mxu1  ;;  %v1035_v11 = vsel %vm1008_vm7, %v845_v9, 0.0 }
 0x12c   : > { %v1043_v31 = vadd.f32 %v1042_v30, %v1035_v11  ;;  %v1059_v34 = vmul.f32 %v1035_v11, %v1035_v11 }
 0x12e   : > { %v1044_v35 = vrot.slane %v1043_v31, 4  ;;  %v1067_v41 = vadd.f32 %v1066_v39, %v1059_v34 }
 0x130   : > { %v1045_v42 = vadd.f32 %v1044_v35, %v1043_v31  ;;  %v1068_v44 = vrot.slane %v1067_v41, 4 }
 0x132   : > { %v1046_v46 = vrot.slane %v1045_v42, 2  ;;  %v1069_v47 = vadd.f32 %v1068_v44, %v1067_v41 }
 0x134   : > { %v1047_v51 = vadd.f32 %v1046_v46, %v1045_v42  ;;  %v1070_v53 = vrot.slane %v1069_v47, 2 }
 0x136   : > { %v1048_v56 = vrot.slane %v1047_v51, 1  ;;  %v1071_v57 = vadd.f32 %v1070_v53, %v1069_v47 }
 0x138   : > { %v1049_v60 = vadd.f32 %v1048_v56, %v1047_v51  ;;  %v1072_v59 = vrot.slane %v1071_v57, 1 }
 0x13a   : > { %v1073_v61 = vadd.f32 %v1072_v59, %v1071_v57  ;;  %v1084_v43 = vmul.f32 0.015625, %v1049_v60 }
 0x13c   : > { %v1085_v45 = vmul.f32 0.015625, %v1073_v61  ;;  %v1086_v38 = vmul.f32 %v1084_v43, %v1084_v43  ;;  %v1100_v52 = vsub.f32 %v2017_v18, %v1084_v43  ;;  %v1101_v7 = vsub.f32 %v1988_v4, %v1084_v43 }
 0x13d   : > { %v1102_v8 = vsub.f32 %v2020_v19, %v1084_v43  ;;  %v1103_v10 = vsub.f32 %v2038_v23, %v1084_v43  ;;  %v1104_v14 = vsub.f32 %v2057_v28, %v1084_v43  ;;  %v1105_v15 = vsub.f32 %v2072_v40, %v1084_v43 }
 0x13e   : > { %v1087_v0 = vsub.f32 %v1085_v45, %v1086_v38  ;;  %v1106_v16 = vsub.f32 %v2100_v2, %v1084_v43  ;;  %v1107_v58 = vsub.f32 %v2117_v48, %v1084_v43  ;;  %v1108_v17 = vsub.f32 %v845_v9, %v1084_v43 }
 0x140   : > { %v1088_v3 = vmax.f32 %v1087_v0, 0.0 }
 0x142   : > { %v1089_v6 = vadd.f32 1e-05, %v1088_v3 }
 0x144   : > { %1575 = vrsqrt.f32 %v1089_v6 }
 0x151   : > { %v1576_v49 = vpop.eup %1575 }
 0x152   : > { %v1109_v62 = vmul.f32 %v1576_v49, %v1100_v52  ;;  %v1110_v20 = vmul.f32 %v1576_v49, %v1101_v7  ;;  %v1111_v18 = vmul.f32 %v1576_v49, %v1102_v8  ;;  %v1112_v32 = vmul.f32 %v1576_v49, %v1103_v10 }
 0x153   : > { %v1113_v4 = vmul.f32 %v1576_v49, %v1104_v14  ;;  %v1114_v33 = vmul.f32 %v1576_v49, %v1105_v15  ;;  %v1115_v19 = vmul.f32 %v1576_v49, %v1106_v16  ;;  %v1116_v50 = vmul.f32 %v1576_v49, %v1107_v58 }
 0x154   : > { %v1117_v23 = vmul.f32 %v1576_v49, %v1108_v17  ;;  %vm1118_vm8 = vcmp.ge.f32.partialorder %v1109_v62, 0.0  ;;  %vm1119_vm9 = vcmp.ge.f32.partialorder %v1110_v20, 0.0  ;;  %vm1120_vm10 = vcmp.ge.f32.partialorder %v1111_v18, 0.0 }
 0x155   : > { %vm1121_vm11 = vcmp.ge.f32.partialorder %v1112_v32, 0.0  ;;  %vm1122_vm12 = vcmp.ge.f32.partialorder %v1113_v4, 0.0  ;;  %vm1123_vm13 = vcmp.ge.f32.partialorder %v1114_v33, 0.0  ;;  %vm1124_vm14 = vcmp.ge.f32.partialorder %v1115_v19, 0.0 }
 0x156   : > { %vm1125_vm15 = vcmp.ge.f32.partialorder %v1116_v50, 0.0  ;;  %vm1126_vm0 = vcmp.ge.f32.partialorder %v1117_v23, 0.0  ;;  %v1127_v28 = vmul.f32 0.2, %v1109_v62  ;;  %v1128_v40 = vmul.f32 0.2, %v1110_v20 }
 0x157   : > { %v1129_v2 = vmul.f32 0.2, %v1111_v18  ;;  %v1130_v48 = vmul.f32 0.2, %v1112_v32  ;;  %v1131_v37 = vmul.f32 0.2, %v1113_v4 }
 0x158   : > { %v1132_v12 = vmul.f32 0.2, %v1114_v33  ;;  %v1133_v13 = vmul.f32 0.2, %v1115_v19  ;;  %v1134_v22 = vmul.f32 0.2, %v1116_v50  ;;  %v1136_v24 = vsel %vm1118_vm8, %v1109_v62, %v1127_v28 }
 0x159   : > { %v1135_v5 = vmul.f32 0.2, %v1117_v23  ;;  %v1137_v29 = vsel %vm1119_vm9, %v1110_v20, %v1128_v40  ;;  %v1138_v36 = vsel %vm1120_vm10, %v1111_v18, %v1129_v2  ;;  %v1139_v21 = vsel %vm1121_vm11, %v1112_v32, %v1130_v48 }
 0x15a   : > { %v1140_v1 = vsel %vm1122_vm12, %v1113_v4, %v1131_v37  ;;  %v1141_v26 = vsel %vm1123_vm13, %v1114_v33, %v1132_v12  ;;  %v1142_v54 = vsel %vm1124_vm14, %v1115_v19, %v1133_v13  ;;  %v1143_v55 = vsel %vm1125_vm15, %v1116_v50, %v1134_v22 }
 0x15b   : > { %v1144_v9 = vsel %vm1126_vm0, %v1117_v23, %v1135_v5  ;;  %v1349_v27 = vpack.c.bf16 %v1137_v29, %v1136_v24  ;;  %v1354_v63 = vpack.c.bf16 %v1139_v21, %v1138_v36  ;;  %v1359_v30 = vpack.c.bf16 %v1141_v26, %v1140_v1 }
 0x15c   : > { %v1345_v25 = vpack.c.bf16 %v1144_v9, %v1144_v9  ;;  %v1364_v11 = vpack.c.bf16 %v1143_v55, %v1142_v54 }
 0x15d   : > { %1350 = vst [vmem:[%s170_s29] sm:$0xff] %v1349_v27   ;;  %1366 = vst [vmem:[%s170_s29 + $0x8] sm:$0xff] %v1354_v63  }
 0x15e   : > { %1367 = vst [vmem:[%s170_s29 + $0x10] sm:$0xff] %v1359_v30   ;;  %1368 = vst [vmem:[%s170_s29 + $0x18] sm:$0xff] %v1364_v11  }
 0x15f   : > { %1190 = vst [vmem:[%s170_s29 + $0x20] sm:$0xf] %v1345_v25 }
 0x160 PF: > { %s13_s12 = sadd.s32 1, %s1583_s12  }
 0x161   : > { %p10_p4 = scmp.ge.s32.totalorder %s13_s12, 4  }
 0x163   :  { %12 = sbr.rel (!%p10_p4) target bundleno = 1 (0x1), region = 65 }

// kernel: discriminator_forward.8
= control target key start
LH: loop header
LB: loop body
LE: loop exit
PB: predicated region body
PF: predicated region fallthrough
CT: control target
= control target key end

     0   :  { %s3871_s12 = smov 0   ;;  %s5015_s0 = inlined_call_operand.vmem [shape: bf16[2,110,32], index: 0, kind: input, shape index: {}]   ;;  %s5016_s1 = inlined_call_operand.vmem [shape: bf16[16,32,128], index: 1, kind: input, shape index: {}]   ;;  %s5017_s2 = inlined_call_operand.vmem [shape: f32[1,128], index: 2, kind: input, shape index: {}]   ;;  %s5018_s3 = inlined_call_operand.vmem [shape: bf16[2,70,128], index: 3, kind: output, shape index: {}]  }
   0x1 LB: > { %s2970_s13 = sadd.s32 4294967295, %s3847_s12   ;;  %p2974_p0 = scmp.ge.s32.totalorder %s3847_s12, 1  ;;  %s3847_s12 = sphi %s3871_s12, %s13_s12  }
   0x2   : > { %p137_p1 = scmp.lt.s32.totalorder %s3847_s12, 3 }
   0x4   : > { %p138_p2 = pnand %p2974_p0, %p137_p1 }
   0x5   : > { %p161_p3 = scmp.lt.s32.totalorder (!%p138_p2), %s2970_s13, 1 }
   0x6   : > { %141 = sbr.rel (%p138_p2) target bundleno = 590 (0x24e), region = 32 }
   0xb   : > { %v3763_v0 = vld [vmem:[%s5016_s1 + $0x8] sm:$0xff]   ;;  %v3849_v1 = vmov 0.0   ;;  %v3764_v2 = vld [vmem:[%s5016_s1 + $0x18] sm:$0xff]   ;;  %v3765_v3 = vld [vmem:[%s5016_s1] sm:$0xff]   ;;  %vm3850_vm0 = vmmov 0   ;;  %s5044_s13 = smov (!%p161_p3, %s2970_s13), 1 }
   0xc   : > { %3373 = vmatprep.subr.bf16.mxu1 %v3849_v1  ;;  %3349 = vmatprep.subr.bf16.mxu0 %v3849_v1  ;;  %v3766_v4 = vld [vmem:[%s5016_s1 + $0x10] sm:$0xff]   ;;  %s3733_s22 = smul.u32 56, %s5044_s13  ;;  %vm267_vm1 = vcmask 261120   ;;  %v3771_v7 = vld [vmem:[%s5016_s1 + $0x38] sm:$0xff]   ;;  %vm215_vm2 = vsmask.f32 7424 }
   0xd   : > { %3374 = vmatpush3.bf16.msra.mxu1 %v3763_v0  ;;  %3377 = vmatprep.mubr.msk.bf16.mxu1 %vm3850_vm0, %v3849_v1  ;;  %v3775_v14 = vld [vmem:[%s5016_s1 + $0x30] sm:$0xff]   ;;  %v3770_v18 = vld [vmem:[%s5016_s1 + $0x28] sm:$0xff]   ;;  %v3774_v25 = vld [vmem:[%s5016_s1 + $0x20] sm:$0xff]   ;;  %vm620_vm3 = vsmask.f32 6400  ;;  %vm462_vm4 = vcmask 1046528  }
   0xe   : > { %3350 = vmatpush3.bf16.msra.mxu0 %v3764_v2  ;;  %3375 = vmatprep.subr.bf16.mxu1 %v3849_v1  ;;  %s3906_s25 = scalar_lea.vmem %s5015_s0, %s3733_s22  ;;  %v3781_v0 = vld [vmem:[%s5016_s1 + $0x58] sm:$0xff]   ;;  %vm1234_vm5 = vsmask.f32 5376  ;;  %vm1107_vm6 = vcmask 1045504   ;;  %vm1826_vm7 = vsmask.f32 4352 }
   0xf   : > { %3351 = vmatprep.subr.bf16.mxu0 %v3849_v1  ;;  %3353 = vmatprep.mubr.msk.bf16.mxu0 %vm3850_vm0, %v3849_v1  ;;  %v173_v5 = vld [vmem:[%s3906_s25] sm:$0xf]  ;;  %v3911_v6 = vld [vmem:[%s3906_s25 + $0x4] sm:$0xf]  ;;  %v3918_v9 = vld [vmem:[%s3906_s25 + $0x8] sm:$0xff]   ;;  %vm1699_vm8 = vcmask 1044480  }
  0x10   : > { %v2981_v8 = vcombine.low %v173_v5, %v3911_v6  ;;  %v224_v12 = vshll.u32 %v3918_v9, 16  ;;  %v3923_v13 = vld [vmem:[%s3906_s25 + $0x10] sm:$0xff]   ;;  %v228_v19 = vshrl.u32 %v3918_v9, 16  ;;  %v3942_v24 = vld [vmem:[%s3906_s25 + $0x18] sm:$0xff]   ;;  %v3958_v29 = vld [vmem:[%s3906_s25 + $0x20] ss:$0 sps:$4 sm:$0xff]  }
  0x11   : > { %3376 = vmatpush3.bf16.msra.mxu1 %v3765_v3  ;;  %v232_v20 = vshll.u32 %v3923_v13, 16  ;;  %v236_v27 = vshrl.u32 %v3923_v13, 16  ;;  %v240_v28 = vshll.u32 %v3942_v24, 16  ;;  %v3967_v32 = vld [vmem:[%s3906_s25 + $0x8] sm:$0xf]  ;;  %v244_v34 = vshrl.u32 %v3942_v24, 16 }
  0x12   : > { %3352 = vmatpush3.bf16.msra.mxu0 %v3766_v4  ;;  %3421 = vmatprep.subr.bf16.mxu1 %v3849_v1  ;;  %v217_v10 = vshrl.u32 %v2981_v8, 16  ;;  %v219_v11 = vshll.u32 %v2981_v8, 16  ;;  %v226_v16 = vrot.slane %v224_v12, 1  ;;  %v3970_v33 = vld [vmem:[%s3906_s25 + $0xc] sm:$0xf]  ;;  %v248_v35 = vshll.u32 %v3958_v29, 16 }
  0x13   : > { %3397 = vmatprep.subr.bf16.mxu0 %v3849_v1  ;;  %v234_v23 = vrot.slane %v232_v20, 1  ;;  %v242_v31 = vrot.slane %v240_v28, 1  ;;  %v3778_v37 = vld [vmem:[%s3906_s25] sm:$0xfe]   ;;  %v3018_v38 = vcombine.low %v3967_v32, %v3970_v33  ;;  %v3984_v43 = vld [vmem:[%s3906_s25 + $0x10] sm:$0xf] }
  0x14   : > { %3378 = vmatmul.mubr.msk.bf16.vlgmr.msra.gmra.mxu1 %vm267_vm1, %v2981_v8  ;;  %v221_v15 = vrot.slane %v219_v11, 1  ;;  %v230_v22 = vor.u32 %v228_v19, %v226_v16  ;;  %v250_v39 = vrot.slane %v248_v35, 1  ;;  %v622_v41 = vshrl.u32 %v3778_v37, 16  ;;  %v3987_v44 = vld [vmem:[%s3906_s25 + $0x14] sm:$0xf]  ;;  %s3734_s8 = smul.u32 36, %s5044_s13 }
  0x15   : > { %3422 = vmatpush3.bf16.msra.mxu1 %v3771_v7  ;;  %3381 = vmatprep.mubr.msk.bf16.mxu1 %vm3850_vm0, %v3849_v1  ;;  %v238_v30 = vor.u32 %v236_v27, %v234_v23  ;;  %v246_v40 = vor.u32 %v244_v34, %v242_v31  ;;  %v625_v42 = vshll.u32 %v3778_v37, 16  ;;  %v630_v45 = vshrl.u32 %v3018_v38, 16  ;;  %v3777_v48 = vld [vmem:[%s3906_s25 + $0x20] ss:$0 sps:$4 sm:$0x77]  }
  0x16   : > { %3423 = vmatprep.subr.bf16.mxu1 %v3849_v1  ;;  %v222_v17 = vor.u32 %v221_v15, %v217_v10  ;;  %v235_v26 = vsel %vm215_vm2, %v230_v22, %v234_v23  ;;  %v633_v46 = vshll.u32 %v3018_v38, 16  ;;  %v3019_v49 = vcombine.low %v3984_v43, %v3987_v44  ;;  %v453_v54 = vld [vmem:[%s3906_s25] sm:$0xe]  ;;  %v4002_v56 = vld [vmem:[%s3906_s25 + $0x18] sm:$0xf]  ;;  %v3780_v15 = vld [vmem:[%s5016_s1 + $0x48] sm:$0xff]   ;;  %s170_s10 = scalar_lea.vmem %s5018_s3, %s3734_s8 }
  0x17   : > { %v243_v36 = vsel %vm215_vm2, %v238_v30, %v242_v31  ;;  %v251_v47 = vsel %vm215_vm2, %v246_v40, %v250_v39  ;;  %v624_v50 = vrot.slane %v622_v41, 1  ;;  %v627_v51 = vrot.slane %v625_v42, 2  ;;  %v4007_v61 = vld [vmem:[%s3906_s25 + $0x1c] sm:$0xf]  ;;  %v4022_v11 = vld [vmem:[%s3906_s25 + $0x20] sm:$0xf] }
  0x18   : > { %v227_v21 = vsel %vm215_vm2, %v222_v17, %v226_v16  ;;  %v632_v52 = vrot.slane %v630_v45, 1  ;;  %v635_v53 = vrot.slane %v633_v46, 2  ;;  %v252_v55 = vshrl.u32 %v3958_v29, 16  ;;  %v3785_v22 = vld [vmem:[%s5016_s1 + $0x40] sm:$0xff]   ;;  %v4067_v40 = vld [vmem:[%s3906_s25 + $0xc] sm:$0xff]  }
  0x19   : > { %3424 = vmatpush3.bf16.msra.mxu1 %v3775_v14  ;;  %3354 = vmatmul.mubr.msk.bf16.vlgmr.msra.gmra.mxu0 %vm267_vm1, %v227_v21  ;;  %v628_v57 = vor.u32 %v627_v51, %v624_v50  ;;  %v639_v59 = vshrl.u32 %v3019_v49, 16  ;;  %v642_v60 = vshll.u32 %v3019_v49, 16  ;;  %v3005_v62 = vcombine.low %v453_v54, %v3911_v6  ;;  %v3786_v14 = vld [vmem:[%s5016_s1 + $0x50] sm:$0xff]   ;;  %v906_v35 = vld [vmem:[%s3906_s25 + $0x4] sm:$0xe] }
  0x1a   : > { %3469 = vmatprep.subr.bf16.mxu1 %v3849_v1  ;;  %3398 = vmatpush3.bf16.msra.mxu0 %v3770_v18  ;;  %v636_v58 = vor.u32 %v635_v53, %v632_v52  ;;  %v254_v63 = vor.u32 %v252_v55, %v250_v39  ;;  %v3020_v2 = vcombine.low %v4002_v56, %v4007_v61  ;;  %v464_v8 = vrot.slane %v3918_v9, 1  ;;  %v4084_v51 = vld [vmem:[%s3906_s25 + $0x14] sm:$0xff]   ;;  %v773_v54 = vld [vmem:[%s3906_s25 + $0x4] sm:$0xe] }
  0x1b   : > { %3357 = vmatprep.mubr.msk.bf16.mxu0 %vm3850_vm0, %v3849_v1  ;;  %3399 = vmatprep.subr.bf16.mxu0 %v3849_v1  ;;  %v641_v4 = vrot.slane %v639_v59, 1  ;;  %v644_v5 = vrot.slane %v642_v60, 2  ;;  %v463_v7 = vrot.slane %v3005_v62, 1  ;;  %v466_v21 = vrot.slane %v3923_v13, 1  ;;  %v3793_v62 = vld [vmem:[%s5016_s1 + $0x78] sm:$0xff]  }
  0x1c   : > { %3382 = vmatmul.mubr.msk.bf16.gmra.mxu1 %vm267_vm1, %v3918_v9  ;;  %v637_v3 = vsel %vm620_vm3, %v628_v57, %v636_v58  ;;  %v648_v6 = vshrl.u32 %v3020_v2, 16  ;;  %v651_v10 = vshll.u32 %v3020_v2, 16  ;;  %v589_v9 = vld [vmem:[%s3906_s25 + $0x24] sm:$0x1]  ;;  %v468_v31 = vrot.slane %v3942_v24, 1  ;;  %v4107_v2 = vld [vmem:[%s3906_s25 + $0x1c] sm:$0xff]  }
  0x1d   : > { %3385 = vmatprep.mubr.msk.bf16.mxu1 %vm3850_vm0, %v3849_v1  ;;  %v645_v12 = vor.u32 %v644_v5, %v641_v4  ;;  %v465_v16 = vsel %vm462_vm4, %v463_v7, %v464_v8  ;;  %v3021_v20 = vcombine.low %v4022_v11, %v589_v9  ;;  %v467_v27 = vsel %vm462_vm4, %v464_v8, %v466_v21  ;;  %v3800_v5 = vld [vmem:[%s5016_s1 + $0x70] sm:$0xff]   ;;  %v4121_v7 = vld [vmem:[%s3906_s25 + $0x24] sm:$0xf]  ;;  %v915_v8 = vld [vmem:[%s3906_s25 + $0x28] sm:$0x1] }
  0x1e   : > { %3400 = vmatpush3.bf16.msra.mxu0 %v3774_v25  ;;  %v650_v17 = vrot.slane %v648_v6, 1  ;;  %v653_v18 = vrot.slane %v651_v10, 2  ;;  %v469_v37 = vsel %vm462_vm4, %v466_v21, %v468_v31  ;;  %v955_v45 = vshrl.u32 %v4067_v40, 16  ;;  %v3792_v10 = vld [vmem:[%s5016_s1 + $0x68] sm:$0xff]  }
  0x1f   : > { %3445 = vmatprep.subr.bf16.mxu0 %v3849_v1  ;;  %v646_v19 = vsel %vm620_vm3, %v636_v58, %v645_v12  ;;  %v657_v25 = vshrl.u32 %v3021_v20, 16  ;;  %v958_v46 = vshll.u32 %v4067_v40, 16  ;;  %v964_v55 = vshrl.u32 %v4084_v51, 16 }
  0x20   : > { %v654_v23 = vor.u32 %v653_v18, %v650_v17  ;;  %v957_v50 = vrot.slane %v955_v45, 1  ;;  %v967_v57 = vshll.u32 %v4084_v51, 16  ;;  %v3033_v58 = vcombine.low %v773_v54, %v3967_v32 }
  0x21   : > { %3358 = vmatmul.mubr.msk.bf16.gmra.mxu0 %vm267_vm1, %v235_v26  ;;  %v660_v26 = vshll.u32 %v3021_v20, 16  ;;  %v659_v28 = vrot.slane %v657_v25, 1  ;;  %v3034_v59 = vcombine.low %v3970_v33, %v3984_v43  ;;  %v976_v4 = vshll.u32 %v4107_v2, 16 }
  0x22   : > { %3361 = vmatprep.mubr.msk.bf16.mxu0 %vm3850_vm0, %v3849_v1  ;;  %v789_v32 = vrot.slane %v3033_v58, 1  ;;  %v3036_v21 = vcombine.low %v4007_v61, %v4022_v11  ;;  %v1098_v61 = vld [vmem:[%s3906_s25 + $0x4] sm:$0xc] }
  0x23   : > { %v662_v30 = vrot.slane %v660_v26, 2  ;;  %v790_v33 = vrot.slane %v3034_v59, 1  ;;  %v1252_v58 = vrot.slane %v976_v4, 3 }
  0x24   : > { %3386 = vmatmul.mubr.msk.bf16.gmra.mxu1 %vm267_vm1, %v3923_v13  ;;  %v655_v13 = vsel %vm620_vm3, %v645_v12, %v654_v23  ;;  %v3035_v12 = vcombine.low %v3987_v44, %v4002_v56  ;;  %v3799_v56 = vld [vmem:[%s5016_s1 + $0x60] sm:$0xff]   ;;  %v794_v26 = vrot.slane %v3036_v21, 1  ;;  %v4262_v21 = vld [vmem:[%s3906_s25 + $0x18] sm:$0xff]  }
  0x25   : > { %3389 = vmatprep.mubr.msk.bf16.mxu1 %vm3850_vm0, %v3849_v1  ;;  %v663_v34 = vor.u32 %v662_v30, %v659_v28  ;;  %v791_v6 = vsel %vm462_vm4, %v789_v32, %v790_v33 }
  0x26   : > { %v792_v44 = vrot.slane %v3035_v12, 1 }
  0x27   : > { %v664_v38 = vsel %vm620_vm3, %v654_v23, %v663_v34 }
  0x28   : > { %v793_v20 = vsel %vm462_vm4, %v790_v33, %v792_v44  ;;  %v795_v11 = vsel %vm462_vm4, %v792_v44, %v794_v26 }
  0x29   : > { %3362 = vmatmul.mubr.msk.bf16.gmra.mxu0 %vm267_vm1, %v243_v36  ;;  %v4061_v36 = vld [vmem:[%s3906_s25 + $0x8] sm:$0xf] }
  0x2a   : > { %3365 = vmatprep.mubr.msk.bf16.mxu0 %vm3850_vm0, %v3849_v1  ;;  %v3049_v39 = vcombine.low %v906_v35, %v4061_v36  ;;  %v3065_v28 = vcombine.low %v1098_v61, %v4061_v36  ;;  %v1243_v36 = vrot.slane %v955_v45, 2  ;;  %v3803_v45 = vld [vmem:[%s5016_s1 + $0x98] sm:$0xff]  }
  0x2b   : > { %v3810_v61 = vld [vmem:[%s5016_s1 + $0xb8] sm:$0xff]  }
  0x2c   : > { %3390 = vmatmul.mubr.msk.bf16.gmra.mxu1 %vm267_vm1, %v3942_v24  ;;  %v470_v24 = vrot.slane %v3958_v29, 1  ;;  %v947_v41 = vshrl.u32 %v3049_v39, 16  ;;  %v950_v42 = vshll.u32 %v3049_v39, 16  ;;  %v960_v29 = vrot.slane %v958_v46, 2 }
  0x2d   : > { %3393 = vmatprep.mubr.msk.bf16.mxu1 %vm3850_vm0, %v3849_v1  ;;  %v1239_v35 = vshll.u32 %v3065_v28, 16 }
  0x2e   : > { %v952_v49 = vrot.slane %v950_v42, 2  ;;  %v961_v53 = vor.u32 %v960_v29, %v957_v50  ;;  %v1109_v50 = vrot.slane %v4067_v40, 2 }
  0x2f   : > { %v1241_v39 = vrot.slane %v1239_v35, 3 }
  0x31   : > { %3366 = vmatmul.mubr.msk.bf16.gmra.mxu0 %vm267_vm1, %v251_v47  ;;  %v471_v47 = vsel %vm462_vm4, %v468_v31, %v470_v24 }
  0x32   : > { %3369 = vmatprep.mubr.msk.bf16.mxu0 %vm3850_vm0, %v3849_v1 }
  0x34   : > { %3394 = vmatmul.mubr.msk.bf16.gmra.mxu1 %vm267_vm1, %v3777_v48  ;;  %v949_v48 = vrot.slane %v947_v41, 1 }
  0x35   : > { %3425 = vmatprep.mubr.msk.bf16.mxu1 %vm3850_vm0, %v3849_v1 }
  0x36   : > { %v953_v52 = vor.u32 %v952_v49, %v949_v48  ;;  %v1248_v48 = vrot.slane %v967_v57, 3  ;;  %v1108_v49 = vrot.slane %v3065_v28, 2 }
  0x38   : > { %v962_v60 = vsel %vm620_vm3, %v953_v52, %v961_v53  ;;  %v3806_v52 = vld [vmem:[%s5016_s1 + $0x90] sm:$0xff]   ;;  %v1110_v54 = vsel %vm1107_vm6, %v1108_v49, %v1109_v50  ;;  %v3814_v49 = vld [vmem:[%s5016_s1 + $0xa0] sm:$0xff]  }
  0x39   : > { %3370 = vmatmul.mubr.msk.bf16.gmra.mxu0 %vm267_vm1, %v254_v63  ;;  %v966_v63 = vrot.slane %v964_v55, 1 }
  0x3a   : > { %3401 = vmatprep.mubr.msk.bf16.mxu0 %vm3850_vm0, %v3849_v1 }
  0x3c   : > { %3426 = vmatmul.mubr.msk.bf16.vlgmr.msra.gmra.mxu1 %vm267_vm1, %v637_v3  ;;  %v973_v3 = vshrl.u32 %v4107_v2, 16 }
  0x3d   : > { %3470 = vmatpush3.bf16.msra.mxu1 %v3781_v0  ;;  %3429 = vmatprep.mubr.msk.bf16.mxu1 %vm3850_vm0, %v3849_v1  ;;  %v969_v0 = vrot.slane %v967_v57, 2 }
  0x3e   : > { %3471 = vmatprep.subr.bf16.mxu1 %v3849_v1  ;;  %v975_v9 = vrot.slane %v973_v3, 1  ;;  %v1251_v57 = vrot.slane %v973_v3, 2 }
  0x3f   : > { %v970_v43 = vor.u32 %v969_v0, %v966_v63 }
  0x40   : > { %v1253_v63 = vor.u32 %v1252_v58, %v1251_v57 }
  0x41   : > { %3472 = vmatpush3.bf16.msra.mxu1 %v3786_v14  ;;  %3402 = vmatmul.mubr.msk.bf16.vlgmr.msra.gmra.mxu0 %vm267_vm1, %v465_v16  ;;  %v971_v14 = vsel %vm620_vm3, %v961_v53, %v970_v43  ;;  %v4137_v16 = vcombine.low %v4121_v7, %v915_v8  ;;  %v1225_v53 = vld [vmem:[%s3906_s25 + $0x28] sm:$0x3]  ;;  %v4239_v8 = vld [vmem:[%s3906_s25 + $0xc] sm:$0xf] }
  0x42   : > { %3517 = vmatprep.subr.bf16.mxu1 %v3849_v1  ;;  %3446 = vmatpush3.bf16.msra.mxu0 %v3780_v15  ;;  %v978_v15 = vrot.slane %v976_v4, 2  ;;  %v3077_v59 = vcombine.low %v4121_v7, %v1225_v53  ;;  %v1113_v4 = vrot.slane %v4107_v2, 2  ;;  %v1372_v7 = vld [vmem:[%s3906_s25 + $0x8] sm:$0xc] }
  0x43   : > { %3405 = vmatprep.mubr.msk.bf16.mxu0 %vm3850_vm0, %v3849_v1  ;;  %3447 = vmatprep.subr.bf16.mxu0 %v3849_v1  ;;  %v982_v18 = vshrl.u32 %v4137_v16, 16  ;;  %v3089_v12 = vcombine.low %v1372_v7, %v4239_v8  ;;  %v1115_v2 = vrot.slane %v4137_v16, 2 }
  0x44   : > { %3430 = vmatmul.mubr.msk.bf16.gmra.mxu1 %vm267_vm1, %v646_v19  ;;  %v979_v17 = vor.u32 %v978_v15, %v975_v9  ;;  %v985_v19 = vshll.u32 %v4137_v16, 16  ;;  %v1256_v0 = vshrl.u32 %v3077_v59, 16  ;;  %v1259_v32 = vshll.u32 %v3077_v59, 16  ;;  %v1381_v59 = vld [vmem:[%s3906_s25 + $0x2c] sm:$0x1] }
  0x45   : > { %3433 = vmatprep.mubr.msk.bf16.mxu1 %vm3850_vm0, %v3849_v1  ;;  %v984_v23 = vrot.slane %v982_v18, 1  ;;  %v1539_v9 = vshrl.u32 %v3089_v12, 16  ;;  %v1542_v15 = vshll.u32 %v3089_v12, 16 }
  0x46   : > { %3448 = vmatpush3.bf16.msra.mxu0 %v3785_v22  ;;  %v980_v22 = vsel %vm620_vm3, %v970_v43, %v979_v17  ;;  %v987_v25 = vrot.slane %v985_v19, 2  ;;  %v1258_v43 = vrot.slane %v1256_v0, 2  ;;  %v1261_v3 = vrot.slane %v1259_v32, 3 }
  0x47   : > { %3493 = vmatprep.subr.bf16.mxu0 %v3849_v1  ;;  %v1541_v18 = vrot.slane %v1539_v9, 2  ;;  %v1544_v19 = vrot.slane %v1542_v15, 3 }
  0x49   : > { %3406 = vmatmul.mubr.msk.bf16.gmra.mxu0 %vm267_vm1, %v467_v27  ;;  %v988_v27 = vor.u32 %v987_v25, %v984_v23  ;;  %v1556_v25 = vshrl.u32 %v4262_v21, 16 }
  0x4a   : > { %3409 = vmatprep.mubr.msk.bf16.mxu0 %vm3850_vm0, %v3849_v1 }
  0x4b   : > { %v989_v30 = vsel %vm620_vm3, %v979_v17, %v988_v27  ;;  %v1116_v17 = vsel %vm1107_vm6, %v1113_v4, %v1115_v2 }
  0x4c   : > { %3434 = vmatmul.mubr.msk.bf16.gmra.mxu1 %vm267_vm1, %v655_v13  ;;  %v3801_v13 = vld [vmem:[%s3906_s25 + $0x24] ss:$0 sps:$4 sm:$0xff]  }
  0x4d   : > { %3437 = vmatprep.mubr.msk.bf16.mxu1 %vm3850_vm0, %v3849_v1  ;;  %v796_v31 = vrot.slane %v3801_v13, 1 }
  0x51   : > { %3410 = vmatmul.mubr.msk.bf16.gmra.mxu0 %vm267_vm1, %v469_v37  ;;  %v797_v37 = vsel %vm462_vm4, %v794_v26, %v796_v31  ;;  %v1559_v26 = vshll.u32 %v4262_v21, 16 }
  0x52   : > { %3413 = vmatprep.mubr.msk.bf16.mxu0 %vm3850_vm0, %v3849_v1 }
  0x53   : > { %v1561_v13 = vrot.slane %v1559_v26, 3 }
  0x54   : > { %3438 = vmatmul.mubr.msk.bf16.gmra.mxu1 %vm267_vm1, %v664_v38 }
  0x55   : > { %3441 = vmatprep.mubr.msk.bf16.mxu1 %vm3850_vm0, %v3849_v1 }
  0x59   : > { %3414 = vmatmul.mubr.msk.bf16.gmra.mxu0 %vm267_vm1, %v471_v47 }
  0x5a   : > { %3417 = vmatprep.mubr.msk.bf16.mxu0 %vm3850_vm0, %v3849_v1 }
  0x5c   : > { %3442 = vmatmul.mubr.msk.bf16.gmra.mxu1 %vm267_vm1, %v663_v34  ;;  %v1236_v34 = vshrl.u32 %v3065_v28, 16  ;;  %v4281_v28 = vld [vmem:[%s3906_s25 + $0x20] sm:$0xff]  }
  0x5d   : > { %3473 = vmatprep.mubr.msk.bf16.mxu1 %vm3850_vm0, %v3849_v1  ;;  %v1565_v35 = vshrl.u32 %v4281_v28, 16  ;;  %v1417_v57 = vrot.slane %v4281_v28, 2 }
  0x5e   : > { %v1238_v38 = vrot.slane %v1236_v34, 2 }
  0x60   : > { %v1242_v41 = vor.u32 %v1241_v39, %v1238_v38  ;;  %v3815_v38 = vld [vmem:[%s5016_s1 + $0xb0] sm:$0xff]   ;;  %v4296_v39 = vld [vmem:[%s3906_s25 + $0x28] sm:$0xf] }
  0x61   : > { %3418 = vmatmul.mubr.msk.bf16.gmra.mxu0 %vm267_vm1, %v470_v24  ;;  %v1244_v24 = vrot.slane %v958_v46, 3  ;;  %v1247_v46 = vrot.slane %v964_v55, 2  ;;  %v3802_v55 = vld [vmem:[%s5016_s1 + $0x88] sm:$0xff]  }
  0x62   : > { %3449 = vmatprep.mubr.msk.bf16.mxu0 %vm3850_vm0, %v3849_v1 }
  0x63   : > { %v1245_v42 = vor.u32 %v1244_v24, %v1243_v36  ;;  %v1249_v29 = vor.u32 %v1248_v48, %v1247_v46  ;;  %v1529_v36 = vld [vmem:[%s3906_s25 + $0x2c] sm:$0x3]  ;;  %v1415_v48 = vrot.slane %v4262_v21, 2 }
  0x64   : > { %3474 = vmatmul.mubr.msk.bf16.vlgmr.msra.gmra.mxu1 %vm267_vm1, %v962_v60  ;;  %v1111_v60 = vrot.slane %v4084_v51, 2  ;;  %v4310_v46 = vcombine.low %v4296_v39, %v1529_v36 }
  0x65   : > { %3518 = vmatpush3.bf16.msra.mxu1 %v3793_v62  ;;  %3477 = vmatprep.mubr.msk.bf16.mxu1 %vm3850_vm0, %v3849_v1  ;;  %v1246_v47 = vsel %vm1234_vm5, %v1242_v41, %v1245_v42  ;;  %v1250_v40 = vsel %vm1234_vm5, %v1245_v42, %v1249_v29  ;;  %v3805_v62 = vld [vmem:[%s5016_s1 + $0x80] sm:$0xff]   ;;  %v1254_v51 = vsel %vm1234_vm5, %v1249_v29, %v1253_v63  ;;  %v3809_v41 = vld [vmem:[%s5016_s1 + $0xa8] sm:$0xff]  }
  0x66   : > { %3519 = vmatprep.subr.bf16.mxu1 %v3849_v1  ;;  %v1112_v33 = vsel %vm1107_vm6, %v1109_v50, %v1111_v60  ;;  %v1574_v29 = vshrl.u32 %v4310_v46, 16 }
  0x69   : > { %3520 = vmatpush3.bf16.msra.mxu1 %v3800_v5  ;;  %3450 = vmatmul.mubr.msk.bf16.vlgmr.msra.gmra.mxu0 %vm267_vm1, %v791_v6  ;;  %v1262_v5 = vor.u32 %v1261_v3, %v1258_v43  ;;  %v1114_v6 = vsel %vm1107_vm6, %v1111_v60, %v1113_v4  ;;  %v1690_v60 = vld [vmem:[%s3906_s25 + $0x8] sm:$0x8] }
  0x6a   : > { %3565 = vmatprep.subr.bf16.mxu1 %v3849_v1  ;;  %3494 = vmatpush3.bf16.msra.mxu0 %v3792_v10  ;;  %v3117_v32 = vcombine.low %v1690_v60, %v4239_v8 }
  0x6b   : > { %3453 = vmatprep.mubr.msk.bf16.mxu0 %vm3850_vm0, %v3849_v1  ;;  %3495 = vmatprep.subr.bf16.mxu0 %v3849_v1  ;;  %v1263_v10 = vsel %vm1234_vm5, %v1253_v63, %v1262_v5  ;;  %v3093_v63 = vcombine.low %v4296_v39, %v1381_v59 }
  0x6c   : > { %3478 = vmatmul.mubr.msk.bf16.gmra.mxu1 %vm267_vm1, %v971_v14  ;;  %v4245_v14 = vld [vmem:[%s3906_s25 + $0x10] sm:$0xff]   ;;  %v1831_v43 = vshll.u32 %v3117_v32, 16 }
  0x6d   : > { %3481 = vmatprep.mubr.msk.bf16.mxu1 %vm3850_vm0, %v3849_v1  ;;  %v1547_v44 = vshrl.u32 %v4245_v14, 16 }
  0x6e   : > { %3496 = vmatpush3.bf16.msra.mxu0 %v3799_v56  ;;  %v1550_v56 = vshll.u32 %v4245_v14, 16 }
  0x6f   : > { %3541 = vmatprep.subr.bf16.mxu0 %v3849_v1  ;;  %v1835_v7 = vrot.slane %v1547_v44, 3 }
  0x70   : > { %v1552_v16 = vrot.slane %v1550_v56, 3  ;;  %v1836_v8 = vrot.slane %v1550_v56, 4  ;;  %v1839_v56 = vrot.slane %v1556_v25, 3 }
  0x71   : > { %3454 = vmatmul.mubr.msk.bf16.gmra.mxu0 %vm267_vm1, %v793_v20  ;;  %v1549_v20 = vrot.slane %v1547_v44, 2  ;;  %v3819_v44 = vld [vmem:[%s5016_s1 + $0xd8] sm:$0xff]  }
  0x72   : > { %3457 = vmatprep.mubr.msk.bf16.mxu0 %vm3850_vm0, %v3849_v1 }
  0x73   : > { %v1553_v23 = vor.u32 %v1552_v16, %v1549_v20 }
  0x74   : > { %3482 = vmatmul.mubr.msk.bf16.gmra.mxu1 %vm267_vm1, %v980_v22  ;;  %v1545_v22 = vor.u32 %v1544_v19, %v1541_v18 }
  0x75   : > { %3485 = vmatprep.mubr.msk.bf16.mxu1 %vm3850_vm0, %v3849_v1 }
  0x79   : > { %3458 = vmatmul.mubr.msk.bf16.gmra.mxu0 %vm267_vm1, %v795_v11  ;;  %v1558_v11 = vrot.slane %v1556_v25, 2 }
  0x7a   : > { %3461 = vmatprep.mubr.msk.bf16.mxu0 %vm3850_vm0, %v3849_v1 }
  0x7b   : > { %v1562_v34 = vor.u32 %v1561_v13, %v1558_v11  ;;  %v1817_v11 = vld [vmem:[%s3906_s25 + $0x2c] sm:$0x7] }
  0x7c   : > { %3486 = vmatmul.mubr.msk.bf16.gmra.mxu1 %vm267_vm1, %v989_v30  ;;  %v1412_v30 = vrot.slane %v3089_v12, 2  ;;  %v1837_v12 = vor.u32 %v1836_v8, %v1835_v7  ;;  %v4426_v7 = vld [vmem:[%s3906_s25 + $0x14] sm:$0xf]  ;;  %v4429_v8 = vld [vmem:[%s3906_s25 + $0x18] sm:$0xf] }
  0x7d   : > { %3489 = vmatprep.mubr.msk.bf16.mxu1 %vm3850_vm0, %v3849_v1  ;;  %v1563_v42 = vsel %vm1234_vm5, %v1553_v23, %v1562_v34 }
  0x81   : > { %3462 = vmatmul.mubr.msk.bf16.gmra.mxu0 %vm267_vm1, %v797_v37  ;;  %v1568_v37 = vshll.u32 %v4281_v28, 16 }
  0x82   : > { %3465 = vmatprep.mubr.msk.bf16.mxu0 %vm3850_vm0, %v3849_v1 }
  0x84   : > { %3490 = vmatmul.mubr.msk.bf16.gmra.mxu1 %vm267_vm1, %v988_v27  ;;  %v1554_v27 = vsel %vm1234_vm5, %v1545_v22, %v1553_v23  ;;  %v1700_v22 = vrot.slane %v3117_v32, 3  ;;  %v1701_v23 = vrot.slane %v4245_v14, 3 }
  0x85   : > { %3521 = vmatprep.mubr.msk.bf16.mxu1 %vm3850_vm0, %v3849_v1 }
  0x89   : > { %3466 = vmatmul.mubr.msk.bf16.gmra.mxu0 %vm267_vm1, %v796_v31  ;;  %v1413_v31 = vrot.slane %v4245_v14, 2  ;;  %v1702_v14 = vsel %vm1699_vm8, %v1700_v22, %v1701_v23 }
  0x8a   : > { %3497 = vmatprep.mubr.msk.bf16.mxu0 %vm3850_vm0, %v3849_v1 }
  0x8b   : > { %v1414_v24 = vsel %vm1107_vm6, %v1412_v30, %v1413_v31  ;;  %v1416_v53 = vsel %vm1107_vm6, %v1413_v31, %v1415_v48 }
  0x8c   : > { %3522 = vmatmul.mubr.msk.bf16.vlgmr.msra.gmra.mxu1 %vm267_vm1, %v1246_v47  ;;  %v1567_v47 = vrot.slane %v1565_v35, 2 }
  0x8d   : > { %3566 = vmatpush3.bf16.msra.mxu1 %v3803_v45  ;;  %3525 = vmatprep.mubr.msk.bf16.mxu1 %vm3850_vm0, %v3849_v1  ;;  %v1570_v45 = vrot.slane %v1568_v37, 3 }
  0x8e   : > { %3567 = vmatprep.subr.bf16.mxu1 %v3849_v1 }
  0x8f   : > { %v1571_v50 = vor.u32 %v1570_v45, %v1567_v47 }
  0x91   : > { %3568 = vmatpush3.bf16.msra.mxu1 %v3806_v52  ;;  %3498 = vmatmul.mubr.msk.bf16.vlgmr.msra.gmra.mxu0 %vm267_vm1, %v1110_v54  ;;  %v1577_v52 = vshll.u32 %v4310_v46, 16  ;;  %v1572_v54 = vsel %vm1234_vm5, %v1562_v34, %v1571_v50  ;;  %v3818_v34 = vld [vmem:[%s5016_s1 + $0xc8] sm:$0xff]  }
  0x92   : > { %3613 = vmatprep.subr.bf16.mxu1 %v3849_v1  ;;  %3542 = vmatpush3.bf16.msra.mxu0 %v3802_v55  ;;  %v1576_v55 = vrot.slane %v1574_v29, 2 }
  0x93   : > { %3501 = vmatprep.mubr.msk.bf16.mxu0 %vm3850_vm0, %v3849_v1  ;;  %3543 = vmatprep.subr.bf16.mxu0 %v3849_v1 }
  0x94   : > { %3526 = vmatmul.mubr.msk.bf16.gmra.mxu1 %vm267_vm1, %v1250_v40  ;;  %v1579_v40 = vrot.slane %v1577_v52, 3 }
  0x95   : > { %3529 = vmatprep.mubr.msk.bf16.mxu1 %vm3850_vm0, %v3849_v1 }
  0x96   : > { %3544 = vmatpush3.bf16.msra.mxu0 %v3805_v62  ;;  %v1580_v58 = vor.u32 %v1579_v40, %v1576_v55  ;;  %v1418_v62 = vsel %vm1107_vm6, %v1415_v48, %v1417_v57 }
  0x97   : > { %3589 = vmatprep.subr.bf16.mxu0 %v3849_v1 }
  0x98   : > { %v1581_v0 = vsel %vm1234_vm5, %v1571_v50, %v1580_v58 }
  0x99   : > { %3502 = vmatmul.mubr.msk.bf16.gmra.mxu0 %vm267_vm1, %v1112_v33  ;;  %v1419_v33 = vrot.slane %v3093_v63, 2 }
  0x9a   : > { %3505 = vmatprep.mubr.msk.bf16.mxu0 %vm3850_vm0, %v3849_v1 }
  0x9b   : > { %v1420_v3 = vsel %vm1107_vm6, %v1417_v57, %v1419_v33 }
  0x9c   : > { %3530 = vmatmul.mubr.msk.bf16.gmra.mxu1 %vm267_vm1, %v1254_v51  ;;  %v1828_v51 = vshrl.u32 %v3117_v32, 16 }
  0x9d   : > { %3533 = vmatprep.mubr.msk.bf16.mxu1 %vm3850_vm0, %v3849_v1 }
  0x9e   : > { %v1830_v4 = vrot.slane %v1828_v51, 3 }
  0xa1   : > { %3506 = vmatmul.mubr.msk.bf16.gmra.mxu0 %vm267_vm1, %v1114_v6 }
  0xa2   : > { %3509 = vmatprep.mubr.msk.bf16.mxu0 %vm3850_vm0, %v3849_v1 }
  0xa4   : > { %3534 = vmatmul.mubr.msk.bf16.gmra.mxu1 %vm267_vm1, %v1263_v10 }
  0xa5   : > { %3537 = vmatprep.mubr.msk.bf16.mxu1 %vm3850_vm0, %v3849_v1 }
  0xa9   : > { %3510 = vmatmul.mubr.msk.bf16.gmra.mxu0 %vm267_vm1, %v1116_v17  ;;  %v1840_v17 = vrot.slane %v1559_v26, 4 }
  0xaa   : > { %3513 = vmatprep.mubr.msk.bf16.mxu0 %vm3850_vm0, %v3849_v1 }
  0xab   : > { %v1841_v26 = vor.u32 %v1840_v17, %v1839_v56 }
  0xac   : > { %3538 = vmatmul.mubr.msk.bf16.gmra.mxu1 %vm267_vm1, %v1262_v5  ;;  %v1833_v5 = vrot.slane %v1831_v43, 4 }
  0xad   : > { %3569 = vmatprep.mubr.msk.bf16.mxu1 %vm3850_vm0, %v3849_v1  ;;  %v1842_v36 = vsel %vm1826_vm7, %v1837_v12, %v1841_v26 }
  0xae   : > { %v1834_v10 = vor.u32 %v1833_v5, %v1830_v4  ;;  %v4423_v4 = vld [vmem:[%s3906_s25 + $0x10] sm:$0xf] }
  0xb0   : > { %v1838_v15 = vsel %vm1826_vm7, %v1834_v10, %v1837_v12 }
  0xb1   : > { %3514 = vmatmul.mubr.msk.bf16.gmra.mxu0 %vm267_vm1, %v1115_v2 }
  0xb2   : > { %3545 = vmatprep.mubr.msk.bf16.mxu0 %vm3850_vm0, %v3849_v1 }
  0xb4   : > { %3570 = vmatmul.mubr.msk.bf16.vlgmr.msra.gmra.mxu1 %vm267_vm1, %v1554_v27  ;;  %v3822_v27 = vld [vmem:[%s5016_s1 + $0xd0] sm:$0xff]  }
  0xb5   : > { %3614 = vmatpush3.bf16.msra.mxu1 %v3810_v61  ;;  %3573 = vmatprep.mubr.msk.bf16.mxu1 %vm3850_vm0, %v3849_v1 }
  0xb6   : > { %3615 = vmatprep.subr.bf16.mxu1 %v3849_v1 }
  0xb9   : > { %3616 = vmatpush3.bf16.msra.mxu1 %v3815_v38  ;;  %3546 = vmatmul.mubr.msk.bf16.vlgmr.msra.gmra.mxu0 %vm267_vm1, %v1414_v24  ;;  %v1843_v24 = vrot.slane %v1565_v35, 3  ;;  %v1703_v35 = vrot.slane %v4262_v21, 3 }
  0xba   : > { %3661 = vmatprep.subr.bf16.mxu1 %v3849_v1  ;;  %3590 = vmatpush3.bf16.msra.mxu0 %v3809_v41  ;;  %v1844_v41 = vrot.slane %v1568_v37, 4  ;;  %v3821_v37 = vld [vmem:[%s5016_s1 + $0xc0] sm:$0xff]  }
  0xbb   : > { %3549 = vmatprep.mubr.msk.bf16.mxu0 %vm3850_vm0, %v3849_v1  ;;  %3591 = vmatprep.subr.bf16.mxu0 %v3849_v1  ;;  %v1704_v40 = vsel %vm1699_vm8, %v1701_v23, %v1703_v35 }
  0xbc   : > { %3574 = vmatmul.mubr.msk.bf16.gmra.mxu1 %vm267_vm1, %v1563_v42  ;;  %v3129_v42 = vcombine.low %v4296_v39, %v1817_v11  ;;  %v1845_v50 = vor.u32 %v1844_v41, %v1843_v24  ;;  %v4456_v11 = vld [vmem:[%s3906_s25 + $0x1c] sm:$0xf] }
  0xbd   : > { %3577 = vmatprep.mubr.msk.bf16.mxu1 %vm3850_vm0, %v3849_v1 }
  0xbe   : > { %3592 = vmatpush3.bf16.msra.mxu0 %v3814_v49  ;;  %v1848_v29 = vshrl.u32 %v3129_v42, 16  ;;  %v1851_v52 = vshll.u32 %v3129_v42, 16 }
  0xbf   : > { %3637 = vmatprep.subr.bf16.mxu0 %v3849_v1 }
  0xc0   : > { %v1850_v59 = vrot.slane %v1848_v29, 3  ;;  %v1853_v60 = vrot.slane %v1851_v52, 4 }
  0xc1   : > { %3550 = vmatmul.mubr.msk.bf16.gmra.mxu0 %vm267_vm1, %v1416_v53 }
  0xc2   : > { %3553 = vmatprep.mubr.msk.bf16.mxu0 %vm3850_vm0, %v3849_v1  ;;  %v1854_v43 = vor.u32 %v1853_v60, %v1850_v59 }
  0xc4   : > { %3578 = vmatmul.mubr.msk.bf16.gmra.mxu1 %vm267_vm1, %v1572_v54 }
  0xc5   : > { %3581 = vmatprep.mubr.msk.bf16.mxu1 %vm3850_vm0, %v3849_v1 }
  0xc9   : > { %3554 = vmatmul.mubr.msk.bf16.gmra.mxu0 %vm267_vm1, %v1418_v62 }
  0xca   : > { %3557 = vmatprep.mubr.msk.bf16.mxu0 %vm3850_vm0, %v3849_v1 }
  0xcc   : > { %3582 = vmatmul.mubr.msk.bf16.gmra.mxu1 %vm267_vm1, %v1581_v0 }
  0xcd   : > { %3585 = vmatprep.mubr.msk.bf16.mxu1 %vm3850_vm0, %v3849_v1 }
  0xd1   : > { %3558 = vmatmul.mubr.msk.bf16.gmra.mxu0 %vm267_vm1, %v1420_v3  ;;  %v1964_v3 = vld [vmem:[%s3906_s25 + $0xc] sm:$0x8] }
  0xd2   : > { %3561 = vmatprep.mubr.msk.bf16.mxu0 %vm3850_vm0, %v3849_v1 }
  0xd4   : > { %v415_v6 = vpop.f32.mrf.mxu1  ;;  %3586 = vmatmul.mubr.msk.bf16.gmra.mxu1 %vm267_vm1, %v1580_v58  ;;  %v1846_v58 = vsel %vm1826_vm7, %v1841_v26, %v1845_v50 }
  0xd5   : > { %3617 = vmatprep.mubr.msk.bf16.mxu1 %vm3850_vm0, %v3849_v1 }
  0xd6   : > { %v3379_v2 = vpop.f32.mrf.mxu1 }
  0xd8   : > { %v418_v9 = vpop.f32.mrf.mxu1 }
  0xd9   : > { %v317_v19 = vpop.f32.mrf.mxu0  ;;  %3562 = vmatmul.mubr.msk.bf16.gmra.mxu0 %vm267_vm1, %v1419_v33  ;;  %v1705_v33 = vrot.slane %v4281_v28, 3  ;;  %v4435_v28 = vcombine.low %v1964_v3, %v4423_v4 }
  0xda   : > { %v3380_v18 = vpop.f32.mrf.mxu1  ;;  %v4368_v20 = vadd.f32 %v415_v6, %v317_v19  ;;  %3593 = vmatprep.mubr.msk.bf16.mxu0 %vm3850_vm0, %v3849_v1 }
  0xdb   : > { %v3355_v25 = vpop.f32.mrf.mxu0  ;;  %v1706_v2 = vsel %vm1699_vm8, %v1703_v35, %v1705_v33  ;;  %v2131_v22 = vshrl.u32 %v4435_v28, 16 }
  0xdc   : > { %v423_v16 = vpop.f32.mrf.mxu1  ;;  %3618 = vmatmul.mubr.msk.bf16.vlgmr.msra.gmra.mxu1 %vm267_vm1, %v1838_v15  ;;  %v1855_v15 = vsel %vm1826_vm7, %v1845_v50, %v1854_v43  ;;  %v2134_v25 = vshll.u32 %v4435_v28, 16 }
  0xdd   : > { %3662 = vmatpush3.bf16.msra.mxu1 %v3819_v44  ;;  %3621 = vmatprep.mubr.msk.bf16.mxu1 %vm3850_vm0, %v3849_v1  ;;  %v320_v13 = vpop.f32.mrf.mxu0  ;;  %v4440_v44 = vcombine.low %v4426_v7, %v4429_v8 }
  0xde   : > { %v3383_v61 = vpop.f32.mrf.mxu1  ;;  %3663 = vmatprep.subr.bf16.mxu1 %v3849_v1  ;;  %v4381_v30 = vadd.f32 %v418_v9, %v320_v13  ;;  %v4459_v13 = vld [vmem:[%s3906_s25 + $0x20] sm:$0xf]  ;;  %v2136_v24 = vrot.slane %v2134_v25, 4 }
  0xdf   : > { %v3356_v38 = vpop.f32.mrf.mxu0  ;;  %v2139_v26 = vshrl.u32 %v4440_v44, 16 }
  0xe0   : > { %v426_v31 = vpop.f32.mrf.mxu1  ;;  %v2133_v38 = vrot.slane %v2131_v22, 3 }
  0xe1   : > { %3664 = vmatpush3.bf16.msra.mxu1 %v3822_v27  ;;  %v325_v45 = vpop.f32.mrf.mxu0  ;;  %3594 = vmatmul.mubr.msk.bf16.vlgmr.msra.gmra.mxu0 %vm267_vm1, %v1702_v14  ;;  %v2142_v27 = vshll.u32 %v4440_v44, 16  ;;  %v2141_v41 = vrot.slane %v2139_v26, 3  ;;  %v3825_v26 = vld [vmem:[%s5016_s1 + $0xe8] sm:$0xff]  }
  0xe2   : > { %v3384_v47 = vpop.f32.mrf.mxu1  ;;  %3709 = vmatprep.subr.bf16.mxu1 %v3849_v1  ;;  %v4395_v48 = vadd.f32 %v423_v16, %v325_v45  ;;  %3638 = vmatpush3.bf16.msra.mxu0 %v3818_v34  ;;  %v1707_v16 = vrot.slane %v4310_v46, 3  ;;  %v2137_v50 = vor.u32 %v2136_v24, %v2133_v38 }
  0xe3   : > { %v3359_v39 = vpop.f32.mrf.mxu0  ;;  %3597 = vmatprep.mubr.msk.bf16.mxu0 %vm3850_vm0, %v3849_v1  ;;  %3639 = vmatprep.subr.bf16.mxu0 %v3849_v1  ;;  %v2144_v42 = vrot.slane %v2142_v27, 4  ;;  %v4466_v47 = vcombine.low %v4456_v11, %v4459_v13 }
  0xe4   : > { %v431_v49 = vpop.f32.mrf.mxu1  ;;  %3622 = vmatmul.mubr.msk.bf16.gmra.mxu1 %vm267_vm1, %v1842_v36  ;;  %v1708_v34 = vsel %vm1699_vm8, %v1705_v33, %v1707_v16 }
  0xe5   : > { %3625 = vmatprep.mubr.msk.bf16.mxu1 %vm3850_vm0, %v3849_v1  ;;  %v328_v54 = vpop.f32.mrf.mxu0  ;;  %v2145_v29 = vor.u32 %v2144_v42, %v2141_v41  ;;  %v2148_v52 = vshrl.u32 %v4466_v47, 16  ;;  %v2007_v42 = vrot.slane %v4466_v47, 3 }
  0xe6   : > { %v3387_v53 = vpop.f32.mrf.mxu1  ;;  %v4407_v55 = vadd.f32 %v426_v31, %v328_v54  ;;  %3640 = vmatpush3.bf16.msra.mxu0 %v3821_v37 }
  0xe7   : > { %v3360_v57 = vpop.f32.mrf.mxu0  ;;  %3685 = vmatprep.subr.bf16.mxu0 %v3849_v1  ;;  %v2151_v53 = vshll.u32 %v4466_v47, 16  ;;  %v2146_v60 = vsel %vm1826_vm7, %v2137_v50, %v2145_v29 }
  0xe8   : > { %v434_v21 = vpop.f32.mrf.mxu1 }
  0xe9   : > { %v333_v63 = vpop.f32.mrf.mxu0  ;;  %3598 = vmatmul.mubr.msk.bf16.gmra.mxu0 %vm267_vm1, %v1704_v40  ;;  %v4482_v40 = vld [vmem:[%s3906_s25 + $0x28] sm:$0xf] }
  0xea   : > { %v3388_v62 = vpop.f32.mrf.mxu1  ;;  %v4413_v0 = vadd.f32 %v431_v49, %v333_v63  ;;  %3601 = vmatprep.mubr.msk.bf16.mxu0 %vm3850_vm0, %v3849_v1  ;;  %v2150_v63 = vrot.slane %v2148_v52, 3 }
  0xeb   : > { %v3363_v51 = vpop.f32.mrf.mxu0  ;;  %v3826_v62 = vld [vmem:[%s5016_s1 + $0xf8] sm:$0xff]  }
  0xec   : > { %v439_v32 = vpop.f32.mrf.mxu1  ;;  %3626 = vmatmul.mubr.msk.bf16.gmra.mxu1 %vm267_vm1, %v1846_v58 }
  0xed   : > { %3629 = vmatprep.mubr.msk.bf16.mxu1 %vm3850_vm0, %v3849_v1  ;;  %v336_v6 = vpop.f32.mrf.mxu0 }
  0xee   : > { %v3391_v5 = vpop.f32.mrf.mxu1  ;;  %v4431_v10 = vadd.f32 %v434_v21, %v336_v6  ;;  %v4479_v21 = vld [vmem:[%s3906_s25 + $0x24] sm:$0xf]  ;;  %v2004_v6 = vrot.slane %v4435_v28, 3  ;;  %v4510_v28 = vld [vmem:[%s3906_s25 + $0x30] sm:$0x7] }
  0xef   : > { %v3364_v9 = vpop.f32.mrf.mxu0  ;;  %v4490_v33 = vcombine.low %v4479_v21, %v4482_v40 }
  0xf0   : > { %v442_v12 = vpop.f32.mrf.mxu1 }
  0xf1   : > { %v341_v17 = vpop.f32.mrf.mxu0  ;;  %3602 = vmatmul.mubr.msk.bf16.gmra.mxu0 %vm267_vm1, %v1706_v2 }
  0xf2   : > { %v3392_v56 = vpop.f32.mrf.mxu1  ;;  %v4443_v18 = vadd.f32 %v439_v32, %v341_v17  ;;  %3605 = vmatprep.mubr.msk.bf16.mxu0 %vm3850_vm0, %v3849_v1  ;;  %v2153_v32 = vrot.slane %v2151_v53, 4 }
  0xf3   : > { %v3367_v23 = vpop.f32.mrf.mxu0  ;;  %v3832_v56 = vld [vmem:[%s5016_s1 + $0xf0] sm:$0xff]  }
  0xf4   : > { %v447_v19 = vpop.f32.mrf.mxu1  ;;  %3630 = vmatmul.mubr.msk.bf16.gmra.mxu1 %vm267_vm1, %v1855_v15  ;;  %v2154_v9 = vor.u32 %v2153_v32, %v2150_v63  ;;  %v2157_v15 = vshrl.u32 %v4490_v33, 16 }
  0xf5   : > { %3633 = vmatprep.mubr.msk.bf16.mxu1 %vm3850_vm0, %v3849_v1  ;;  %v344_v31 = vpop.f32.mrf.mxu0 }
  0xf6   : > { %v3395_v61 = vpop.f32.mrf.mxu1  ;;  %v4461_v14 = vadd.f32 %v442_v12, %v344_v31  ;;  %v2005_v12 = vrot.slane %v4440_v44, 3  ;;  %v2159_v31 = vrot.slane %v2157_v15, 3 }
  0xf7   : > { %v3368_v36 = vpop.f32.mrf.mxu0  ;;  %v2155_v61 = vsel %vm1826_vm7, %v2145_v29, %v2154_v9 }
  0xf8   : > { %v450_v46 = vpop.f32.mrf.mxu1  ;;  %v2006_v25 = vsel %vm1699_vm8, %v2004_v6, %v2005_v12  ;;  %v1973_v6 = vld [vmem:[%s3906_s25 + $0x30] sm:$0x3] }
  0xf9   : > { %v349_v49 = vpop.f32.mrf.mxu0  ;;  %3606 = vmatmul.mubr.msk.bf16.gmra.mxu0 %vm267_vm1, %v1708_v34 }
  0xfa   : > { %v3396_v45 = vpop.f32.mrf.mxu1  ;;  %v4469_v35 = vadd.f32 %v447_v19, %v349_v49  ;;  %3609 = vmatprep.mubr.msk.bf16.mxu0 %vm3850_vm0, %v3849_v1  ;;  %v4507_v19 = vld [vmem:[%s3906_s25 + $0x2c] sm:$0xf] }
  0xfb   : > { %v3371_v39 = vpop.f32.mrf.mxu0  ;;  %v3157_v34 = vcombine.low %v4507_v19, %v4510_v28  ;;  %v3831_v45 = vld [vmem:[%s5016_s1 + $0xe0] sm:$0xff]  }
  0xfc   : > { %v726_v37 = vpop.f32.mrf.mxu1  ;;  %3634 = vmatmul.mubr.msk.bf16.gmra.mxu1 %vm267_vm1, %v1854_v43 }
  0xfd   : > { %3665 = vmatprep.mubr.msk.bf16.mxu1 %vm3850_vm0, %v3849_v1  ;;  %v352_v57 = vpop.f32.mrf.mxu0  ;;  %v2166_v39 = vshrl.u32 %v3157_v34, 16 }
  0xfe   : > { %v3427_v54 = vpop.f32.mrf.mxu1 }
  0xff   : > { %v3372_v59 = vpop.f32.mrf.mxu0  ;;  %v2008_v54 = vsel %vm1699_vm8, %v2005_v12, %v2007_v42 }
 0x100   : > { %v729_v58 = vpop.f32.mrf.mxu1  ;;  %v2168_v59 = vrot.slane %v2166_v39, 3 }
 0x101   : > { %v533_v43 = vpop.f32.mrf.mxu0  ;;  %3610 = vmatmul.mubr.msk.bf16.gmra.mxu0 %vm267_vm1, %v1707_v16 }
 0x102   : > { %v3428_v51 = vpop.f32.mrf.mxu1  ;;  %v571_v3 = vadd.f32 %v533_v43, %v4368_v20  ;;  %3641 = vmatprep.mubr.msk.bf16.mxu0 %vm3850_vm0, %v3849_v1  ;;  %v2160_v20 = vshll.u32 %v4490_v33, 16 }
 0x103   : > { %v3403_v2 = vpop.f32.mrf.mxu0 }
 0x104   : > { %v734_v5 = vpop.f32.mrf.mxu1  ;;  %3666 = vmatmul.mubr.msk.bf16.vlgmr.msra.gmra.mxu1 %vm267_vm1, %v2146_v60  ;;  %v4513_v44 = vadd.f32 %v726_v37, %v571_v3  ;;  %v2162_v46 = vrot.slane %v2160_v20, 4 }
 0x105   : > { %3710 = vmatpush3.bf16.msra.mxu1 %v3826_v62  ;;  %3669 = vmatprep.mubr.msk.bf16.mxu1 %vm3850_vm0, %v3849_v1  ;;  %v536_v16 = vpop.f32.mrf.mxu0 }
 0x106   : > { %v3431_v17 = vpop.f32.mrf.mxu1  ;;  %3711 = vmatprep.subr.bf16.mxu1 %v3849_v1  ;;  %v572_v22 = vadd.f32 %v536_v16, %v4381_v30  ;;  %v2163_v37 = vor.u32 %v2162_v46, %v2159_v31  ;;  %v4561_v16 = vcombine.low %v4423_v4, %v4426_v7 }
 0x107   : > { %v3404_v27 = vpop.f32.mrf.mxu0 }
 0x108   : > { %v737_v23 = vpop.f32.mrf.mxu1  ;;  %v4523_v36 = vadd.f32 %v729_v58, %v572_v22  ;;  %v2164_v58 = vsel %vm1826_vm7, %v2154_v9, %v2163_v37  ;;  %v2411_v7 = vshll.u32 %v4561_v16, 16 }
 0x109   : > { %3712 = vmatpush3.bf16.msra.mxu1 %v3832_v56  ;;  %v541_v30 = vpop.f32.mrf.mxu0  ;;  %3642 = vmatmul.mubr.msk.bf16.vlgmr.msra.gmra.mxu0 %vm267_vm1, %v2006_v25  ;;  %v3145_v56 = vcombine.low %v4507_v19, %v1973_v6 }
 0x10a   : > { %v3432_v38 = vpop.f32.mrf.mxu1  ;;  %v573_v24 = vadd.f32 %v541_v30, %v4395_v48  ;;  %3686 = vmatpush3.bf16.msra.mxu0 %v3825_v26  ;;  %3645 = vmatprep.mubr.msk.bf16.mxu0 %vm3850_vm0, %v3849_v1  ;;  %v2169_v48 = vshll.u32 %v3157_v34, 16 }
 0x10b   : > { %v3407_v49 = vpop.f32.mrf.mxu0  ;;  %3687 = vmatprep.subr.bf16.mxu0 %v3849_v1  ;;  %v2011_v27 = vrot.slane %v3145_v56, 3 }
 0x10c   : > { %v742_v41 = vpop.f32.mrf.mxu1  ;;  %3670 = vmatmul.mubr.msk.bf16.gmra.mxu1 %vm267_vm1, %v2155_v61  ;;  %v4537_v29 = vadd.f32 %v734_v5, %v573_v24  ;;  %v2171_v60 = vrot.slane %v2169_v48, 4  ;;  %v4572_v61 = vcombine.low %v4429_v8, %v4456_v11  ;;  %v2413_v8 = vrot.slane %v2411_v7, 1 }
 0x10d   : > { %3673 = vmatprep.mubr.msk.bf16.mxu1 %vm3850_vm0, %v3849_v1  ;;  %v544_v47 = vpop.f32.mrf.mxu0 }
 0x10e   : > { %v3435_v50 = vpop.f32.mrf.mxu1  ;;  %v574_v52 = vadd.f32 %v544_v47, %v4407_v55  ;;  %3688 = vmatpush3.bf16.msra.mxu0 %v3831_v45  ;;  %v2009_v55 = vrot.slane %v4490_v33, 3  ;;  %v2172_v5 = vor.u32 %v2171_v60, %v2168_v59  ;;  %v2415_v11 = vshll.u32 %v4572_v61, 16 }
 0x10f   : > { %v3408_v57 = vpop.f32.mrf.mxu0  ;;  %v4594_v47 = vcombine.low %v4459_v13, %v4479_v21  ;;  %v2419_v59 = vshrl.u32 %v4572_v61, 16 }
 0x110   : > { %v745_v53 = vpop.f32.mrf.mxu1  ;;  %v4542_v63 = vadd.f32 %v737_v23, %v574_v52  ;;  %v2010_v20 = vsel %vm1699_vm8, %v2007_v42, %v2009_v55  ;;  %v2173_v33 = vsel %vm1826_vm7, %v2163_v37, %v2172_v5  ;;  %v2012_v30 = vsel %vm1699_vm8, %v2009_v55, %v2011_v27 }
 0x111   : > { %v549_v32 = vpop.f32.mrf.mxu0  ;;  %3646 = vmatmul.mubr.msk.bf16.gmra.mxu0 %vm267_vm1, %v2008_v54  ;;  %v2417_v50 = vrot.slane %v2415_v11, 1  ;;  %v2422_v60 = vshll.u32 %v4594_v47, 16 }
 0x112   : > { %v3436_v62 = vpop.f32.mrf.mxu1  ;;  %v575_v51 = vadd.f32 %v549_v32, %v4413_v0  ;;  %3649 = vmatprep.mubr.msk.bf16.mxu0 %vm3850_vm0, %v3849_v1 }
 0x113   : > { %v3411_v3 = vpop.f32.mrf.mxu0  ;;  %v2424_v55 = vrot.slane %v2422_v60, 1 }
 0x114   : > { %v750_v43 = vpop.f32.mrf.mxu1  ;;  %3674 = vmatmul.mubr.msk.bf16.gmra.mxu1 %vm267_vm1, %v2164_v58  ;;  %v4553_v2 = vadd.f32 %v742_v41, %v575_v51  ;;  %v2409_v41 = vshrl.u32 %v4561_v16, 16  ;;  %v4610_v3 = vcombine.low %v4482_v40, %v4507_v19 }
 0x115   : > { %3677 = vmatprep.mubr.msk.bf16.mxu1 %vm3850_vm0, %v3849_v1  ;;  %v552_v9 = vpop.f32.mrf.mxu0 }
 0x116   : > { %v3439_v12 = vpop.f32.mrf.mxu1  ;;  %v576_v0 = vadd.f32 %v552_v9, %v4431_v10  ;;  %v2414_v48 = vor.u32 %v2413_v8, %v2409_v41  ;;  %v2429_v56 = vshll.u32 %v4610_v3, 16 }
 0x117   : > { %v3412_v17 = vpop.f32.mrf.mxu0 }
 0x118   : > { %v753_v15 = vpop.f32.mrf.mxu1  ;;  %v4563_v23 = vadd.f32 %v745_v53, %v576_v0  ;;  %v2418_v58 = vsel %vm215_vm2, %v2414_v48, %v2417_v50 }
 0x119   : > { %v557_v25 = vpop.f32.mrf.mxu0  ;;  %3650 = vmatmul.mubr.msk.bf16.gmra.mxu0 %vm267_vm1, %v2010_v20  ;;  %v2426_v20 = vshrl.u32 %v4594_v47, 16 }
 0x11a   : > { %v3440_v22 = vpop.f32.mrf.mxu1  ;;  %v577_v10 = vadd.f32 %v557_v25, %v4443_v18  ;;  %3653 = vmatprep.mubr.msk.bf16.mxu0 %vm3850_vm0, %v3849_v1 }
 0x11b   : > { %v3415_v4 = vpop.f32.mrf.mxu0  ;;  %v2428_v25 = vor.u32 %v2426_v20, %v2424_v55 }
 0x11c   : > { %v758_v26 = vpop.f32.mrf.mxu1  ;;  %3678 = vmatmul.mubr.msk.bf16.gmra.mxu1 %vm267_vm1, %v2173_v33  ;;  %v4577_v46 = vadd.f32 %v750_v43, %v577_v10  ;;  %v2421_v43 = vor.u32 %v2419_v59, %v2417_v50  ;;  %v2431_v10 = vrot.slane %v2429_v56, 1 }
 0x11d   : > { %3681 = vmatprep.mubr.msk.bf16.mxu1 %vm3850_vm0, %v3849_v1  ;;  %v560_v18 = vpop.f32.mrf.mxu0 }
 0x11e   : > { %v3443_v31 = vpop.f32.mrf.mxu1  ;;  %v578_v34 = vadd.f32 %v560_v18, %v4461_v14  ;;  %v2432_v18 = vsel %vm215_vm2, %v2428_v25, %v2431_v10 }
 0x11f   : > { %v3416_v24 = vpop.f32.mrf.mxu0 }
 0x120   : > { %v761_v38 = vpop.f32.mrf.mxu1  ;;  %v4583_v45 = vadd.f32 %v753_v15, %v578_v34  ;;  %v2425_v15 = vsel %vm215_vm2, %v2421_v43, %v2424_v55  ;;  %v2433_v34 = vshrl.u32 %v4610_v3, 16 }
 0x121   : > { %v565_v49 = vpop.f32.mrf.mxu0  ;;  %3654 = vmatmul.mubr.msk.bf16.gmra.mxu0 %vm267_vm1, %v2012_v30 }
 0x122   : > { %v3444_v42 = vpop.f32.mrf.mxu1  ;;  %v579_v37 = vadd.f32 %v565_v49, %v4469_v35  ;;  %3657 = vmatprep.mubr.msk.bf16.mxu0 %vm3850_vm0, %v3849_v1 }
 0x123   : > { %v3419_v14 = vpop.f32.mrf.mxu0  ;;  %v2435_v42 = vor.u32 %v2433_v34, %v2431_v10 }
 0x124   : > { %v1051_v39 = vpop.f32.mrf.mxu1  ;;  %3682 = vmatmul.mubr.msk.bf16.gmra.mxu1 %vm267_vm1, %v2172_v5  ;;  %v4596_v53 = vadd.f32 %v758_v26, %v579_v37  ;;  %v3837_v26 = vld [vmem:[%s3906_s25 + $0x30] ss:$0 sps:$4 sm:$0xff]  }
 0x125   : > { %3713 = vmatprep.mubr.msk.bf16.mxu1 %vm3850_vm0, %v3849_v1  ;;  %v568_v35 = vpop.f32.mrf.mxu0  ;;  %v2437_v38 = vshll.u32 %v3837_v26, 16 }
 0x126   : > { %v3475_v52 = vpop.f32.mrf.mxu1 }
 0x127   : > { %v3420_v57 = vpop.f32.mrf.mxu0  ;;  %v2439_v49 = vrot.slane %v2437_v38, 1 }
 0x128   : > { %v1054_v54 = vpop.f32.mrf.mxu1 }
 0x129   : > { %v859_v32 = vpop.f32.mrf.mxu0  ;;  %3658 = vmatmul.mubr.msk.bf16.gmra.mxu0 %vm267_vm1, %v2011_v27  ;;  %v2440_v50 = vsel %vm215_vm2, %v2435_v42, %v2439_v49 }
 0x12a   : > { %v3476_v62 = vpop.f32.mrf.mxu1  ;;  %v897_v51 = vadd.f32 %v859_v32, %v4513_v44  ;;  %3689 = vmatprep.mubr.msk.bf16.mxu0 %vm3850_vm0, %v3849_v1 }
 0x12b   : > { %v3451_v21 = vpop.f32.mrf.mxu0 }
 0x12c   : > { %v1059_v13 = vpop.f32.mrf.mxu1  ;;  %3714 = vmatmul.mubr.msk.bf16.vlgmr.msra.gmra.mxu1 %vm267_vm1, %v2418_v58  ;;  %v4612_v6 = vadd.f32 %v1051_v39, %v897_v51 }
 0x12d   : > { %3717 = vmatprep.mubr.msk.bf16.mxu1 %vm3850_vm0, %v3849_v1  ;;  %v862_v44 = vpop.f32.mrf.mxu0 }
 0x12e   : > { %v3479_v5 = vpop.f32.mrf.mxu1  ;;  %v898_v12 = vadd.f32 %v862_v44, %v4523_v36 }
 0x12f   : > { %v3452_v0 = vpop.f32.mrf.mxu0 }
 0x130   : > { %v1062_v9 = vpop.f32.mrf.mxu1  ;;  %v4618_v33 = vadd.f32 %v1054_v54, %v898_v12 }
 0x131   : > { %v867_v40 = vpop.f32.mrf.mxu0  ;;  %3690 = vmatmul.mubr.msk.bf16.vlgmr.msra.gmra.mxu0 %vm267_vm1, %v4561_v16 }
 0x132   : > { %v3480_v17 = vpop.f32.mrf.mxu1  ;;  %v899_v19 = vadd.f32 %v867_v40, %v4537_v29  ;;  %3693 = vmatprep.mubr.msk.bf16.mxu0 %vm3850_vm0, %v3849_v1 }
 0x133   : > { %v3455_v36 = vpop.f32.mrf.mxu0 }
 0x134   : > { %v1067_v22 = vpop.f32.mrf.mxu1  ;;  %3718 = vmatmul.mubr.msk.bf16.gmra.mxu1 %vm267_vm1, %v2425_v15  ;;  %v4629_v4 = vadd.f32 %v1059_v13, %v899_v19  ;;  %v3173_v15 = vcombine.low %v4510_v28, %v4510_v28 }
 0x135   : > { %3721 = vmatprep.mubr.msk.bf16.mxu1 %vm3850_vm0, %v3849_v1  ;;  %v870_v7 = vpop.f32.mrf.mxu0 }
 0x136   : > { %v3483_v27 = vpop.f32.mrf.mxu1  ;;  %v900_v16 = vadd.f32 %v870_v7, %v4542_v63 }
 0x137   : > { %v3456_v31 = vpop.f32.mrf.mxu0 }
 0x138   : > { %v1070_v29 = vpop.f32.mrf.mxu1  ;;  %v4634_v24 = vadd.f32 %v1062_v9, %v900_v16 }
 0x139   : > { %v875_v41 = vpop.f32.mrf.mxu0  ;;  %3694 = vmatmul.mubr.msk.bf16.gmra.mxu0 %vm267_vm1, %v4572_v61 }
 0x13a   : > { %v3484_v30 = vpop.f32.mrf.mxu1  ;;  %v901_v8 = vadd.f32 %v875_v41, %v4553_v2  ;;  %3697 = vmatprep.mubr.msk.bf16.mxu0 %vm3850_vm0, %v3849_v1 }
 0x13b   : > { %v3459_v63 = vpop.f32.mrf.mxu0 }
 0x13c   : > { %v1075_v11 = vpop.f32.mrf.mxu1  ;;  %3722 = vmatmul.mubr.msk.bf16.gmra.mxu1 %vm267_vm1, %v2432_v18  ;;  %v4644_v39 = vadd.f32 %v1067_v22, %v901_v8 }
 0x13d   : > { %3725 = vmatprep.mubr.msk.bf16.mxu1 %vm3850_vm0, %v3849_v1  ;;  %v878_v14 = vpop.f32.mrf.mxu0 }
 0x13e   : > { %v3487_v37 = vpop.f32.mrf.mxu1  ;;  %v902_v61 = vadd.f32 %v878_v14, %v4563_v23  ;;  %v2441_v23 = vshrl.u32 %v3837_v26, 16 }
 0x13f   : > { %v3460_v2 = vpop.f32.mrf.mxu0 }
 0x140   : > { %v1078_v48 = vpop.f32.mrf.mxu1  ;;  %v4648_v35 = vadd.f32 %v1070_v29, %v902_v61 }
 0x141   : > { %v883_v54 = vpop.f32.mrf.mxu0  ;;  %3698 = vmatmul.mubr.msk.bf16.gmra.mxu0 %vm267_vm1, %v4594_v47  ;;  %v2443_v47 = vor.u32 %v2441_v23, %v2439_v49 }
 0x142   : > { %v3488_v52 = vpop.f32.mrf.mxu1  ;;  %v903_v57 = vadd.f32 %v883_v54, %v4577_v46  ;;  %3701 = vmatprep.mubr.msk.bf16.mxu0 %vm3850_vm0, %v3849_v1 }
 0x143   : > { %v3463_v59 = vpop.f32.mrf.mxu0 }
 0x144   : > { %v1083_v58 = vpop.f32.mrf.mxu1  ;;  %3726 = vmatmul.mubr.msk.bf16.gmra.mxu1 %vm267_vm1, %v2440_v50  ;;  %v1095_v62 = vadd.f32 %v1075_v11, %v903_v57 }
 0x145   : > { %3729 = vmatprep.mubr.msk.bf16.mxu1 %vm3850_vm0, %v3849_v1  ;;  %v886_v32 = vpop.f32.mrf.mxu0 }
 0x146   : > { %v3491_v60 = vpop.f32.mrf.mxu1  ;;  %v904_v51 = vadd.f32 %v886_v32, %v4583_v45 }
 0x147   : > { %v3464_v21 = vpop.f32.mrf.mxu0 }
 0x148   : > { %v1086_v13 = vpop.f32.mrf.mxu1  ;;  %v1096_v43 = vadd.f32 %v1078_v48, %v904_v51 }
 0x149   : > { %v891_v55 = vpop.f32.mrf.mxu0  ;;  %3702 = vmatmul.mubr.msk.bf16.gmra.mxu0 %vm267_vm1, %v4610_v3 }
 0x14a   : > { %v3492_v46 = vpop.f32.mrf.mxu1  ;;  %v905_v5 = vadd.f32 %v891_v55, %v4596_v53  ;;  %3705 = vmatprep.mubr.msk.bf16.mxu0 %vm3850_vm0, %v3849_v1 }
 0x14b   : > { %v3467_v12 = vpop.f32.mrf.mxu0 }
 0x14c   : > { %v1325_v44 = vpop.f32.mrf.mxu1  ;;  %3730 = vmatmul.mubr.msk.bf16.gmra.mxu1 %vm267_vm1, %v2443_v47  ;;  %v1097_v45 = vadd.f32 %v1083_v58, %v905_v5 }
 0x14d   : > { %v894_v0 = vpop.f32.mrf.mxu0 }
 0x14e   : > { %v3523_v9 = vpop.f32.mrf.mxu1 }
 0x14f   : > { %v3468_v56 = vpop.f32.mrf.mxu0 }
 0x150   : > { %v1328_v20 = vpop.f32.mrf.mxu1 }
 0x151   : > { %v1178_v40 = vpop.f32.mrf.mxu0  ;;  %3706 = vmatmul.mubr.msk.bf16.gmra.mxu0 %vm267_vm1, %v3173_v15 }
 0x152   : > { %v3524_v17 = vpop.f32.mrf.mxu1  ;;  %v1216_v53 = vadd.f32 %v1178_v40, %v4612_v6 }
 0x153   : > { %v3499_v19 = vpop.f32.mrf.mxu0 }
 0x154   : > { %v1333_v3 = vpop.f32.mrf.mxu1  ;;  %v1363_v36 = vadd.f32 %v1325_v44, %v1216_v53 }
 0x155   : > { %v1181_v1 = vpop.f32.mrf.mxu0 }
 0x156   : > { %v3527_v22 = vpop.f32.mrf.mxu1  ;;  %v1217_v25 = vadd.f32 %v1181_v1, %v4618_v33 }
 0x157   : > { %v3500_v26 = vpop.f32.mrf.mxu0 }
 0x158   : > { %v1336_v10 = vpop.f32.mrf.mxu1  ;;  %v1364_v7 = vadd.f32 %v1328_v20, %v1217_v25 }
 0x159   : > { %v1186_v28 = vpop.f32.mrf.mxu0 }
 0x15a   : > { %v3528_v27 = vpop.f32.mrf.mxu1  ;;  %v1218_v16 = vadd.f32 %v1186_v28, %v4629_v4 }
 0x15b   : > { %v3503_v31 = vpop.f32.mrf.mxu0 }
 0x15c   : > { %v1341_v29 = vpop.f32.mrf.mxu1  ;;  %v1365_v34 = vadd.f32 %v1333_v3, %v1218_v16 }
 0x15d   : > { %v1189_v38 = vpop.f32.mrf.mxu0 }
 0x15e   : > { %v3531_v18 = vpop.f32.mrf.mxu1  ;;  %v1219_v6 = vadd.f32 %v1189_v38, %v4634_v24 }
 0x15f   : > { %v3504_v41 = vpop.f32.mrf.mxu0 }
 0x160   : > { %v1344_v30 = vpop.f32.mrf.mxu1  ;;  %v1366_v11 = vadd.f32 %v1336_v10, %v1219_v6 }
 0x161   : > { %v1194_v63 = vpop.f32.mrf.mxu0 }
 0x162   : > { %v3532_v8 = vpop.f32.mrf.mxu1  ;;  %v1220_v33 = vadd.f32 %v1194_v63, %v4644_v39 }
 0x163   : > { %v3507_v49 = vpop.f32.mrf.mxu0 }
 0x164   : > { %v1349_v42 = vpop.f32.mrf.mxu1  ;;  %v1367_v14 = vadd.f32 %v1341_v29, %v1220_v33 }
 0x165   : > { %v1197_v61 = vpop.f32.mrf.mxu0 }
 0x166   : > { %v3535_v37 = vpop.f32.mrf.mxu1  ;;  %v1221_v4 = vadd.f32 %v1197_v61, %v4648_v35 }
 0x167   : > { %v3508_v2 = vpop.f32.mrf.mxu0 }
 0x168   : > { %v1352_v48 = vpop.f32.mrf.mxu1  ;;  %v1368_v52 = vadd.f32 %v1344_v30, %v1221_v4 }
 0x169   : > { %v1202_v54 = vpop.f32.mrf.mxu0 }
 0x16a   : > { %v3536_v50 = vpop.f32.mrf.mxu1  ;;  %v1222_v24 = vadd.f32 %v1202_v54, %v1095_v62 }
 0x16b   : > { %v3511_v58 = vpop.f32.mrf.mxu0 }
 0x16c   : > { %v1357_v57 = vpop.f32.mrf.mxu1  ;;  %v1369_v59 = vadd.f32 %v1349_v42, %v1222_v24 }
 0x16d   : > { %v1205_v60 = vpop.f32.mrf.mxu0 }
 0x16e   : > { %v3539_v23 = vpop.f32.mrf.mxu1  ;;  %v1223_v32 = vadd.f32 %v1205_v60, %v1096_v43 }
 0x16f   : > { %v3512_v51 = vpop.f32.mrf.mxu0 }
 0x170   : > { %v1360_v39 = vpop.f32.mrf.mxu1  ;;  %v1370_v47 = vadd.f32 %v1352_v48, %v1223_v32 }
 0x171   : > { %v1210_v21 = vpop.f32.mrf.mxu0 }
 0x172   : > { %v3540_v13 = vpop.f32.mrf.mxu1  ;;  %v1224_v46 = vadd.f32 %v1210_v21, %v1097_v45 }
 0x173   : > { %v3515_v35 = vpop.f32.mrf.mxu0 }
 0x174   : > { %v1643_v55 = vpop.f32.mrf.mxu1  ;;  %v1371_v44 = vadd.f32 %v1357_v57, %v1224_v46 }
 0x175   : > { %v1213_v12 = vpop.f32.mrf.mxu0 }
 0x176   : > { %v3571_v5 = vpop.f32.mrf.mxu1 }
 0x177   : > { %v3516_v0 = vpop.f32.mrf.mxu0 }
 0x178   : > { %v1646_v9 = vpop.f32.mrf.mxu1 }
 0x179   : > { %v1482_v15 = vpop.f32.mrf.mxu0 }
 0x17a   : > { %v3572_v62 = vpop.f32.mrf.mxu1  ;;  %v1520_v20 = vadd.f32 %v1482_v15, %v1363_v36 }
 0x17b   : > { %v3547_v17 = vpop.f32.mrf.mxu0 }
 0x17c   : > { %v1651_v56 = vpop.f32.mrf.mxu1  ;;  %v1681_v43 = vadd.f32 %v1643_v55, %v1520_v20 }
 0x17d   : > { %v1485_v53 = vpop.f32.mrf.mxu0 }
 0x17e   : > { %v3575_v40 = vpop.f32.mrf.mxu1  ;;  %v1521_v3 = vadd.f32 %v1485_v53, %v1364_v7 }
 0x17f   : > { %v3548_v22 = vpop.f32.mrf.mxu0 }
 0x180   : > { %v1654_v19 = vpop.f32.mrf.mxu1  ;;  %v1682_v45 = vadd.f32 %v1646_v9, %v1521_v3 }
 0x181   : > { %v1490_v25 = vpop.f32.mrf.mxu0 }
 0x182   : > { %v3576_v1 = vpop.f32.mrf.mxu1  ;;  %v1522_v10 = vadd.f32 %v1490_v25, %v1365_v34 }
 0x183   : > { %v3551_v27 = vpop.f32.mrf.mxu0 }
 0x184   : > { %v1659_v26 = vpop.f32.mrf.mxu1  ;;  %v1683_v16 = vadd.f32 %v1651_v56, %v1522_v10 }
 0x185   : > { %v1493_v29 = vpop.f32.mrf.mxu0 }
 0x186   : > { %v3579_v28 = vpop.f32.mrf.mxu1  ;;  %v1523_v31 = vadd.f32 %v1493_v29, %v1366_v11 }
 0x187   : > { %v3552_v36 = vpop.f32.mrf.mxu0 }
 0x188   : > { %v1662_v18 = vpop.f32.mrf.mxu1  ;;  %v1684_v6 = vadd.f32 %v1654_v19, %v1523_v31 }
 0x189   : > { %v1498_v30 = vpop.f32.mrf.mxu0 }
 0x18a   : > { %v3580_v38 = vpop.f32.mrf.mxu1  ;;  %v1524_v41 = vadd.f32 %v1498_v30, %v1367_v14 }
 0x18b   : > { %v3555_v7 = vpop.f32.mrf.mxu0 }
 0x18c   : > { %v1667_v8 = vpop.f32.mrf.mxu1  ;;  %v1685_v33 = vadd.f32 %v1659_v26, %v1524_v41 }
 0x18d   : > { %v1501_v42 = vpop.f32.mrf.mxu0 }
 0x18e   : > { %v3583_v63 = vpop.f32.mrf.mxu1  ;;  %v1525_v49 = vadd.f32 %v1501_v42, %v1368_v52 }
 0x18f   : > { %v3556_v34 = vpop.f32.mrf.mxu0 }
 0x190   : > { %v1670_v37 = vpop.f32.mrf.mxu1  ;;  %v1686_v4 = vadd.f32 %v1662_v18, %v1525_v49 }
 0x191   : > { %v1506_v48 = vpop.f32.mrf.mxu0 }
 0x192   : > { %v3584_v61 = vpop.f32.mrf.mxu1  ;;  %v1526_v2 = vadd.f32 %v1506_v48, %v1369_v59 }
 0x193   : > { %v3559_v11 = vpop.f32.mrf.mxu0 }
 0x194   : > { %v1675_v50 = vpop.f32.mrf.mxu1  ;;  %v1687_v24 = vadd.f32 %v1667_v8, %v1526_v2 }
 0x195   : > { %v1509_v57 = vpop.f32.mrf.mxu0 }
 0x196   : > { %v3587_v54 = vpop.f32.mrf.mxu1  ;;  %v1527_v58 = vadd.f32 %v1509_v57, %v1370_v47 }
 0x197   : > { %v3560_v14 = vpop.f32.mrf.mxu0 }
 0x198   : > { %v1678_v23 = vpop.f32.mrf.mxu1  ;;  %v1688_v32 = vadd.f32 %v1670_v37, %v1527_v58 }
 0x199   : > { %v1514_v39 = vpop.f32.mrf.mxu0 }
 0x19a   : > { %v3588_v60 = vpop.f32.mrf.mxu1  ;;  %v1528_v51 = vadd.f32 %v1514_v39, %v1371_v44 }
 0x19b   : > { %v3563_v52 = vpop.f32.mrf.mxu0 }
 0x19c   : > { %v1917_v13 = vpop.f32.mrf.mxu1  ;;  %v1689_v46 = vadd.f32 %v1675_v50, %v1528_v51 }
 0x19d   : > { %v1517_v55 = vpop.f32.mrf.mxu0 }
 0x19e   : > { %v3619_v21 = vpop.f32.mrf.mxu1 }
 0x19f   : > { %v3564_v5 = vpop.f32.mrf.mxu0 }
 0x1a0   : > { %v1920_v35 = vpop.f32.mrf.mxu1 }
 0x1a1   : > { %v1770_v12 = vpop.f32.mrf.mxu0 }
 0x1a2   : > { %v3620_v59 = vpop.f32.mrf.mxu1  ;;  %v1808_v9 = vadd.f32 %v1770_v12, %v1681_v43 }
 0x1a3   : > { %v3595_v62 = vpop.f32.mrf.mxu0 }
 0x1a4   : > { %v1925_v0 = vpop.f32.mrf.mxu1  ;;  %v4674_v47 = vadd.f32 %v1917_v13, %v1808_v9  ;;  %v2567_v9 = vlaneseq }
 0x1a5   : > { %v1773_v20 = vpop.f32.mrf.mxu0 }
 0x1a6   : > { %v3623_v15 = vpop.f32.mrf.mxu1  ;;  %v1809_v56 = vadd.f32 %v1773_v20, %v1682_v45 }
 0x1a7   : > { %v3596_v40 = vpop.f32.mrf.mxu0 }
 0x1a8   : > { %v1928_v17 = vpop.f32.mrf.mxu1  ;;  %v4676_v53 = vadd.f32 %v1920_v35, %v1809_v56  ;;  %v4708_v56 = vshrl.u32 %v2567_v9, 7 }
 0x1a9   : > { %v1778_v3 = vpop.f32.mrf.mxu0 }
 0x1aa   : > { %v3624_v44 = vpop.f32.mrf.mxu1  ;;  %v1810_v19 = vadd.f32 %v1778_v3, %v1683_v16 }
 0x1ab   : > { %v3599_v1 = vpop.f32.mrf.mxu0 }
 0x1ac   : > { %v1933_v22 = vpop.f32.mrf.mxu1  ;;  %v4678_v10 = vadd.f32 %v1925_v0, %v1810_v19  ;;  %v2569_v1 = vadd.s32 8, %v4708_v56 }
 0x1ad   : > { %v1781_v43 = vpop.f32.mrf.mxu0 }
 0x1ae   : > { %v3627_v25 = vpop.f32.mrf.mxu1  ;;  %v1811_v26 = vadd.f32 %v1781_v43, %v1684_v6  ;;  %v2570_v43 = vadd.s32 16, %v4708_v56 }
 0x1af   : > { %v3600_v28 = vpop.f32.mrf.mxu0 }
 0x1b0   : > { %v1936_v27 = vpop.f32.mrf.mxu1  ;;  %v4680_v31 = vadd.f32 %v1928_v17, %v1811_v26 }
 0x1b1   : > { %v1786_v45 = vpop.f32.mrf.mxu0 }
 0x1b2   : > { %v3628_v29 = vpop.f32.mrf.mxu1  ;;  %v1812_v18 = vadd.f32 %v1786_v45, %v1685_v33 }
 0x1b3   : > { %v3603_v38 = vpop.f32.mrf.mxu0  ;;  %v4724_v29 = vmul.u32.u64.low 3435973837, %v2569_v1  ;;  %v4725_v45 = vmul.u32.u64.high 3435973837, %v2569_v1, %v4724_v29 }
 0x1b4   : > { %v1941_v36 = vpop.f32.mrf.mxu1  ;;  %v4682_v41 = vadd.f32 %v1933_v22, %v1812_v18  ;;  %v4715_v19 = vmul.u32.u64.low 3435973837, %v4708_v56  ;;  %v4716_v22 = vmul.u32.u64.high 3435973837, %v4708_v56, %v4715_v19 }
 0x1b5   : > { %v1789_v16 = vpop.f32.mrf.mxu0  ;;  %v4766_v19 = vadd.s32 48, %v4708_v56 }
 0x1b6   : > { %v3631_v30 = vpop.f32.mrf.mxu1  ;;  %v1813_v8 = vadd.f32 %v1789_v16, %v1686_v4  ;;  %v2571_v16 = vadd.s32 24, %v4708_v56 }
 0x1b7   : > { %v3604_v63 = vpop.f32.mrf.mxu0 }
 0x1b8   : > { %v1944_v7 = vpop.f32.mrf.mxu1  ;;  %v4684_v49 = vadd.f32 %v1936_v27, %v1813_v8  ;;  %v2583_v63 = vshrl.u32 %v4716_v22, 3 }
 0x1b9   : > { %v1794_v6 = vpop.f32.mrf.mxu0 }
 0x1ba   : > { %v3632_v42 = vpop.f32.mrf.mxu1  ;;  %v1814_v37 = vadd.f32 %v1794_v6, %v1687_v24 }
 0x1bb   : > { %v3607_v61 = vpop.f32.mrf.mxu0 }
 0x1bc   : > { %v1949_v34 = vpop.f32.mrf.mxu1  ;;  %v4686_v2 = vadd.f32 %v1941_v36, %v1814_v37  ;;  %v4727_v36 = vmul.u32.u64.low 3435973837, %v2570_v43  ;;  %v4728_v38 = vmul.u32.u64.high 3435973837, %v2570_v43, %v4727_v36 }
 0x1bd   : > { %v1797_v33 = vpop.f32.mrf.mxu0 }
 0x1be   : > { %v3635_v48 = vpop.f32.mrf.mxu1  ;;  %v1815_v50 = vadd.f32 %v1797_v33, %v1688_v32  ;;  %v2584_v33 = vmul.u32 10, %v2583_v63 }
 0x1bf   : > { %v3608_v54 = vpop.f32.mrf.mxu0 }
 0x1c0   : > { %v1952_v11 = vpop.f32.mrf.mxu1  ;;  %v4688_v58 = vadd.f32 %v1944_v7, %v1815_v50  ;;  %v2594_v50 = vshrl.u32 %v4725_v45, 3 }
 0x1c1   : > { %v1802_v4 = vpop.f32.mrf.mxu0  ;;  %v4745_v11 = vadd.s32 32, %v4708_v56 }
 0x1c2   : > { %v3636_v57 = vpop.f32.mrf.mxu1  ;;  %v1816_v23 = vadd.f32 %v1802_v4, %v1689_v46 }
 0x1c3   : > { %v3611_v60 = vpop.f32.mrf.mxu0  ;;  %v2605_v57 = vshrl.u32 %v4728_v38, 3 }
 0x1c4   : > { %v4690_v14 = vpop.f32.mrf.mxu1  ;;  %v4692_v51 = vadd.f32 %v1949_v34, %v1816_v23  ;;  %v4738_v37 = vmul.u32.u64.low 3435973837, %v2571_v16  ;;  %v4739_v34 = vmul.u32.u64.high 3435973837, %v2571_v16, %v4738_v37  ;;  %v4751_v23 = vadd.s32 40, %v4708_v56 }
 0x1c5   : > { %v1805_v24 = vpop.f32.mrf.mxu0 }
 0x1c6   : > { %v3667_v39 = vpop.f32.mrf.mxu1  ;;  %v2585_v24 = vsub.s32 %v4708_v56, %v2584_v33 }
 0x1c7   : > { %v3612_v52 = vpop.f32.mrf.mxu0 }
 0x1c8   : > { %v4694_v13 = vpop.f32.mrf.mxu1  ;;  %v2595_v52 = vmul.u32 10, %v2594_v50  ;;  %vm2676_vm9 = vcmp.ne.s32.totalorder %v2585_v24, 0  ;;  %vm2685_vm10 = vcmp.lt.s32.totalorder %v2585_v24, 0  ;;  %v2703_v36 = vadd.s32 10, %v2585_v24 }
 0x1c9   : > { %v4696_v55 = vpop.f32.mrf.mxu0  ;;  %vm4772_vm11 = vmand %vm2685_vm10, %vm2676_vm9 }
 0x1ca   : > { %v3668_v21 = vpop.f32.mrf.mxu1  ;;  %v2712_v50 = vsel %vm4772_vm11, %v2703_v36, %v2585_v24 }
 0x1cb   : > { %v3643_v35 = vpop.f32.mrf.mxu0  ;;  %vm4819_vm2 = vcmp.lt.s32.totalorder %v2712_v50, 7 }
 0x1cc   : > { %v4698_v32 = vpop.f32.mrf.mxu1  ;;  %v4755_v21 = vmul.u32.u64.low 3435973837, %v4745_v11  ;;  %v4756_v35 = vmul.u32.u64.high 3435973837, %v4745_v11, %v4755_v21 }
 0x1cd   : > { %v4700_v59 = vpop.f32.mrf.mxu0 }
 0x1ce   : > { %v3671_v5 = vpop.f32.mrf.mxu1 }
 0x1cf   : > { %v3644_v12 = vpop.f32.mrf.mxu0 }
 0x1d0   : > { %v4702_v46 = vpop.f32.mrf.mxu1  ;;  %v2606_v12 = vmul.u32 10, %v2605_v57 }
 0x1d1   : > { %v4704_v62 = vpop.f32.mrf.mxu0 }
 0x1d2   : > { %v3672_v0 = vpop.f32.mrf.mxu1  ;;  %v2607_v45 = vsub.s32 %v2570_v43, %v2606_v12  ;;  %v4815_v12 = vadd.s32 64, %v4708_v56 }
 0x1d3   : > { %v3647_v20 = vpop.f32.mrf.mxu0  ;;  %v2616_v0 = vshrl.u32 %v4739_v34, 3 }
 0x1d4   : > { %v4706_v15 = vpop.f32.mrf.mxu1  ;;  %vm2678_vm14 = vcmp.ne.s32.totalorder %v2607_v45, 0  ;;  %vm2687_vm15 = vcmp.lt.s32.totalorder %v2607_v45, 0 }
 0x1d5   : > { %v4710_v40 = vpop.f32.mrf.mxu0  ;;  %v2617_v38 = vmul.u32 10, %v2616_v0  ;;  %vm4806_vm1 = vmand %vm2687_vm15, %vm2678_vm14  ;;  %v2114_v0 = vadd.f32 %v4704_v62, %v4678_v10 }
 0x1d6   : > { %v3675_v17 = vpop.f32.mrf.mxu1 }
 0x1d7   : > { %v3648_v3 = vpop.f32.mrf.mxu0  ;;  %v4762_v20 = vmul.u32.u64.low 3435973837, %v4751_v23  ;;  %v4763_v17 = vmul.u32.u64.high 3435973837, %v4751_v23, %v4762_v20  ;;  %v4792_v57 = vsub.s32 %v2571_v16, %v2617_v38 }
 0x1d8   : > { %v4712_v44 = vpop.f32.mrf.mxu1 }
 0x1d9   : > { %v4720_v26 = vpop.f32.mrf.mxu0  ;;  %vm2679_vm3 = vcmp.ne.s32.totalorder %v4792_v57, 0  ;;  %vm2688_vm4 = vcmp.lt.s32.totalorder %v4792_v57, 0 }
 0x1da   : > { %v3676_v25 = vpop.f32.mrf.mxu1  ;;  %vm4850_vm5 = vmand %vm2688_vm4, %vm2679_vm3 }
 0x1db   : > { %v3651_v28 = vpop.f32.mrf.mxu0  ;;  %v4768_v25 = vsub.s32 %v2569_v1, %v2595_v52  ;;  %v2113_v1 = vadd.f32 %v4700_v59, %v4676_v53  ;;  %v2705_v59 = vadd.s32 10, %v2607_v45  ;;  %v4804_v52 = vld [vmem:[%s5017_s2] ss:$0 sm:$0xff]  ;;  %v2116_v53 = vadd.f32 %v4720_v26, %v4682_v41 }
 0x1dc   : > { %v4722_v27 = vpop.f32.mrf.mxu1  ;;  %v2112_v28 = vadd.f32 %v4696_v55, %v4674_v47  ;;  %v2627_v47 = vshrl.u32 %v4756_v35, 3  ;;  %v4784_v55 = vadd.s32 56, %v4708_v56 }
 0x1dd   : > { %v4730_v30 = vpop.f32.mrf.mxu0  ;;  %vm2677_vm12 = vcmp.ne.s32.totalorder %v4768_v25, 0  ;;  %vm2686_vm13 = vcmp.lt.s32.totalorder %v4768_v25, 0 }
 0x1de   : > { %v3679_v18 = vpop.f32.mrf.mxu1  ;;  %v2273_v43 = vadd.f32 %v4690_v14, %v2112_v28  ;;  %vm4797_vm0 = vmand %vm2686_vm13, %vm2677_vm12  ;;  %v2628_v21 = vmul.u32 10, %v2627_v47  ;;  %v2115_v47 = vadd.f32 %v4710_v40, %v4680_v31 }
 0x1df   : > { %v3652_v7 = vpop.f32.mrf.mxu0 }
 0x1e0   : > { %v4733_v8 = vpop.f32.mrf.mxu1  ;;  %v2706_v7 = vadd.s32 10, %v4792_v57  ;;  %v2276_v16 = vadd.f32 %v4702_v46, %v2115_v47 }
 0x1e1   : > { %v4736_v6 = vpop.f32.mrf.mxu0 }
 0x1e2   : > { %v3680_v42 = vpop.f32.mrf.mxu1 }
 0x1e3   : > { %v3655_v48 = vpop.f32.mrf.mxu0  ;;  %v4777_v42 = vmul.u32.u64.low 3435973837, %v4766_v19  ;;  %v4778_v37 = vmul.u32.u64.high 3435973837, %v4766_v19, %v4777_v42 }
 0x1e4   : > { %v4741_v61 = vpop.f32.mrf.mxu1 }
 0x1e5   : > { %v4748_v4 = vpop.f32.mrf.mxu0 }
 0x1e6   : > { %v3683_v54 = vpop.f32.mrf.mxu1 }
 0x1e7   : > { %v3656_v39 = vpop.f32.mrf.mxu0  ;;  %v2704_v54 = vadd.s32 10, %v4768_v25 }
 0x1e8   : > { %v2270_v60 = vpop.f32.mrf.mxu1 }
 0x1e9   : > { %v4758_v9 = vpop.f32.mrf.mxu0  ;;  %v2638_v60 = vshrl.u32 %v4763_v17, 3 }
 0x1ea   : > { %v3684_v5 = vpop.f32.mrf.mxu1 }
 0x1eb   : > { %v3659_v22 = vpop.f32.mrf.mxu0  ;;  %v4811_v35 = vmul.u32.u64.low 3435973837, %v4784_v55  ;;  %v4812_v5 = vmul.u32.u64.high 3435973837, %v4784_v55, %v4811_v35  ;;  %v2639_v56 = vmul.u32 10, %v2638_v60 }
 0x1ec   : > { %v2505_v3 = vpop.f32.mrf.mxu1  ;;  %v2274_v22 = vadd.f32 %v4694_v13, %v2113_v1  ;;  %v2649_v13 = vshrl.u32 %v4778_v37, 3  ;;  %v2118_v37 = vadd.f32 %v4736_v6, %v4686_v2 }
 0x1ed   : > { %v2109_v18 = vpop.f32.mrf.mxu0  ;;  %v4863_v31 = vsub.s32 %v4751_v23, %v2639_v56  ;;  %v2660_v23 = vshrl.u32 %v4812_v5, 3  ;;  %v2117_v56 = vadd.f32 %v4730_v30, %v4684_v49 }
 0x1ee   : > { %v3715_v29 = vpop.f32.mrf.mxu1  ;;  %v2713_v18 = vsel %vm4797_vm0, %v2704_v54, %v4768_v25  ;;  %v4837_v25 = vsub.s32 %v4745_v11, %v2628_v21  ;;  %v2650_v54 = vmul.u32 10, %v2649_v13  ;;  %v2277_v13 = vadd.f32 %v4706_v15, %v2116_v53 }
 0x1ef   : > { %v3660_v34 = vpop.f32.mrf.mxu0  ;;  %vm4854_vm7 = vcmp.lt.s32.totalorder %v2713_v18, 7  ;;  %vm2681_vm12 = vcmp.ne.s32.totalorder %v4863_v31, 0  ;;  %vm2690_vm13 = vcmp.lt.s32.totalorder %v4863_v31, 0  ;;  %v2708_v30 = vadd.s32 10, %v4863_v31 }
 0x1f0   : > { %v2508_v63 = vpop.f32.mrf.mxu1  ;;  %v4840_v42 = vmul.u32.u64.low 3435973837, %v4815_v12  ;;  %v4841_v34 = vmul.u32.u64.high 3435973837, %v4815_v12, %v4840_v42  ;;  %vm2680_vm9 = vcmp.ne.s32.totalorder %v4837_v25, 0  ;;  %vm2689_vm10 = vcmp.lt.s32.totalorder %v4837_v25, 0  ;;  %vm4919_vm0 = vmand %vm2690_vm13, %vm2681_vm12 }
 0x1f1   : > { %v2353_v33 = vpop.f32.mrf.mxu0  ;;  %v2707_v17 = vadd.s32 10, %v4837_v25  ;;  %vm4891_vm11 = vmand %vm2689_vm10, %vm2680_vm9  ;;  %v4897_v26 = vsub.s32 %v4766_v19, %v2650_v54 }
 0x1f2   : > { %v3716_v48 = vpop.f32.mrf.mxu1  ;;  %v2391_v39 = vadd.f32 %v2353_v33, %v2273_v43  ;;  %v2275_v43 = vadd.f32 %v4698_v32, %v2114_v0  ;;  %v2671_v18 = vshrl.u32 %v4841_v34, 3  ;;  %v2278_v33 = vadd.f32 %v4712_v44, %v2117_v56 }
 0x1f3   : > { %v3691_v24 = vpop.f32.mrf.mxu0  ;;  %v2716_v47 = vsel %vm4891_vm11, %v2707_v17, %v4837_v25  ;;  %vm2682_vm15 = vcmp.ne.s32.totalorder %v4897_v26, 0  ;;  %v2709_v2 = vadd.s32 10, %v4897_v26 }
 0x1f4   : > { %v2513_v14 = vpop.f32.mrf.mxu1  ;;  %v2543_v20 = vadd.f32 %v2505_v3, %v2391_v39  ;;  %v2714_v3 = vsel %vm4806_vm1, %v2705_v59, %v2607_v45  ;;  %v2715_v39 = vsel %vm4850_vm5, %v2706_v7, %v4792_v57  ;;  %vm2691_vm1 = vcmp.lt.s32.totalorder %v4897_v26, 0 }
 0x1f5   : > { %v2356_v29 = vpop.f32.mrf.mxu0  ;;  %vm4858_vm8 = vcmp.lt.s32.totalorder %v2714_v3, 7  ;;  %vm2724_vm14 = vcmp.lt.s32.totalorder %v2715_v39, 7  ;;  %vm4942_vm3 = vmand %vm2691_vm1, %vm2682_vm15 }
 0x1f6   : > { %v3719_v28 = vpop.f32.mrf.mxu1  ;;  %v4830_v10 = vadd.f32 %v4804_v52, %v2543_v20  ;;  %v2392_v62 = vadd.f32 %v2356_v29, %v2274_v22  ;;  %v2661_v29 = vmul.u32 10, %v2660_v23 }
 0x1f7   : > { %v3692_v38 = vpop.f32.mrf.mxu0 }
 0x1f8   : > { %v2516_v36 = vpop.f32.mrf.mxu1  ;;  %v2544_v1 = vadd.f32 %v2508_v63, %v2392_v62  ;;  %v2748_v32 = vsel %vm4819_vm2, %v4830_v10, 0.0  ;;  %v4925_v25 = vsub.s32 %v4784_v55, %v2661_v29  ;;  %vm2725_vm2 = vcmp.lt.s32.totalorder %v2716_v47, 7 }
 0x1f9   : > { %v2361_v48 = vpop.f32.mrf.mxu0  ;;  %v2774_v35 = vmul.f32 %v2748_v32, %v2748_v32  ;;  %v2717_v55 = vsel %vm4919_vm0, %v2708_v30, %v4863_v31  ;;  %v2119_v31 = vadd.f32 %v4748_v4, %v4688_v58 }
 0x1fa   : > { %v3720_v45 = vpop.f32.mrf.mxu1  ;;  %v4869_v40 = vadd.f32 %v4804_v52, %v2544_v1  ;;  %v2393_v63 = vadd.f32 %v2361_v48, %v2275_v43  ;;  %vm2683_vm4 = vcmp.ne.s32.totalorder %v4925_v25, 0  ;;  %vm2692_vm5 = vcmp.lt.s32.totalorder %v4925_v25, 0 }
 0x1fb   : > { %v3695_v60 = vpop.f32.mrf.mxu0  ;;  %v2672_v45 = vmul.u32 10, %v2671_v18  ;;  %v2710_v58 = vadd.s32 10, %v4925_v25  ;;  %v2280_v29 = vadd.f32 %v4733_v8, %v2119_v31 }
 0x1fc   : > { %v2521_v50 = vpop.f32.mrf.mxu1  ;;  %v2749_v59 = vsel %vm4854_vm7, %v4869_v40, 0.0  ;;  %v2545_v24 = vadd.f32 %v2513_v14, %v2393_v63  ;;  %vm2726_vm7 = vcmp.lt.s32.totalorder %v2717_v55, 7 }
 0x1fd   : > { %v2757_v0 = vadd.f32 %v2749_v59, %v2748_v32  ;;  %v2775_v57 = vmul.f32 %v2749_v59, %v2749_v59  ;;  %v2364_v20 = vpop.f32.mrf.mxu0  ;;  %v2673_v59 = vsub.s32 %v4815_v12, %v2672_v45  ;;  %v2718_v12 = vsel %vm4942_vm3, %v2709_v2, %v4897_v26 }
 0x1fe   : > { %v3723_v21 = vpop.f32.mrf.mxu1  ;;  %v4885_v22 = vadd.f32 %v4804_v52, %v2545_v24  ;;  %v2394_v5 = vadd.f32 %v2364_v20, %v2276_v16  ;;  %vm2727_vm11 = vcmp.lt.s32.totalorder %v2718_v12, 7 }
 0x1ff   : > { %v2783_v14 = vadd.f32 %v2775_v57, %v2774_v35  ;;  %v3696_v28 = vpop.f32.mrf.mxu0  ;;  %v2279_v21 = vadd.f32 %v4722_v27, %v2118_v37  ;;  %vm2684_vm9 = vcmp.ne.s32.totalorder %v2673_v59, 0  ;;  %vm2693_vm10 = vcmp.lt.s32.totalorder %v2673_v59, 0 }
 0x200   : > { %v2524_v46 = vpop.f32.mrf.mxu1  ;;  %v2750_v62 = vsel %vm4858_vm8, %v4885_v22, 0.0  ;;  %v2546_v3 = vadd.f32 %v2516_v36, %v2394_v5  ;;  %vm4964_vm8 = vmand %vm2692_vm5, %vm2683_vm4 }
 0x201   : > { %v2758_v19 = vadd.f32 %v2757_v0, %v2750_v62  ;;  %v2776_v7 = vmul.f32 %v2750_v62, %v2750_v62  ;;  %v2369_v42 = vpop.f32.mrf.mxu0  ;;  %vm4980_vm12 = vmand %vm2693_vm10, %vm2684_vm9 }
 0x202   : > { %v3724_v38 = vpop.f32.mrf.mxu1  ;;  %v4911_v34 = vadd.f32 %v4804_v52, %v2546_v3  ;;  %v2395_v49 = vadd.f32 %v2369_v42, %v2277_v13 }
 0x203   : > { %v2784_v36 = vadd.f32 %v2783_v14, %v2776_v7  ;;  %v3699_v15 = vpop.f32.mrf.mxu0  ;;  %v2120_v14 = vadd.f32 %v4758_v9, %v4692_v51  ;;  %v2711_v7 = vadd.s32 10, %v2673_v59 }
 0x204   : > { %v2529_v1 = vpop.f32.mrf.mxu1  ;;  %v2751_v11 = vsel %vm2724_vm14, %v4911_v34, 0.0  ;;  %v2547_v48 = vadd.f32 %v2521_v50, %v2395_v49 }
 0x205   : > { %v2759_v63 = vadd.f32 %v2758_v19, %v2751_v11  ;;  %v2777_v54 = vmul.f32 %v2751_v11, %v2751_v11  ;;  %v2372_v60 = vpop.f32.mrf.mxu0  ;;  %v2719_v19 = vsel %vm4964_vm8, %v2710_v58, %v4925_v25  ;;  %v2281_v30 = vadd.f32 %v4741_v61, %v2120_v14 }
 0x206   : > { %v3727_v32 = vpop.f32.mrf.mxu1  ;;  %v4932_v39 = vadd.f32 %v4804_v52, %v2547_v48  ;;  %v2396_v23 = vadd.f32 %v2372_v60, %v2278_v33  ;;  %vm2728_vm13 = vcmp.lt.s32.totalorder %v2719_v19, 7  ;;  %v2720_v37 = vsel %vm4980_vm12, %v2711_v7, %v2673_v59 }
 0x207   : > { %v2785_v53 = vadd.f32 %v2784_v36, %v2777_v54  ;;  %v3700_v50 = vpop.f32.mrf.mxu0  ;;  %vm2729_vm14 = vcmp.lt.s32.totalorder %v2720_v37, 7 }
 0x208   : > { %v2532_v6 = vpop.f32.mrf.mxu1  ;;  %v2752_v24 = vsel %vm2725_vm2, %v4932_v39, 0.0  ;;  %v2548_v16 = vadd.f32 %v2524_v46, %v2396_v23 }
 0x209   : > { %v2760_v0 = vadd.f32 %v2759_v63, %v2752_v24  ;;  %v2778_v57 = vmul.f32 %v2752_v24, %v2752_v24  ;;  %v2377_v20 = vpop.f32.mrf.mxu0 }
 0x20a   : > { %v3728_v35 = vpop.f32.mrf.mxu1  ;;  %v4954_v17 = vadd.f32 %v4804_v52, %v2548_v16  ;;  %v2397_v5 = vadd.f32 %v2377_v20, %v2279_v21 }
 0x20b   : > { %v2786_v41 = vadd.f32 %v2785_v53, %v2778_v57  ;;  %v3703_v46 = vpop.f32.mrf.mxu0 }
 0x20c   : > { %v2537_v4 = vpop.f32.mrf.mxu1  ;;  %v2753_v26 = vsel %vm2726_vm7, %v4954_v17, 0.0  ;;  %v2549_v28 = vadd.f32 %v2529_v1, %v2397_v5 }
 0x20d   : > { %v2761_v56 = vadd.f32 %v2760_v0, %v2753_v26  ;;  %v2779_v62 = vmul.f32 %v2753_v26, %v2753_v26  ;;  %v2380_v3 = vpop.f32.mrf.mxu0 }
 0x20e   : > { %v3731_v18 = vpop.f32.mrf.mxu1  ;;  %v4973_v13 = vadd.f32 %v4804_v52, %v2549_v28  ;;  %v2398_v38 = vadd.f32 %v2380_v3, %v2280_v29 }
 0x20f   : > { %v2787_v9 = vadd.f32 %v2786_v41, %v2779_v62  ;;  %v3704_v42 = vpop.f32.mrf.mxu0 }
 0x210   : > { %v2540_v51 = vpop.f32.mrf.mxu1  ;;  %v2754_v47 = vsel %vm2727_vm11, %v4973_v13, 0.0  ;;  %v2550_v49 = vadd.f32 %v2532_v6, %v2398_v38 }
 0x211   : > { %v2762_v36 = vadd.f32 %v2761_v56, %v2754_v47  ;;  %v2780_v15 = vmul.f32 %v2754_v47, %v2754_v47  ;;  %v2385_v43 = vpop.f32.mrf.mxu0 }
 0x212   : > { %v3732_v1 = vpop.f32.mrf.mxu1  ;;  %v2565_v25 = vadd.f32 %v4804_v52, %v2550_v49  ;;  %v2399_v45 = vadd.f32 %v2385_v43, %v2281_v30 }
 0x213   : > { %v2788_v11 = vadd.f32 %v2787_v9, %v2780_v15  ;;  %v3707_v48 = vpop.f32.mrf.mxu0 }
 0x214   : > { %v2755_v33 = vsel %vm2728_vm13, %v2565_v25, 0.0  ;;  %v2551_v32 = vadd.f32 %v2537_v4, %v2399_v45 }
 0x215   : > { %v2763_v63 = vadd.f32 %v2762_v36, %v2755_v33  ;;  %v2781_v54 = vmul.f32 %v2755_v33, %v2755_v33  ;;  %v2388_v60 = vpop.f32.mrf.mxu0 }
 0x216   : > { %v2566_v61 = vadd.f32 %v4804_v52, %v2551_v32 }
 0x217   : > { %v2789_v23 = vadd.f32 %v2788_v11, %v2781_v54  ;;  %v3708_v55 = vpop.f32.mrf.mxu0 }
 0x218   : > { %v2756_v2 = vsel %vm2729_vm14, %v2566_v61, 0.0  ;;  %2807 = vst [vmem:[#allocation2 + $0x8] sm:$0x3f] %v2566_v61 }
 0x219   : > { %v2765_v6 = vsel %vm1107_vm6, %v2756_v2, 0.0  ;;  %v2782_v53 = vmul.f32 %v2756_v2, %v2756_v2 }
 0x21a   : > { %v2766_v50 = vadd.f32 %v2765_v6, %v2763_v63 }
 0x21b   : > { %v2790_v44 = vsel %vm1107_vm6, %v2782_v53, 0.0 }
 0x21c   : > { %v2767_v59 = vrot.slane %v2766_v50, 4  ;;  %v2791_v31 = vadd.f32 %v2790_v44, %v2789_v23 }
 0x21e   : > { %v2768_v24 = vadd.f32 %v2767_v59, %v2766_v50  ;;  %v2792_v16 = vrot.slane %v2791_v31, 4 }
 0x21f   : > { %v2823_v7 = vld [vmem:[#allocation2 + $0x8] sm:$0x3f] }
 0x220   : > { %v2769_v21 = vrot.slane %v2768_v24, 2  ;;  %v2793_v35 = vadd.f32 %v2792_v16, %v2791_v31 }
 0x222   : > { %v2770_v0 = vadd.f32 %v2769_v21, %v2768_v24  ;;  %v2794_v57 = vrot.slane %v2793_v35, 2 }
 0x224   : > { %v2771_v20 = vrot.slane %v2770_v0, 1  ;;  %v2795_v52 = vadd.f32 %v2794_v57, %v2793_v35 }
 0x226   : > { %v2772_v5 = vadd.f32 %v2771_v20, %v2770_v0  ;;  %v2796_v12 = vrot.slane %v2795_v52, 1 }
 0x228   : > { %v2797_v58 = vadd.f32 %v2796_v12, %v2795_v52  ;;  %v2808_v4 = vmul.f32 0.020408163, %v2772_v5 }
 0x22a   : > { %v2809_v41 = vmul.f32 0.020408163, %v2797_v58  ;;  %v2810_v46 = vmul.f32 %v2808_v4, %v2808_v4  ;;  %v2824_v27 = vsub.f32 %v4830_v10, %v2808_v4  ;;  %v2825_v14 = vsub.f32 %v4869_v40, %v2808_v4 }
 0x22b   : > { %v2826_v26 = vsub.f32 %v4885_v22, %v2808_v4  ;;  %v2827_v28 = vsub.f32 %v4911_v34, %v2808_v4  ;;  %v2828_v29 = vsub.f32 %v4932_v39, %v2808_v4  ;;  %v2829_v18 = vsub.f32 %v4954_v17, %v2808_v4 }
 0x22c   : > { %v2811_v56 = vsub.f32 %v2809_v41, %v2810_v46  ;;  %v2830_v62 = vsub.f32 %v4973_v13, %v2808_v4  ;;  %v2831_v3 = vsub.f32 %v2565_v25, %v2808_v4  ;;  %v2832_v51 = vsub.f32 %v2823_v7, %v2808_v4 }
 0x22e   : > { %v2812_v38 = vmax.f32 %v2811_v56, 0.0 }
 0x230   : > { %v2813_v19 = vadd.f32 1e-05, %v2812_v38 }
 0x232   : > { %3839 = vrsqrt.f32 %v2813_v19 }
 0x23f   : > { %v3840_v10 = vpop.eup %3839 }
 0x240   : > { %v2833_v40 = vmul.f32 %v3840_v10, %v2824_v27  ;;  %v2834_v9 = vmul.f32 %v3840_v10, %v2825_v14  ;;  %v2835_v22 = vmul.f32 %v3840_v10, %v2826_v26  ;;  %v2836_v42 = vmul.f32 %v3840_v10, %v2827_v28 }
 0x241   : > { %v2837_v34 = vmul.f32 %v3840_v10, %v2828_v29  ;;  %v2838_v8 = vmul.f32 %v3840_v10, %v2829_v18  ;;  %v2839_v39 = vmul.f32 %v3840_v10, %v2830_v62  ;;  %v2840_v47 = vmul.f32 %v3840_v10, %v2831_v3 }
 0x242   : > { %v2841_v17 = vmul.f32 %v3840_v10, %v2832_v51  ;;  %vm2842_vm6 = vcmp.ge.f32.partialorder %v2833_v40, 0.0  ;;  %vm2843_vm15 = vcmp.ge.f32.partialorder %v2834_v9, 0.0  ;;  %vm2844_vm0 = vcmp.ge.f32.partialorder %v2835_v22, 0.0 }
 0x243   : > { %vm2845_vm1 = vcmp.ge.f32.partialorder %v2836_v42, 0.0  ;;  %vm2846_vm2 = vcmp.ge.f32.partialorder %v2837_v34, 0.0  ;;  %vm2847_vm3 = vcmp.ge.f32.partialorder %v2838_v8, 0.0  ;;  %vm2848_vm4 = vcmp.ge.f32.partialorder %v2839_v39, 0.0 }
 0x244   : > { %vm2849_vm5 = vcmp.ge.f32.partialorder %v2840_v47, 0.0  ;;  %vm2850_vm7 = vcmp.ge.f32.partialorder %v2841_v17, 0.0  ;;  %v2851_v13 = vmul.f32 0.2, %v2833_v40  ;;  %v2852_v49 = vmul.f32 0.2, %v2834_v9 }
 0x245   : > { %v2853_v30 = vmul.f32 0.2, %v2835_v22  ;;  %v2854_v1 = vmul.f32 0.2, %v2836_v42  ;;  %v2855_v36 = vmul.f32 0.2, %v2837_v34 }
 0x246   : > { %v2856_v15 = vmul.f32 0.2, %v2838_v8  ;;  %v2857_v43 = vmul.f32 0.2, %v2839_v39  ;;  %v2858_v25 = vmul.f32 0.2, %v2840_v47  ;;  %v2860_v45 = vsel %vm2842_vm6, %v2833_v40, %v2851_v13 }
 0x247   : > { %v2859_v37 = vmul.f32 0.2, %v2841_v17  ;;  %v2861_v11 = vsel %vm2843_vm15, %v2834_v9, %v2852_v49  ;;  %v2862_v48 = vsel %vm2844_vm0, %v2835_v22, %v2853_v30  ;;  %v2863_v33 = vsel %vm2845_vm1, %v2836_v42, %v2854_v1 }
 0x248   : > { %v2864_v32 = vsel %vm2846_vm2, %v2837_v34, %v2855_v36  ;;  %v2865_v63 = vsel %vm2847_vm3, %v2838_v8, %v2856_v15  ;;  %v2866_v54 = vsel %vm2848_vm4, %v2839_v39, %v2857_v43  ;;  %v2867_v60 = vsel %vm2849_vm5, %v2840_v47, %v2858_v25 }
 0x249   : > { %v2868_v61 = vsel %vm2850_vm7, %v2841_v17, %v2859_v37  ;;  %v3217_v23 = vpack.c.bf16 %v2861_v11, %v2860_v45  ;;  %v3222_v55 = vpack.c.bf16 %v2863_v33, %v2862_v48  ;;  %v3227_v2 = vpack.c.bf16 %v2865_v63, %v2864_v32 }
 0x24a   : > { %v3213_v6 = vpack.c.bf16 %v2868_v61, %v2868_v61  ;;  %v3232_v53 = vpack.c.bf16 %v2867_v60, %v2866_v54 }
 0x24b   : > { %3218 = vst [vmem:[%s170_s10] sm:$0xff] %v3217_v23   ;;  %3234 = vst [vmem:[%s170_s10 + $0x8] sm:$0xff] %v3222_v55  }
 0x24c   : > { %3235 = vst [vmem:[%s170_s10 + $0x10] sm:$0xff] %v3227_v2   ;;  %3236 = vst [vmem:[%s170_s10 + $0x18] sm:$0xff] %v3232_v53  }
 0x24d   : > { %2914 = vst [vmem:[%s170_s10 + $0x20] sm:$0x7] %v3213_v6 }
 0x24e PF: > { %s13_s12 = sadd.s32 1, %s3847_s12  }
 0x24f   : > { %p10_p4 = scmp.ge.s32.totalorder %s13_s12, 4  }
 0x251   :  { %12 = sbr.rel (!%p10_p4) target bundleno = 1 (0x1), region = 77 }

// kernel: discriminator_forward.9
= control target key start
LH: loop header
LB: loop body
LE: loop exit
PB: predicated region body
PF: predicated region fallthrough
CT: control target
= control target key end

     0   :  { %s3560_s12 = smov 0   ;;  %s4487_s0 = inlined_call_operand.vmem [shape: bf16[2,90,64], index: 0, kind: input, shape index: {}]   ;;  %s4488_s1 = inlined_call_operand.vmem [shape: bf16[16,64,128], index: 1, kind: input, shape index: {}]   ;;  %s4489_s2 = inlined_call_operand.vmem [shape: f32[1,128], index: 2, kind: input, shape index: {}]   ;;  %s4490_s3 = inlined_call_operand.vmem [shape: f32[2,1,128], index: 3, kind: output, shape index: {}]  }
   0x1 LB: > { %s2730_s13 = sadd.s32 4294967295, %s3538_s12   ;;  %p2734_p0 = scmp.ge.s32.totalorder %s3538_s12, 1  ;;  %s3538_s12 = sphi %s3560_s12, %s13_s12  }
   0x2   : > { %p137_p1 = scmp.lt.s32.totalorder %s3538_s12, 3 }
   0x4   : > { %p138_p2 = pnand %p2734_p0, %p137_p1 }
   0x6   : > { %141 = sbr.rel (%p138_p2) target bundleno = 373 (0x175), region = 32 }
   0xb   : > { %v3431_v0 = vld [vmem:[%s4488_s1 + $0x38] sm:$0xff]   ;;  %p159_p3 = scmp.lt.s32.totalorder %s2730_s13, 1  ;;  %v3433_v2 = vld [vmem:[%s4488_s1 + $0x30] sm:$0xff]   ;;  %v3435_v4 = vld [vmem:[%s4488_s1 + $0x28] sm:$0xff]   ;;  %vm268_vm0 = vcmask 523264   ;;  %vm458_vm2 = vcmask 1046528  }
   0xc   : > { %v3432_v1 = vld [vmem:[%s4488_s1 + $0x18] sm:$0xff]   ;;  %3152 = vmatprep.subr.bf16.mxu0 %v3431_v0  ;;  %v3434_v3 = vld [vmem:[%s4488_s1 + $0x10] sm:$0xff]   ;;  %v3436_v5 = vld [vmem:[%s4488_s1 + $0x8] sm:$0xff]   ;;  %vm212_vm1 = vsmask.f32 7424  ;;  %vm1226_vm4 = vcmask 1045504  }
   0xd   : > { %s4526_s13 = smov (!%p159_p3, %s2730_s13), 1  ;;  %3168 = vmatprep.subr.bf16.mxu1 %v3432_v1  ;;  %3153 = vmatpush3.bf16.msra.mxu0 %v3431_v0  ;;  %v3437_v6 = vld [vmem:[%s4488_s1 + $0x20] sm:$0xff]   ;;  %v3442_v18 = vld [vmem:[%s4488_s1 + $0x58] sm:$0xff]   ;;  %v3444_v26 = vld [vmem:[%s4488_s1 + $0x50] sm:$0xff]   ;;  %vm610_vm3 = vsmask.f32 6400 }
   0xe   : > { %3169 = vmatpush3.bf16.msra.mxu1 %v3432_v1  ;;  %3154 = vmatprep.subr.bf16.mxu0 %v3433_v2  ;;  %s3408_s24 = smul.u32 48, %s4526_s13  ;;  %v3438_v7 = vld [vmem:[%s4488_s1] sm:$0xff]   ;;  %v3443_v21 = vld [vmem:[%s4488_s1 + $0x78] sm:$0xff]   ;;  %v3445_v30 = vld [vmem:[%s4488_s1 + $0x70] sm:$0xff]   ;;  %vm1793_vm5 = vsmask.f32 5376  ;;  %s166_s28 = scalar_lea.vmem %s4490_s3, %s4526_s13 }
   0xf   : > { %3170 = vmatprep.subr.bf16.mxu1 %v3434_v3  ;;  %v3448_v35 = vld [vmem:[%s4488_s1 + $0x48] sm:$0xff]   ;;  %v3450_v48 = vld [vmem:[%s4488_s1 + $0x40] sm:$0xff]   ;;  %vm2390_vm6 = vcmask 1044480  }
  0x10   : > { %s3595_s4 = scalar_lea.vmem %s4487_s0, %s3408_s24  ;;  %v3449_v39 = vld [vmem:[%s4488_s1 + $0x68] sm:$0xff]   ;;  %v3451_v53 = vld [vmem:[%s4488_s1 + $0x60] sm:$0xff]  }
  0x11   : > { %3155 = vmatpush3.bf16.msra.mxu0 %v3433_v2  ;;  %v169_v8 = vld [vmem:[%s3595_s4] sm:$0xf]  ;;  %v3602_v9 = vld [vmem:[%s3595_s4 + $0x4] sm:$0xf]  ;;  %v3606_v11 = vld [vmem:[%s3595_s4 + $0x8] sm:$0xff]  }
  0x12   : > { %3171 = vmatpush3.bf16.msra.mxu1 %v3434_v3  ;;  %3156 = vmatprep.subr.bf16.mxu0 %v3435_v4  ;;  %v2744_v10 = vcombine.low %v169_v8, %v3602_v9  ;;  %v3609_v12 = vld [vmem:[%s3595_s4 + $0x10] sm:$0xff]   ;;  %v221_v15 = vshll.u32 %v3606_v11, 16  ;;  %v225_v16 = vshrl.u32 %v3606_v11, 16  ;;  %v3622_v25 = vld [vmem:[%s3595_s4 + $0x18] ss:$0 sps:$4 sm:$0xff]   ;;  %v460_v36 = vrot.slane %v3606_v11, 1 }
  0x13   : > { %3172 = vmatprep.subr.bf16.mxu1 %v3436_v5  ;;  %v229_v17 = vshll.u32 %v3609_v12, 16  ;;  %v233_v27 = vshrl.u32 %v3609_v12, 16  ;;  %v237_v31 = vshll.u32 %v3622_v25, 16  ;;  %v241_v34 = vshrl.u32 %v3622_v25, 16  ;;  %v445_v40 = vld [vmem:[%s3595_s4] sm:$0xe] }
  0x14   : > { %v214_v13 = vshrl.u32 %v2744_v10, 16  ;;  %v216_v14 = vshll.u32 %v2744_v10, 16  ;;  %3176 = vmatprep.mubr.msk.bf16.mxu1 %vm268_vm0, %v2744_v10  ;;  %v223_v20 = vrot.slane %v221_v15, 1  ;;  %v3447_v38 = vld [vmem:[%s3595_s4 + $0x18] ss:$0 sps:$4 sm:$0x77]   ;;  %v2773_v43 = vcombine.low %v445_v40, %v3602_v9 }
  0x15   : > { %3157 = vmatpush3.bf16.msra.mxu0 %v3435_v4  ;;  %v231_v22 = vrot.slane %v229_v17, 1  ;;  %v239_v33 = vrot.slane %v237_v31, 1  ;;  %v573_v41 = vld [vmem:[%s3595_s4] sm:$0xe]  ;;  %v462_v42 = vrot.slane %v3609_v12, 1  ;;  %v3456_v4 = vld [vmem:[%s4488_s1 + $0x98] sm:$0xff]  }
  0x16   : > { %3173 = vmatpush3.bf16.msra.mxu1 %v3436_v5  ;;  %3158 = vmatprep.subr.bf16.mxu0 %v3437_v6  ;;  %v218_v19 = vrot.slane %v216_v14, 1  ;;  %v227_v24 = vor.u32 %v225_v16, %v223_v20  ;;  %v574_v44 = vld [vmem:[%s3595_s4 + $0x4] sm:$0xf]  ;;  %v3657_v45 = vld [vmem:[%s3595_s4 + $0x8] sm:$0xf]  ;;  %v459_v54 = vrot.slane %v2773_v43, 1 }
  0x17   : > { %3174 = vmatprep.subr.bf16.mxu1 %v3438_v7  ;;  %v235_v32 = vor.u32 %v233_v27, %v231_v22  ;;  %v576_v46 = vld [vmem:[%s3595_s4 + $0xc] sm:$0xf]  ;;  %v243_v47 = vor.u32 %v241_v34, %v239_v33  ;;  %v2790_v49 = vcombine.low %v573_v41, %v574_v44  ;;  %v577_v51 = vld [vmem:[%s3595_s4 + $0x10] sm:$0xf]  ;;  %v578_v52 = vld [vmem:[%s3595_s4 + $0x14] sm:$0xf]  ;;  %v2810_v63 = vcombine.low %v574_v44, %v3657_v45 }
  0x18   : > { %v219_v23 = vor.u32 %v218_v19, %v214_v13  ;;  %v232_v29 = vsel %vm212_vm1, %v227_v24, %v231_v22  ;;  %v2791_v50 = vcombine.low %v3657_v45, %v576_v46  ;;  %v2792_v55 = vcombine.low %v577_v51, %v578_v52  ;;  %v3457_v9 = vld [vmem:[%s4488_s1 + $0xb8] sm:$0xff]   ;;  %v3458_v22 = vld [vmem:[%s4488_s1 + $0x90] sm:$0xff]   ;;  %v3464_v40 = vld [vmem:[%s4488_s1 + $0x80] sm:$0xff]  }
  0x19   : > { %3159 = vmatpush3.bf16.msra.mxu0 %v3437_v6  ;;  %v240_v37 = vsel %vm212_vm1, %v235_v32, %v239_v33  ;;  %v612_v56 = vshrl.u32 %v2790_v49, 16  ;;  %v615_v57 = vshll.u32 %v2790_v49, 16  ;;  %v461_v60 = vsel %vm458_vm2, %v459_v54, %v460_v36  ;;  %v579_v13 = vld [vmem:[%s3595_s4 + $0x18] sm:$0xf]  ;;  %v580_v16 = vld [vmem:[%s3595_s4 + $0x1c] sm:$0x1] }
  0x1a   : > { %3175 = vmatpush3.bf16.msra.mxu1 %v3438_v7  ;;  %3184 = vmatprep.subr.bf16.mxu0 %v3442_v18  ;;  %v224_v28 = vsel %vm212_vm1, %v219_v23, %v223_v20  ;;  %v620_v58 = vshrl.u32 %v2791_v50, 16  ;;  %v623_v59 = vshll.u32 %v2791_v50, 16  ;;  %v629_v61 = vshrl.u32 %v2792_v55, 16  ;;  %v3459_v23 = vld [vmem:[%s4488_s1 + $0xb0] sm:$0xff]   ;;  %v907_v32 = vld [vmem:[%s3595_s4 + $0x4] sm:$0xe] }
  0x1b   : > { %3200 = vmatprep.subr.bf16.mxu1 %v3443_v21  ;;  %3160 = vmatprep.mubr.msk.bf16.mxu0 %vm268_vm0, %v224_v28  ;;  %v632_v62 = vshll.u32 %v2792_v55, 16  ;;  %v614_v0 = vrot.slane %v612_v56, 1  ;;  %v617_v1 = vrot.slane %v615_v57, 2  ;;  %v464_v10 = vrot.slane %v3622_v25, 1  ;;  %v3462_v33 = vld [vmem:[%s4488_s1 + $0x88] sm:$0xff]  }
  0x1c   : > { %3161 = vmatmul.mubr.msk.bf16.vlgmr.msra.gmra.mxu0 %vm268_vm0, %v232_v29  ;;  %v622_v2 = vrot.slane %v620_v58, 1  ;;  %v625_v3 = vrot.slane %v623_v59, 2  ;;  %v631_v5 = vrot.slane %v629_v61, 1  ;;  %v3683_v14 = vcombine.low %v576_v46, %v577_v51  ;;  %v3726_v44 = vld [vmem:[%s3595_s4 + $0x1c] ss:$0 sps:$4 sm:$0xff]  }
  0x1d   : > { %3177 = vmatmul.mubr.msk.bf16.vlgmr.msra.gmra.mxu1 %vm268_vm0, %v3606_v11  ;;  %3185 = vmatpush3.bf16.msra.mxu0 %v3442_v18  ;;  %v634_v6 = vrot.slane %v632_v62, 2  ;;  %v618_v7 = vor.u32 %v617_v1, %v614_v0  ;;  %v2793_v18 = vcombine.low %v579_v13, %v580_v16  ;;  %v772_v19 = vshll.u32 %v2810_v63, 16  ;;  %v1034_v57 = vld [vmem:[%s3595_s4 + $0x4] sm:$0xe]  ;;  %v1035_v58 = vld [vmem:[%s3595_s4 + $0x8] sm:$0xf] }
  0x1e   : > { %3201 = vmatpush3.bf16.msra.mxu1 %v3443_v21  ;;  %3186 = vmatprep.subr.bf16.mxu0 %v3444_v26  ;;  %v626_v8 = vor.u32 %v625_v3, %v622_v2  ;;  %v463_v20 = vsel %vm458_vm2, %v460_v36, %v462_v42  ;;  %v777_v11 = vshll.u32 %v3683_v14, 16  ;;  %v770_v27 = vshrl.u32 %v2810_v63, 16  ;;  %v3749_v59 = vld [vmem:[%s3595_s4 + $0xc] sm:$0xf]  ;;  %v3754_v61 = vld [vmem:[%s3595_s4 + $0x10] sm:$0xf] }
  0x1f   : > { %3202 = vmatprep.subr.bf16.mxu1 %v3445_v30  ;;  %3164 = vmatprep.mubr.msk.bf16.mxu0 %vm268_vm0, %v240_v37  ;;  %v635_v15 = vor.u32 %v634_v6, %v631_v5  ;;  %v638_v24 = vshrl.u32 %v2793_v18, 16  ;;  %v641_v25 = vshll.u32 %v2793_v18, 16  ;;  %v774_v31 = vrot.slane %v772_v19, 1  ;;  %v1213_v63 = vld [vmem:[%s3595_s4 + $0x4] sm:$0xc]  ;;  %v3474_v18 = vld [vmem:[%s4488_s1 + $0xc8] sm:$0xff]  }
  0x20   : > { %3180 = vmatprep.mubr.msk.bf16.mxu1 %vm268_vm0, %v3609_v12  ;;  %v627_v17 = vsel %vm610_vm3, %v618_v7, %v626_v8  ;;  %v2830_v12 = vcombine.low %v907_v32, %v3657_v45  ;;  %v779_v36 = vrot.slane %v777_v11, 1  ;;  %v781_v37 = vshrl.u32 %v3683_v14, 16  ;;  %v3465_v45 = vld [vmem:[%s4488_s1 + $0xa0] sm:$0xff]   ;;  %v3758_v0 = vld [vmem:[%s3595_s4 + $0x14] sm:$0xf] }
  0x21   : > { %3187 = vmatpush3.bf16.msra.mxu0 %v3444_v26  ;;  %v636_v21 = vsel %vm610_vm3, %v626_v8, %v635_v15  ;;  %v465_v26 = vsel %vm458_vm2, %v462_v42, %v464_v10  ;;  %v640_v28 = vrot.slane %v638_v24, 1  ;;  %v643_v29 = vrot.slane %v641_v25, 2  ;;  %v3766_v3 = vld [vmem:[%s3595_s4 + $0x18] sm:$0xf]  ;;  %v3471_v8 = vld [vmem:[%s4488_s1 + $0xd0] sm:$0xff]   ;;  %v3475_v25 = vld [vmem:[%s4488_s1 + $0xe8] sm:$0xff]  }
  0x22   : > { %3203 = vmatpush3.bf16.msra.mxu1 %v3445_v30  ;;  %3188 = vmatprep.subr.bf16.mxu0 %v3448_v35  ;;  %v3707_v30 = vcombine.low %v578_v52, %v579_v13  ;;  %v775_v41 = vor.u32 %v774_v31, %v770_v27  ;;  %v920_v42 = vrot.slane %v2830_v12, 1  ;;  %v3469_v52 = vld [vmem:[%s4488_s1 + $0xd8] sm:$0xff]   ;;  %v783_v54 = vor.u32 %v781_v37, %v779_v36 }
  0x23   : > { %3204 = vmatprep.subr.bf16.mxu1 %v3449_v39  ;;  %v644_v34 = vor.u32 %v643_v29, %v640_v28  ;;  %v925_v56 = vrot.slane %v3726_v44, 1  ;;  %v2847_v62 = vcombine.low %v1034_v57, %v1035_v58  ;;  %v3763_v2 = vcombine.low %v3749_v59, %v3754_v61  ;;  %v3797_v11 = vld [vmem:[%s3595_s4 + $0x1c] sm:$0xf]  ;;  %v3476_v29 = vld [vmem:[%s4488_s1 + $0xc0] sm:$0xff]  }
  0x24   : > { %3165 = vmatmul.mubr.msk.bf16.gmra.mxu0 %vm268_vm0, %v243_v47  ;;  %v785_v43 = vshll.u32 %v3707_v30, 16  ;;  %v923_v46 = vrot.slane %v3707_v30, 1  ;;  %v789_v47 = vshrl.u32 %v3707_v30, 16  ;;  %v780_v49 = vsel %vm212_vm1, %v775_v41, %v779_v36  ;;  %v3477_v30 = vld [vmem:[%s4488_s1 + $0xe0] sm:$0xff]  }
  0x25   : > { %3181 = vmatmul.mubr.msk.bf16.gmra.mxu1 %vm268_vm0, %v3447_v38  ;;  %3189 = vmatpush3.bf16.msra.mxu0 %v3448_v35  ;;  %v3463_v35 = vld [vmem:[%s4488_s1 + $0xa8] sm:$0xff]   ;;  %v921_v38 = vrot.slane %v3683_v14, 1  ;;  %v1072_v5 = vshrl.u32 %v2847_v62, 16  ;;  %v1075_v6 = vshll.u32 %v2847_v62, 16  ;;  %v3771_v7 = vcombine.low %v3758_v0, %v3766_v3  ;;  %v3484_v62 = vld [vmem:[%s4488_s1 + $0x110] sm:$0xff]  }
  0x26   : > { %3205 = vmatpush3.bf16.msra.mxu1 %v3449_v39  ;;  %3190 = vmatprep.subr.bf16.mxu0 %v3450_v48  ;;  %v645_v39 = vsel %vm610_vm3, %v635_v15, %v644_v34  ;;  %v787_v51 = vrot.slane %v785_v43, 1  ;;  %v1083_v13 = vshll.u32 %v3763_v2, 16  ;;  %v926_v15 = vsel %vm458_vm2, %v923_v46, %v925_v56  ;;  %v1474_v43 = vld [vmem:[%s3595_s4 + $0x8] sm:$0xe] }
  0x27   : > { %3206 = vmatprep.subr.bf16.mxu1 %v3451_v53  ;;  %3192 = vmatprep.mubr.msk.bf16.mxu0 %vm268_vm0, %v461_v60  ;;  %v922_v50 = vsel %vm458_vm2, %v920_v42, %v921_v38  ;;  %v924_v1 = vsel %vm458_vm2, %v921_v38, %v923_v46  ;;  %v797_v16 = vshrl.u32 %v3726_v44, 16  ;;  %v1074_v19 = vrot.slane %v1072_v5, 1 }
  0x28   : > { %3208 = vmatprep.mubr.msk.bf16.mxu1 %vm268_vm0, %v627_v17  ;;  %v791_v60 = vor.u32 %v789_v47, %v787_v51  ;;  %v2867_v17 = vcombine.low %v1213_v63, %v1035_v58  ;;  %v1092_v24 = vshll.u32 %v3771_v7, 16  ;;  %v1228_v12 = vrot.slane %v3763_v2, 2  ;;  %v3485_v63 = vld [vmem:[%s4488_s1 + $0x130] sm:$0xff]  }
  0x29   : > { %3191 = vmatpush3.bf16.msra.mxu0 %v3450_v48  ;;  %v793_v48 = vshll.u32 %v3726_v44, 16  ;;  %v1230_v47 = vrot.slane %v3771_v7, 2  ;;  %v3482_v44 = vld [vmem:[%s4488_s1 + $0x118] sm:$0xff]   ;;  %v2885_v5 = vcombine.low %v3754_v61, %v3758_v0  ;;  %v1481_v61 = vld [vmem:[%s3595_s4 + $0x24] sm:$0x1]  ;;  %v3488_v0 = vld [vmem:[%s4488_s1 + $0x128] sm:$0xff]  }
  0x2a   : > { %3207 = vmatpush3.bf16.msra.mxu1 %v3451_v53  ;;  %3216 = vmatprep.subr.bf16.mxu0 %v3456_v4  ;;  %v3470_v53 = vld [vmem:[%s4488_s1 + $0xf8] sm:$0xff]  }
  0x2b   : > { %3232 = vmatprep.subr.bf16.mxu1 %v3457_v9  ;;  %v795_v55 = vrot.slane %v793_v48, 1 }
  0x2c   : > { %3193 = vmatmul.mubr.msk.bf16.vlgmr.msra.gmra.mxu0 %vm268_vm0, %v463_v20  ;;  %v1077_v20 = vrot.slane %v1075_v6, 2 }
  0x2d   : > { %3209 = vmatmul.mubr.msk.bf16.vlgmr.msra.gmra.mxu1 %vm268_vm0, %v636_v21  ;;  %3217 = vmatpush3.bf16.msra.mxu0 %v3456_v4  ;;  %v788_v4 = vsel %vm212_vm1, %v783_v54, %v787_v51  ;;  %v796_v14 = vsel %vm212_vm1, %v791_v60, %v795_v55  ;;  %v799_v27 = vor.u32 %v797_v16, %v795_v55  ;;  %v3841_v54 = vld [vmem:[%s3595_s4 + $0x18] sm:$0xff]  }
  0x2e   : > { %3233 = vmatpush3.bf16.msra.mxu1 %v3457_v9  ;;  %3218 = vmatprep.subr.bf16.mxu0 %v3458_v22  ;;  %v3472_v9 = vld [vmem:[%s4488_s1 + $0xf0] sm:$0xff]   ;;  %v1078_v31 = vor.u32 %v1077_v20, %v1074_v19  ;;  %v1231_v60 = vsel %vm1226_vm4, %v1228_v12, %v1230_v47 }
  0x2f   : > { %3234 = vmatprep.subr.bf16.mxu1 %v3459_v23  ;;  %3196 = vmatprep.mubr.msk.bf16.mxu0 %vm268_vm0, %v465_v26  ;;  %v1041_v26 = vld [vmem:[%s3595_s4 + $0x20] sm:$0x1] }
  0x30   : > { %3212 = vmatprep.mubr.msk.bf16.mxu1 %vm268_vm0, %v645_v39  ;;  %v3803_v28 = vcombine.low %v3797_v11, %v1041_v26 }
  0x31   : > { %3219 = vmatpush3.bf16.msra.mxu0 %v3458_v22  ;;  %v1085_v22 = vrot.slane %v1083_v13, 2 }
  0x32   : > { %3235 = vmatpush3.bf16.msra.mxu1 %v3459_v23  ;;  %3220 = vmatprep.subr.bf16.mxu0 %v3462_v33  ;;  %v1089_v23 = vshrl.u32 %v3771_v7, 16  ;;  %v1098_v36 = vshrl.u32 %v3803_v28, 16  ;;  %v1101_v37 = vshll.u32 %v3803_v28, 16  ;;  %v1529_v7 = vshrl.u32 %v3841_v54, 16 }
  0x33   : > { %3236 = vmatprep.subr.bf16.mxu1 %v3463_v35 }
  0x34   : > { %3197 = vmatmul.mubr.msk.bf16.gmra.mxu0 %vm268_vm0, %v464_v10  ;;  %v1080_v10 = vshrl.u32 %v3763_v2, 16  ;;  %v1100_v38 = vrot.slane %v1098_v36, 1  ;;  %v1103_v39 = vrot.slane %v1101_v37, 2 }
  0x35   : > { %3213 = vmatmul.mubr.msk.bf16.gmra.mxu1 %vm268_vm0, %v644_v34  ;;  %3221 = vmatpush3.bf16.msra.mxu0 %v3462_v33  ;;  %v1227_v33 = vrot.slane %v2867_v17, 2  ;;  %v1091_v34 = vrot.slane %v1089_v23, 1  ;;  %v1361_v17 = vrot.slane %v2885_v5, 1  ;;  %v1531_v23 = vrot.slane %v1529_v7, 1  ;;  %v3506_v5 = vld [vmem:[%s4488_s1 + $0x160] sm:$0xff]  }
  0x36   : > { %3237 = vmatpush3.bf16.msra.mxu1 %v3463_v35  ;;  %3222 = vmatprep.subr.bf16.mxu0 %v3464_v40  ;;  %v1082_v21 = vrot.slane %v1080_v10, 1  ;;  %v1094_v35 = vrot.slane %v1092_v24, 2  ;;  %v1104_v55 = vor.u32 %v1103_v39, %v1100_v38  ;;  %v3487_v10 = vld [vmem:[%s4488_s1 + $0x108] sm:$0xff]   ;;  %v1780_v39 = vld [vmem:[%s3595_s4 + $0x24] sm:$0x3] }
  0x37   : > { %3238 = vmatprep.subr.bf16.mxu1 %v3465_v45  ;;  %3224 = vmatprep.mubr.msk.bf16.mxu0 %vm268_vm0, %v780_v49  ;;  %v1229_v42 = vsel %vm1226_vm4, %v1227_v33, %v1228_v12  ;;  %v3483_v49 = vld [vmem:[%s4488_s1 + $0x138] sm:$0xff]  }
  0x38   : > { %3240 = vmatprep.mubr.msk.bf16.mxu1 %vm268_vm0, %v922_v50  ;;  %v1086_v32 = vor.u32 %v1085_v22, %v1082_v21  ;;  %v1095_v46 = vor.u32 %v1094_v35, %v1091_v34  ;;  %v3498_v34 = vld [vmem:[%s4488_s1 + $0x178] sm:$0xff]  }
  0x39   : > { %3223 = vmatpush3.bf16.msra.mxu0 %v3464_v40  ;;  %v3815_v40 = vld [vmem:[%s3595_s4 + $0x10] sm:$0xff]  }
  0x3a   : > { %3239 = vmatpush3.bf16.msra.mxu1 %v3465_v45  ;;  %3248 = vmatprep.subr.bf16.mxu0 %v3469_v52  ;;  %v1087_v41 = vsel %vm610_vm3, %v1078_v31, %v1086_v32  ;;  %v3825_v45 = vld [vmem:[%s3595_s4 + $0xc] sm:$0xf]  ;;  %v1520_v50 = vshrl.u32 %v3815_v40, 16  ;;  %v1523_v51 = vshll.u32 %v3815_v40, 16  ;;  %v1096_v58 = vsel %vm610_vm3, %v1086_v32, %v1095_v46  ;;  %v3497_v31 = vld [vmem:[%s4488_s1 + $0x158] sm:$0xff]  }
  0x3b   : > { %3264 = vmatprep.subr.bf16.mxu1 %v3470_v53  ;;  %v2904_v48 = vcombine.low %v1474_v43, %v3825_v45  ;;  %v3499_v43 = vld [vmem:[%s4488_s1 + $0x150] sm:$0xff]  }
  0x3c   : > { %3225 = vmatmul.mubr.msk.bf16.vlgmr.msra.gmra.mxu0 %vm268_vm0, %v788_v4  ;;  %v1525_v2 = vrot.slane %v1523_v51, 2 }
  0x3d   : > { %3241 = vmatmul.mubr.msk.bf16.vlgmr.msra.gmra.mxu1 %vm268_vm0, %v924_v1  ;;  %3249 = vmatpush3.bf16.msra.mxu0 %v3469_v52  ;;  %v1341_v52 = vld [vmem:[%s3595_s4 + $0x8] sm:$0xe]  ;;  %v1515_v57 = vshll.u32 %v2904_v48, 16  ;;  %v1522_v1 = vrot.slane %v1520_v50, 1 }
  0x3e   : > { %3265 = vmatpush3.bf16.msra.mxu1 %v3470_v53  ;;  %3250 = vmatprep.subr.bf16.mxu0 %v3471_v8  ;;  %v1512_v53 = vshrl.u32 %v2904_v48, 16  ;;  %v2884_v4 = vcombine.low %v1341_v52, %v3749_v59  ;;  %v1532_v59 = vshll.u32 %v3841_v54, 16 }
  0x3f   : > { %3266 = vmatprep.subr.bf16.mxu1 %v3472_v9  ;;  %3228 = vmatprep.mubr.msk.bf16.mxu0 %vm268_vm0, %v796_v14  ;;  %v1517_v13 = vrot.slane %v1515_v57, 2  ;;  %v1480_v14 = vld [vmem:[%s3595_s4 + $0x20] sm:$0xf]  ;;  %v1526_v20 = vor.u32 %v1525_v2, %v1522_v1  ;;  %v3942_v1 = vld [vmem:[%s3595_s4 + $0x10] sm:$0xf]  ;;  %v1806_v2 = vrot.slane %v1529_v7, 2 }
  0x40   : > { %3244 = vmatprep.mubr.msk.bf16.mxu1 %vm268_vm0, %v926_v15  ;;  %v1514_v6 = vrot.slane %v1512_v53, 1  ;;  %v3873_v15 = vcombine.low %v1480_v14, %v1481_v61  ;;  %v1360_v16 = vrot.slane %v2884_v4, 1  ;;  %v1534_v24 = vrot.slane %v1532_v59, 2  ;;  %v3508_v61 = vld [vmem:[%s4488_s1 + $0x198] sm:$0xff]  }
  0x41   : > { %3251 = vmatpush3.bf16.msra.mxu0 %v3471_v8  ;;  %v1105_v8 = vsel %vm610_vm3, %v1095_v46, %v1104_v55  ;;  %v2941_v48 = vcombine.low %v1480_v14, %v1780_v39  ;;  %v1803_v53 = vrot.slane %v1523_v51, 3  ;;  %v1667_v51 = vrot.slane %v3815_v40, 2  ;;  %v3505_v40 = vld [vmem:[%s4488_s1 + $0x140] sm:$0xff]  }
  0x42   : > { %3267 = vmatpush3.bf16.msra.mxu1 %v3472_v9  ;;  %3252 = vmatprep.subr.bf16.mxu0 %v3474_v18  ;;  %v1518_v19 = vor.u32 %v1517_v13, %v1514_v6  ;;  %v1538_v21 = vshrl.u32 %v3873_v15, 16  ;;  %v1541_v22 = vshll.u32 %v3873_v15, 16  ;;  %v1535_v12 = vor.u32 %v1534_v24, %v1531_v23  ;;  %v3960_v13 = vld [vmem:[%s3595_s4 + $0x14] sm:$0xff]   ;;  %v3979_v23 = vld [vmem:[%s3595_s4 + $0x24] sm:$0xf] }
  0x43   : > { %3268 = vmatprep.subr.bf16.mxu1 %v3475_v25  ;;  %v1811_v57 = vshrl.u32 %v2941_v48, 16  ;;  %v1807_v4 = vrot.slane %v1532_v59, 3  ;;  %v1669_v59 = vrot.slane %v3841_v54, 2 }
  0x44   : > { %3229 = vmatmul.mubr.msk.bf16.gmra.mxu0 %vm268_vm0, %v799_v27  ;;  %v3893_v27 = vld [vmem:[%s3595_s4 + $0x20] ss:$0 sps:$4 sm:$0xff]   ;;  %v1540_v32 = vrot.slane %v1538_v21, 1  ;;  %v1543_v33 = vrot.slane %v1541_v22, 2  ;;  %v1972_v21 = vshrl.u32 %v3960_v13, 16  ;;  %v1975_v22 = vshll.u32 %v3960_v13, 16 }
  0x45   : > { %3245 = vmatmul.mubr.msk.bf16.gmra.mxu1 %vm268_vm0, %v925_v56  ;;  %3253 = vmatpush3.bf16.msra.mxu0 %v3474_v18  ;;  %v1232_v56 = vrot.slane %v3803_v28, 2  ;;  %v2886_v18 = vcombine.low %v3766_v3, %v3797_v11  ;;  %v3489_v3 = vld [vmem:[%s4488_s1 + $0x100] sm:$0xff]   ;;  %v1365_v35 = vrot.slane %v3893_v27, 1  ;;  %v1813_v6 = vrot.slane %v1811_v57, 2 }
  0x46   : > { %3269 = vmatpush3.bf16.msra.mxu1 %v3475_v25  ;;  %3254 = vmatprep.subr.bf16.mxu0 %v3476_v29  ;;  %v1653_v25 = vld [vmem:[%s3595_s4 + $0x8] sm:$0xc]  ;;  %v3490_v11 = vld [vmem:[%s4488_s1 + $0x120] sm:$0xff]   ;;  %v1544_v38 = vor.u32 %v1543_v33, %v1540_v32  ;;  %v1808_v14 = vor.u32 %v1807_v4, %v1806_v2  ;;  %v1977_v32 = vrot.slane %v1975_v22, 2 }
  0x47   : > { %3270 = vmatprep.subr.bf16.mxu1 %v3477_v30  ;;  %3256 = vmatprep.mubr.msk.bf16.mxu0 %vm268_vm0, %v1087_v41  ;;  %v1233_v9 = vsel %vm1226_vm4, %v1230_v47, %v1232_v56  ;;  %v1363_v26 = vrot.slane %v2886_v18, 1  ;;  %v3896_v28 = vcombine.low %v1653_v25, %v3825_v45  ;;  %v3500_v45 = vld [vmem:[%s4488_s1 + $0x170] sm:$0xff]   ;;  %v1802_v47 = vrot.slane %v1520_v50, 2  ;;  %v3503_v50 = vld [vmem:[%s4488_s1 + $0x148] sm:$0xff]  }
  0x48   : > { %3272 = vmatprep.mubr.msk.bf16.mxu1 %vm268_vm0, %v1229_v42  ;;  %v1536_v42 = vsel %vm610_vm3, %v1526_v20, %v1535_v12  ;;  %v1933_v25 = vld [vmem:[%s3595_s4 + $0x28] sm:$0x1] }
  0x49   : > { %3255 = vmatpush3.bf16.msra.mxu0 %v3476_v29  ;;  %v1362_v29 = vsel %vm458_vm2, %v1360_v16, %v1361_v17  ;;  %v1795_v36 = vshrl.u32 %v3896_v28, 16  ;;  %v1798_v37 = vshll.u32 %v3896_v28, 16  ;;  %v1364_v41 = vsel %vm458_vm2, %v1361_v17, %v1363_v26  ;;  %v2105_v17 = vld [vmem:[%s3595_s4 + $0xc] sm:$0xc] }
  0x4a   : > { %3271 = vmatpush3.bf16.msra.mxu1 %v3477_v30  ;;  %3280 = vmatprep.subr.bf16.mxu0 %v3482_v44  ;;  %v1527_v30 = vsel %vm610_vm3, %v1518_v19, %v1526_v20  ;;  %v1366_v46 = vsel %vm458_vm2, %v1363_v26, %v1365_v35  ;;  %v1671_v16 = vrot.slane %v3873_v15, 2  ;;  %v3974_v20 = vld [vmem:[%s3595_s4 + $0x1c] sm:$0xff]   ;;  %v1670_v15 = vsel %vm1226_vm4, %v1667_v51, %v1669_v59 }
  0x4b   : > { %3296 = vmatprep.subr.bf16.mxu1 %v3483_v49  ;;  %v1800_v52 = vrot.slane %v1798_v37, 3  ;;  %v4002_v33 = vcombine.low %v3979_v23, %v1933_v25  ;;  %v3529_v25 = vld [vmem:[%s4488_s1 + $0x1e0] sm:$0xff]  }
  0x4c   : > { %3257 = vmatmul.mubr.msk.bf16.vlgmr.msra.gmra.mxu0 %vm268_vm0, %v1096_v58  ;;  %v1814_v58 = vshll.u32 %v2941_v48, 16  ;;  %v1672_v26 = vsel %vm1226_vm4, %v1669_v59, %v1671_v16  ;;  %v3516_v48 = vld [vmem:[%s4488_s1 + $0x1a0] sm:$0xff]  }
  0x4d   : > { %3273 = vmatmul.mubr.msk.bf16.vlgmr.msra.gmra.mxu1 %vm268_vm0, %v1231_v60  ;;  %3281 = vmatpush3.bf16.msra.mxu0 %v3482_v44  ;;  %v1545_v44 = vsel %vm610_vm3, %v1535_v12, %v1544_v38  ;;  %v1981_v12 = vshrl.u32 %v3974_v20, 16  ;;  %v2123_v57 = vrot.slane %v4002_v33, 2 }
  0x4e   : > { %3297 = vmatpush3.bf16.msra.mxu1 %v3483_v49  ;;  %3282 = vmatprep.subr.bf16.mxu0 %v3484_v62  ;;  %v1797_v49 = vrot.slane %v1795_v36, 2  ;;  %v3514_v36 = vld [vmem:[%s4488_s1 + $0x1a8] sm:$0xff]  }
  0x4f   : > { %3298 = vmatprep.subr.bf16.mxu1 %v3485_v63  ;;  %3260 = vmatprep.mubr.msk.bf16.mxu0 %vm268_vm0, %v1105_v8  ;;  %v1816_v8 = vrot.slane %v1814_v58, 3 }
  0x50   : > { %3276 = vmatprep.mubr.msk.bf16.mxu1 %vm268_vm0, %v1233_v9  ;;  %v1801_v60 = vor.u32 %v1800_v52, %v1797_v49 }
  0x51   : > { %3283 = vmatpush3.bf16.msra.mxu0 %v3484_v62  ;;  %v1804_v62 = vor.u32 %v1803_v53, %v1802_v47  ;;  %v1817_v54 = vor.u32 %v1816_v8, %v1813_v6  ;;  %v3515_v47 = vld [vmem:[%s4488_s1 + $0x180] sm:$0xff]   ;;  %v3524_v6 = vld [vmem:[%s4488_s1 + $0x1f0] sm:$0xff]  }
  0x52   : > { %3299 = vmatpush3.bf16.msra.mxu1 %v3485_v63  ;;  %3284 = vmatprep.subr.bf16.mxu0 %v3487_v10  ;;  %v1926_v63 = vld [vmem:[%s3595_s4 + $0xc] sm:$0xe] }
  0x53   : > { %3300 = vmatprep.subr.bf16.mxu1 %v3488_v0  ;;  %v2958_v9 = vcombine.low %v1926_v63, %v3942_v1  ;;  %v1809_v24 = vsel %vm1793_vm5, %v1804_v62, %v1808_v14  ;;  %v1818_v27 = vsel %vm1793_vm5, %v1808_v14, %v1817_v54  ;;  %v2253_v14 = vrot.slane %v1972_v21, 2 }
  0x54   : > { %3261 = vmatmul.mubr.msk.bf16.gmra.mxu0 %vm268_vm0, %v1104_v55  ;;  %v3504_v55 = vld [vmem:[%s4488_s1 + $0x168] sm:$0xff]  }
  0x55   : > { %3277 = vmatmul.mubr.msk.bf16.gmra.mxu1 %vm268_vm0, %v1232_v56  ;;  %3285 = vmatpush3.bf16.msra.mxu0 %v3487_v10  ;;  %v1666_v56 = vrot.slane %v3896_v28, 2  ;;  %v1805_v10 = vsel %vm1793_vm5, %v1801_v60, %v1804_v62  ;;  %v1964_v18 = vshrl.u32 %v2958_v9, 16  ;;  %v1967_v19 = vshll.u32 %v2958_v9, 16  ;;  %v2232_v62 = vld [vmem:[%s3595_s4 + $0x28] sm:$0x3] }
  0x56   : > { %3301 = vmatpush3.bf16.msra.mxu1 %v3488_v0  ;;  %3286 = vmatprep.subr.bf16.mxu0 %v3489_v3  ;;  %v3509_v0 = vld [vmem:[%s4488_s1 + $0x1b8] sm:$0xff]   ;;  %v2995_v8 = vcombine.low %v3979_v23, %v2232_v62  ;;  %v2257_v23 = vrot.slane %v1981_v12, 2 }
  0x57   : > { %3302 = vmatprep.subr.bf16.mxu1 %v3490_v11  ;;  %3288 = vmatprep.mubr.msk.bf16.mxu0 %vm268_vm0, %v1362_v29  ;;  %v1668_v7 = vsel %vm1226_vm4, %v1666_v56, %v1667_v51  ;;  %v1966_v28 = vrot.slane %v1964_v18, 1  ;;  %v3993_v29 = vcombine.low %v2105_v17, %v3942_v1  ;;  %v3521_v56 = vld [vmem:[%s4488_s1 + $0x1d8] sm:$0xff]   ;;  %v3527_v17 = vld [vmem:[%s4488_s1 + $0x1e8] sm:$0xff]  }
  0x58   : > { %3304 = vmatprep.mubr.msk.bf16.mxu1 %vm268_vm0, %v1527_v30  ;;  %v1969_v30 = vrot.slane %v1967_v19, 2  ;;  %v3522_v51 = vld [vmem:[%s4488_s1 + $0x1f8] sm:$0xff]   ;;  %v2265_v18 = vshll.u32 %v2995_v8, 16 }
  0x59   : > { %3287 = vmatpush3.bf16.msra.mxu0 %v3489_v3  ;;  %v3510_v3 = vld [vmem:[%s4488_s1 + $0x190] sm:$0xff]   ;;  %v2118_v37 = vrot.slane %v3993_v29, 2  ;;  %v2246_v58 = vshrl.u32 %v3993_v29, 16  ;;  %v2249_v60 = vshll.u32 %v3993_v29, 16 }
  0x5a   : > { %3303 = vmatpush3.bf16.msra.mxu1 %v3490_v11  ;;  %3312 = vmatprep.subr.bf16.mxu0 %v3497_v31  ;;  %v3511_v11 = vld [vmem:[%s4488_s1 + $0x1b0] sm:$0xff]   ;;  %v1970_v39 = vor.u32 %v1969_v30, %v1966_v28  ;;  %v2396_v30 = vrot.slane %v2995_v8, 3 }
  0x5b   : > { %3328 = vmatprep.subr.bf16.mxu1 %v3498_v34 }
  0x5c   : > { %3289 = vmatmul.mubr.msk.bf16.vlgmr.msra.gmra.mxu0 %vm268_vm0, %v1364_v41 }
  0x5d   : > { %3305 = vmatmul.mubr.msk.bf16.vlgmr.msra.gmra.mxu1 %vm268_vm0, %v1536_v42  ;;  %3313 = vmatpush3.bf16.msra.mxu0 %v3497_v31  ;;  %v1974_v31 = vrot.slane %v1972_v21, 1  ;;  %v1990_v42 = vshrl.u32 %v4002_v33, 16 }
  0x5e   : > { %3329 = vmatpush3.bf16.msra.mxu1 %v3498_v34  ;;  %3314 = vmatprep.subr.bf16.mxu0 %v3499_v43  ;;  %v1984_v34 = vshll.u32 %v3974_v20, 16 }
  0x5f   : > { %3330 = vmatprep.subr.bf16.mxu1 %v3500_v45  ;;  %3292 = vmatprep.mubr.msk.bf16.mxu0 %vm268_vm0, %v1366_v46  ;;  %v1978_v41 = vor.u32 %v1977_v32, %v1974_v31  ;;  %v1992_v52 = vrot.slane %v1990_v42, 1 }
  0x60   : > { %3308 = vmatprep.mubr.msk.bf16.mxu1 %vm268_vm0, %v1545_v44  ;;  %v1986_v46 = vrot.slane %v1984_v34, 2 }
  0x61   : > { %3315 = vmatpush3.bf16.msra.mxu0 %v3499_v43  ;;  %v1993_v43 = vshll.u32 %v4002_v33, 16  ;;  %v1979_v44 = vsel %vm610_vm3, %v1970_v39, %v1978_v41 }
  0x62   : > { %3331 = vmatpush3.bf16.msra.mxu1 %v3500_v45  ;;  %3316 = vmatprep.subr.bf16.mxu0 %v3503_v50  ;;  %v1983_v45 = vrot.slane %v1981_v12, 1 }
  0x63   : > { %3332 = vmatprep.subr.bf16.mxu1 %v3504_v55  ;;  %v1995_v53 = vrot.slane %v1993_v43, 2 }
  0x64   : > { %3293 = vmatmul.mubr.msk.bf16.gmra.mxu0 %vm268_vm0, %v1365_v35  ;;  %v3513_v35 = vld [vmem:[%s4488_s1 + $0x188] sm:$0xff]  }
  0x65   : > { %3309 = vmatmul.mubr.msk.bf16.gmra.mxu1 %vm268_vm0, %v1544_v38  ;;  %3317 = vmatpush3.bf16.msra.mxu0 %v3503_v50  ;;  %v2119_v38 = vrot.slane %v3960_v13, 2  ;;  %v1987_v50 = vor.u32 %v1986_v46, %v1983_v45  ;;  %v1996_v63 = vor.u32 %v1995_v53, %v1992_v52 }
  0x66   : > { %3333 = vmatpush3.bf16.msra.mxu1 %v3504_v55  ;;  %3318 = vmatprep.subr.bf16.mxu0 %v3505_v40  ;;  %v2121_v55 = vrot.slane %v3974_v20, 2 }
  0x67   : > { %3334 = vmatprep.subr.bf16.mxu1 %v3506_v5  ;;  %3320 = vmatprep.mubr.msk.bf16.mxu0 %vm268_vm0, %v1668_v7  ;;  %v2120_v49 = vsel %vm1226_vm4, %v2118_v37, %v2119_v38  ;;  %v1988_v2 = vsel %vm610_vm3, %v1978_v41, %v1987_v50  ;;  %v2248_v7 = vrot.slane %v2246_v58, 2  ;;  %v1997_v59 = vsel %vm610_vm3, %v1987_v50, %v1996_v63 }
  0x68   : > { %3336 = vmatprep.mubr.msk.bf16.mxu1 %vm268_vm0, %v1805_v10  ;;  %v2122_v4 = vsel %vm1226_vm4, %v2119_v38, %v2121_v55  ;;  %v2124_v9 = vsel %vm1226_vm4, %v2121_v55, %v2123_v57  ;;  %v2251_v10 = vrot.slane %v2249_v60, 3 }
  0x69   : > { %3319 = vmatpush3.bf16.msra.mxu0 %v3505_v40  ;;  %v2377_v40 = vld [vmem:[%s3595_s4 + $0xc] sm:$0x8] }
  0x6a   : > { %3335 = vmatpush3.bf16.msra.mxu1 %v3506_v5  ;;  %3344 = vmatprep.subr.bf16.mxu0 %v3508_v61  ;;  %v3523_v5 = vld [vmem:[%s4488_s1 + $0x1d0] sm:$0xff]   ;;  %v2252_v19 = vor.u32 %v2251_v10, %v2248_v7 }
  0x6b   : > { %3360 = vmatprep.subr.bf16.mxu1 %v3509_v0 }
  0x6c   : > { %3321 = vmatmul.mubr.msk.bf16.vlgmr.msra.gmra.mxu0 %vm268_vm0, %v1670_v15  ;;  %v2258_v15 = vrot.slane %v1984_v34, 3 }
  0x6d   : > { %3337 = vmatmul.mubr.msk.bf16.vlgmr.msra.gmra.mxu1 %vm268_vm0, %v1809_v24  ;;  %3345 = vmatpush3.bf16.msra.mxu0 %v3508_v61  ;;  %v2254_v61 = vrot.slane %v1975_v22, 3  ;;  %v2392_v22 = vrot.slane %v3960_v13, 3  ;;  %v3528_v24 = vld [vmem:[%s4488_s1 + $0x1c0] sm:$0xff]  }
  0x6e   : > { %3361 = vmatpush3.bf16.msra.mxu1 %v3509_v0  ;;  %3346 = vmatprep.subr.bf16.mxu0 %v3510_v3  ;;  %v3012_v0 = vcombine.low %v2377_v40, %v3942_v1  ;;  %v2259_v28 = vor.u32 %v2258_v15, %v2257_v23 }
  0x6f   : > { %3362 = vmatprep.subr.bf16.mxu1 %v3511_v11  ;;  %3324 = vmatprep.mubr.msk.bf16.mxu0 %vm268_vm0, %v1672_v26  ;;  %v2255_v1 = vor.u32 %v2254_v61, %v2253_v14 }
  0x70   : > { %3340 = vmatprep.mubr.msk.bf16.mxu1 %vm268_vm0, %v1818_v27  ;;  %v2391_v21 = vrot.slane %v3012_v0, 3  ;;  %v2394_v27 = vrot.slane %v3974_v20, 3 }
  0x71   : > { %3347 = vmatpush3.bf16.msra.mxu0 %v3510_v3  ;;  %v2267_v3 = vrot.slane %v2265_v18, 3  ;;  %v2260_v32 = vsel %vm1793_vm5, %v2255_v1, %v2259_v28 }
  0x72   : > { %3363 = vmatpush3.bf16.msra.mxu1 %v3511_v11  ;;  %3348 = vmatprep.subr.bf16.mxu0 %v3513_v35  ;;  %v2256_v11 = vsel %vm1793_vm5, %v2252_v19, %v2255_v1  ;;  %v2393_v26 = vsel %vm2390_vm6, %v2391_v21, %v2392_v22  ;;  %v2395_v31 = vsel %vm2390_vm6, %v2392_v22, %v2394_v27 }
  0x73   : > { %3364 = vmatprep.subr.bf16.mxu1 %v3514_v36  ;;  %v2397_v12 = vsel %vm2390_vm6, %v2394_v27, %v2396_v30 }
  0x74   : > { %3325 = vmatmul.mubr.msk.bf16.gmra.mxu0 %vm268_vm0, %v1671_v16  ;;  %v3526_v16 = vld [vmem:[%s4488_s1 + $0x1c8] sm:$0xff]  }
  0x75   : > { %3341 = vmatmul.mubr.msk.bf16.gmra.mxu1 %vm268_vm0, %v1817_v54  ;;  %3349 = vmatpush3.bf16.msra.mxu0 %v3513_v35  ;;  %v2262_v54 = vshrl.u32 %v2995_v8, 16 }
  0x76   : > { %3365 = vmatpush3.bf16.msra.mxu1 %v3514_v36  ;;  %3350 = vmatprep.subr.bf16.mxu0 %v3515_v47 }
  0x77   : > { %3366 = vmatprep.subr.bf16.mxu1 %v3516_v48  ;;  %3352 = vmatprep.mubr.msk.bf16.mxu0 %vm268_vm0, %v1979_v44  ;;  %v2264_v13 = vrot.slane %v2262_v54, 2 }
  0x78   : > { %3368 = vmatprep.mubr.msk.bf16.mxu1 %vm268_vm0, %v2120_v49 }
  0x79   : > { %3351 = vmatpush3.bf16.msra.mxu0 %v3515_v47  ;;  %v2268_v29 = vor.u32 %v2267_v3, %v2264_v13 }
  0x7a   : > { %3367 = vmatpush3.bf16.msra.mxu1 %v3516_v48  ;;  %3376 = vmatprep.subr.bf16.mxu0 %v3521_v56 }
  0x7b   : > { %3392 = vmatprep.subr.bf16.mxu1 %v3522_v51  ;;  %v2269_v33 = vsel %vm1793_vm5, %v2259_v28, %v2268_v29 }
  0x7c   : > { %3353 = vmatmul.mubr.msk.bf16.vlgmr.msra.gmra.mxu0 %vm268_vm0, %v1988_v2 }
  0x7d   : > { %3369 = vmatmul.mubr.msk.bf16.vlgmr.msra.gmra.mxu1 %vm268_vm0, %v2122_v4  ;;  %3377 = vmatpush3.bf16.msra.mxu0 %v3521_v56 }
  0x7e   : > { %3393 = vmatpush3.bf16.msra.mxu1 %v3522_v51  ;;  %3378 = vmatprep.subr.bf16.mxu0 %v3523_v5 }
  0x7f   : > { %3394 = vmatprep.subr.bf16.mxu1 %v3524_v6  ;;  %3356 = vmatprep.mubr.msk.bf16.mxu0 %vm268_vm0, %v1997_v59 }
  0x80   : > { %3372 = vmatprep.mubr.msk.bf16.mxu1 %vm268_vm0, %v2124_v9 }
  0x81   : > { %3379 = vmatpush3.bf16.msra.mxu0 %v3523_v5 }
  0x82   : > { %3395 = vmatpush3.bf16.msra.mxu1 %v3524_v6  ;;  %3380 = vmatprep.subr.bf16.mxu0 %v3526_v16 }
  0x83   : > { %3396 = vmatprep.subr.bf16.mxu1 %v3527_v17 }
  0x84   : > { %3357 = vmatmul.mubr.msk.bf16.gmra.mxu0 %vm268_vm0, %v1996_v63 }
  0x85   : > { %3373 = vmatmul.mubr.msk.bf16.gmra.mxu1 %vm268_vm0, %v2123_v57  ;;  %3381 = vmatpush3.bf16.msra.mxu0 %v3526_v16 }
  0x86   : > { %3397 = vmatpush3.bf16.msra.mxu1 %v3527_v17  ;;  %3382 = vmatprep.subr.bf16.mxu0 %v3528_v24 }
  0x87   : > { %3398 = vmatprep.subr.bf16.mxu1 %v3529_v25  ;;  %3384 = vmatprep.mubr.msk.bf16.mxu0 %vm268_vm0, %v2256_v11 }
  0x88   : > { %3400 = vmatprep.mubr.msk.bf16.mxu1 %vm268_vm0, %v2393_v26 }
  0x89   : > { %3383 = vmatpush3.bf16.msra.mxu0 %v3528_v24 }
  0x8a   : > { %3399 = vmatpush3.bf16.msra.mxu1 %v3529_v25 }
  0x8c   : > { %3385 = vmatmul.mubr.msk.bf16.vlgmr.msra.gmra.mxu0 %vm268_vm0, %v2260_v32 }
  0x8d   : > { %3401 = vmatmul.mubr.msk.bf16.vlgmr.msra.gmra.mxu1 %vm268_vm0, %v2395_v31  ;;  %3388 = vmatprep.mubr.msk.bf16.mxu0 %vm268_vm0, %v2269_v33 }
  0x8e   : > { %3404 = vmatprep.mubr.msk.bf16.mxu1 %vm268_vm0, %v2397_v12 }
  0x94   : > { %3389 = vmatmul.mubr.msk.bf16.gmra.mxu0 %vm268_vm0, %v2268_v29 }
  0x95   : > { %3405 = vmatmul.mubr.msk.bf16.gmra.mxu1 %vm268_vm0, %v2396_v30 }
  0xdc   : > { %v3162_v20 = vpop.f32.mrf.mxu0 }
  0xdd   : > { %v3178_v34 = vpop.f32.mrf.mxu1 }
  0xde   : > { %v424_v35 = vadd.f32 %v3178_v34, %v3162_v20  ;;  %v315_v36 = vpop.f32.mrf.mxu0 }
  0xdf   : > { %v415_v37 = vpop.f32.mrf.mxu1 }
  0xe0   : > { %v416_v38 = vadd.f32 %v415_v37, %v315_v36  ;;  %v3163_v39 = vpop.f32.mrf.mxu0 }
  0xe1   : > { %v3179_v41 = vpop.f32.mrf.mxu1 }
  0xe2   : > { %v427_v42 = vadd.f32 %v3179_v41, %v3163_v39  ;;  %v318_v43 = vpop.f32.mrf.mxu0 }
  0xe3   : > { %v418_v45 = vpop.f32.mrf.mxu1 }
  0xe4   : > { %v419_v46 = vadd.f32 %v418_v45, %v318_v43  ;;  %v3166_v47 = vpop.f32.mrf.mxu0 }
  0xe5   : > { %v3182_v48 = vpop.f32.mrf.mxu1 }
  0xe6   : > { %v440_v44 = vadd.f32 %v3182_v48, %v3166_v47  ;;  %v331_v49 = vpop.f32.mrf.mxu0 }
  0xe7   : > { %v431_v52 = vpop.f32.mrf.mxu1 }
  0xe8   : > { %v432_v53 = vadd.f32 %v431_v52, %v331_v49  ;;  %v3167_v50 = vpop.f32.mrf.mxu0 }
  0xe9   : > { %v3183_v55 = vpop.f32.mrf.mxu1 }
  0xea   : > { %v334_v56 = vpop.f32.mrf.mxu0 }
  0xeb   : > { %v434_v51 = vpop.f32.mrf.mxu1 }
  0xec   : > { %v435_v57 = vadd.f32 %v434_v51, %v334_v56  ;;  %v3194_v58 = vpop.f32.mrf.mxu0 }
  0xed   : > { %v3210_v60 = vpop.f32.mrf.mxu1  ;;  %v568_v62 = vadd.f32 %v3194_v58, %v424_v35 }
  0xee   : > { %v536_v63 = vpop.f32.mrf.mxu0 }
  0xef   : > { %v716_v2 = vpop.f32.mrf.mxu1  ;;  %v748_v4 = vadd.f32 %v3210_v60, %v568_v62  ;;  %v566_v40 = vadd.f32 %v536_v63, %v416_v38 }
  0xf0   : > { %v3195_v5 = vpop.f32.mrf.mxu0 }
  0xf1   : > { %v3211_v6 = vpop.f32.mrf.mxu1  ;;  %v746_v8 = vadd.f32 %v716_v2, %v566_v40  ;;  %v569_v9 = vadd.f32 %v3195_v5, %v427_v42 }
  0xf2   : > { %v539_v7 = vpop.f32.mrf.mxu0 }
  0xf3   : > { %v719_v10 = vpop.f32.mrf.mxu1  ;;  %v749_v59 = vadd.f32 %v3211_v6, %v569_v9  ;;  %v567_v14 = vadd.f32 %v539_v7, %v419_v46  ;;  %v2518_v9 = vlaneseq }
  0xf4   : > { %v3198_v61 = vpop.f32.mrf.mxu0 }
  0xf5   : > { %v3214_v0 = vpop.f32.mrf.mxu1  ;;  %v4100_v16 = vadd.f32 %v719_v10, %v567_v14  ;;  %v572_v17 = vadd.f32 %v3198_v61, %v440_v44  ;;  %v4158_v61 = vshrl.u32 %v2518_v9, 7 }
  0xf6   : > { %v552_v54 = vpop.f32.mrf.mxu0 }
  0xf7   : > { %v732_v18 = vpop.f32.mrf.mxu1  ;;  %v752_v19 = vadd.f32 %v3214_v0, %v572_v17  ;;  %v570_v1 = vadd.f32 %v552_v54, %v432_v53 }
  0xf8   : > { %v3199_v21 = vpop.f32.mrf.mxu0 }
  0xf9   : > { %v3215_v22 = vpop.f32.mrf.mxu1  ;;  %v750_v23 = vadd.f32 %v732_v18, %v570_v1 }
  0xfa   : > { %v555_v15 = vpop.f32.mrf.mxu0 }
  0xfb   : > { %v735_v24 = vpop.f32.mrf.mxu1  ;;  %v571_v25 = vadd.f32 %v555_v15, %v435_v57 }
  0xfc   : > { %v3226_v13 = vpop.f32.mrf.mxu0 }
  0xfd   : > { %v3242_v3 = vpop.f32.mrf.mxu1  ;;  %v4102_v11 = vadd.f32 %v735_v24, %v571_v25  ;;  %v902_v26 = vadd.f32 %v3226_v13, %v748_v4 }
  0xfe   : > { %v870_v27 = vpop.f32.mrf.mxu0 }
  0xff   : > { %v997_v28 = vpop.f32.mrf.mxu1  ;;  %v4104_v29 = vadd.f32 %v3242_v3, %v902_v26  ;;  %v900_v30 = vadd.f32 %v870_v27, %v746_v8 }
 0x100   : > { %v3227_v31 = vpop.f32.mrf.mxu0 }
 0x101   : > { %v3243_v32 = vpop.f32.mrf.mxu1  ;;  %v4106_v33 = vadd.f32 %v997_v28, %v900_v30  ;;  %v903_v12 = vadd.f32 %v3227_v31, %v749_v59  ;;  %v4189_v30 = vmul.u32.u64.low 3817748708, %v4158_v61  ;;  %v4190_v31 = vmul.u32.u64.high 3817748708, %v4158_v61, %v4189_v30 }
 0x102   : > { %v4108_v20 = vpop.f32.mrf.mxu0 }
 0x103   : > { %v4110_v34 = vpop.f32.mrf.mxu1  ;;  %v4112_v35 = vadd.f32 %v3243_v32, %v903_v12  ;;  %v4193_v32 = vadd.s32 24, %v4158_v61  ;;  %v901_v9 = vadd.f32 %v4108_v20, %v4100_v16 }
 0x104   : > { %v3230_v36 = vpop.f32.mrf.mxu0 }
 0x105   : > { %v3246_v37 = vpop.f32.mrf.mxu1  ;;  %v906_v38 = vadd.f32 %v3230_v36, %v752_v19  ;;  %v2521_v19 = vadd.s32 16, %v4158_v61  ;;  %v1028_v20 = vadd.f32 %v4110_v34, %v901_v9 }
 0x106   : > { %v886_v39 = vpop.f32.mrf.mxu0 }
 0x107   : > { %v1013_v41 = vpop.f32.mrf.mxu1  ;;  %v4114_v42 = vadd.f32 %v3246_v37, %v906_v38  ;;  %v904_v43 = vadd.f32 %v886_v39, %v750_v23  ;;  %v4173_v15 = vmul.u32.u64.low 3817748708, %v2521_v19  ;;  %v4174_v24 = vmul.u32.u64.high 3817748708, %v2521_v19, %v4173_v15 }
 0x108   : > { %v3231_v45 = vpop.f32.mrf.mxu0  ;;  %v2532_v15 = vshrl.u32 %v4190_v31, 3 }
 0x109   : > { %v3247_v46 = vpop.f32.mrf.mxu1  ;;  %v4116_v47 = vadd.f32 %v1013_v41, %v904_v43  ;;  %v2554_v37 = vshrl.u32 %v4174_v24, 3  ;;  %v4205_v41 = vadd.s32 8, %v4158_v61 }
 0x10a   : > { %v4118_v48 = vpop.f32.mrf.mxu0  ;;  %v4208_v43 = vmul.u32.u64.low 3817748708, %v4193_v32  ;;  %v4209_v45 = vmul.u32.u64.high 3817748708, %v4193_v32, %v4208_v43 }
 0x10b   : > { %v4120_v44 = vpop.f32.mrf.mxu1  ;;  %v4223_v24 = vmul.u32.u64.low 3817748708, %v4205_v41  ;;  %v4224_v30 = vmul.u32.u64.high 3817748708, %v4205_v41, %v4223_v24  ;;  %v4227_v43 = vadd.s32 48, %v4158_v61 }
 0x10c   : > { %v3258_v49 = vpop.f32.mrf.mxu0  ;;  %v2533_v24 = vmul.u32 9, %v2532_v15 }
 0x10d   : > { %v4122_v52 = vpop.f32.mrf.mxu1 }
 0x10e   : > { %v1176_v53 = vpop.f32.mrf.mxu0 }
 0x10f   : > { %v4124_v50 = vpop.f32.mrf.mxu1 }
 0x110   : > { %v4126_v55 = vpop.f32.mrf.mxu0 }
 0x111   : > { %v4128_v56 = vpop.f32.mrf.mxu1  ;;  %v1209_v31 = vadd.f32 %v4126_v55, %v4112_v35  ;;  %v2565_v35 = vshrl.u32 %v4209_v45, 3 }
 0x112   : > { %v4130_v51 = vpop.f32.mrf.mxu0 }
 0x113   : > { %v4132_v57 = vpop.f32.mrf.mxu1  ;;  %v1207_v34 = vadd.f32 %v4130_v51, %v1028_v20 }
 0x114   : > { %v4134_v58 = vpop.f32.mrf.mxu0 }
 0x115   : > { %v4136_v60 = vpop.f32.mrf.mxu1 }
 0x116   : > { %v4138_v62 = vpop.f32.mrf.mxu0 }
 0x117   : > { %v4140_v63 = vpop.f32.mrf.mxu1 }
 0x118   : > { %v3263_v2 = vpop.f32.mrf.mxu0 }
 0x119   : > { %v3279_v4 = vpop.f32.mrf.mxu1 }
 0x11a   : > { %v4142_v40 = vpop.f32.mrf.mxu0  ;;  %v2555_v4 = vmul.u32 9, %v2554_v37  ;;  %v1206_v37 = vadd.f32 %v1176_v53, %v4106_v33  ;;  %v905_v53 = vadd.f32 %v4118_v48, %v4102_v11  ;;  %v1210_v48 = vadd.f32 %v4138_v62, %v4116_v47 }
 0x11b   : > { %v4144_v5 = vpop.f32.mrf.mxu1  ;;  %v4285_v62 = vsub.s32 %v4158_v61, %v2533_v24 }
 0x11c   : > { %v4146_v6 = vpop.f32.mrf.mxu0  ;;  %v4231_v16 = vsub.s32 %v2521_v19, %v2555_v4 }
 0x11d   : > { %v4148_v8 = vpop.f32.mrf.mxu1  ;;  %vm2603_vm10 = vcmp.ne.s32.totalorder %v4285_v62, 0  ;;  %vm2610_vm11 = vcmp.lt.s32.totalorder %v4285_v62, 0 }
 0x11e   : > { %v4150_v7 = vpop.f32.mrf.mxu0  ;;  %vm2605_vm7 = vcmp.ne.s32.totalorder %v4231_v16, 0  ;;  %vm2612_vm8 = vcmp.lt.s32.totalorder %v4231_v16, 0  ;;  %vm4346_vm12 = vmand %vm2610_vm11, %vm2603_vm10 }
 0x11f   : > { %v4152_v10 = vpop.f32.mrf.mxu1  ;;  %vm4299_vm9 = vmand %vm2612_vm8, %vm2605_vm7 }
 0x120   : > { %v4154_v59 = vpop.f32.mrf.mxu0 }
 0x121   : > { %v4156_v14 = vpop.f32.mrf.mxu1 }
 0x122   : > { %v4160_v0 = vpop.f32.mrf.mxu0 }
 0x123   : > { %v4162_v17 = vpop.f32.mrf.mxu1 }
 0x124   : > { %v4164_v54 = vpop.f32.mrf.mxu0 }
 0x125   : > { %v4166_v18 = vpop.f32.mrf.mxu1 }
 0x126   : > { %v4169_v1 = vpop.f32.mrf.mxu0 }
 0x127   : > { %v4171_v21 = vpop.f32.mrf.mxu1 }
 0x128   : > { %v3295_v22 = vpop.f32.mrf.mxu0 }
 0x129   : > { %v3311_v23 = vpop.f32.mrf.mxu1 }
 0x12a   : > { %v4176_v25 = vpop.f32.mrf.mxu0 }
 0x12b   : > { %v4178_v13 = vpop.f32.mrf.mxu1 }
 0x12c   : > { %4491 = vst [vmem:[#allocation2_spill] sm:$0xff] %v4178_v13  ;;  %v4180_v3 = vpop.f32.mrf.mxu0  ;;  %v1208_v13 = vadd.f32 %v3258_v49, %v4104_v29  ;;  %v4245_v29 = vadd.s32 32, %v4158_v61  ;;  %v1334_v49 = vadd.f32 %v4124_v50, %v1206_v37  ;;  %v1212_v50 = vadd.f32 %v4134_v58, %v4114_v42 }
 0x12d   : > { %v4182_v26 = vpop.f32.mrf.mxu1  ;;  %v4279_v58 = vadd.s32 9, %v4231_v16 }
 0x12e   : > { %v4184_v27 = vpop.f32.mrf.mxu0  ;;  %v1336_v33 = vadd.f32 %v4122_v52, %v1208_v13  ;;  %v1337_v52 = vadd.f32 %v4128_v56, %v1209_v31  ;;  %v1467_v11 = vadd.f32 %v4150_v7, %v1334_v49  ;;  %v1335_v56 = vadd.f32 %v4132_v57, %v1207_v34 }
 0x12f   : > { %v4186_v28 = vpop.f32.mrf.mxu1 }
 0x130   : > { %v4195_v12 = vpop.f32.mrf.mxu0  ;;  %v1469_v51 = vadd.f32 %v4146_v6, %v1336_v33  ;;  %v1470_v42 = vadd.f32 %v4154_v59, %v1337_v52  ;;  %v1032_v6 = vadd.f32 %v4120_v44, %v905_v53  ;;  %v1646_v59 = vadd.f32 %v4152_v10, %v1467_v11 }
 0x131   : > { %v4197_v36 = vpop.f32.mrf.mxu1  ;;  %v1468_v37 = vadd.f32 %v4160_v0, %v1335_v56 }
 0x132   : > { %4492 = vst [vmem:[#allocation3_spill] sm:$0xff] %v4197_v36  ;;  %v4200_v38 = vpop.f32.mrf.mxu0  ;;  %v1648_v57 = vadd.f32 %v4148_v8, %v1469_v51  ;;  %v1211_v20 = vadd.f32 %v4142_v40, %v1032_v6  ;;  %v2566_v8 = vmul.u32 9, %v2565_v35  ;;  %v1649_v10 = vadd.f32 %v4156_v14, %v1470_v42 }
 0x133   : > { %v4202_v39 = vpop.f32.mrf.mxu1  ;;  %v1773_v49 = vadd.f32 %v4184_v27, %v1646_v59  ;;  %v1647_v14 = vadd.f32 %v4162_v17, %v1468_v37 }
 0x134   : > { %4493 = vst [vmem:[#allocation4_spill] sm:$0xff] %v4202_v39  ;;  %v4211_v46 = vpop.f32.mrf.mxu0  ;;  %v1775_v33 = vadd.f32 %v4180_v3, %v1648_v57  ;;  %v1339_v3 = vadd.f32 %v4144_v5, %v1211_v20 }
 0x135   : > { %4494 = vst [vmem:[#allocation5_spill] sm:$0xff] %v4211_v46  ;;  %v4213_v2 = vpop.f32.mrf.mxu1  ;;  %v4241_v46 = vmul.u32.u64.low 3817748708, %v4227_v43  ;;  %v4242_v36 = vmul.u32.u64.high 3817748708, %v4227_v43, %v4241_v46  ;;  %v1919_v11 = vadd.f32 %v4186_v28, %v1773_v49 }
 0x136   : > { %4495 = vst [vmem:[#allocation6_spill] sm:$0xff] %v4213_v2  ;;  %v4217_v22 = vpop.f32.mrf.mxu0  ;;  %v2543_v46 = vshrl.u32 %v4224_v30, 3  ;;  %v1340_v30 = vadd.f32 %v4136_v60, %v1212_v50  ;;  %v4330_v50 = vsub.s32 %v4193_v32, %v2566_v8 }
 0x137   : > { %4496 = vst [vmem:[#allocation7_spill] sm:$0xff] %v4217_v22  ;;  %v4219_v23 = vpop.f32.mrf.mxu1  ;;  %v2598_v40 = vshrl.u32 %v4242_v36, 3  ;;  %v1921_v36 = vadd.f32 %v4182_v26, %v1775_v33 }
 0x138   : > { %4497 = vst [vmem:[#allocation8_spill] sm:$0xff] %v4219_v23  ;;  %v3327_v2 = vpop.f32.mrf.mxu0  ;;  %v2544_v24 = vmul.u32 9, %v2543_v46  ;;  %v1473_v0 = vadd.f32 %v4164_v54, %v1340_v30  ;;  %v1776_v54 = vadd.f32 %v4195_v12, %v1649_v10  ;;  %v1472_v46 = vadd.f32 %v4176_v25, %v1339_v3 }
 0x139   : > { %v3343_v39 = vpop.f32.mrf.mxu1  ;;  %v4273_v2 = vmul.u32.u64.low 3817748708, %v4245_v29  ;;  %v4274_v4 = vmul.u32.u64.high 3817748708, %v4245_v29, %v4273_v2  ;;  %v4502_v28 = vld [vmem:[#allocation3_spill] sm:$0xff]  ;;  %vm2606_vm15 = vcmp.ne.s32.totalorder %v4330_v50, 0  ;;  %vm2613_vm1 = vcmp.lt.s32.totalorder %v4330_v50, 0 }
 0x13a   : > { %v4236_v23 = vpop.f32.mrf.mxu0  ;;  %v4260_v39 = vadd.s32 40, %v4158_v61  ;;  %v1338_v61 = vadd.f32 %v4140_v63, %v1210_v48  ;;  %v2633_v63 = vsel %vm4299_vm9, %v4279_v58, %v4231_v16  ;;  %v4333_v51 = vsub.s32 %v4205_v41, %v2544_v24  ;;  %vm4406_vm7 = vmand %vm2613_vm1, %vm2606_vm15 }
 0x13b   : > { %v4238_v22 = vpop.f32.mrf.mxu1  ;;  %v2576_v17 = vshrl.u32 %v4274_v4, 3  ;;  %v1652_v12 = vadd.f32 %v4166_v18, %v1473_v0  ;;  %v1774_v48 = vadd.f32 %v4200_v38, %v1647_v14  ;;  %v2599_v18 = vmul.u32 9, %v2598_v40  ;;  %v4505_v59 = vld [vmem:[#allocation4_spill] sm:$0xff] }
 0x13c   : > { %v4253_v55 = vpop.f32.mrf.mxu0  ;;  %v4288_v9 = vmul.u32.u64.low 3817748708, %v4260_v39  ;;  %v4289_v15 = vmul.u32.u64.high 3817748708, %v4260_v39, %v4288_v9  ;;  %v1471_v34 = vadd.f32 %v4169_v1, %v1338_v61  ;;  %v4324_v1 = vadd.s32 9, %v4285_v62  ;;  %v4503_v38 = vld [vmem:[#allocation5_spill] sm:$0xff] }
 0x13d   : > { %v4255_v19 = vpop.f32.mrf.mxu1  ;;  %v1922_v4 = vadd.f32 %v4502_v28, %v1776_v54  ;;  %v1779_v56 = vadd.f32 %v4503_v38, %v1652_v12  ;;  %vm2604_vm13 = vcmp.ne.s32.totalorder %v4333_v51, 0  ;;  %vm2611_vm14 = vcmp.lt.s32.totalorder %v4333_v51, 0  ;;  %v4507_v33 = vld [vmem:[#allocation6_spill] sm:$0xff] }
 0x13e   : > { %v2068_v13 = vpop.f32.mrf.mxu0  ;;  %v1650_v5 = vadd.f32 %v4171_v21, %v1471_v34  ;;  %v2587_v26 = vshrl.u32 %v4289_v15, 3  ;;  %v2100_v21 = vadd.f32 %v4253_v55, %v1921_v36  ;;  %v4504_v42 = vld [vmem:[#allocation7_spill] sm:$0xff]  ;;  %v2577_v57 = vmul.u32 9, %v2576_v17  ;;  %v4506_v55 = vld [vmem:[#allocation2_spill] sm:$0xff]  ;;  %vm4377_vm0 = vmand %vm2611_vm14, %vm2604_vm13 }
 0x13f   : > { %v4269_v45 = vpop.f32.mrf.mxu1  ;;  %v2098_v25 = vadd.f32 %v2068_v13, %v1919_v11  ;;  %v1920_v37 = vadd.f32 %v4505_v59, %v1774_v48  ;;  %v2631_v61 = vsel %vm4346_vm12, %v4324_v1, %v4285_v62  ;;  %v1651_v13 = vadd.f32 %v4506_v55, %v1472_v46  ;;  %v4510_v14 = vld [vmem:[#allocation8_spill] sm:$0xff]  ;;  %v3021_v28 = vld [vmem:[%s4489_s2] ss:$0 sm:$0xff] }
 0x140   : > { %v3355_v7 = vpop.f32.mrf.mxu0  ;;  %v1777_v6 = vadd.f32 %v4504_v42, %v1650_v5  ;;  %v2625_v24 = vadd.s32 9, %v4333_v51  ;;  %v4368_v10 = vsub.s32 %v4227_v43, %v2599_v18  ;;  %v2588_v0 = vmul.u32 9, %v2587_v26 }
 0x141   : > { %v4282_v47 = vpop.f32.mrf.mxu1  ;;  %v2101_v15 = vadd.f32 %v3355_v7, %v1922_v4  ;;  %v1925_v49 = vadd.f32 %v4507_v33, %v1779_v56  ;;  %v2227_v7 = vadd.f32 %v4255_v19, %v2100_v21  ;;  %v2225_v34 = vadd.f32 %v4269_v45, %v2098_v25 }
 0x142   : > { %v2071_v31 = vpop.f32.mrf.mxu0  ;;  %v1923_v54 = vadd.f32 %v4510_v14, %v1777_v6  ;;  %v1778_v43 = vadd.f32 %v4236_v23, %v1651_v13  ;;  %v4385_v19 = vsub.s32 %v4245_v29, %v2577_v57  ;;  %v2627_v5 = vadd.s32 9, %v4330_v50 }
 0x143   : > { %v4305_v60 = vpop.f32.mrf.mxu1  ;;  %v2099_v40 = vadd.f32 %v2071_v31, %v1920_v37  ;;  %v2228_v45 = vadd.f32 %v4282_v47, %v2101_v15  ;;  %v2632_v23 = vsel %vm4377_vm0, %v2625_v24, %v4333_v51  ;;  %v4393_v46 = vsub.s32 %v4260_v39, %v2588_v0 }
 0x144   : > { %v3358_v53 = vpop.f32.mrf.mxu0  ;;  %vm2609_vm2 = vcmp.ne.s32.totalorder %v4368_v10, 0  ;;  %v1924_v47 = vadd.f32 %v4238_v22, %v1778_v43  ;;  %vm2616_vm3 = vcmp.lt.s32.totalorder %v4368_v10, 0  ;;  %vm2607_vm5 = vcmp.ne.s32.totalorder %v4385_v19, 0 }
 0x145   : > { %v4312_v52 = vpop.f32.mrf.mxu1  ;;  %v2104_v31 = vadd.f32 %v3358_v53, %v1925_v49  ;;  %v2226_v29 = vadd.f32 %v4305_v60, %v2099_v40  ;;  %vm2614_vm6 = vcmp.lt.s32.totalorder %v4385_v19, 0  ;;  %v2628_v41 = vadd.s32 9, %v4385_v19  ;;  %vm4441_vm14 = vmand %vm2616_vm3, %vm2609_vm2 }
 0x146   : > { %v2084_v27 = vpop.f32.mrf.mxu0  ;;  %vm2608_vm8 = vcmp.ne.s32.totalorder %v4393_v46, 0  ;;  %vm2615_vm10 = vcmp.lt.s32.totalorder %v4393_v46, 0  ;;  %vm4421_vm11 = vmand %vm2614_vm6, %vm2607_vm5  ;;  %vm4425_vm12 = vcmp.lt.s32.totalorder %v2631_v61, 6  ;;  %v2634_v6 = vsel %vm4406_vm7, %v2627_v5, %v4330_v50 }
 0x147   : > { %v4327_v35 = vpop.f32.mrf.mxu1  ;;  %v2102_v36 = vadd.f32 %v2084_v27, %v1923_v54  ;;  %v2231_v51 = vadd.f32 %v4312_v52, %v2104_v31  ;;  %vm4432_vm13 = vcmp.lt.s32.totalorder %v2632_v23, 6  ;;  %v2630_v57 = vadd.s32 9, %v4368_v10  ;;  %vm4463_vm0 = vmand %vm2615_vm10, %vm2608_vm8 }
 0x148   : > { %v3359_v2 = vpop.f32.mrf.mxu0  ;;  %v2629_v50 = vadd.s32 9, %v4393_v46  ;;  %vm4452_vm15 = vcmp.lt.s32.totalorder %v2633_v63, 6  ;;  %v2635_v0 = vsel %vm4421_vm11, %v2628_v41, %v4385_v19  ;;  %vm2641_vm9 = vcmp.lt.s32.totalorder %v2634_v6, 6 }
 0x149   : > { %v3375_v32 = vpop.f32.mrf.mxu1  ;;  %v2229_v18 = vadd.f32 %v4327_v35, %v2102_v36  ;;  %vm2642_vm1 = vcmp.lt.s32.totalorder %v2635_v0, 6 }
 0x14a   : > { %v2087_v9 = vpop.f32.mrf.mxu0  ;;  %v2636_v43 = vsel %vm4463_vm0, %v2629_v50, %v4393_v46 }
 0x14b   : > { %v4355_v30 = vpop.f32.mrf.mxu1  ;;  %v2103_v26 = vadd.f32 %v2087_v9, %v1924_v47  ;;  %vm2643_vm3 = vcmp.lt.s32.totalorder %v2636_v43, 6 }
 0x14c   : > { %v3386_v20 = vpop.f32.mrf.mxu0 }
 0x14d   : > { %v3402_v8 = vpop.f32.mrf.mxu1  ;;  %v2372_v17 = vadd.f32 %v3386_v20, %v2227_v7  ;;  %v2230_v20 = vadd.f32 %v4355_v30, %v2103_v26 }
 0x14e   : > { %v2340_v1 = vpop.f32.mrf.mxu0 }
 0x14f   : > { %v2468_v3 = vpop.f32.mrf.mxu1  ;;  %v2370_v12 = vadd.f32 %v2340_v1, %v2225_v34  ;;  %v2500_v39 = vadd.f32 %v3402_v8, %v2372_v17  ;;  %v2637_v34 = vsel %vm4441_vm14, %v2630_v57, %v4368_v10 }
 0x150   : > { %v3387_v11 = vpop.f32.mrf.mxu0  ;;  %vm2644_vm2 = vcmp.lt.s32.totalorder %v2637_v34, 6 }
 0x151   : > { %v3403_v48 = vpop.f32.mrf.mxu1  ;;  %v2498_v2 = vadd.f32 %v2468_v3, %v2370_v12  ;;  %v2373_v32 = vadd.f32 %v3387_v11, %v2228_v45  ;;  %v2513_v15 = vadd.f32 %v3021_v28, %v2500_v39 }
 0x152   : > { %v2343_v53 = vpop.f32.mrf.mxu0 }
 0x153   : > { %v2471_v27 = vpop.f32.mrf.mxu1  ;;  %v2371_v22 = vadd.f32 %v2343_v53, %v2226_v29  ;;  %v2511_v38 = vadd.f32 %v3021_v28, %v2498_v2  ;;  %v2501_v56 = vadd.f32 %v3403_v48, %v2373_v32  ;;  %v2661_v62 = vsel %vm4452_vm15, %v2513_v15, 0.0 }
 0x154   : > { %v3390_v52 = vpop.f32.mrf.mxu0 }
 0x155   : > { %v3406_v4 = vpop.f32.mrf.mxu1  ;;  %v2499_v21 = vadd.f32 %v2471_v27, %v2371_v22  ;;  %v2376_v25 = vadd.f32 %v3390_v52, %v2231_v51  ;;  %v2659_v16 = vsel %vm4425_vm12, %v2511_v38, 0.0  ;;  %v2514_v58 = vadd.f32 %v3021_v28, %v2501_v56 }
 0x156   : > { %v2356_v59 = vpop.f32.mrf.mxu0 }
 0x157   : > { %v2484_v37 = vpop.f32.mrf.mxu1  ;;  %v2512_v55 = vadd.f32 %v3021_v28, %v2499_v21  ;;  %v2374_v13 = vadd.f32 %v2356_v59, %v2229_v18  ;;  %v2504_v24 = vadd.f32 %v3406_v4, %v2376_v25  ;;  %v2662_v45 = vsel %vm2641_vm9, %v2514_v58, 0.0 }
 0x158   : > { %v3391_v33 = vpop.f32.mrf.mxu0 }
 0x159   : > { %v3407_v49 = vpop.f32.mrf.mxu1  ;;  %v2660_v63 = vsel %vm4432_vm13, %v2512_v55, 0.0  ;;  %v2502_v30 = vadd.f32 %v2484_v37, %v2374_v13  ;;  %v2517_v3 = vadd.f32 %v3021_v28, %v2504_v24 }
 0x15a   : > { %v2666_v7 = vadd.f32 %v2660_v63, %v2659_v16  ;;  %v2359_v40 = vpop.f32.mrf.mxu0 }
 0x15b   : > { %v2515_v14 = vadd.f32 %v3021_v28, %v2502_v30  ;;  %v2375_v54 = vadd.f32 %v2359_v40, %v2230_v20  ;;  %v2487_v19 = vpop.f32.mrf.mxu1  ;;  %v2665_v36 = vsel %vm2644_vm2, %v2517_v3, 0.0 }
 0x15c   : > { %v2667_v1 = vadd.f32 %v2666_v7, %v2661_v62  ;;  %v2672_v23 = vsel %vm1226_vm4, %v2665_v36, 0.0 }
 0x15d   : > { %v2503_v31 = vadd.f32 %v2487_v19, %v2375_v54  ;;  %v2663_v10 = vsel %vm2642_vm1, %v2515_v14, 0.0 }
 0x15e   : > { %v2668_v17 = vadd.f32 %v2667_v1, %v2662_v45 }
 0x15f   : > { %v2516_v12 = vadd.f32 %v3021_v28, %v2503_v31 }
 0x160   : > { %v2669_v11 = vadd.f32 %v2668_v17, %v2663_v10 }
 0x161   : > { %v2664_v48 = vsel %vm2643_vm3, %v2516_v12, 0.0 }
 0x162   : > { %v2670_v5 = vadd.f32 %v2669_v11, %v2664_v48 }
 0x164   : > { %v2673_v29 = vadd.f32 %v2672_v23, %v2670_v5 }
 0x166   : > { %v2674_v46 = vrot.slane %v2673_v29, 4 }
 0x168   : > { %v2675_v2 = vadd.f32 %v2674_v46, %v2673_v29 }
 0x16a   : > { %v2676_v32 = vrot.slane %v2675_v2, 2 }
 0x16c   : > { %v2677_v47 = vadd.f32 %v2676_v32, %v2675_v2 }
 0x16e   : > { %v2678_v53 = vrot.slane %v2677_v47, 1 }
 0x170   : > { %v2679_v27 = vadd.f32 %v2678_v53, %v2677_v47 }
 0x172   : > { %v2681_v51 = vmul.f32 0.027777778, %v2679_v27 }
 0x174   : > { %2682 = vst [vmem:[%s166_s28] sm:$0x1] %v2681_v51 }
 0x175 PF: > { %s13_s12 = sadd.s32 1, %s3538_s12  }
 0x176   : > { %p10_p4 = scmp.ge.s32.totalorder %s13_s12, 4  }
 0x178   :  { %12 = sbr.rel (!%p10_p4) target bundleno = 1 (0x1), region = 77 }

</bundles_post_ra>
